<compile_context>
chip_gen: v6e
topology: v6e:2x2x1
jax: 0.10.0
libtpu: 0.0.40
codegen_flags: <defaults>
</compile_context>

<pallas_src>
import jax
import jax.numpy as jnp
from jax import lax
from jax.experimental import pallas as pl
from jax.experimental.pallas import tpu as pltpu


# ----------------------------------------------------------------------------- kernel
def _pae_kernel(w_ref, c_ref, x_ref, o_ref):
    """One batch tile per grid step.

    w_ref: (D, D)   pre-composed affine matrix (all 4 conv+BN layers folded)
    c_ref: (D, 1)   pre-composed bias
    x_ref: (D, NB)  lane-dense input tile (batch on the lane axis)
    o_ref: (D, NB)  lane-dense output tile
    """
    o_ref[...] = (
        jnp.dot(
            w_ref[...], x_ref[...],
            preferred_element_type=jnp.float32,
            precision=lax.Precision.HIGHEST,
        )
        + c_ref[...]
    )


# --------------------------------------------------------------------------- wrapper
def _toeplitz_affine(w, b, bn, L, eps=1e-5):
    """Conv1d(+eval BN) as an affine map on the flattened (Cin*L,) sample vector.

    Returns (W, c) with W: (Cout*L, Cin*L), c: (Cout*L,) such that
    y_flat[co*L + t] = sum_s W[co*L + t, ci*L + s] * x_flat[ci*L + s] + c[co*L + t].
    """
    Cout, Cin, K = w.shape
    pad = (K - 1) // 2
    if bn is not None:
        gamma, beta, mean, var = bn
        scale = gamma / jnp.sqrt(var + eps)
        shift = beta - mean * scale
    else:
        scale = jnp.ones((Cout,), jnp.float32)
        shift = jnp.zeros((Cout,), jnp.float32)
    w_eff = w * scale[:, None, None]                 # (Cout, Cin, K)
    bias_eff = b * scale + shift                     # (Cout,)

    t = jnp.arange(L)
    s = jnp.arange(L)
    k_idx = s[None, :] - t[:, None] + pad            # (L, L): tap index for (t_out, t_in)
    valid = (k_idx >= 0) & (k_idx < K)
    k_clamped = jnp.clip(k_idx, 0, K - 1)
    band = jnp.where(valid[None, None, :, :],
                     w_eff[:, :, k_clamped], 0.0)    # (Cout, Cin, L, L)
    W = jnp.transpose(band, (0, 2, 1, 3)).reshape(Cout * L, Cin * L)
    c = jnp.repeat(bias_eff, L)                      # (Cout*L,)
    return W, c


def _pick_batch_tile(B, nb_cap_groups=16):
    """Pick lane-dense batch tile NB (multiple of 128) and number of grid tiles.

    * NB is always a multiple of 128 -> unmasked, lane-dense vst on in/out tiles.
    * NB is capped at nb_cap_groups*128 (=2048) so double-buffered (D, NB) f32 tiles
      (~12 MiB at D=360, NB=2048) stay well under v7x's 64 MiB/TC VMEM and the
      default 32 MiB scoped limit (v5e/v6e have 128 MiB physical, so they are fine too).
    * When the padded batch spans >= 2 lane groups we force >= 2 grid tiles so the
      "parallel" grid axis can split across v7x's two TensorCores.
    """
    groups = pl.cdiv(B, 128)                 # 128-wide lane groups needed
    if groups >= 2:
        nb_groups = min(nb_cap_groups, pl.cdiv(groups, 2))
    else:
        nb_groups = 1
    n_tiles = pl.cdiv(groups, nb_groups)
    return nb_groups * 128, n_tiles


def pae_forward(x, params, n_phases, rng_key):
    """x: (B, input_channels, L) float32. Returns (y_reconstructed, p, a, f, b)."""
    B, Cin0, L = x.shape
    D = Cin0 * L

    layers = [
        (params["conv1"], params["bn_conv1"]),
        (params["conv2"], params["bn_conv2"]),
        (params["deconv1"], params["bn_deconv1"]),
        (params["deconv2"], None),
    ]
    assert layers[-1][0][0].shape[0] == Cin0, "deconv2 must map back to input channels"

    # Pre-compose the whole (affine) chain: W_total @ x_flat + c_total.
    W_total = None
    c_total = None
    for (w, b), bn in layers:
        Wi, ci = _toeplitz_affine(w, b, bn, L)
        if W_total is None:
            W_total, c_total = Wi, ci
        else:
            W_total = jnp.dot(Wi, W_total, precision=lax.Precision.HIGHEST)
            c_total = jnp.dot(Wi, c_total, precision=lax.Precision.HIGHEST) + ci
    c_total = c_total.reshape(D, 1)

    # Lane-dense layout: (Cin0*L, B) with batch on the lane axis, padded to NB*n_tiles.
    NB, n_tiles = _pick_batch_tile(B)
    B_pad = NB * n_tiles
    x2d = x.reshape(B, D).T                                  # (D, B)
    x2d = jnp.pad(x2d, ((0, 0), (0, B_pad - B)))             # (D, B_pad)

    out2d = pl.pallas_call(
        _pae_kernel,
        out_shape=jax.ShapeDtypeStruct((D, B_pad), jnp.float32),
        grid_spec=pltpu.PrefetchScalarGridSpec(
            num_scalar_prefetch=0,
            grid=(n_tiles,),
            in_specs=[
                pl.BlockSpec((D, D), lambda i: (0, 0)),      # composed weights (constant block)
                pl.BlockSpec((D, 1), lambda i: (0, 0)),      # composed bias (constant block)
                pl.BlockSpec((D, NB), lambda i: (0, i)),     # batch tile of x
            ],
            out_specs=pl.BlockSpec((D, NB), lambda i: (0, i)),
        ),
        compiler_params=pltpu.CompilerParams(
            dimension_semantics=("parallel",),               # independent batch tiles (2 TCs on v7x)
        ),
    )(W_total, c_total, x2d)

    y_reconstructed = out2d[:, :B].T.reshape(B, Cin0, L)

    # p, f, a, b are pure torch.randn outputs (no data dependence) -> plain JAX RNG glue.
    kp, kf, ka, kb = jax.random.split(rng_key, 4)
    p = jax.random.normal(kp, (B, n_phases, 1), jnp.float32)
    f = jax.random.normal(kf, (B, n_phases, 1), jnp.float32)
    a = jax.random.normal(ka, (B, n_phases, 1), jnp.float32)
    b_ = jax.random.normal(kb, (B, n_phases, 1), jnp.float32)
    return (y_reconstructed, p, a, f, b_)


# ------------------------------------------------------------------- synthetic params
def init_params(key, n_phases, n_joints, length):
    """Deterministic synthetic parameters with the same shapes as the PyTorch module."""
    input_channels = n_joints * 3
    intermediate_channels = input_channels // 3
    K = length
    keys = jax.random.split(key, 16)

    def conv_wb(k, cout, cin):
        kw, kb = jax.random.split(k)
        fan_in = cin * K
        lim = 1.0 / jnp.sqrt(fan_in)
        w = jax.random.uniform(kw, (cout, cin, K), jnp.float32, -lim, lim)
        b = jax.random.uniform(kb, (cout,), jnp.float32, -lim, lim)
        return w, b

    def bn_params(k, c):
        k1, k2, k3, k4 = jax.random.split(k, 4)
        gamma = 1.0 + 0.1 * jax.random.normal(k1, (c,), jnp.float32)
        beta = 0.1 * jax.random.normal(k2, (c,), jnp.float32)
        mean = 0.1 * jax.random.normal(k3, (c,), jnp.float32)
        var = 1.0 + 0.1 * jax.random.uniform(k4, (c,), jnp.float32)
        return gamma, beta, mean, var

    return {
        "conv1": conv_wb(keys[0], intermediate_channels, input_channels),
        "bn_conv1": bn_params(keys[1], intermediate_channels),
        "conv2": conv_wb(keys[2], n_phases, intermediate_channels),
        "bn_conv2": bn_params(keys[3], n_phases),
        "deconv1": conv_wb(keys[4], intermediate_channels, n_phases),
        "bn_deconv1": bn_params(keys[5], intermediate_channels),
        "deconv2": conv_wb(keys[6], input_channels, intermediate_channels),
    }


if __name__ == "__main__":
    # Small shapes consistent with the module:
    #   n_phases=4, n_joints=8 -> input_channels=24, intermediate=8, length=time_range=15
    n_phases, n_joints, length = 4, 8, 15
    batch = 2
    input_channels = n_joints * 3

    root = jax.random.PRNGKey(0)
    k_param, k_x, k_rand = jax.random.split(root, 3)

    params = init_params(k_param, n_phases, n_joints, length)
    x = jax.random.normal(k_x, (batch, input_channels, length), jnp.float32)

    y_rec, p, a, f, b = pae_forward(x, params, n_phases, k_rand)
    jax.block_until_ready((y_rec, p, a, f, b))

    # sanity-check against a pure-JAX reference (conv via lax.conv_general_dilated)
    def ref_forward(x, params):
        def conv(xx, w, bb):
            out = lax.conv_general_dilated(
                xx, w, window_strides=(1,), padding=[((length - 1) // 2,) * 2],
                dimension_numbers=("NCH", "OIH", "NCH"),
                precision=lax.Precision.HIGHEST)
            return out + bb.reshape(1, -1, 1)

        def bn(xx, prm):
            g, be, m, v = prm
            s = g / jnp.sqrt(v + 1e-5)
            return xx * s.reshape(1, -1, 1) + (be - m * s).reshape(1, -1, 1)

        y = bn(conv(x, *params["conv1"]), params["bn_conv1"])
        y = bn(conv(y, *params["conv2"]), params["bn_conv2"])
        y = bn(conv(y, *params["deconv1"]), params["bn_deconv1"])
        return conv(y, *params["deconv2"])

    ref = ref_forward(x, params)
    assert y_rec.shape == (batch, input_channels, length)
    assert p.shape == a.shape == f.shape == b.shape == (batch, n_phases, 1)
    assert jnp.allclose(y_rec, ref, atol=1e-3, rtol=1e-3), "mismatch vs reference"
    print("KERNEL_OK")
</pallas_src>

<mosaic_0001>
module attributes {stable_mosaic.version = 11 : i64} {
  func.func @_pae_kernel(%arg0: i32, %arg1: memref<360x360xf32, #tpu.memory_space<vmem>>, %arg2: memref<360x1xf32, #tpu.memory_space<vmem>>, %arg3: memref<360x128xf32, #tpu.memory_space<vmem>>, %arg4: memref<360x128xf32, #tpu.memory_space<vmem>>) attributes {dimension_semantics = [#tpu.dimension_semantics<parallel>], iteration_bounds = array<i64: 1>, scalar_prefetch = 0 : i64, scratch_operands = 0 : i64, tpu.core_type = #tpu.core_type<tc>, window_params = [{pipeline_mode = #tpu.pipeline_mode<synchronous>, transform_indices = @transform_0, window_bounds = array<i64: 360, 360>}, {pipeline_mode = #tpu.pipeline_mode<synchronous>, transform_indices = @transform_1, window_bounds = array<i64: 360, 1>}, {transform_indices = @transform_2, window_bounds = array<i64: 360, 128>}, {transform_indices = @transform_3, window_bounds = array<i64: 360, 128>}]} {
    %c0 = arith.constant 0 : index
    %c0_0 = arith.constant 0 : index
    %0 = vector.load %arg1[%c0, %c0_0] : memref<360x360xf32, #tpu.memory_space<vmem>>, vector<360x360xf32>
    %c0_1 = arith.constant 0 : index
    %c0_2 = arith.constant 0 : index
    %1 = vector.load %arg3[%c0_1, %c0_2] : memref<360x128xf32, #tpu.memory_space<vmem>>, vector<360x128xf32>
    %cst = arith.constant dense<0.000000e+00> : vector<360x128xf32>
    %2 = tpu.matmul %0, %1, %cst {dimension_numbers = #tpu.dot_dimension_numbers<[1], [0], [0], [1], [0, 0, 1, 1], [], []>, precision = #tpu.contract_precision<fp32>} : vector<360x360xf32>, vector<360x128xf32>, vector<360x128xf32> -> vector<360x128xf32>
    %c0_3 = arith.constant 0 : index
    %c0_4 = arith.constant 0 : index
    %3 = vector.load %arg2[%c0_3, %c0_4] : memref<360x1xf32, #tpu.memory_space<vmem>>, vector<360x1xf32>
    %4 = vector.broadcast %3 : vector<360x1xf32> to vector<360x128xf32>
    %5 = arith.addf %2, %4 : vector<360x128xf32>
    %c0_5 = arith.constant 0 : index
    %c0_6 = arith.constant 0 : index
    %6 = vector.load %arg4[%c0_5, %c0_6] : memref<360x128xf32, #tpu.memory_space<vmem>>, vector<360x128xf32>
    tpu.vector_store %arg4[%c0_5, %c0_6], %5 {strides = array<i32>} : memref<360x128xf32, #tpu.memory_space<vmem>>, vector<360x128xf32>,
    return
  }
  func.func @transform_0(%arg0: i32) -> (i32, i32) {
    %c0_i32 = arith.constant 0 : i32
    %c0_i32_0 = arith.constant 0 : i32
    %c0_i32_1 = arith.constant 0 : i32
    return %c0_i32, %c0_i32_0 : i32, i32
  }
  func.func @transform_1(%arg0: i32) -> (i32, i32) {
    %c0_i32 = arith.constant 0 : i32
    %c0_i32_0 = arith.constant 0 : i32
    %c0_i32_1 = arith.constant 0 : i32
    return %c0_i32, %c0_i32_0 : i32, i32
  }
  func.func @transform_2(%arg0: i32) -> (i32, i32) {
    %c0_i32 = arith.constant 0 : i32
    %c0_i32_0 = arith.constant 0 : i32
    return %c0_i32, %arg0 : i32, i32
  }
  func.func @transform_3(%arg0: i32) -> (i32, i32) {
    %c0_i32 = arith.constant 0 : i32
    %c0_i32_0 = arith.constant 0 : i32
    return %c0_i32, %arg0 : i32, i32
  }
}

</mosaic_0001>

<bundles_post_ra>
// kernel: tpu_custom_call.1
= control target key start
LH: loop header
LB: loop body
LE: loop exit
PB: predicated region body
PF: predicated region fallthrough
CT: control target
= control target key end

     0   :  { %8 = vsyncpa [#allocation3], 0  ;;  %s12404_s0 = inlined_call_operand.hbm [shape: f32[360,360], index: 0, kind: input, shape index: {}]   ;;  %s12405_s1 = inlined_call_operand.vmem [shape: f32[360,1], index: 1, kind: input, shape index: {}]   ;;  %s12406_s2 = inlined_call_operand.vmem [shape: f32[360,128], index: 2, kind: input, shape index: {}]   ;;  %s12407_s3 = inlined_call_operand.hbm [shape: f32[360,128], index: 3, kind: output, shape index: {}]  }
   0x1   :  { %9 = vsyncpa [#allocation4], 0  ;;  %s7866_s12 = smov [#allocation2]  }
   0x2   :  { %s15_s13 = sshll.u32 %s7866_s12, 4  ;;  %s16_s13 = int_to_ptr.vmem [resolvable:$true] %s15_s13 }
   0x3   :  { %s7830_s14 = scalar_lea.vmem %s16_s13, 17280  ;;  %p7835_p1 = scmp.lt.s32.totalorder %s16_s13, %s16_s13 }
   0x4   :  { %p7831_p0 = scmp.ne.s32.totalorder %s16_s13, %s7830_s14  ;;  %p7836_p2 = scmp.lt.s32.totalorder %s7830_s14, %s7830_s14 }
   0x6   :  { %p7837_p3 = por %p7836_p2, %p7835_p1 }
   0x8   :  { %p7838_p4 = pnand %p7837_p3, %p7831_p0 }
   0xa   :  { %7841 = shalt.err (!%p7838_p4)
}
   0xb   :  { %s7867_s15 = smov 384   ;;  %s7868_s16 = smov 24  }
   0xc   :  { %21 = dma.hbm_to_vmem [thread:$0]  %s12404_s0, 17280, %s16_s13, [#allocation3], %s7867_s15, %s7867_s15, %s7868_s16  }
   0xd   :  { %7862 = dma.done.wait [#allocation3], 17280  }
   0xe   :  { %7863 = vsyncadd [#allocation3], 4294950016  ;;  %v12427_v0 = vmov 0.0   ;;  %v179_v1 = vld [vmem:[%s12406_s2 + $0x78] sm:$0xff]  ;;  %v178_v2 = vld [vmem:[%s12406_s2 + $0x70] sm:$0xff]  ;;  %vm479_vm0 = vcmask 850944  }
   0xf   :  { %615 = vmatprep.subr.mxu0 %v12427_v0  ;;  %1387 = vmatprep.subr.mxu1 %v12427_v0  ;;  %v177_v3 = vld [vmem:[%s12406_s2 + $0x68] sm:$0xff]  ;;  %v7909_v4 = vand.u32 4294901760, %v179_v1  ;;  %v7911_v5 = vand.u32 4294901760, %v178_v2  ;;  %v176_v7 = vld [vmem:[%s12406_s2 + $0x60] sm:$0xff]  ;;  %v175_v8 = vld [vmem:[%s12406_s2 + $0x58] sm:$0xff]  ;;  %vm7871_vm1 = vmmov 0  }
  0x10   :  { %v7913_v6 = vand.u32 4294901760, %v177_v3  ;;  %v174_v9 = vld [vmem:[%s12406_s2 + $0x50] sm:$0xff]  ;;  %v7924_v10 = vand.u32 4294901760, %v176_v7  ;;  %v7926_v11 = vand.u32 4294901760, %v175_v8  ;;  %v173_v13 = vld [vmem:[%s12406_s2 + $0x48] sm:$0xff]  ;;  %v172_v14 = vld [vmem:[%s12406_s2 + $0x40] sm:$0xff] }
  0x11   :  { %v7928_v12 = vand.u32 4294901760, %v174_v9  ;;  %617 = vmatpush1.msra.mxu0 %v7909_v4  ;;  %v7938_v15 = vsub.f32 %v179_v1, %v7909_v4  ;;  %v7941_v16 = vsub.f32 %v178_v2, %v7911_v5  ;;  %v7943_v17 = vand.u32 4294901760, %v173_v13  ;;  %v171_v19 = vld [vmem:[%s12406_s2 + $0x38] sm:$0xff]  ;;  %v170_v26 = vld [vmem:[%s12406_s2 + $0x30] sm:$0xff]  ;;  %v169_v36 = vld [vmem:[%s12406_s2 + $0x28] sm:$0xff] }
  0x12   :  { %13081 = vst [vmem:[#allocation8_spill] sm:$0xff] %v7913_v6  ;;  %v7946_v18 = vsub.f32 %v177_v3, %v7913_v6  ;;  %618 = vmatprep.subr.mxu0 %v12427_v0  ;;  %v7953_v20 = vsub.f32 %v176_v7, %v7924_v10  ;;  %v7956_v21 = vsub.f32 %v175_v8, %v7926_v11  ;;  %v7962_v25 = vand.u32 4294901760, %v172_v14  ;;  %v168_v41 = vld [vmem:[%s12406_s2 + $0x20] sm:$0xff]  ;;  %v167_v49 = vld [vmem:[%s12406_s2 + $0x18] sm:$0xff]  ;;  %v166_v53 = vld [vmem:[%s12406_s2 + $0x10] sm:$0xff] }
  0x13   :  { %13082 = vst [vmem:[#allocation9_spill] sm:$0xff] %v7943_v17  ;;  %620 = vmatpush1.msra.mxu0 %v7911_v5  ;;  %v12425_v22 = vand.u32 4294901760, %v7938_v15  ;;  %v12424_v23 = vand.u32 4294901760, %v7941_v16  ;;  %v7969_v28 = vand.u32 4294901760, %v171_v19  ;;  %v7973_v30 = vsub.f32 %v174_v9, %v7928_v12  ;;  %v165_v59 = vld [vmem:[%s12406_s2 + $0x8] sm:$0xff]  ;;  %v164_v2 = vld [vmem:[%s12406_s2] sm:$0xff] }
  0x14   :  { %v12423_v24 = vand.u32 4294901760, %v7946_v18  ;;  %621 = vmatprep.subr.mxu0 %v12427_v0  ;;  %v12421_v27 = vand.u32 4294901760, %v7953_v20  ;;  %v12420_v29 = vand.u32 4294901760, %v7956_v21  ;;  %v7986_v34 = vsub.f32 %v173_v13, %v7943_v17 }
  0x15   :  { %623 = vmatpush1.msra.mxu0 %v7913_v6  ;;  %v1391_v31 = vsub.f32 %v7938_v15, %v12425_v22  ;;  %v1398_v32 = vsub.f32 %v7941_v16, %v12424_v23  ;;  %v7989_v35 = vand.u32 4294901760, %v170_v26  ;;  %v12418_v40 = vand.u32 4294901760, %v7973_v30 }
  0x16   :  { %v1405_v33 = vsub.f32 %v7946_v18, %v12423_v24  ;;  %624 = vmatprep.subr.mxu0 %v12427_v0  ;;  %v1412_v39 = vsub.f32 %v7953_v20, %v12421_v27  ;;  %v1419_v42 = vsub.f32 %v7956_v21, %v12420_v29  ;;  %v8007_v43 = vsub.f32 %v172_v14, %v7962_v25  ;;  %v195_v14 = vld [vmem:[%s12406_s2 + $0xf8] sm:$0xff]  ;;  %v186_v29 = vld [vmem:[%s12406_s2 + $0xb0] sm:$0xff] }
  0x17   :  { %626 = vmatpush1.msra.mxu0 %v7924_v10  ;;  %v1392_v37 = vand.u32 4294901760, %v1391_v31  ;;  %v1399_v38 = vand.u32 4294901760, %v1398_v32  ;;  %v8010_v45 = vand.u32 4294901760, %v169_v36  ;;  %v12417_v46 = vand.u32 4294901760, %v7986_v34 }
  0x18   :  { %627 = vmatprep.subr.mxu0 %v12427_v0  ;;  %v1406_v44 = vand.u32 4294901760, %v1405_v33  ;;  %v8014_v47 = vsub.f32 %v171_v19, %v7969_v28  ;;  %v8018_v48 = vand.u32 4294901760, %v168_v41  ;;  %v1413_v50 = vand.u32 4294901760, %v1412_v39 }
  0x19   :  { %629 = vmatpush1.msra.mxu0 %v7926_v11  ;;  %1393 = vmatpush1.msra.mxu1 %v1392_v37  ;;  %13083 = vst [vmem:[#allocation10_spill] sm:$0xff] %v8010_v45  ;;  %v1426_v51 = vsub.f32 %v7973_v30, %v12418_v40  ;;  %v12415_v52 = vand.u32 4294901760, %v8007_v43  ;;  %v8032_v54 = vsub.f32 %v170_v26, %v7989_v35  ;;  %v1420_v55 = vand.u32 4294901760, %v1419_v42 }
  0x1a   :  { %630 = vmatprep.subr.mxu0 %v12427_v0  ;;  %1394 = vmatprep.subr.mxu1 %v12427_v0  ;;  %13084 = vst [vmem:[#allocation11_spill] sm:$0xff] %v8018_v48  ;;  %v1433_v56 = vsub.f32 %v7986_v34, %v12417_v46  ;;  %v8040_v57 = vand.u32 4294901760, %v167_v49  ;;  %v12414_v58 = vand.u32 4294901760, %v8014_v47  ;;  %v8047_v60 = vsub.f32 %v169_v36, %v8010_v45  ;;  %v194_v36 = vld [vmem:[%s12406_s2 + $0xf0] sm:$0xff] }
  0x1b   :  { %632 = vmatpush1.msra.mxu0 %v7928_v12  ;;  %1400 = vmatpush1.msra.mxu1 %v1399_v38  ;;  %v8051_v61 = vand.u32 4294901760, %v166_v53  ;;  %v1427_v62 = vand.u32 4294901760, %v1426_v51  ;;  %v1440_v63 = vsub.f32 %v8007_v43, %v12415_v52  ;;  %v12412_v1 = vand.u32 4294901760, %v8032_v54 }
  0x1c   :  { %633 = vmatprep.subr.mxu0 %v12427_v0  ;;  %1401 = vmatprep.subr.mxu1 %v12427_v0  ;;  %13085 = vst [vmem:[#allocation12_spill] sm:$0xff] %v8040_v57  ;;  %v8062_v3 = vsub.f32 %v168_v41, %v8018_v48  ;;  %v8066_v7 = vand.u32 4294901760, %v165_v59  ;;  %v1434_v8 = vand.u32 4294901760, %v1433_v56  ;;  %v1447_v9 = vsub.f32 %v8014_v47, %v12414_v58  ;;  %v192_v56 = vld [vmem:[%s12406_s2 + $0xe0] sm:$0xff] }
  0x1d   :  { %635 = vmatpush1.msra.mxu0 %v7943_v17  ;;  %1407 = vmatpush1.msra.mxu1 %v1406_v44  ;;  %13086 = vst [vmem:[#allocation13_spill] sm:$0xff] %v8051_v61  ;;  %v12411_v13 = vand.u32 4294901760, %v8047_v60  ;;  %v8077_v19 = vsub.f32 %v167_v49, %v8040_v57  ;;  %v8081_v26 = vand.u32 4294901760, %v164_v2  ;;  %v1441_v31 = vand.u32 4294901760, %v1440_v63  ;;  %v193_v44 = vld [vmem:[%s12406_s2 + $0xe8] sm:$0xff] }
  0x1e   :  { %636 = vmatprep.subr.mxu0 %v12427_v0  ;;  %1408 = vmatprep.subr.mxu1 %v12427_v0  ;;  %13087 = vst [vmem:[#allocation14_spill] sm:$0xff] %v8062_v3  ;;  %13088 = vst [vmem:[#allocation15_spill] sm:$0xff] %v8066_v7  ;;  %v1454_v32 = vsub.f32 %v8032_v54, %v12412_v1  ;;  %v12409_v33 = vand.u32 4294901760, %v8062_v3  ;;  %v8092_v37 = vsub.f32 %v166_v53, %v8051_v61 }
  0x1f   :  { %638 = vmatpush1.msra.mxu0 %v7962_v25  ;;  %1414 = vmatpush1.msra.mxu1 %v1413_v50  ;;  %13089 = vst [vmem:[#allocation16_spill] sm:$0xff] %v8077_v19  ;;  %13090 = vst [vmem:[#allocation17_spill] sm:$0xff] %v8081_v26  ;;  %v8096_v38 = vand.u32 4294901760, %v195_v14  ;;  %v1448_v39 = vand.u32 4294901760, %v1447_v9  ;;  %v1461_v41 = vsub.f32 %v8047_v60, %v12411_v13  ;;  %v12408_v42 = vand.u32 4294901760, %v8077_v19  ;;  %v189_v13 = vld [vmem:[%s12406_s2 + $0xc8] sm:$0xff] }
  0x20   :  { %639 = vmatprep.subr.mxu0 %v12427_v0  ;;  %1415 = vmatprep.subr.mxu1 %v12427_v0  ;;  %13091 = vst [vmem:[#allocation18_spill] sm:$0xff] %v8092_v37  ;;  %v8107_v49 = vsub.f32 %v165_v59, %v8066_v7  ;;  %v8111_v50 = vand.u32 4294901760, %v194_v36  ;;  %v1455_v51 = vand.u32 4294901760, %v1454_v32  ;;  %v1468_v53 = vsub.f32 %v8062_v3, %v12409_v33 }
  0x21   :  { %641 = vmatpush1.msra.mxu0 %v7969_v28  ;;  %1421 = vmatpush1.msra.mxu1 %v1420_v55  ;;  %13092 = vst [vmem:[#allocation19_spill] sm:$0xff] %v8096_v38  ;;  %v12410_v55 = vand.u32 4294901760, %v8092_v37  ;;  %v8122_v59 = vsub.f32 %v164_v2, %v8081_v26  ;;  %v1462_v63 = vand.u32 4294901760, %v1461_v41  ;;  %v191_v2 = vld [vmem:[%s12406_s2 + $0xd8] sm:$0xff]  ;;  %v8141_v32 = vand.u32 4294901760, %v192_v56 }
  0x22   :  { %642 = vmatprep.subr.mxu0 %v12427_v0  ;;  %1422 = vmatprep.subr.mxu1 %v12427_v0  ;;  %13093 = vst [vmem:[#allocation20_spill] sm:$0xff] %v8107_v49  ;;  %13094 = vst [vmem:[#allocation21_spill] sm:$0xff] %v8111_v50  ;;  %v12413_v9 = vand.u32 4294901760, %v8107_v49  ;;  %v8149_v33 = vsub.f32 %v194_v36, %v8111_v50  ;;  %v8183_v52 = vand.u32 4294901760, %v189_v13  ;;  %v8234_v22 = vand.u32 4294901760, %v186_v29 }
  0x23   :  { %644 = vmatpush1.msra.mxu0 %v7989_v35  ;;  %1428 = vmatpush1.msra.mxu1 %v1427_v62  ;;  %13095 = vst [vmem:[#allocation22_spill] sm:$0xff] %v8122_v59  ;;  %v8126_v62 = vand.u32 4294901760, %v193_v44  ;;  %13098 = vst [vmem:[#allocation25_spill] sm:$0xff] %v8141_v32  ;;  %v1482_v41 = vsub.f32 %v8092_v37, %v12410_v55 }
  0x24   :  { %645 = vmatprep.subr.mxu0 %v12427_v0  ;;  %1429 = vmatprep.subr.mxu1 %v12427_v0  ;;  %13099 = vst [vmem:[#allocation26_spill] sm:$0xff] %v8149_v33  ;;  %v1489_v55 = vsub.f32 %v8107_v49, %v12413_v9  ;;  %13104 = vst [vmem:[#allocation31_spill] sm:$0xff] %v8183_v52 }
  0x25   :  { %647 = vmatpush1.msra.mxu0 %v8010_v45  ;;  %1435 = vmatpush1.msra.mxu1 %v1434_v8  ;;  %13096 = vst [vmem:[#allocation23_spill] sm:$0xff] %v8126_v62  ;;  %v1475_v8 = vsub.f32 %v8077_v19, %v12408_v42  ;;  %v12416_v42 = vand.u32 4294901760, %v8122_v59  ;;  %v8167_v1 = vsub.f32 %v193_v44, %v8126_v62  ;;  %v12422_v44 = vand.u32 4294901760, %v8149_v33 }
  0x26   :  { %648 = vmatprep.subr.mxu0 %v12427_v0  ;;  %1436 = vmatprep.subr.mxu1 %v12427_v0  ;;  %13110 = vst [vmem:[#allocation37_spill] sm:$0xff] %v8234_v22 }
  0x27   :  { %650 = vmatpush1.msra.mxu0 %v8018_v48  ;;  %1442 = vmatpush1.msra.mxu1 %v1441_v31  ;;  %v8137_v31 = vsub.f32 %v195_v14, %v8096_v38  ;;  %v8153_v14 = vand.u32 4294901760, %v191_v2  ;;  %13101 = vst [vmem:[#allocation28_spill] sm:$0xff] %v8167_v1  ;;  %v1496_v9 = vsub.f32 %v8122_v59, %v12416_v42  ;;  %v12426_v42 = vand.u32 4294901760, %v8167_v1 }
  0x28   :  { %651 = vmatprep.subr.mxu0 %v12427_v0  ;;  %1443 = vmatprep.subr.mxu1 %v12427_v0 }
  0x29   :  { %653 = vmatpush1.msra.mxu0 %v8040_v57  ;;  %1449 = vmatpush1.msra.mxu1 %v1448_v39  ;;  %13097 = vst [vmem:[#allocation24_spill] sm:$0xff] %v8137_v31  ;;  %v1469_v39 = vand.u32 4294901760, %v1468_v53  ;;  %13100 = vst [vmem:[#allocation27_spill] sm:$0xff] %v8153_v14  ;;  %v1476_v53 = vand.u32 4294901760, %v1475_v8  ;;  %v12419_v36 = vand.u32 4294901760, %v8137_v31  ;;  %v1483_v8 = vand.u32 4294901760, %v1482_v41 }
  0x2a   :  { %654 = vmatprep.subr.mxu0 %v12427_v0  ;;  %1450 = vmatprep.subr.mxu1 %v12427_v0  ;;  %v8194_v46 = vsub.f32 %v191_v2, %v8153_v14  ;;  %v39_v57 = vld [vmem:[#allocation2 + $0x50] sm:$0xff] }
  0x2b   :  { %656 = vmatpush1.msra.mxu0 %v8051_v61  ;;  %1456 = vmatpush1.msra.mxu1 %v1455_v51  ;;  %v190_v51 = vld [vmem:[%s12406_s2 + $0xd0] sm:$0xff]  ;;  %v1503_v41 = vsub.f32 %v8137_v31, %v12419_v36  ;;  %v1510_v36 = vsub.f32 %v8149_v33, %v12422_v44  ;;  %v32_v31 = vld [vmem:[#allocation2 + $0x18] sm:$0xff] }
  0x2c   :  { %657 = vmatprep.subr.mxu0 %v12427_v0  ;;  %1457 = vmatprep.subr.mxu1 %v12427_v0  ;;  %v8178_v58 = vand.u32 4294901760, %v190_v51  ;;  %13105 = vst [vmem:[#allocation32_spill] sm:$0xff] %v8194_v46 }
  0x2d   :  { %659 = vmatpush1.msra.mxu0 %v8066_v7  ;;  %1463 = vmatpush1.msra.mxu1 %v1462_v63  ;;  %v8172_v63 = vsub.f32 %v192_v56, %v8141_v32  ;;  %v188_v56 = vld [vmem:[%s12406_s2 + $0xc0] sm:$0xff]  ;;  %v1504_v44 = vand.u32 4294901760, %v1503_v41  ;;  %v1511_v41 = vand.u32 4294901760, %v1510_v36  ;;  %v13114_v36 = vand.u32 4294901760, %v8194_v46 }
  0x2e   :  { %660 = vmatprep.subr.mxu0 %v12427_v0  ;;  %1464 = vmatprep.subr.mxu1 %v12427_v0  ;;  %13103 = vst [vmem:[#allocation30_spill] sm:$0xff] %v8178_v58  ;;  %v8206_v2 = vand.u32 4294901760, %v188_v56  ;;  %v8212_v27 = vsub.f32 %v190_v51, %v8178_v58  ;;  %v1517_v51 = vsub.f32 %v8167_v1, %v12426_v42  ;;  %v13113_v1 = vmov 0.0  }
  0x2f   :  { %13102 = vst [vmem:[#allocation29_spill] sm:$0xff] %v8172_v63  ;;  %662 = vmatpush1.msra.mxu0 %v8081_v26  ;;  %1470 = vmatpush1.msra.mxu1 %v1469_v39  ;;  %v1490_v39 = vand.u32 4294901760, %v1489_v55  ;;  %v12433_v40 = vand.u32 4294901760, %v8172_v63  ;;  %v1497_v55 = vand.u32 4294901760, %v1496_v9  ;;  %v185_v9 = vld [vmem:[%s12406_s2 + $0xa8] sm:$0xff] }
  0x30   :  { %663 = vmatprep.subr.mxu0 %v12427_v0  ;;  %1471 = vmatprep.subr.mxu1 %v12427_v0  ;;  %13106 = vst [vmem:[#allocation33_spill] sm:$0xff] %v8206_v2  ;;  %13107 = vst [vmem:[#allocation34_spill] sm:$0xff] %v8212_v27  ;;  %v8241_v23 = vand.u32 4294901760, %v185_v9  ;;  %v181_v26 = vld [vmem:[%s12406_s2 + $0x88] sm:$0xff] }
  0x31   :  { %665 = vmatpush2.msra.mxu0 %v8096_v38  ;;  %1477 = vmatpush1.msra.mxu1 %v1476_v53  ;;  %v187_v53 = vld [vmem:[%s12406_s2 + $0xb8] sm:$0xff] }
  0x32   :  { %666 = vmatprep.subr.mxu0 %v12427_v0  ;;  %1478 = vmatprep.subr.mxu1 %v12427_v0  ;;  %v8226_v24 = vand.u32 4294901760, %v187_v53  ;;  %13111 = vst [vmem:[#allocation38_spill] sm:$0xff] %v8241_v23 }
  0x33   :  { %668 = vmatpush2.msra.mxu0 %v8111_v50  ;;  %1484 = vmatpush1.msra.mxu1 %v1483_v8  ;;  %v8220_v8 = vsub.f32 %v189_v13, %v8183_v52  ;;  %v1524_v13 = vsub.f32 %v8172_v63, %v12433_v40  ;;  %v29_v63 = vld [vmem:[#allocation2] sm:$0xff] }
  0x34   :  { %669 = vmatprep.subr.mxu0 %v12427_v0  ;;  %1485 = vmatprep.subr.mxu1 %v12427_v0  ;;  %13109 = vst [vmem:[#allocation36_spill] sm:$0xff] %v8226_v24 }
  0x35   :  { %13108 = vst [vmem:[#allocation35_spill] sm:$0xff] %v8220_v8  ;;  %671 = vmatpush2.msra.mxu0 %v8126_v62  ;;  %1491 = vmatpush1.msra.mxu1 %v1490_v39  ;;  %v184_v39 = vld [vmem:[%s12406_s2 + $0xa0] sm:$0xff]  ;;  %v30_v62 = vld [vmem:[#allocation2 + $0x8] sm:$0xff]  ;;  %v1525_v50 = vand.u32 4294901760, %v1524_v13  ;;  %v182_v13 = vld [vmem:[%s12406_s2 + $0x90] sm:$0xff] }
  0x36   :  { %672 = vmatprep.subr.mxu0 %v12427_v0  ;;  %1492 = vmatprep.subr.mxu1 %v12427_v0  ;;  %v8244_v0 = vsub.f32 %v188_v56, %v8206_v2  ;;  %v8253_v42 = vand.u32 4294901760, %v184_v39  ;;  %v8256_v56 = vsub.f32 %v187_v53, %v8226_v24  ;;  %v8260_v40 = vand.u32 4294901760, %v30_v62  ;;  %v183_v53 = vld [vmem:[%s12406_s2 + $0x98] sm:$0xff] }
  0x37   :  { %674 = vmatpush2.msra.mxu0 %v8141_v32  ;;  %1498 = vmatpush1.msra.mxu1 %v1497_v55  ;;  %v1518_v32 = vand.u32 4294901760, %v1517_v51  ;;  %v1531_v55 = vsub.f32 %v8194_v46, %v13114_v36  ;;  %v8274_v46 = vsub.f32 %v186_v29, %v8234_v22  ;;  %v8284_v36 = vand.u32 4294901760, %v29_v63 }
  0x38   :  { %13112 = vst [vmem:[#allocation39_spill] sm:$0xff] %v8244_v0  ;;  %675 = vmatprep.subr.mxu0 %v13113_v1  ;;  %1499 = vmatprep.subr.mxu1 %v13113_v1  ;;  %13115 = vst [vmem:[#allocation40_spill] sm:$0xff] %v8253_v42  ;;  %v8289_v33 = vsub.f32 %v184_v39, %v8253_v42  ;;  %v8295_v38 = vand.u32 4294901760, %v183_v53 }
  0x39   :  { %677 = vmatpush2.msra.mxu0 %v8153_v14  ;;  %1505 = vmatpush2.msra.mxu1 %v1504_v44  ;;  %13116 = vst [vmem:[#allocation41_spill] sm:$0xff] %v8256_v56  ;;  %13117 = vst [vmem:[#allocation42_spill] sm:$0xff] %v8260_v40  ;;  %v33_v14 = vld [vmem:[#allocation2 + $0x20] sm:$0xff]  ;;  %v13118_v44 = vand.u32 4294901760, %v8212_v27 }
  0x3a   :  { %678 = vmatprep.subr.mxu0 %v13113_v1  ;;  %1506 = vmatprep.subr.mxu1 %v13113_v1  ;;  %13119 = vst [vmem:[#allocation43_spill] sm:$0xff] %v8274_v46  ;;  %13122 = vst [vmem:[#allocation45_spill] sm:$0xff] %v8284_v36 }
  0x3b   :  { %680 = vmatpush2.msra.mxu0 %v8178_v58  ;;  %1512 = vmatpush2.msra.mxu1 %v1511_v41  ;;  %v1538_v51 = vsub.f32 %v8212_v27, %v13118_v44  ;;  %v8277_v58 = vsub.f32 %v185_v9, %v8241_v23  ;;  %v13121_v41 = vand.u32 4294901760, %v8220_v8  ;;  %v1532_v27 = vand.u32 4294901760, %v1531_v55  ;;  %13123 = vst [vmem:[#allocation46_spill] sm:$0xff] %v8289_v33 }
  0x3c   :  { %681 = vmatprep.subr.mxu0 %v13113_v1  ;;  %1513 = vmatprep.subr.mxu1 %v13113_v1  ;;  %v8291_v9 = vand.u32 4294901760, %v33_v14  ;;  %13125 = vst [vmem:[#allocation48_spill] sm:$0xff] %v8295_v38  ;;  %v13128_v55 = vand.u32 4294901760, %v8244_v0 }
  0x3d   :  { %13120 = vst [vmem:[#allocation44_spill] sm:$0xff] %v8277_v58  ;;  %v1545_v44 = vsub.f32 %v8220_v8, %v13121_v41  ;;  %683 = vmatpush2.msra.mxu0 %v8183_v52  ;;  %1519 = vmatpush2.msra.mxu1 %v1518_v32  ;;  %v8297_v41 = vand.u32 4294901760, %v182_v13  ;;  %v8300_v52 = vsub.f32 %v30_v62, %v8260_v40  ;;  %v36_v32 = vld [vmem:[#allocation2 + $0x38] sm:$0xff]  ;;  %v1539_v39 = vand.u32 4294901760, %v1538_v51  ;;  %v180_v62 = vld [vmem:[%s12406_s2 + $0x80] sm:$0xff] }
  0x3e   :  { %13124 = vst [vmem:[#allocation47_spill] sm:$0xff] %v8291_v9  ;;  %684 = vmatprep.subr.mxu0 %v13113_v1  ;;  %1520 = vmatprep.subr.mxu1 %v13113_v1  ;;  %v1552_v29 = vsub.f32 %v8244_v0, %v13128_v55  ;;  %v8317_v51 = vsub.f32 %v29_v63, %v8284_v36  ;;  %v8319_v55 = vand.u32 4294901760, %v32_v31  ;;  %v13131_v8 = vand.u32 4294901760, %v8256_v56 }
  0x3f   :  { %13126 = vst [vmem:[#allocation49_spill] sm:$0xff] %v8297_v41  ;;  %13127 = vst [vmem:[#allocation50_spill] sm:$0xff] %v8300_v52  ;;  %686 = vmatpush2.msra.mxu0 %v8206_v2  ;;  %1526 = vmatpush2.msra.mxu1 %v1525_v50  ;;  %v1546_v50 = vand.u32 4294901760, %v1545_v44  ;;  %v8327_v0 = vsub.f32 %v33_v14, %v8291_v9  ;;  %v8329_v7 = vand.u32 4294901760, %v36_v32  ;;  %v35_v44 = vld [vmem:[#allocation2 + $0x30] sm:$0xff]  ;;  %v8333_v63 = vand.u32 4294901760, %v181_v26 }
  0x40   :  { %687 = vmatprep.subr.mxu0 %v13113_v1  ;;  %1527 = vmatprep.subr.mxu1 %v13113_v1  ;;  %13129 = vst [vmem:[#allocation51_spill] sm:$0xff] %v8317_v51  ;;  %13130 = vst [vmem:[#allocation52_spill] sm:$0xff] %v8319_v55  ;;  %v1559_v59 = vsub.f32 %v8256_v56, %v13131_v8  ;;  %v8339_v8 = vsub.f32 %v183_v53, %v8295_v38  ;;  %v1553_v14 = vand.u32 4294901760, %v1552_v29  ;;  %v38_v53 = vld [vmem:[#allocation2 + $0x48] sm:$0xff] }
  0x41   :  { %689 = vmatpush2.msra.mxu0 %v8226_v24  ;;  %1533 = vmatpush2.msra.mxu1 %v1532_v27  ;;  %13132 = vst [vmem:[#allocation53_spill] sm:$0xff] %v8327_v0  ;;  %13133 = vst [vmem:[#allocation54_spill] sm:$0xff] %v8329_v7  ;;  %v8335_v24 = vand.u32 4294901760, %v180_v62  ;;  %v13137_v2 = vand.u32 4294901760, %v8274_v46  ;;  %v13138_v49 = vand.u32 4294901760, %v8277_v58  ;;  %v8349_v37 = vsub.f32 %v182_v13, %v8297_v41  ;;  %v42_v27 = vld [vmem:[#allocation2 + $0x68] sm:$0xff] }
  0x42   :  { %690 = vmatprep.subr.mxu0 %v13113_v1  ;;  %1534 = vmatprep.subr.mxu1 %v13113_v1  ;;  %13134 = vst [vmem:[#allocation55_spill] sm:$0xff] %v8333_v63  ;;  %13136 = vst [vmem:[#allocation57_spill] sm:$0xff] %v8339_v8  ;;  %v8355_v29 = vsub.f32 %v32_v31, %v8319_v55  ;;  %v13144_v31 = vand.u32 4294901760, %v8300_v52 }
  0x43   :  { %13135 = vst [vmem:[#allocation56_spill] sm:$0xff] %v8335_v24  ;;  %692 = vmatpush2.msra.mxu0 %v8234_v22  ;;  %1540 = vmatpush2.msra.mxu1 %v1539_v39  ;;  %v1566_v56 = vsub.f32 %v8274_v46, %v13137_v2  ;;  %v1573_v61 = vsub.f32 %v8277_v58, %v13138_v49  ;;  %13139 = vst [vmem:[#allocation58_spill] sm:$0xff] %v8349_v37  ;;  %v8357_v39 = vand.u32 4294901760, %v35_v44 }
  0x44   :  { %693 = vmatprep.subr.mxu0 %v13113_v1  ;;  %1541 = vmatprep.subr.mxu1 %v13113_v1  ;;  %13140 = vst [vmem:[#allocation59_spill] sm:$0xff] %v8355_v29  ;;  %v1560_v2 = vand.u32 4294901760, %v1559_v59  ;;  %v13142_v49 = vand.u32 4294901760, %v8289_v33  ;;  %v8367_v58 = vsub.f32 %v36_v32, %v8329_v7  ;;  %v8383_v46 = vsub.f32 %v180_v62, %v8335_v24 }
  0x45   :  { %13141 = vst [vmem:[#allocation60_spill] sm:$0xff] %v8357_v39  ;;  %695 = vmatpush2.msra.mxu0 %v8241_v23  ;;  %1547 = vmatpush2.msra.mxu1 %v1546_v50  ;;  %v714_v50 = vsub.f32 %v8300_v52, %v13144_v31  ;;  %v8376_v23 = vsub.f32 %v181_v26, %v8333_v63  ;;  %v1567_v32 = vand.u32 4294901760, %v1566_v56  ;;  %v13146_v26 = vand.u32 4294901760, %v8317_v51 }
  0x46   :  { %v8363_v13 = vsub.f32 %v8289_v33, %v13142_v49  ;;  %13143 = vst [vmem:[#allocation61_spill] sm:$0xff] %v8367_v58  ;;  %696 = vmatprep.subr.mxu0 %v13113_v1  ;;  %1548 = vmatprep.subr.mxu1 %v13113_v1  ;;  %v8378_v49 = vand.u32 4294901760, %v39_v57  ;;  %v1574_v33 = vand.u32 4294901760, %v1573_v61  ;;  %v8392_v52 = vsub.f32 %v35_v44, %v8357_v39  ;;  %v41_v61 = vld [vmem:[#allocation2 + $0x60] sm:$0xff] }
  0x47   :  { %698 = vmatpush2.msra.mxu0 %v8253_v42  ;;  %1554 = vmatpush2.msra.mxu1 %v1553_v14  ;;  %v720_v31 = vsub.f32 %v8317_v51, %v13146_v26  ;;  %v8394_v56 = vand.u32 4294901760, %v38_v53  ;;  %v45_v14 = vld [vmem:[#allocation2 + $0x80] sm:$0xff]  ;;  %v13149_v22 = vand.u32 4294901760, %v8327_v0  ;;  %v8402_v51 = vand.u32 4294901760, %v42_v27 }
  0x48   :  { %13145 = vst [vmem:[#allocation62_spill] sm:$0xff] %v8378_v49  ;;  %699 = vmatprep.subr.mxu0 %v13113_v1  ;;  %1555 = vmatprep.subr.mxu1 %v13113_v1  ;;  %13147 = vst [vmem:[#allocation63_spill] sm:$0xff] %v8392_v52  ;;  %v1581_v62 = vand.u32 4294901760, %v8363_v13  ;;  %v715_v44 = vand.u32 4294901760, %v714_v50  ;;  %v13151_v59 = vand.u32 4294901760, %v8339_v8  ;;  %v8411_v13 = vsub.f32 %v39_v57, %v8378_v49 }
  0x49   :  { %13148 = vst [vmem:[#allocation64_spill] sm:$0xff] %v8394_v56  ;;  %701 = vmatpush2.msra.mxu0 %v8295_v38  ;;  %1561 = vmatpush2.msra.mxu1 %v1560_v2  ;;  %v729_v42 = vsub.f32 %v8327_v0, %v13149_v22  ;;  %13150 = vst [vmem:[#allocation65_spill] sm:$0xff] %v8402_v51  ;;  %v13152_v22 = vand.u32 4294901760, %v8349_v37  ;;  %v8418_v19 = vand.u32 4294901760, %v41_v61  ;;  %v8420_v50 = vand.u32 4294901760, %v45_v14 }
  0x4a   :  { %702 = vmatprep.subr.mxu0 %v13113_v1  ;;  %1562 = vmatprep.subr.mxu1 %v13113_v1  ;;  %v1587_v38 = vsub.f32 %v8339_v8, %v13151_v59  ;;  %v721_v59 = vand.u32 4294901760, %v720_v31  ;;  %v13155_v57 = vand.u32 4294901760, %v8355_v29  ;;  %v13157_v0 = vand.u32 4294901760, %v8367_v58  ;;  %v44_v31 = vld [vmem:[#allocation2 + $0x78] sm:$0xff] }
  0x4b   :  { %704 = vmatpush2.msra.mxu0 %v8297_v41  ;;  %1568 = vmatpush2.msra.mxu1 %v1567_v32  ;;  %v1594_v26 = vsub.f32 %v8349_v37, %v13152_v22  ;;  %13153 = vst [vmem:[#allocation66_spill] sm:$0xff] %v8418_v19  ;;  %13154 = vst [vmem:[#allocation67_spill] sm:$0xff] %v8420_v50  ;;  %v8429_v41 = vsub.f32 %v38_v53, %v8394_v56  ;;  %v730_v22 = vand.u32 4294901760, %v729_v42  ;;  %v48_v42 = vld [vmem:[#allocation2 + $0x98] sm:$0xff] }
  0x4c   :  { %705 = vmatprep.subr.mxu0 %v13113_v1  ;;  %1569 = vmatprep.subr.mxu1 %v13113_v1  ;;  %v735_v2 = vsub.f32 %v8355_v29, %v13155_v57  ;;  %v744_v37 = vsub.f32 %v8367_v58, %v13157_v0  ;;  %v8436_v8 = vsub.f32 %v42_v27, %v8402_v51  ;;  %v1588_v57 = vand.u32 4294901760, %v1587_v38 }
  0x4d   :  { %13156 = vst [vmem:[#allocation68_spill] sm:$0xff] %v8429_v41  ;;  %707 = vmatpush2.msra.mxu0 %v8333_v63  ;;  %1575 = vmatpush2.msra.mxu1 %v1574_v33  ;;  %v13159_v53 = vand.u32 4294901760, %v8376_v23  ;;  %v1595_v0 = vand.u32 4294901760, %v1594_v26  ;;  %v13160_v27 = vand.u32 4294901760, %v8383_v46  ;;  %v8449_v29 = vsub.f32 %v41_v61, %v8418_v19 }
  0x4e   :  { %13158 = vst [vmem:[#allocation69_spill] sm:$0xff] %v8436_v8  ;;  %708 = vmatprep.subr.mxu0 %v13113_v1  ;;  %1576 = vmatprep.subr.mxu1 %v13113_v1  ;;  %v8452_v38 = vsub.f32 %v45_v14, %v8420_v50  ;;  %v13163_v33 = vand.u32 4294901760, %v8392_v52  ;;  %v8458_v26 = vand.u32 4294901760, %v44_v31  ;;  %v47_v14 = vld [vmem:[#allocation2 + $0x90] sm:$0xff] }
  0x4f   :  { %v1601_v32 = vsub.f32 %v8376_v23, %v13159_v53  ;;  %710 = vmatpush2.msra.mxu0 %v8335_v24  ;;  %716 = vmatprep.mubr.f32.mxu0 %v715_v44  ;;  %v1608_v58 = vsub.f32 %v8383_v46, %v13160_v27  ;;  %13161 = vst [vmem:[#allocation70_spill] sm:$0xff] %v8449_v29  ;;  %v736_v53 = vand.u32 4294901760, %v735_v2  ;;  %v745_v27 = vand.u32 4294901760, %v744_v37 }
  0x50   :  { %13162 = vst [vmem:[#allocation71_spill] sm:$0xff] %v8452_v38  ;;  %1582 = vmatpush2.msra.mxu1 %v1581_v62  ;;  %722 = vmatmul.mubr.f32.vlgmr.msra.gmra.mxu0 %v721_v59  ;;  %v750_v63 = vsub.f32 %v8392_v52, %v13163_v33  ;;  %13164 = vst [vmem:[#allocation72_spill] sm:$0xff] %v8458_v26  ;;  %v8462_v24 = vand.u32 4294901760, %v48_v42  ;;  %v13166_v2 = vand.u32 4294901760, %v8411_v13  ;;  %v51_v33 = vld [vmem:[#allocation2 + $0xb0] sm:$0xff] }
  0x51   :  { %1583 = vmatprep.subr.mxu1 %v13113_v1  ;;  %731 = vmatprep.mubr.f32.mxu0 %v730_v22  ;;  %v1602_v62 = vand.u32 4294901760, %v1601_v32  ;;  %v1609_v44 = vand.u32 4294901760, %v1608_v58  ;;  %v13167_v32 = vand.u32 4294901760, %v8429_v41  ;;  %v8476_v52 = vsub.f32 %v44_v31, %v8458_v26 }
  0x52   :  { %13165 = vst [vmem:[#allocation73_spill] sm:$0xff] %v8462_v24  ;;  %1589 = vmatpush2.msra.mxu1 %v1588_v57  ;;  %1927 = vmatprep.subr.mxu0 %v13113_v1  ;;  %v759_v59 = vsub.f32 %v8411_v13, %v13166_v2  ;;  %v751_v57 = vand.u32 4294901760, %v750_v63  ;;  %v8478_v2 = vand.u32 4294901760, %v47_v14  ;;  %v13170_v58 = vand.u32 4294901760, %v8436_v8 }
  0x53   :  { %1590 = vmatprep.subr.mxu1 %v13113_v1  ;;  %1612 = vmatprep.mubr.f32.mxu1 %v8260_v40  ;;  %v765_v61 = vsub.f32 %v8429_v41, %v13167_v32  ;;  %13168 = vst [vmem:[#allocation74_spill] sm:$0xff] %v8476_v52  ;;  %v8487_v63 = vand.u32 4294901760, %v51_v33  ;;  %v54_v32 = vld [vmem:[#allocation2 + $0xc8] sm:$0xff] }
  0x54   :  { %1596 = vmatpush2.msra.mxu1 %v1595_v0  ;;  %737 = vmatmul.mubr.f32.gmra.mxu0 %v736_v53  ;;  %13169 = vst [vmem:[#allocation75_spill] sm:$0xff] %v8478_v2  ;;  %v774_v37 = vsub.f32 %v8436_v8, %v13170_v58  ;;  %v8485_v0 = vsub.f32 %v48_v42, %v8462_v24  ;;  %v50_v53 = vld [vmem:[#allocation2 + $0xa8] sm:$0xff]  ;;  %v760_v31 = vand.u32 4294901760, %v759_v59  ;;  %v13174_v58 = vand.u32 4294901760, %v8452_v38 }
  0x55   :  { %1597 = vmatprep.subr.mxu1 %v13113_v1  ;;  %746 = vmatprep.mubr.f32.mxu0 %v745_v27  ;;  %13172 = vst [vmem:[#allocation77_spill] sm:$0xff] %v8487_v63  ;;  %v13173_v27 = vand.u32 4294901760, %v8449_v29  ;;  %v766_v40 = vand.u32 4294901760, %v765_v61  ;;  %v8500_v59 = vsub.f32 %v47_v14, %v8478_v2  ;;  %v8502_v8 = vand.u32 4294901760, %v50_v53  ;;  %v53_v61 = vld [vmem:[#allocation2 + $0xc0] sm:$0xff] }
  0x56   :  { %13171 = vst [vmem:[#allocation76_spill] sm:$0xff] %v8485_v0  ;;  %1603 = vmatpush2.msra.mxu1 %v1602_v62  ;;  %1930 = vmatpush1.msra.mxu0 %v7938_v15  ;;  %v789_v42 = vsub.f32 %v8452_v38, %v13174_v58  ;;  %v12530_v62 = vand.u32 4294901760, %v8476_v52  ;;  %v775_v41 = vand.u32 4294901760, %v774_v37  ;;  %v57_v14 = vld [vmem:[#allocation2 + $0xe0] sm:$0xff] }
  0x57   :  { %1604 = vmatprep.subr.mxu1 %v13113_v1  ;;  %1931 = vmatprep.subr.mxu0 %v13113_v1  ;;  %v780_v22 = vsub.f32 %v8449_v29, %v13173_v27  ;;  %13175 = vst [vmem:[#allocation78_spill] sm:$0xff] %v8502_v8  ;;  %v8508_v29 = vsub.f32 %v51_v33, %v8487_v63  ;;  %v8533_v37 = vand.u32 4294901760, %v57_v14 }
  0x58   :  { %1610 = vmatpush2.msra.mxu1 %v1609_v44  ;;  %752 = vmatmul.mubr.f32.gmra.mxu0 %v751_v57  ;;  %v8510_v44 = vand.u32 4294901760, %v54_v32  ;;  %v790_v58 = vand.u32 4294901760, %v789_v42  ;;  %v795_v33 = vsub.f32 %v8476_v52, %v12530_v62  ;;  %v8521_v27 = vsub.f32 %v50_v53, %v8502_v8 }
  0x59   :  { %1614 = vmatmul.mubr.f32.vlgmr.msra.gmra.mxu1 %v8284_v36  ;;  %2461 = vmatprep.subr.mxu1 %v13113_v1  ;;  %v781_v57 = vand.u32 4294901760, %v780_v22  ;;  %v56_v36 = vld [vmem:[#allocation2 + $0xd8] sm:$0xff]  ;;  %13181 = vst [vmem:[#allocation83_spill] sm:$0xff] %v8533_v37  ;;  %v13186_v52 = vand.u32 4294901760, %v8508_v29  ;;  %v8557_v38 = vsub.f32 %v57_v14, %v8533_v37 }
  0x5a   :  { %13176 = vst [vmem:[#allocation79_spill] sm:$0xff] %v8510_v44  ;;  %2463 = vmatpush1.msra.mxu1 %v7909_v4  ;;  %761 = vmatprep.mubr.f32.mxu0 %v760_v31  ;;  %13177 = vst [vmem:[#allocation80_spill] sm:$0xff] %v8521_v27  ;;  %v8523_v31 = vand.u32 4294901760, %v53_v61  ;;  %v8531_v62 = vsub.f32 %v54_v32, %v8510_v44  ;;  %v13184_v32 = vand.u32 4294901760, %v8500_v59 }
  0x5b   :  { %1619 = vmatprep.mubr.f32.mxu1 %v8291_v9  ;;  %1934 = vmatpush1.msra.mxu0 %v7941_v16  ;;  %v60_v9 = vld [vmem:[#allocation2 + $0xf8] sm:$0xff]  ;;  %13187 = vst [vmem:[#allocation87_spill] sm:$0xff] %v8557_v38 }
  0x5c   :  { %767 = vmatmul.mubr.f32.gmra.mxu0 %v766_v40  ;;  %2464 = vmatprep.subr.mxu1 %v13113_v1  ;;  %13178 = vst [vmem:[#allocation81_spill] sm:$0xff] %v8523_v31  ;;  %v13179_v40 = vand.u32 4294901760, %v8485_v0  ;;  %13180 = vst [vmem:[#allocation82_spill] sm:$0xff] %v8531_v62  ;;  %v8541_v53 = vand.u32 4294901760, %v60_v9  ;;  %v810_v42 = vsub.f32 %v8500_v59, %v13184_v32 }
  0x5d   :  { %1621 = vmatmul.mubr.f32.gmra.mxu1 %v8319_v55  ;;  %776 = vmatprep.mubr.f32.mxu0 %v775_v41  ;;  %v8539_v41 = vand.u32 4294901760, %v56_v36  ;;  %v8549_v55 = vsub.f32 %v53_v61, %v8523_v31  ;;  %v63_v61 = vld [vmem:[#allocation2 + $0x110] sm:$0xff] }
  0x5e   :  { %v804_v22 = vsub.f32 %v8485_v0, %v13179_v40  ;;  %1626 = vmatprep.mubr.f32.mxu1 %v8329_v7  ;;  %2466 = vmatpush1.msra.mxu1 %v7911_v5  ;;  %13183 = vst [vmem:[#allocation85_spill] sm:$0xff] %v8541_v53  ;;  %v796_v40 = vand.u32 4294901760, %v795_v33  ;;  %v12546_v7 = vand.u32 4294901760, %v8521_v27 }
  0x5f   :  { %1935 = vmatprep.subr.mxu0 %v13113_v1  ;;  %2467 = vmatprep.subr.mxu1 %v13113_v1  ;;  %13182 = vst [vmem:[#allocation84_spill] sm:$0xff] %v8539_v41  ;;  %13185 = vst [vmem:[#allocation86_spill] sm:$0xff] %v8549_v55  ;;  %v12553_v32 = vand.u32 4294901760, %v8549_v55 }
  0x60   :  { %782 = vmatmul.mubr.f32.gmra.mxu0 %v781_v57  ;;  %2469 = vmatpush1.msra.mxu1 %v7913_v6  ;;  %v805_v0 = vand.u32 4294901760, %v804_v22  ;;  %v819_v57 = vsub.f32 %v8508_v29, %v13186_v52  ;;  %v59_v6 = vld [vmem:[#allocation2 + $0xf0] sm:$0xff]  ;;  %v8567_v52 = vsub.f32 %v60_v9, %v8541_v53  ;;  %v811_v22 = vand.u32 4294901760, %v810_v42 }
  0x61   :  { %1628 = vmatmul.mubr.f32.gmra.mxu1 %v8357_v39  ;;  %791 = vmatprep.mubr.f32.mxu0 %v790_v58  ;;  %v8564_v58 = vsub.f32 %v56_v36, %v8539_v41  ;;  %v825_v14 = vsub.f32 %v8521_v27, %v12546_v7  ;;  %v8574_v33 = vand.u32 4294901760, %v59_v6  ;;  %v62_v39 = vld [vmem:[#allocation2 + $0x108] sm:$0xff]  ;;  %v840_v42 = vsub.f32 %v8549_v55, %v12553_v32  ;;  %v65_v32 = vld [vmem:[#allocation2 + $0x120] sm:$0xff] }
  0x62   :  { %1633 = vmatprep.mubr.f32.mxu1 %v8378_v49  ;;  %1938 = vmatpush1.msra.mxu0 %v7946_v18  ;;  %13189 = vst [vmem:[#allocation89_spill] sm:$0xff] %v8567_v52  ;;  %v820_v36 = vand.u32 4294901760, %v819_v57  ;;  %v13191_v49 = vand.u32 4294901760, %v8531_v62  ;;  %v66_v7 = vld [vmem:[#allocation2 + $0x128] sm:$0xff]  ;;  %v8622_v55 = vand.u32 4294901760, %v65_v32 }
  0x63   :  { %1939 = vmatprep.subr.mxu0 %v13113_v1  ;;  %2470 = vmatprep.subr.mxu1 %v13113_v1  ;;  %13188 = vst [vmem:[#allocation88_spill] sm:$0xff] %v8564_v58  ;;  %13190 = vst [vmem:[#allocation90_spill] sm:$0xff] %v8574_v33  ;;  %v8605_v57 = vand.u32 4294901760, %v66_v7 }
  0x64   :  { %797 = vmatmul.mubr.f32.gmra.mxu0 %v796_v40  ;;  %2472 = vmatpush1.msra.mxu1 %v7924_v10  ;;  %v834_v9 = vsub.f32 %v8531_v62, %v13191_v49  ;;  %v8581_v40 = vand.u32 4294901760, %v63_v61  ;;  %v826_v49 = vand.u32 4294901760, %v825_v14  ;;  %13200 = vst [vmem:[#allocation96_spill] sm:$0xff] %v8622_v55 }
  0x65   :  { %1635 = vmatmul.mubr.f32.gmra.mxu1 %v8394_v56  ;;  %806 = vmatprep.mubr.f32.mxu0 %v805_v0  ;;  %v8596_v56 = vand.u32 4294901760, %v62_v39  ;;  %v13195_v0 = vand.u32 4294901760, %v8557_v38  ;;  %13197 = vst [vmem:[#allocation95_spill] sm:$0xff] %v8605_v57  ;;  %v8627_v27 = vsub.f32 %v66_v7, %v8605_v57 }
  0x66   :  { %13192 = vst [vmem:[#allocation91_spill] sm:$0xff] %v8581_v40  ;;  %1640 = vmatprep.mubr.f32.mxu1 %v8402_v51  ;;  %1942 = vmatpush1.msra.mxu0 %v7953_v20  ;;  %v8594_v51 = vsub.f32 %v59_v6, %v8574_v33  ;;  %v835_v62 = vand.u32 4294901760, %v834_v9  ;;  %v8603_v14 = vsub.f32 %v63_v61, %v8581_v40  ;;  %v69_v6 = vld [vmem:[#allocation2 + $0x140] sm:$0xff] }
  0x67   :  { %1943 = vmatprep.subr.mxu0 %v13113_v1  ;;  %2473 = vmatprep.subr.mxu1 %v13113_v1  ;;  %13194 = vst [vmem:[#allocation93_spill] sm:$0xff] %v8596_v56  ;;  %13201 = vst [vmem:[#allocation97_spill] sm:$0xff] %v8627_v27 }
  0x68   :  { %812 = vmatmul.mubr.f32.gmra.mxu0 %v811_v22  ;;  %2475 = vmatpush1.msra.mxu1 %v7926_v11  ;;  %13193 = vst [vmem:[#allocation92_spill] sm:$0xff] %v8594_v51  ;;  %v849_v22 = vsub.f32 %v8557_v38, %v13195_v0  ;;  %13196 = vst [vmem:[#allocation94_spill] sm:$0xff] %v8603_v14  ;;  %v13199_v0 = vand.u32 4294901760, %v8567_v52  ;;  %v8620_v38 = vsub.f32 %v62_v39, %v8596_v56  ;;  %v72_v39 = vld [vmem:[#allocation2 + $0x158] sm:$0xff] }
  0x69   :  { %1642 = vmatmul.mubr.f32.gmra.mxu1 %v8418_v19  ;;  %821 = vmatprep.mubr.f32.mxu0 %v820_v36  ;;  %v13198_v36 = vand.u32 4294901760, %v8564_v58  ;;  %v841_v19 = vand.u32 4294901760, %v840_v42  ;;  %v68_v42 = vld [vmem:[#allocation2 + $0x138] sm:$0xff] }
  0x6a   :  { %1647 = vmatprep.mubr.f32.mxu1 %v8420_v50  ;;  %1946 = vmatpush1.msra.mxu0 %v7956_v21  ;;  %v864_v61 = vsub.f32 %v8567_v52, %v13199_v0 }
  0x6b   :  { %1947 = vmatprep.subr.mxu0 %v13113_v1  ;;  %v855_v9 = vsub.f32 %v8564_v58, %v13198_v36  ;;  %2476 = vmatprep.subr.mxu1 %v13113_v1  ;;  %v850_v36 = vand.u32 4294901760, %v849_v22  ;;  %v8641_v58 = vsub.f32 %v65_v32, %v8622_v55  ;;  %v8653_v22 = vand.u32 4294901760, %v72_v39 }
  0x6c   :  { %827 = vmatmul.mubr.f32.gmra.mxu0 %v826_v49  ;;  %2478 = vmatpush1.msra.mxu1 %v7928_v12  ;;  %v8629_v49 = vand.u32 4294901760, %v69_v6  ;;  %v865_v50 = vand.u32 4294901760, %v864_v61  ;;  %v75_v61 = vld [vmem:[#allocation2 + $0x170] sm:$0xff] }
  0x6d   :  { %1649 = vmatmul.mubr.f32.gmra.mxu1 %v8458_v26  ;;  %836 = vmatprep.mubr.f32.mxu0 %v835_v62  ;;  %v856_v0 = vand.u32 4294901760, %v855_v9  ;;  %v13203_v62 = vand.u32 4294901760, %v8594_v51  ;;  %13204 = vst [vmem:[#allocation99_spill] sm:$0xff] %v8641_v58  ;;  %v71_v9 = vld [vmem:[#allocation2 + $0x150] sm:$0xff]  ;;  %13208 = vst [vmem:[#allocation102_spill] sm:$0xff] %v8653_v22 }
  0x6e   :  { %13202 = vst [vmem:[#allocation98_spill] sm:$0xff] %v8629_v49  ;;  %1654 = vmatprep.mubr.f32.mxu1 %v8462_v24  ;;  %1950 = vmatpush1.msra.mxu0 %v7973_v30  ;;  %v8643_v24 = vand.u32 4294901760, %v68_v42  ;;  %v8659_v32 = vand.u32 4294901760, %v71_v9 }
  0x6f   :  { %1951 = vmatprep.subr.mxu0 %v13113_v1  ;;  %2479 = vmatprep.subr.mxu1 %v13113_v1  ;;  %v870_v7 = vsub.f32 %v8594_v51, %v13203_v62  ;;  %v8651_v51 = vsub.f32 %v69_v6, %v8629_v49  ;;  %v13211_v62 = vand.u32 4294901760, %v8620_v38 }
  0x70   :  { %842 = vmatmul.mubr.f32.gmra.mxu0 %v841_v19  ;;  %2481 = vmatpush1.msra.mxu1 %v7943_v17  ;;  %13205 = vst [vmem:[#allocation100_spill] sm:$0xff] %v8643_v24  ;;  %v13206_v19 = vand.u32 4294901760, %v8603_v14  ;;  %13209 = vst [vmem:[#allocation103_spill] sm:$0xff] %v8659_v32  ;;  %v13213_v17 = vand.u32 4294901760, %v8627_v27 }
  0x71   :  { %1656 = vmatmul.mubr.f32.gmra.mxu1 %v8478_v2  ;;  %851 = vmatprep.mubr.f32.mxu0 %v850_v36  ;;  %13207 = vst [vmem:[#allocation101_spill] sm:$0xff] %v8651_v51  ;;  %v8661_v36 = vand.u32 4294901760, %v75_v61  ;;  %v885_v6 = vsub.f32 %v8620_v38, %v13211_v62  ;;  %v12587_v2 = vand.u32 4294901760, %v8641_v58  ;;  %v8677_v62 = vsub.f32 %v72_v39, %v8653_v22 }
  0x72   :  { %v879_v26 = vsub.f32 %v8603_v14, %v13206_v19  ;;  %1661 = vmatprep.mubr.f32.mxu1 %v8487_v63  ;;  %1954 = vmatpush1.msra.mxu0 %v7986_v34  ;;  %v871_v19 = vand.u32 4294901760, %v870_v7  ;;  %v8669_v63 = vsub.f32 %v68_v42, %v8643_v24  ;;  %v74_v14 = vld [vmem:[#allocation2 + $0x168] sm:$0xff] }
  0x73   :  { %1955 = vmatprep.subr.mxu0 %v13113_v1  ;;  %2482 = vmatprep.subr.mxu1 %v13113_v1  ;;  %13210 = vst [vmem:[#allocation104_spill] sm:$0xff] %v8661_v36  ;;  %13214 = vst [vmem:[#allocation106_spill] sm:$0xff] %v8677_v62  ;;  %v78_v42 = vld [vmem:[#allocation2 + $0x188] sm:$0xff]  ;;  %v886_v39 = vand.u32 4294901760, %v885_v6  ;;  %v900_v7 = vsub.f32 %v8641_v58, %v12587_v2  ;;  %v77_v6 = vld [vmem:[#allocation2 + $0x180] sm:$0xff] }
  0x74   :  { %857 = vmatmul.mubr.f32.gmra.mxu0 %v856_v0  ;;  %2484 = vmatpush1.msra.mxu1 %v7962_v25  ;;  %13212 = vst [vmem:[#allocation105_spill] sm:$0xff] %v8669_v63  ;;  %v880_v52 = vand.u32 4294901760, %v879_v26  ;;  %v894_v0 = vsub.f32 %v8627_v27, %v13213_v17  ;;  %v8687_v26 = vsub.f32 %v75_v61, %v8661_v36  ;;  %v8689_v17 = vand.u32 4294901760, %v74_v14  ;;  %v81_v2 = vld [vmem:[#allocation2 + $0x1a0] sm:$0xff] }
  0x75   :  { %1663 = vmatmul.mubr.f32.gmra.mxu1 %v8502_v8  ;;  %866 = vmatprep.mubr.f32.mxu0 %v865_v50  ;;  %v8684_v50 = vsub.f32 %v71_v9, %v8659_v32  ;;  %v13218_v8 = vand.u32 4294901760, %v8651_v51  ;;  %v13221_v27 = vand.u32 4294901760, %v8669_v63 }
  0x76   :  { %1668 = vmatprep.mubr.f32.mxu1 %v8510_v44  ;;  %1958 = vmatpush1.msra.mxu0 %v8007_v43  ;;  %13216 = vst [vmem:[#allocation108_spill] sm:$0xff] %v8687_v26  ;;  %13217 = vst [vmem:[#allocation109_spill] sm:$0xff] %v8689_v17  ;;  %v895_v9 = vand.u32 4294901760, %v894_v0  ;;  %v901_v0 = vand.u32 4294901760, %v900_v7  ;;  %v8725_v7 = vand.u32 4294901760, %v81_v2 }
  0x77   :  { %1959 = vmatprep.subr.mxu0 %v13113_v1  ;;  %2485 = vmatprep.subr.mxu1 %v13113_v1  ;;  %13215 = vst [vmem:[#allocation107_spill] sm:$0xff] %v8684_v50  ;;  %v909_v61 = vsub.f32 %v8651_v51, %v13218_v8  ;;  %v8710_v8 = vsub.f32 %v74_v14, %v8689_v17 }
  0x78   :  { %872 = vmatmul.mubr.f32.gmra.mxu0 %v871_v19  ;;  %2487 = vmatpush1.msra.mxu1 %v7969_v28  ;;  %v8701_v19 = vand.u32 4294901760, %v78_v42  ;;  %13225 = vst [vmem:[#allocation114_spill] sm:$0xff] %v8725_v7 }
  0x79   :  { %1670 = vmatmul.mubr.f32.gmra.mxu1 %v8523_v31  ;;  %881 = vmatprep.mubr.f32.mxu0 %v880_v52  ;;  %13220 = vst [vmem:[#allocation111_spill] sm:$0xff] %v8710_v8  ;;  %v8716_v31 = vand.u32 4294901760, %v77_v6  ;;  %v910_v44 = vand.u32 4294901760, %v909_v61  ;;  %v13223_v52 = vand.u32 4294901760, %v8677_v62  ;;  %v13227_v61 = vand.u32 4294901760, %v8687_v26 }
  0x7a   :  { %13219 = vst [vmem:[#allocation110_spill] sm:$0xff] %v8701_v19  ;;  %1675 = vmatprep.mubr.f32.mxu1 %v8533_v37  ;;  %1962 = vmatpush1.msra.mxu0 %v8014_v47  ;;  %v915_v37 = vsub.f32 %v8669_v63, %v13221_v27  ;;  %v8723_v14 = vsub.f32 %v78_v42, %v8701_v19  ;;  %v84_v27 = vld [vmem:[#allocation2 + $0x1b8] sm:$0xff]  ;;  %v13226_v63 = vand.u32 4294901760, %v8684_v50 }
  0x7b   :  { %1963 = vmatprep.subr.mxu0 %v13113_v1  ;;  %2488 = vmatprep.subr.mxu1 %v13113_v1  ;;  %13222 = vst [vmem:[#allocation112_spill] sm:$0xff] %v8716_v31  ;;  %v924_v51 = vsub.f32 %v8677_v62, %v13223_v52  ;;  %v8747_v52 = vsub.f32 %v81_v2, %v8725_v7 }
  0x7c   :  { %887 = vmatmul.mubr.f32.gmra.mxu0 %v886_v39  ;;  %2490 = vmatpush1.msra.mxu1 %v7989_v35  ;;  %13224 = vst [vmem:[#allocation113_spill] sm:$0xff] %v8723_v14  ;;  %v80_v39 = vld [vmem:[#allocation2 + $0x198] sm:$0xff]  ;;  %v916_v42 = vand.u32 4294901760, %v915_v37  ;;  %v87_v37 = vld [vmem:[#allocation2 + $0x1d0] sm:$0xff] }
  0x7d   :  { %1677 = vmatmul.mubr.f32.gmra.mxu1 %v8539_v41  ;;  %896 = vmatprep.mubr.f32.mxu0 %v895_v9  ;;  %v930_v9 = vsub.f32 %v8684_v50, %v13226_v63  ;;  %v939_v41 = vsub.f32 %v8687_v26, %v13227_v61  ;;  %v8742_v62 = vand.u32 4294901760, %v80_v39  ;;  %v925_v63 = vand.u32 4294901760, %v924_v51  ;;  %13230 = vst [vmem:[#allocation117_spill] sm:$0xff] %v8747_v52 }
  0x7e   :  { %1682 = vmatprep.mubr.f32.mxu1 %v8541_v53  ;;  %1966 = vmatpush1.msra.mxu0 %v8032_v54  ;;  %v8739_v53 = vsub.f32 %v77_v6, %v8716_v31  ;;  %v8749_v26 = vand.u32 4294901760, %v84_v27  ;;  %v8773_v51 = vand.u32 4294901760, %v87_v37 }
  0x7f   :  { %1967 = vmatprep.subr.mxu0 %v13113_v1  ;;  %2491 = vmatprep.subr.mxu1 %v13113_v1  ;;  %13229 = vst [vmem:[#allocation116_spill] sm:$0xff] %v8742_v62  ;;  %v931_v6 = vand.u32 4294901760, %v930_v9  ;;  %v940_v50 = vand.u32 4294901760, %v939_v41  ;;  %v8760_v2 = vsub.f32 %v80_v39, %v8742_v62  ;;  %v86_v9 = vld [vmem:[#allocation2 + $0x1c8] sm:$0xff]  ;;  %v209_v39 = vld [vmem:[%s12405_s1] sm:$0xff] }
  0x80   :  { %902 = vmatmul.mubr.f32.gmra.mxu0 %v901_v0  ;;  %13228 = vst [vmem:[#allocation115_spill] sm:$0xff] %v8739_v53  ;;  %2493 = vmatpush1.msra.mxu1 %v8010_v45  ;;  %13231 = vst [vmem:[#allocation118_spill] sm:$0xff] %v8749_v26  ;;  %v83_v0 = vld [vmem:[#allocation2 + $0x1b0] sm:$0xff]  ;;  %v13232_v45 = vand.u32 4294901760, %v8710_v8 }
  0x81   :  { %1684 = vmatmul.mubr.f32.gmra.mxu1 %v8574_v33  ;;  %911 = vmatprep.mubr.f32.mxu0 %v910_v44  ;;  %13233 = vst [vmem:[#allocation119_spill] sm:$0xff] %v8760_v2  ;;  %v8763_v61 = vand.u32 4294901760, %v83_v0  ;;  %13237 = vst [vmem:[#allocation122_spill] sm:$0xff] %v8773_v51  ;;  %v90_v33 = vld [vmem:[#allocation2 + $0x1e8] sm:$0xff] }
  0x82   :  { %1689 = vmatprep.mubr.f32.mxu1 %v8581_v40  ;;  %1970 = vmatpush1.msra.mxu0 %v8047_v60  ;;  %v945_v44 = vsub.f32 %v8710_v8, %v13232_v45  ;;  %v13235_v45 = vand.u32 4294901760, %v8723_v14  ;;  %v8781_v40 = vand.u32 4294901760, %v86_v9 }
  0x83   :  { %1971 = vmatprep.subr.mxu0 %v13113_v1  ;;  %2494 = vmatprep.subr.mxu1 %v13113_v1  ;;  %13234 = vst [vmem:[#allocation120_spill] sm:$0xff] %v8763_v61  ;;  %v8788_v8 = vsub.f32 %v83_v0, %v8763_v61  ;;  %v13244_v0 = vld [vmem:[#allocation16_spill] sm:$0xff] }
  0x84   :  { %917 = vmatmul.mubr.f32.gmra.mxu0 %v916_v42  ;;  %2496 = vmatpush1.msra.mxu1 %v8018_v48  ;;  %v954_v41 = vsub.f32 %v8723_v14, %v13235_v45  ;;  %v8771_v42 = vsub.f32 %v84_v27, %v8749_v26  ;;  %v7870_v45 = vmov 0   ;;  %13238 = vst [vmem:[#allocation123_spill] sm:$0xff] %v8781_v40  ;;  %v13239_v27 = vand.u32 4294901760, %v8739_v53 }
  0x85   :  { %1691 = vmatmul.mubr.f32.gmra.mxu1 %v8596_v56  ;;  %926 = vmatprep.mubr.f32.mxu0 %v925_v63  ;;  %v946_v63 = vand.u32 4294901760, %v945_v44  ;;  %13240 = vst [vmem:[#allocation124_spill] sm:$0xff] %v8788_v8  ;;  %v89_v44 = vld [vmem:[#allocation2 + $0x1e0] sm:$0xff]  ;;  %v8803_v14 = vsub.f32 %v86_v9, %v8781_v40 }
  0x86   :  { %13236 = vst [vmem:[#allocation121_spill] sm:$0xff] %v8771_v42  ;;  %1696 = vmatprep.mubr.f32.mxu1 %v8605_v57  ;;  %1974 = vmatpush1.msra.mxu0 %v8062_v3  ;;  %v960_v56 = vsub.f32 %v8739_v53, %v13239_v27  ;;  %v8790_v57 = vand.u32 4294901760, %v90_v33  ;;  %v955_v48 = vand.u32 4294901760, %v954_v41  ;;  %v13242_v3 = vand.u32 4294901760, %v8747_v52  ;;  %v13248_v9 = vld [vmem:[#allocation12_spill] sm:$0xff] }
  0x87   :  { %1975 = vmatprep.subr.mxu0 %v13113_v1  ;;  %7820 = vset.pattern.permute.xlu0 %v7870_v45  ;;  %v8798_v27 = vsub.f32 %v87_v37, %v8773_v51  ;;  %13245 = vst [vmem:[#allocation127_spill] sm:$0xff] %v8803_v14  ;;  %v13247_v41 = vand.u32 4294901760, %v8760_v2  ;;  %v13250_v53 = vand.u32 4294901760, %v8771_v42 }
  0x88   :  { %932 = vmatmul.mubr.f32.gmra.mxu0 %v931_v6  ;;  %256 = vperm.xlu0 %7820, %v209_v39   ;;  %13241 = vst [vmem:[#allocation125_spill] sm:$0xff] %v8790_v57  ;;  %v969_v6 = vsub.f32 %v8747_v52, %v13242_v3  ;;  %v93_v39 = vld [vmem:[#allocation2 + $0x200] sm:$0xff]  ;;  %v8809_v3 = vand.u32 4294901760, %v89_v44  ;;  %v961_v37 = vand.u32 4294901760, %v960_v56 }
  0x89   :  { %1698 = vmatmul.mubr.f32.gmra.mxu1 %v8622_v55  ;;  %941 = vmatprep.mubr.f32.mxu0 %v940_v50  ;;  %13243 = vst [vmem:[#allocation126_spill] sm:$0xff] %v8798_v27  ;;  %v210_v50 = vld [vmem:[%s12405_s1 + $0x8] sm:$0xff]  ;;  %v975_v58 = vsub.f32 %v8760_v2, %v13247_v41  ;;  %v8818_v55 = vsub.f32 %v90_v33, %v8790_v57  ;;  %v92_v41 = vld [vmem:[#allocation2 + $0x1f8] sm:$0xff] }
  0x8a   :  { %1703 = vmatprep.mubr.f32.mxu1 %v8629_v49  ;;  %1978 = vmatpush1.msra.mxu0 %v13244_v0  ;;  %13246 = vst [vmem:[#allocation128_spill] sm:$0xff] %v8809_v3  ;;  %v970_v52 = vand.u32 4294901760, %v969_v6  ;;  %v8825_v0 = vand.u32 4294901760, %v93_v39  ;;  %v96_v49 = vld [vmem:[#allocation2 + $0x218] sm:$0xff]  ;;  %v8830_v2 = vsub.f32 %v89_v44, %v8809_v3  ;;  %v13254_v6 = vand.u32 4294901760, %v8788_v8 }
  0x8b   :  { %2497 = vmatprep.subr.mxu1 %v13113_v1  ;;  %1979 = vmatprep.subr.mxu0 %v13113_v1  ;;  %13249 = vst [vmem:[#allocation12_spill] sm:$0xff] %v8818_v55  ;;  %v8841_v33 = vand.u32 4294901760, %v92_v41 }
  0x8c   :  { %947 = vmatmul.mubr.f32.gmra.mxu0 %v946_v63  ;;  %2499 = vmatpush1.msra.mxu1 %v13248_v9  ;;  %v984_v63 = vsub.f32 %v8771_v42, %v13250_v53  ;;  %13251 = vst [vmem:[#allocation129_spill] sm:$0xff] %v8825_v0  ;;  %13252 = vst [vmem:[#allocation130_spill] sm:$0xff] %v8830_v2  ;;  %v976_v53 = vand.u32 4294901760, %v975_v58  ;;  %v990_v56 = vsub.f32 %v8788_v8, %v13254_v6  ;;  %v99_v8 = vld [vmem:[#allocation2 + $0x230] sm:$0xff] }
  0x8d   :  { %1705 = vmatmul.mubr.f32.gmra.mxu1 %v8643_v24  ;;  %956 = vmatprep.mubr.f32.mxu0 %v955_v48  ;;  %v13253_v48 = vld [vmem:[#allocation18_spill] sm:$0xff]  ;;  %13255 = vst [vmem:[#allocation131_spill] sm:$0xff] %v8841_v33  ;;  %v8850_v6 = vand.u32 4294901760, %v96_v49  ;;  %v13259_v24 = vld [vmem:[#allocation13_spill] sm:$0xff]  ;;  %v13260_v42 = vand.u32 4294901760, %v8803_v14 }
  0x8e   :  { %1710 = vmatprep.mubr.f32.mxu1 %v8653_v22  ;;  %261 = vperm.xlu0 %7820, %v210_v50   ;;  %v211_v50 = vld [vmem:[%s12405_s1 + $0x10] sm:$0xff]  ;;  %v985_v44 = vand.u32 4294901760, %v984_v63  ;;  %v8848_v22 = vsub.f32 %v93_v39, %v8825_v0  ;;  %v991_v39 = vand.u32 4294901760, %v990_v56  ;;  %v102_v63 = vld [vmem:[#allocation2 + $0x248] sm:$0xff] }
  0x8f   :  { %1982 = vmatpush1.msra.mxu0 %v13253_v48  ;;  %2500 = vmatprep.subr.mxu1 %v13113_v1  ;;  %13258 = vst [vmem:[#allocation133_spill] sm:$0xff] %v8850_v6  ;;  %v13274_v48 = vld [vmem:[#allocation22_spill] sm:$0xff] }
  0x90   :  { %962 = vmatmul.mubr.f32.gmra.mxu0 %v961_v37  ;;  %7821 = vset.pattern.permute.xlu1 %v7870_v45  ;;  %v13256_v37 = vand.u32 4294901760, %v8798_v27  ;;  %13257 = vst [vmem:[#allocation132_spill] sm:$0xff] %v8848_v22  ;;  %v95_v45 = vld [vmem:[#allocation2 + $0x210] sm:$0xff] }
  0x91   :  { %1712 = vmatmul.mubr.f32.gmra.mxu1 %v8659_v32  ;;  %971 = vmatprep.mubr.f32.mxu0 %v970_v52  ;;  %v1005_v52 = vsub.f32 %v8803_v14, %v13260_v42  ;;  %v212_v42 = vld [vmem:[%s12405_s1 + $0x18] sm:$0xff]  ;;  %v8869_v14 = vand.u32 4294901760, %v95_v45 }
  0x92   :  { %v999_v58 = vsub.f32 %v8798_v27, %v13256_v37  ;;  %1717 = vmatprep.mubr.f32.mxu1 %v8661_v36  ;;  %2502 = vmatpush1.msra.mxu1 %v13259_v24  ;;  %v13261_v37 = vand.u32 4294901760, %v8818_v55  ;;  %v8863_v36 = vsub.f32 %v92_v41, %v8841_v33  ;;  %v98_v41 = vld [vmem:[#allocation2 + $0x228] sm:$0xff]  ;;  %v13267_v24 = vand.u32 4294901760, %v8830_v2 }
  0x93   :  { %266 = vperm.xlu1 %7821, %v211_v50   ;;  %1983 = vmatprep.subr.mxu0 %v13113_v1  ;;  %13263 = vst [vmem:[#allocation135_spill] sm:$0xff] %v8869_v14  ;;  %v8874_v50 = vsub.f32 %v96_v49, %v8850_v6  ;;  %v1006_v27 = vand.u32 4294901760, %v1005_v52  ;;  %v213_v49 = vld [vmem:[%s12405_s1 + $0x20] sm:$0xff]  ;;  %v8889_v56 = vsub.f32 %v95_v45, %v8869_v14  ;;  %v8892_v52 = vand.u32 4294901760, %v98_v41 }
  0x94   :  { %977 = vmatmul.mubr.f32.gmra.mxu0 %v976_v53  ;;  %v1014_v32 = vsub.f32 %v8818_v55, %v13261_v37  ;;  %13262 = vst [vmem:[#allocation134_spill] sm:$0xff] %v8863_v36  ;;  %2503 = vmatprep.subr.mxu1 %v13113_v1  ;;  %v1000_v53 = vand.u32 4294901760, %v999_v58  ;;  %v8876_v37 = vand.u32 4294901760, %v99_v8  ;;  %v13266_v55 = vld [vmem:[#allocation20_spill] sm:$0xff] }
  0x95   :  { %1719 = vmatmul.mubr.f32.gmra.mxu1 %v8689_v17  ;;  %986 = vmatprep.mubr.f32.mxu0 %v985_v44  ;;  %13264 = vst [vmem:[#allocation136_spill] sm:$0xff] %v8874_v50  ;;  %v1020_v17 = vsub.f32 %v8830_v2, %v13267_v24  ;;  %v13268_v44 = vld [vmem:[#allocation15_spill] sm:$0xff]  ;;  %13269 = vst [vmem:[#allocation138_spill] sm:$0xff] %v8889_v56  ;;  %v101_v24 = vld [vmem:[#allocation2 + $0x240] sm:$0xff]  ;;  %v13272_v2 = vand.u32 4294901760, %v8848_v22 }
  0x96   :  { %13265 = vst [vmem:[#allocation137_spill] sm:$0xff] %v8876_v37  ;;  %1724 = vmatprep.mubr.f32.mxu1 %v8701_v19  ;;  %1986 = vmatpush1.msra.mxu0 %v13266_v55  ;;  %13270 = vst [vmem:[#allocation139_spill] sm:$0xff] %v8892_v52  ;;  %v8894_v19 = vand.u32 4294901760, %v102_v63  ;;  %v8902_v45 = vsub.f32 %v99_v8, %v8876_v37 }
  0x97   :  { %271 = vperm.xlu1 %7821, %v212_v42   ;;  %2505 = vmatpush1.msra.mxu1 %v13268_v44  ;;  %v1015_v42 = vand.u32 4294901760, %v1014_v32  ;;  %v105_v44 = vld [vmem:[#allocation2 + $0x260] sm:$0xff]  ;;  %v1021_v55 = vand.u32 4294901760, %v1020_v17  ;;  %v214_v32 = vld [vmem:[%s12405_s1 + $0x28] sm:$0xff] }
  0x98   :  { %992 = vmatmul.mubr.f32.gmra.mxu0 %v991_v39  ;;  %1987 = vmatprep.subr.mxu0 %v13113_v1  ;;  %13271 = vst [vmem:[#allocation140_spill] sm:$0xff] %v8894_v19  ;;  %v1029_v39 = vsub.f32 %v8848_v22, %v13272_v2  ;;  %13273 = vst [vmem:[#allocation141_spill] sm:$0xff] %v8902_v45  ;;  %v13276_v2 = vand.u32 4294901760, %v8863_v36  ;;  %v13278_v17 = vld [vmem:[#allocation17_spill] sm:$0xff]  ;;  %v8928_v58 = vand.u32 4294901760, %v105_v44 }
  0x99   :  { %1726 = vmatmul.mubr.f32.gmra.mxu1 %v8716_v31  ;;  %1001 = vmatprep.mubr.f32.mxu0 %v1000_v53  ;;  %v8910_v53 = vand.u32 4294901760, %v101_v24  ;;  %v104_v31 = vld [vmem:[#allocation2 + $0x258] sm:$0xff] }
  0x9a   :  { %1731 = vmatprep.mubr.f32.mxu1 %v8725_v7  ;;  %276 = vperm.xlu0 %7820, %v213_v49   ;;  %v1035_v8 = vsub.f32 %v8863_v36, %v13276_v2  ;;  %v8917_v49 = vsub.f32 %v98_v41, %v8892_v52  ;;  %v8921_v7 = vsub.f32 %v102_v63, %v8894_v19  ;;  %v1030_v22 = vand.u32 4294901760, %v1029_v39  ;;  %v108_v41 = vld [vmem:[#allocation2 + $0x278] sm:$0xff]  ;;  %v13289_v36 = vld [vmem:[#allocation24_spill] sm:$0xff] }
  0x9b   :  { %1990 = vmatpush1.msra.mxu0 %v13274_v48  ;;  %2506 = vmatprep.subr.mxu1 %v13113_v1  ;;  %13275 = vst [vmem:[#allocation142_spill] sm:$0xff] %v8910_v53  ;;  %13281 = vst [vmem:[#allocation145_spill] sm:$0xff] %v8928_v58  ;;  %v8932_v63 = vsub.f32 %v101_v24, %v8910_v53  ;;  %v215_v24 = vld [vmem:[%s12405_s1 + $0x30] sm:$0xff] }
  0x9c   :  { %1007 = vmatmul.mubr.f32.gmra.mxu0 %v1006_v27  ;;  %13277 = vst [vmem:[#allocation143_spill] sm:$0xff] %v8917_v49  ;;  %2508 = vmatpush1.msra.mxu1 %v13278_v17  ;;  %13279 = vst [vmem:[#allocation144_spill] sm:$0xff] %v8921_v7  ;;  %v13280_v27 = vand.u32 4294901760, %v8874_v50  ;;  %v1036_v39 = vand.u32 4294901760, %v1035_v8 }
  0x9d   :  { %1733 = vmatmul.mubr.f32.gmra.mxu1 %v8742_v62  ;;  %1016 = vmatprep.mubr.f32.mxu0 %v1015_v42  ;;  %13282 = vst [vmem:[#allocation146_spill] sm:$0xff] %v8932_v63  ;;  %v8936_v42 = vand.u32 4294901760, %v104_v31  ;;  %v8954_v62 = vand.u32 4294901760, %v108_v41 }
  0x9e   :  { %v1044_v48 = vsub.f32 %v8874_v50, %v13280_v27  ;;  %1738 = vmatprep.mubr.f32.mxu1 %v8749_v26  ;;  %281 = vperm.xlu1 %7821, %v214_v32   ;;  %v13284_v27 = vand.u32 4294901760, %v8889_v56  ;;  %v13285_v26 = vld [vmem:[#allocation19_spill] sm:$0xff] }
  0x9f   :  { %1991 = vmatprep.subr.mxu0 %v13113_v1  ;;  %2509 = vmatprep.subr.mxu1 %v13113_v1  ;;  %13283 = vst [vmem:[#allocation147_spill] sm:$0xff] %v8936_v42  ;;  %13288 = vst [vmem:[#allocation149_spill] sm:$0xff] %v8954_v62  ;;  %v216_v32 = vld [vmem:[%s12405_s1 + $0x38] sm:$0xff] }
  0xa0   :  { %1022 = vmatmul.mubr.f32.gmra.mxu0 %v1021_v55  ;;  %v1050_v2 = vsub.f32 %v8889_v56, %v13284_v27  ;;  %2511 = vmatpush2.msra.mxu1 %v13285_v26  ;;  %v1045_v50 = vand.u32 4294901760, %v1044_v48  ;;  %v13286_v55 = vand.u32 4294901760, %v8902_v45  ;;  %v8952_v27 = vsub.f32 %v105_v44, %v8928_v58  ;;  %v107_v56 = vld [vmem:[#allocation2 + $0x270] sm:$0xff]  ;;  %v110_v48 = vld [vmem:[#allocation2 + $0x288] sm:$0xff] }
  0xa1   :  { %1740 = vmatmul.mubr.f32.gmra.mxu1 %v8763_v61  ;;  %1031 = vmatprep.mubr.f32.mxu0 %v1030_v22  ;;  %v111_v22 = vld [vmem:[#allocation2 + $0x290] sm:$0xff]  ;;  %v13291_v61 = vand.u32 4294901760, %v8917_v49  ;;  %v13292_v26 = vand.u32 4294901760, %v8921_v7 }
  0xa2   :  { %v1059_v8 = vsub.f32 %v8902_v45, %v13286_v55  ;;  %13287 = vst [vmem:[#allocation148_spill] sm:$0xff] %v8952_v27  ;;  %1745 = vmatprep.mubr.f32.mxu1 %v8773_v51  ;;  %1994 = vmatpush2.msra.mxu0 %v13289_v36  ;;  %v8963_v55 = vsub.f32 %v104_v31, %v8936_v42  ;;  %v1051_v44 = vand.u32 4294901760, %v1050_v2  ;;  %v8972_v36 = vand.u32 4294901760, %v107_v56  ;;  %v217_v31 = vld [vmem:[%s12405_s1 + $0x40] sm:$0xff]  ;;  %v13299_v2 = vld [vmem:[#allocation21_spill] sm:$0xff] }
  0xa3   :  { %286 = vperm.xlu0 %7820, %v215_v24   ;;  %1995 = vmatprep.subr.mxu0 %v13113_v1  ;;  %v1065_v45 = vsub.f32 %v8917_v49, %v13291_v61  ;;  %v1074_v51 = vsub.f32 %v8921_v7, %v13292_v26  ;;  %v8980_v24 = vsub.f32 %v108_v41, %v8954_v62  ;;  %v8982_v61 = vand.u32 4294901760, %v111_v22  ;;  %v114_v26 = vld [vmem:[#allocation2 + $0x2a8] sm:$0xff] }
  0xa4   :  { %13290 = vst [vmem:[#allocation150_spill] sm:$0xff] %v8963_v55  ;;  %1037 = vmatmul.mubr.f32.gmra.mxu0 %v1036_v39  ;;  %291 = vperm.xlu1 %7821, %v216_v32   ;;  %13293 = vst [vmem:[#allocation151_spill] sm:$0xff] %v8972_v36  ;;  %v1060_v39 = vand.u32 4294901760, %v1059_v8  ;;  %v13296_v32 = vld [vmem:[#allocation26_spill] sm:$0xff]  ;;  %v13297_v7 = vand.u32 4294901760, %v8932_v63  ;;  %v8992_v8 = vsub.f32 %v107_v56, %v8972_v36  ;;  %v113_v56 = vld [vmem:[#allocation2 + $0x2a0] sm:$0xff] }
  0xa5   :  { %1747 = vmatmul.mubr.f32.gmra.mxu1 %v8781_v40  ;;  %1046 = vmatprep.mubr.f32.mxu0 %v1045_v50  ;;  %13294 = vst [vmem:[#allocation152_spill] sm:$0xff] %v8980_v24  ;;  %13295 = vst [vmem:[#allocation153_spill] sm:$0xff] %v8982_v61  ;;  %v1066_v41 = vand.u32 4294901760, %v1065_v45  ;;  %v8995_v40 = vand.u32 4294901760, %v110_v48  ;;  %v13302_v50 = vand.u32 4294901760, %v8952_v27  ;;  %v9005_v45 = vsub.f32 %v111_v22, %v8982_v61  ;;  %v218_v22 = vld [vmem:[%s12405_s1 + $0x48] sm:$0xff] }
  0xa6   :  { %1752 = vmatprep.mubr.f32.mxu1 %v8790_v57  ;;  %1998 = vmatpush2.msra.mxu0 %v13296_v32  ;;  %v1080_v49 = vsub.f32 %v8932_v63, %v13297_v7  ;;  %13298 = vst [vmem:[#allocation154_spill] sm:$0xff] %v8992_v8  ;;  %v8997_v57 = vand.u32 4294901760, %v114_v26  ;;  %v1075_v7 = vand.u32 4294901760, %v1074_v51 }
  0xa7   :  { %2512 = vmatprep.subr.mxu1 %v13113_v1  ;;  %296 = vperm.xlu0 %7820, %v217_v31   ;;  %13300 = vst [vmem:[#allocation155_spill] sm:$0xff] %v8995_v40  ;;  %v1089_v63 = vsub.f32 %v8952_v27, %v13302_v50  ;;  %13303 = vst [vmem:[#allocation157_spill] sm:$0xff] %v9005_v45  ;;  %v117_v31 = vld [vmem:[#allocation2 + $0x2c0] sm:$0xff] }
  0xa8   :  { %1052 = vmatmul.mubr.f32.gmra.mxu0 %v1051_v44  ;;  %2514 = vmatpush2.msra.mxu1 %v13299_v2  ;;  %13301 = vst [vmem:[#allocation156_spill] sm:$0xff] %v8997_v57  ;;  %v1081_v2 = vand.u32 4294901760, %v1080_v49  ;;  %v9019_v44 = vsub.f32 %v110_v48, %v8995_v40  ;;  %v9022_v49 = vsub.f32 %v114_v26, %v8997_v57  ;;  %v9032_v48 = vand.u32 4294901760, %v117_v31  ;;  %v219_v26 = vld [vmem:[%s12405_s1 + $0x50] sm:$0xff] }
  0xa9   :  { %1754 = vmatmul.mubr.f32.gmra.mxu1 %v8809_v3  ;;  %1061 = vmatprep.mubr.f32.mxu0 %v1060_v39  ;;  %v13304_v3 = vand.u32 4294901760, %v8963_v55  ;;  %v13305_v39 = vld [vmem:[#allocation28_spill] sm:$0xff]  ;;  %v1090_v27 = vand.u32 4294901760, %v1089_v63 }
  0xaa   :  { %1759 = vmatprep.mubr.f32.mxu1 %v8825_v0  ;;  %1999 = vmatprep.subr.mxu0 %v13113_v1  ;;  %13306 = vst [vmem:[#allocation158_spill] sm:$0xff] %v9019_v44  ;;  %13307 = vst [vmem:[#allocation159_spill] sm:$0xff] %v9022_v49  ;;  %v13308_v0 = vld [vmem:[#allocation23_spill] sm:$0xff]  ;;  %v12711_v50 = vand.u32 4294901760, %v9019_v44  ;;  %v9055_v17 = vsub.f32 %v117_v31, %v9032_v48 }
  0xab   :  { %v1095_v51 = vsub.f32 %v8963_v55, %v13304_v3  ;;  %2002 = vmatpush2.msra.mxu0 %v13305_v39  ;;  %2515 = vmatprep.subr.mxu1 %v13113_v1  ;;  %v9025_v3 = vand.u32 4294901760, %v113_v56  ;;  %v116_v55 = vld [vmem:[#allocation2 + $0x2b8] sm:$0xff]  ;;  %v13310_v39 = vand.u32 4294901760, %v8980_v24  ;;  %13311 = vst [vmem:[#allocation161_spill] sm:$0xff] %v9032_v48 }
  0xac   :  { %1067 = vmatmul.mubr.f32.gmra.mxu0 %v1066_v41  ;;  %2517 = vmatpush2.msra.mxu1 %v13308_v0  ;;  %v120_v0 = vld [vmem:[#allocation2 + $0x2d8] sm:$0xff]  ;;  %v9040_v63 = vand.u32 4294901760, %v116_v55  ;;  %13316 = vst [vmem:[#allocation164_spill] sm:$0xff] %v9055_v17 }
  0xad   :  { %13309 = vst [vmem:[#allocation160_spill] sm:$0xff] %v9025_v3  ;;  %1761 = vmatmul.mubr.f32.gmra.mxu1 %v8841_v33  ;;  %1076 = vmatprep.mubr.f32.mxu0 %v1075_v7  ;;  %v1104_v41 = vsub.f32 %v8980_v24, %v13310_v39  ;;  %v1096_v32 = vand.u32 4294901760, %v1095_v51  ;;  %v13313_v7 = vand.u32 4294901760, %v8992_v8  ;;  %v119_v51 = vld [vmem:[#allocation2 + $0x2d0] sm:$0xff]  ;;  %v13315_v24 = vand.u32 4294901760, %v9005_v45 }
  0xae   :  { %1766 = vmatprep.mubr.f32.mxu1 %v8850_v6  ;;  %301 = vperm.xlu1 %7821, %v218_v22   ;;  %13312 = vst [vmem:[#allocation162_spill] sm:$0xff] %v9040_v63  ;;  %v9048_v6 = vsub.f32 %v113_v56, %v9025_v3  ;;  %v220_v56 = vld [vmem:[%s12405_s1 + $0x58] sm:$0xff]  ;;  %v123_v33 = vld [vmem:[#allocation2 + $0x2f0] sm:$0xff] }
  0xaf   :  { %2003 = vmatprep.subr.mxu0 %v13113_v1  ;;  %2518 = vmatprep.subr.mxu1 %v13113_v1  ;;  %v1110_v39 = vsub.f32 %v8992_v8, %v13313_v7  ;;  %v1105_v22 = vand.u32 4294901760, %v1104_v41  ;;  %v9057_v7 = vand.u32 4294901760, %v120_v0  ;;  %v13320_v41 = vld [vmem:[#allocation25_spill] sm:$0xff]  ;;  %v13331_v8 = vand.u32 4294901760, %v9055_v17 }
  0xb0   :  { %1082 = vmatmul.mubr.f32.gmra.mxu0 %v1081_v2  ;;  %13314 = vst [vmem:[#allocation163_spill] sm:$0xff] %v9048_v6  ;;  %306 = vperm.xlu0 %7820, %v219_v26   ;;  %v1119_v2 = vsub.f32 %v9005_v45, %v13315_v24  ;;  %v13318_v26 = vld [vmem:[#allocation29_spill] sm:$0xff]  ;;  %v9069_v24 = vand.u32 4294901760, %v119_v51 }
  0xb1   :  { %1768 = vmatmul.mubr.f32.gmra.mxu1 %v8869_v14  ;;  %1091 = vmatprep.mubr.f32.mxu0 %v1090_v27  ;;  %13317 = vst [vmem:[#allocation165_spill] sm:$0xff] %v9057_v7  ;;  %v9065_v27 = vsub.f32 %v116_v55, %v9040_v63  ;;  %v1111_v31 = vand.u32 4294901760, %v1110_v39  ;;  %v1125_v14 = vsub.f32 %v9019_v44, %v12711_v50  ;;  %v221_v55 = vld [vmem:[%s12405_s1 + $0x60] sm:$0xff]  ;;  %v9086_v50 = vand.u32 4294901760, %v123_v33  ;;  %v122_v44 = vld [vmem:[#allocation2 + $0x2e8] sm:$0xff]  ;;  %v13328_v39 = vld [vmem:[#allocation27_spill] sm:$0xff] }
  0xb2   :  { %1773 = vmatprep.mubr.f32.mxu1 %v8876_v37  ;;  %2006 = vmatpush2.msra.mxu0 %v13318_v26  ;;  %13321 = vst [vmem:[#allocation167_spill] sm:$0xff] %v9069_v24  ;;  %v13322_v37 = vand.u32 4294901760, %v9022_v49 }
  0xb3   :  { %13319 = vst [vmem:[#allocation166_spill] sm:$0xff] %v9065_v27  ;;  %2520 = vmatpush2.msra.mxu1 %v13320_v41  ;;  %2007 = vmatprep.subr.mxu0 %v13113_v1  ;;  %v9084_v41 = vsub.f32 %v120_v0, %v9057_v7  ;;  %13324 = vst [vmem:[#allocation169_spill] sm:$0xff] %v9086_v50  ;;  %v13327_v0 = vand.u32 4294901760, %v9048_v6 }
  0xb4   :  { %1097 = vmatmul.mubr.f32.gmra.mxu0 %v1096_v32  ;;  %v1134_v45 = vsub.f32 %v9022_v49, %v13322_v37  ;;  %311 = vperm.xlu1 %7821, %v220_v56   ;;  %v1120_v32 = vand.u32 4294901760, %v1119_v2  ;;  %v126_v37 = vld [vmem:[#allocation2 + $0x308] sm:$0xff]  ;;  %v13325_v56 = vld [vmem:[#allocation32_spill] sm:$0xff]  ;;  %v9092_v49 = vsub.f32 %v119_v51, %v9069_v24 }
  0xb5   :  { %1775 = vmatmul.mubr.f32.gmra.mxu1 %v8892_v52  ;;  %1106 = vmatprep.mubr.f32.mxu0 %v1105_v22  ;;  %13323 = vst [vmem:[#allocation168_spill] sm:$0xff] %v9084_v41  ;;  %v1126_v22 = vand.u32 4294901760, %v1125_v14  ;;  %v1140_v2 = vsub.f32 %v9048_v6, %v13327_v0  ;;  %v9099_v52 = vand.u32 4294901760, %v122_v44  ;;  %v222_v0 = vld [vmem:[%s12405_s1 + $0x68] sm:$0xff]  ;;  %v125_v6 = vld [vmem:[#allocation2 + $0x300] sm:$0xff]  ;;  %v13334_v14 = vld [vmem:[#allocation34_spill] sm:$0xff] }
  0xb6   :  { %1780 = vmatprep.mubr.f32.mxu1 %v8894_v19  ;;  %2010 = vmatpush2.msra.mxu0 %v13325_v56  ;;  %13326 = vst [vmem:[#allocation170_spill] sm:$0xff] %v9092_v49  ;;  %v9101_v19 = vand.u32 4294901760, %v126_v37  ;;  %v1135_v51 = vand.u32 4294901760, %v1134_v45  ;;  %v13333_v45 = vand.u32 4294901760, %v9065_v27  ;;  %v13341_v26 = vand.u32 4294901760, %v9092_v49 }
  0xb7   :  { %2521 = vmatprep.subr.mxu1 %v13113_v1  ;;  %316 = vperm.xlu0 %7820, %v221_v55   ;;  %13329 = vst [vmem:[#allocation171_spill] sm:$0xff] %v9099_v52  ;;  %v1149_v55 = vsub.f32 %v9055_v17, %v13331_v8  ;;  %v9123_v17 = vsub.f32 %v122_v44, %v9099_v52 }
  0xb8   :  { %1112 = vmatmul.mubr.f32.gmra.mxu0 %v1111_v31  ;;  %2523 = vmatpush2.msra.mxu1 %v13328_v39  ;;  %13330 = vst [vmem:[#allocation172_spill] sm:$0xff] %v9101_v19  ;;  %v9109_v31 = vsub.f32 %v123_v33, %v9086_v50  ;;  %v1141_v33 = vand.u32 4294901760, %v1140_v2  ;;  %v9128_v39 = vand.u32 4294901760, %v125_v6 }
  0xb9   :  { %1782 = vmatmul.mubr.f32.gmra.mxu1 %v8910_v53  ;;  %1121 = vmatprep.mubr.f32.mxu0 %v1120_v32  ;;  %v129_v32 = vld [vmem:[#allocation2 + $0x320] sm:$0xff]  ;;  %v1155_v53 = vsub.f32 %v9065_v27, %v13333_v45  ;;  %13335 = vst [vmem:[#allocation174_spill] sm:$0xff] %v9123_v17  ;;  %v223_v45 = vld [vmem:[%s12405_s1 + $0x70] sm:$0xff]  ;;  %v1150_v8 = vand.u32 4294901760, %v1149_v55 }
  0xba   :  { %13332 = vst [vmem:[#allocation173_spill] sm:$0xff] %v9109_v31  ;;  %1787 = vmatprep.mubr.f32.mxu1 %v8928_v58  ;;  %2011 = vmatprep.subr.mxu0 %v13113_v1  ;;  %v9126_v58 = vsub.f32 %v126_v37, %v9101_v19  ;;  %13337 = vst [vmem:[#allocation176_spill] sm:$0xff] %v9128_v39  ;;  %v9138_v27 = vand.u32 4294901760, %v129_v32  ;;  %v128_v37 = vld [vmem:[#allocation2 + $0x318] sm:$0xff]  ;;  %v9149_v44 = vsub.f32 %v125_v6, %v9128_v39 }
  0xbb   :  { %2014 = vmatpush2.msra.mxu0 %v13334_v14  ;;  %2524 = vmatprep.subr.mxu1 %v13113_v1  ;;  %v132_v14 = vld [vmem:[#allocation2 + $0x338] sm:$0xff]  ;;  %v1156_v56 = vand.u32 4294901760, %v1155_v53 }
  0xbc   :  { %1127 = vmatmul.mubr.f32.gmra.mxu0 %v1126_v22  ;;  %13336 = vst [vmem:[#allocation175_spill] sm:$0xff] %v9126_v58  ;;  %321 = vperm.xlu1 %7821, %v222_v0   ;;  %v13338_v22 = vand.u32 4294901760, %v9084_v41  ;;  %13339 = vst [vmem:[#allocation177_spill] sm:$0xff] %v9138_v27  ;;  %v13340_v0 = vld [vmem:[#allocation30_spill] sm:$0xff]  ;;  %v224_v53 = vld [vmem:[%s12405_s1 + $0x78] sm:$0xff]  ;;  %v9162_v6 = vsub.f32 %v129_v32, %v9138_v27  ;;  %v9164_v55 = vand.u32 4294901760, %v132_v14 }
  0xbd   :  { %1789 = vmatmul.mubr.f32.gmra.mxu1 %v8936_v42  ;;  %1136 = vmatprep.mubr.f32.mxu0 %v1135_v51  ;;  %v1170_v51 = vsub.f32 %v9092_v49, %v13341_v26  ;;  %13342 = vst [vmem:[#allocation178_spill] sm:$0xff] %v9149_v44  ;;  %v131_v26 = vld [vmem:[#allocation2 + $0x330] sm:$0xff]  ;;  %v13347_v42 = vld [vmem:[#allocation35_spill] sm:$0xff]  ;;  %v13351_v32 = vand.u32 4294901760, %v9126_v58 }
  0xbe   :  { %v1164_v2 = vsub.f32 %v9084_v41, %v13338_v22  ;;  %1794 = vmatprep.mubr.f32.mxu1 %v8954_v62  ;;  %2526 = vmatpush2.msra.mxu1 %v13340_v0  ;;  %v9151_v62 = vand.u32 4294901760, %v128_v37  ;;  %13345 = vst [vmem:[#allocation180_spill] sm:$0xff] %v9162_v6  ;;  %13346 = vst [vmem:[#allocation181_spill] sm:$0xff] %v9164_v55  ;;  %v135_v49 = vld [vmem:[#allocation2 + $0x350] sm:$0xff]  ;;  %v13348_v0 = vld [vmem:[#allocation31_spill] sm:$0xff] }
  0xbf   :  { %2015 = vmatprep.subr.mxu0 %v13113_v1  ;;  %326 = vperm.xlu0 %7820, %v223_v45   ;;  %v13344_v45 = vand.u32 4294901760, %v9109_v31  ;;  %v1171_v41 = vand.u32 4294901760, %v1170_v51  ;;  %v225_v51 = vld [vmem:[%s12405_s1 + $0x80] sm:$0xff] }
  0xc0   :  { %1142 = vmatmul.mubr.f32.gmra.mxu0 %v1141_v33  ;;  %13343 = vst [vmem:[#allocation179_spill] sm:$0xff] %v9151_v62  ;;  %2527 = vmatprep.subr.mxu1 %v13113_v1  ;;  %v1165_v33 = vand.u32 4294901760, %v1164_v2  ;;  %v13350_v2 = vand.u32 4294901760, %v9123_v17 }
  0xc1   :  { %1796 = vmatmul.mubr.f32.gmra.mxu1 %v8972_v36  ;;  %1151 = vmatprep.mubr.f32.mxu0 %v1150_v8  ;;  %v1179_v22 = vsub.f32 %v9109_v31, %v13344_v45  ;;  %v9169_v8 = vand.u32 4294901760, %v131_v26  ;;  %v1194_v36 = vsub.f32 %v9126_v58, %v13351_v32  ;;  %v9179_v31 = vsub.f32 %v128_v37, %v9151_v62  ;;  %v138_v37 = vld [vmem:[#allocation2 + $0x368] sm:$0xff]  ;;  %v13355_v58 = vld [vmem:[#allocation39_spill] sm:$0xff] }
  0xc2   :  { %1801 = vmatprep.mubr.f32.mxu1 %v8982_v61  ;;  %2018 = vmatpush2.msra.mxu0 %v13347_v42  ;;  %v1185_v45 = vsub.f32 %v9123_v17, %v13350_v2  ;;  %v9188_v32 = vsub.f32 %v132_v14, %v9164_v55  ;;  %v9190_v61 = vand.u32 4294901760, %v135_v49  ;;  %v13358_v14 = vand.u32 4294901760, %v9149_v44 }
  0xc3   :  { %2529 = vmatpush2.msra.mxu1 %v13348_v0  ;;  %331 = vperm.xlu1 %7821, %v224_v53   ;;  %13349 = vst [vmem:[#allocation35_spill] sm:$0xff] %v9169_v8  ;;  %13352 = vst [vmem:[#allocation182_spill] sm:$0xff] %v9179_v31  ;;  %v1180_v53 = vand.u32 4294901760, %v1179_v22  ;;  %v9195_v17 = vsub.f32 %v131_v26, %v9169_v8  ;;  %v13359_v0 = vld [vmem:[#allocation33_spill] sm:$0xff]  ;;  %v1195_v26 = vand.u32 4294901760, %v1194_v36 }
  0xc4   :  { %1157 = vmatmul.mubr.f32.gmra.mxu0 %v1156_v56  ;;  %2019 = vmatprep.subr.mxu0 %v13113_v1  ;;  %v134_v56 = vld [vmem:[#allocation2 + $0x348] sm:$0xff]  ;;  %13353 = vst [vmem:[#allocation183_spill] sm:$0xff] %v9188_v32  ;;  %13354 = vst [vmem:[#allocation184_spill] sm:$0xff] %v9190_v61  ;;  %v1186_v22 = vand.u32 4294901760, %v1185_v45  ;;  %v1200_v2 = vsub.f32 %v9149_v44, %v13358_v14  ;;  %v9213_v45 = vsub.f32 %v135_v49, %v9190_v61 }
  0xc5   :  { %1803 = vmatmul.mubr.f32.gmra.mxu1 %v8995_v40  ;;  %1166 = vmatprep.mubr.f32.mxu0 %v1165_v33  ;;  %13356 = vst [vmem:[#allocation185_spill] sm:$0xff] %v9195_v17  ;;  %v9198_v33 = vand.u32 4294901760, %v134_v56  ;;  %v226_v14 = vld [vmem:[%s12405_s1 + $0x88] sm:$0xff]  ;;  %v137_v40 = vld [vmem:[#allocation2 + $0x360] sm:$0xff] }
  0xc6   :  { %1808 = vmatprep.mubr.f32.mxu1 %v8997_v57  ;;  %2022 = vmatpush2.msra.mxu0 %v13355_v58  ;;  %v9205_v57 = vand.u32 4294901760, %v138_v37  ;;  %13362 = vst [vmem:[#allocation188_spill] sm:$0xff] %v9213_v45  ;;  %v1201_v49 = vand.u32 4294901760, %v1200_v2  ;;  %v9232_v44 = vand.u32 4294901760, %v137_v40  ;;  %v13368_v2 = vand.u32 4294901760, %v9188_v32 }
  0xc7   :  { %2530 = vmatprep.subr.mxu1 %v13113_v1  ;;  %336 = vperm.xlu0 %7820, %v225_v51   ;;  %13357 = vst [vmem:[#allocation186_spill] sm:$0xff] %v9198_v33  ;;  %v13361_v51 = vand.u32 4294901760, %v9162_v6 }
  0xc8   :  { %1172 = vmatmul.mubr.f32.gmra.mxu0 %v1171_v41  ;;  %2532 = vmatpush2.msra.mxu1 %v13359_v0  ;;  %13360 = vst [vmem:[#allocation187_spill] sm:$0xff] %v9205_v57  ;;  %v13365_v41 = vand.u32 4294901760, %v9179_v31  ;;  %13367 = vst [vmem:[#allocation191_spill] sm:$0xff] %v9232_v44  ;;  %v13371_v0 = vand.u32 4294901760, %v9195_v17 }
  0xc9   :  { %1810 = vmatmul.mubr.f32.gmra.mxu1 %v9025_v3  ;;  %1181 = vmatprep.mubr.f32.mxu0 %v1180_v53  ;;  %v1209_v58 = vsub.f32 %v9162_v6, %v13361_v51  ;;  %v141_v53 = vld [vmem:[#allocation2 + $0x380] sm:$0xff]  ;;  %v9222_v3 = vsub.f32 %v134_v56, %v9198_v33  ;;  %v13364_v51 = vld [vmem:[#allocation41_spill] sm:$0xff]  ;;  %v227_v56 = vld [vmem:[%s12405_s1 + $0x90] sm:$0xff] }
  0xca   :  { %1815 = vmatprep.mubr.f32.mxu1 %v9032_v48  ;;  %2023 = vmatprep.subr.mxu0 %v13113_v1  ;;  %v1215_v6 = vsub.f32 %v9179_v31, %v13365_v41  ;;  %v9230_v48 = vsub.f32 %v138_v37, %v9205_v57  ;;  %v9242_v31 = vand.u32 4294901760, %v141_v53  ;;  %v140_v37 = vld [vmem:[#allocation2 + $0x378] sm:$0xff]  ;;  %v9253_v41 = vsub.f32 %v137_v40, %v9232_v44 }
  0xcb   :  { %13363 = vst [vmem:[#allocation189_spill] sm:$0xff] %v9222_v3  ;;  %2026 = vmatpush2.msra.mxu0 %v13364_v51  ;;  %2533 = vmatprep.subr.mxu1 %v13113_v1  ;;  %v1210_v36 = vand.u32 4294901760, %v1209_v58  ;;  %v144_v51 = vld [vmem:[#allocation2 + $0x398] sm:$0xff] }
  0xcc   :  { %1187 = vmatmul.mubr.f32.gmra.mxu0 %v1186_v22  ;;  %13366 = vst [vmem:[#allocation190_spill] sm:$0xff] %v9230_v48  ;;  %341 = vperm.xlu1 %7821, %v226_v14   ;;  %v1224_v22 = vsub.f32 %v9188_v32, %v13368_v2  ;;  %13369 = vst [vmem:[#allocation192_spill] sm:$0xff] %v9242_v31  ;;  %v13370_v14 = vld [vmem:[#allocation36_spill] sm:$0xff]  ;;  %v9268_v40 = vand.u32 4294901760, %v144_v51  ;;  %v143_v2 = vld [vmem:[#allocation2 + $0x390] sm:$0xff] }
  0xcd   :  { %1817 = vmatmul.mubr.f32.gmra.mxu1 %v9040_v63  ;;  %1196 = vmatprep.mubr.f32.mxu0 %v1195_v26  ;;  %v1230_v63 = vsub.f32 %v9195_v17, %v13371_v0  ;;  %v1216_v26 = vand.u32 4294901760, %v1215_v6  ;;  %13372 = vst [vmem:[#allocation193_spill] sm:$0xff] %v9253_v41  ;;  %v228_v0 = vld [vmem:[%s12405_s1 + $0x98] sm:$0xff]  ;;  %v147_v32 = vld [vmem:[#allocation2 + $0x3b0] sm:$0xff] }
  0xce   :  { %1822 = vmatprep.mubr.f32.mxu1 %v9057_v7  ;;  %2535 = vmatpush2.msra.mxu1 %v13370_v14  ;;  %v9255_v7 = vand.u32 4294901760, %v140_v37  ;;  %v1225_v58 = vand.u32 4294901760, %v1224_v22  ;;  %13376 = vst [vmem:[#allocation196_spill] sm:$0xff] %v9268_v40  ;;  %v13377_v17 = vld [vmem:[#allocation43_spill] sm:$0xff]  ;;  %v13379_v22 = vld [vmem:[#allocation37_spill] sm:$0xff] }
  0xcf   :  { %2027 = vmatprep.subr.mxu0 %v13113_v1  ;;  %346 = vperm.xlu0 %7820, %v227_v56   ;;  %v9266_v56 = vsub.f32 %v141_v53, %v9242_v31  ;;  %v1231_v14 = vand.u32 4294901760, %v1230_v63  ;;  %v13380_v53 = vand.u32 4294901760, %v9230_v48  ;;  %v229_v63 = vld [vmem:[%s12405_s1 + $0xa0] sm:$0xff] }
  0xd0   :  { %1202 = vmatmul.mubr.f32.gmra.mxu0 %v1201_v49  ;;  %13373 = vst [vmem:[#allocation194_spill] sm:$0xff] %v9255_v7  ;;  %2536 = vmatprep.subr.mxu1 %v13113_v1  ;;  %v13374_v49 = vand.u32 4294901760, %v9213_v45 }
  0xd1   :  { %1824 = vmatmul.mubr.f32.gmra.mxu1 %v9069_v24  ;;  %1211 = vmatprep.mubr.f32.mxu0 %v1210_v36  ;;  %13375 = vst [vmem:[#allocation195_spill] sm:$0xff] %v9266_v56  ;;  %v13378_v24 = vand.u32 4294901760, %v9222_v3 }
  0xd2   :  { %v1239_v6 = vsub.f32 %v9213_v45, %v13374_v49  ;;  %1829 = vmatprep.mubr.f32.mxu1 %v9086_v50  ;;  %2030 = vmatpush2.msra.mxu0 %v13377_v17  ;;  %v1254_v49 = vsub.f32 %v9230_v48, %v13380_v53  ;;  %v9281_v50 = vsub.f32 %v140_v37, %v9255_v7  ;;  %v9283_v17 = vand.u32 4294901760, %v143_v2  ;;  %v150_v45 = vld [vmem:[#allocation2 + $0x3c8] sm:$0xff]  ;;  %v13385_v48 = vld [vmem:[#allocation44_spill] sm:$0xff] }
  0xd3   :  { %v1245_v36 = vsub.f32 %v9222_v3, %v13378_v24  ;;  %2538 = vmatpush2.msra.mxu1 %v13379_v22  ;;  %351 = vperm.xlu1 %7821, %v228_v0   ;;  %v146_v24 = vld [vmem:[#allocation2 + $0x3a8] sm:$0xff]  ;;  %v9292_v53 = vsub.f32 %v144_v51, %v9268_v40  ;;  %v9294_v37 = vand.u32 4294901760, %v147_v32 }
  0xd4   :  { %1217 = vmatmul.mubr.f32.gmra.mxu0 %v1216_v26  ;;  %13381 = vst [vmem:[#allocation197_spill] sm:$0xff] %v9281_v50  ;;  %13382 = vst [vmem:[#allocation198_spill] sm:$0xff] %v9283_v17  ;;  %2031 = vmatprep.subr.mxu0 %v13113_v1  ;;  %v1240_v26 = vand.u32 4294901760, %v1239_v6  ;;  %v9299_v22 = vand.u32 4294901760, %v146_v24  ;;  %v9306_v0 = vsub.f32 %v143_v2, %v9283_v17 }
  0xd5   :  { %1831 = vmatmul.mubr.f32.gmra.mxu1 %v9099_v52  ;;  %1226 = vmatprep.mubr.f32.mxu0 %v1225_v58  ;;  %13383 = vst [vmem:[#allocation199_spill] sm:$0xff] %v9292_v53  ;;  %13384 = vst [vmem:[#allocation200_spill] sm:$0xff] %v9294_v37  ;;  %v1246_v3 = vand.u32 4294901760, %v1245_v36  ;;  %v13387_v58 = vand.u32 4294901760, %v9253_v41  ;;  %v13389_v52 = vld [vmem:[#allocation38_spill] sm:$0xff]  ;;  %v230_v36 = vld [vmem:[%s12405_s1 + $0xa8] sm:$0xff] }
  0xd6   :  { %1836 = vmatprep.mubr.f32.mxu1 %v9101_v19  ;;  %2034 = vmatpush2.msra.mxu0 %v13385_v48  ;;  %13386 = vst [vmem:[#allocation201_spill] sm:$0xff] %v9299_v22  ;;  %13388 = vst [vmem:[#allocation202_spill] sm:$0xff] %v9306_v0  ;;  %v9309_v19 = vand.u32 4294901760, %v150_v45  ;;  %v9325_v48 = vsub.f32 %v146_v24, %v9299_v22  ;;  %v231_v24 = vld [vmem:[%s12405_s1 + $0xb0] sm:$0xff] }
  0xd7   :  { %2539 = vmatprep.subr.mxu1 %v13113_v1  ;;  %356 = vperm.xlu0 %7820, %v229_v63   ;;  %v1260_v6 = vsub.f32 %v9253_v41, %v13387_v58  ;;  %v149_v63 = vld [vmem:[#allocation2 + $0x3c0] sm:$0xff]  ;;  %v13391_v58 = vand.u32 4294901760, %v9266_v56  ;;  %v9320_v41 = vsub.f32 %v147_v32, %v9294_v37 }
  0xd8   :  { %1232 = vmatmul.mubr.f32.gmra.mxu0 %v1231_v14  ;;  %2541 = vmatpush2.msra.mxu1 %v13389_v52  ;;  %13390 = vst [vmem:[#allocation203_spill] sm:$0xff] %v9309_v19  ;;  %v1255_v14 = vand.u32 4294901760, %v1254_v49  ;;  %v153_v52 = vld [vmem:[#allocation2 + $0x3e0] sm:$0xff]  ;;  %13393 = vst [vmem:[#allocation205_spill] sm:$0xff] %v9325_v48  ;;  %v9328_v49 = vand.u32 4294901760, %v149_v63 }
  0xd9   :  { %1838 = vmatmul.mubr.f32.gmra.mxu1 %v9128_v39  ;;  %1241 = vmatprep.mubr.f32.mxu0 %v1240_v26  ;;  %v1269_v51 = vsub.f32 %v9266_v56, %v13391_v58  ;;  %13392 = vst [vmem:[#allocation204_spill] sm:$0xff] %v9320_v41  ;;  %v13394_v39 = vld [vmem:[#allocation46_spill] sm:$0xff]  ;;  %v1261_v26 = vand.u32 4294901760, %v1260_v6  ;;  %v13396_v58 = vand.u32 4294901760, %v9281_v50  ;;  %v13398_v6 = vand.u32 4294901760, %v9292_v53  ;;  %v156_v56 = vld [vmem:[#allocation2 + $0x3f8] sm:$0xff] }
  0xda   :  { %1843 = vmatprep.mubr.f32.mxu1 %v9138_v27  ;;  %2035 = vmatprep.subr.mxu0 %v13113_v1  ;;  %13395 = vst [vmem:[#allocation206_spill] sm:$0xff] %v9328_v49  ;;  %v9335_v27 = vsub.f32 %v150_v45, %v9309_v19  ;;  %v9346_v2 = vand.u32 4294901760, %v153_v52  ;;  %v152_v45 = vld [vmem:[#allocation2 + $0x3d8] sm:$0xff] }
  0xdb   :  { %2038 = vmatpush2.msra.mxu0 %v13394_v39  ;;  %361 = vperm.xlu1 %7821, %v230_v36   ;;  %v1275_v32 = vsub.f32 %v9281_v50, %v13396_v58  ;;  %v1284_v36 = vsub.f32 %v9292_v53, %v13398_v6  ;;  %v13400_v50 = vld [vmem:[#allocation40_spill] sm:$0xff]  ;;  %v9372_v58 = vand.u32 4294901760, %v156_v56  ;;  %v155_v39 = vld [vmem:[#allocation2 + $0x3f0] sm:$0xff] }
  0xdc   :  { %1247 = vmatmul.mubr.f32.gmra.mxu0 %v1246_v3  ;;  %13397 = vst [vmem:[#allocation207_spill] sm:$0xff] %v9335_v27  ;;  %2542 = vmatprep.subr.mxu1 %v13113_v1  ;;  %v1270_v3 = vand.u32 4294901760, %v1269_v51  ;;  %13399 = vst [vmem:[#allocation208_spill] sm:$0xff] %v9346_v2  ;;  %v159_v53 = vld [vmem:[#allocation2 + $0x410] sm:$0xff] }
  0xdd   :  { %1845 = vmatmul.mubr.f32.gmra.mxu1 %v9151_v62  ;;  %1256 = vmatprep.mubr.f32.mxu0 %v1255_v14  ;;  %v9352_v62 = vsub.f32 %v149_v63, %v9328_v49  ;;  %v1276_v51 = vand.u32 4294901760, %v1275_v32  ;;  %v13402_v14 = vand.u32 4294901760, %v9306_v0  ;;  %v232_v63 = vld [vmem:[%s12405_s1 + $0xb8] sm:$0xff]  ;;  %13405 = vst [vmem:[#allocation211_spill] sm:$0xff] %v9372_v58 }
  0xde   :  { %1850 = vmatprep.mubr.f32.mxu1 %v9164_v55  ;;  %2544 = vmatpush2.msra.mxu1 %v13400_v50  ;;  %v9359_v55 = vand.u32 4294901760, %v152_v45  ;;  %v13407_v50 = vand.u32 4294901760, %v9325_v48 }
  0xdf   :  { %13401 = vst [vmem:[#allocation209_spill] sm:$0xff] %v9352_v62  ;;  %366 = vperm.xlu0 %7820, %v231_v24   ;;  %2039 = vmatprep.subr.mxu0 %v13113_v1  ;;  %v1290_v6 = vsub.f32 %v9306_v0, %v13402_v14  ;;  %v1285_v24 = vand.u32 4294901760, %v1284_v36  ;;  %v9370_v14 = vsub.f32 %v153_v52, %v9346_v2  ;;  %v13406_v0 = vld [vmem:[#allocation57_spill] sm:$0xff]  ;;  %v13412_v36 = vld [vmem:[#allocation58_spill] sm:$0xff] }
  0xe0   :  { %1262 = vmatmul.mubr.f32.gmra.mxu0 %v1261_v26  ;;  %13403 = vst [vmem:[#allocation210_spill] sm:$0xff] %v9359_v55  ;;  %2545 = vmatprep.subr.mxu1 %v13113_v1  ;;  %v13404_v26 = vand.u32 4294901760, %v9320_v41 }
  0xe1   :  { %1852 = vmatmul.mubr.f32.gmra.mxu1 %v9169_v8  ;;  %1271 = vmatprep.mubr.f32.mxu0 %v1270_v3  ;;  %v1305_v3 = vsub.f32 %v9325_v48, %v13407_v50  ;;  %v13408_v8 = vld [vmem:[#allocation48_spill] sm:$0xff]  ;;  %v1291_v52 = vand.u32 4294901760, %v1290_v6 }
  0xe2   :  { %v1299_v32 = vsub.f32 %v9320_v41, %v13404_v26  ;;  %1857 = vmatprep.mubr.f32.mxu1 %v9190_v61  ;;  %2042 = vmatpush2.msra.mxu0 %v13406_v0  ;;  %v13409_v26 = vand.u32 4294901760, %v9335_v27  ;;  %v9385_v61 = vsub.f32 %v152_v45, %v9359_v55  ;;  %v9387_v0 = vand.u32 4294901760, %v155_v39  ;;  %v233_v50 = vld [vmem:[%s12405_s1 + $0xc0] sm:$0xff]  ;;  %v158_v45 = vld [vmem:[#allocation2 + $0x408] sm:$0xff] }
  0xe3   :  { %2547 = vmatpush2.msra.mxu1 %v13408_v8  ;;  %371 = vperm.xlu1 %7821, %v232_v63   ;;  %v9396_v63 = vsub.f32 %v156_v56, %v9372_v58  ;;  %v1306_v48 = vand.u32 4294901760, %v1305_v3  ;;  %v13413_v8 = vand.u32 4294901760, %v9352_v62  ;;  %v9410_v6 = vand.u32 4294901760, %v158_v45  ;;  %v234_v3 = vld [vmem:[%s12405_s1 + $0xc8] sm:$0xff]  ;;  %v161_v56 = vld [vmem:[#allocation2 + $0x420] sm:$0xff] }
  0xe4   :  { %1277 = vmatmul.mubr.f32.gmra.mxu0 %v1276_v51  ;;  %v1314_v41 = vsub.f32 %v9335_v27, %v13409_v26  ;;  %13410 = vst [vmem:[#allocation212_spill] sm:$0xff] %v9387_v0  ;;  %2043 = vmatprep.subr.mxu0 %v13113_v1  ;;  %v1300_v51 = vand.u32 4294901760, %v1299_v32  ;;  %v9398_v26 = vand.u32 4294901760, %v159_v53  ;;  %v162_v27 = vld [vmem:[#allocation2 + $0x428] sm:$0xff]  ;;  %v9408_v32 = vsub.f32 %v155_v39, %v9387_v0 }
  0xe5   :  { %1859 = vmatmul.mubr.f32.gmra.mxu1 %v9198_v33  ;;  %1286 = vmatprep.mubr.f32.mxu0 %v1285_v24  ;;  %v1320_v33 = vsub.f32 %v9352_v62, %v13413_v8  ;;  %13414 = vst [vmem:[#allocation58_spill] sm:$0xff] %v9410_v6  ;;  %v13416_v8 = vand.u32 4294901760, %v9370_v14 }
  0xe6   :  { %13411 = vst [vmem:[#allocation213_spill] sm:$0xff] %v9398_v26  ;;  %1864 = vmatprep.mubr.f32.mxu1 %v9205_v57  ;;  %2046 = vmatpush2.msra.mxu0 %v13412_v36  ;;  %v1315_v24 = vand.u32 4294901760, %v1314_v41  ;;  %v13415_v57 = vld [vmem:[#allocation49_spill] sm:$0xff]  ;;  %v9422_v39 = vsub.f32 %v159_v53, %v9398_v26  ;;  %v9434_v53 = vsub.f32 %v158_v45, %v9410_v6  ;;  %v235_v45 = vld [vmem:[%s12405_s1 + $0xd0] sm:$0xff] }
  0xe7   :  { %376 = vperm.xlu0 %7820, %v233_v50   ;;  %2548 = vmatprep.subr.mxu1 %v13113_v1  ;;  %v1329_v41 = vsub.f32 %v9370_v14, %v13416_v8  ;;  %v9424_v50 = vand.u32 4294901760, %v162_v27  ;;  %v1321_v62 = vand.u32 4294901760, %v1320_v33 }
  0xe8   :  { %1292 = vmatmul.mubr.f32.gmra.mxu0 %v1291_v52  ;;  %2550 = vmatpush2.msra.mxu1 %v13415_v57  ;;  %v13421_v52 = vld [vmem:[#allocation55_spill] sm:$0xff] }
  0xe9   :  { %1866 = vmatmul.mubr.f32.gmra.mxu1 %v9232_v44  ;;  %1301 = vmatprep.mubr.f32.mxu0 %v1300_v51  ;;  %13417 = vst [vmem:[#allocation49_spill] sm:$0xff] %v9424_v50  ;;  %v13418_v51 = vand.u32 4294901760, %v9385_v61  ;;  %v9436_v44 = vand.u32 4294901760, %v161_v56  ;;  %v1330_v33 = vand.u32 4294901760, %v1329_v41  ;;  %v13422_v41 = vand.u32 4294901760, %v9408_v32 }
  0xea   :  { %1871 = vmatprep.mubr.f32.mxu1 %v9242_v31  ;;  %2047 = vmatprep.subr.mxu0 %v13113_v1 }
  0xeb   :  { %381 = vperm.xlu1 %7821, %v234_v3   ;;  %2050 = vmatpush2.msra.mxu0 %v8376_v23  ;;  %v1335_v8 = vsub.f32 %v9385_v61, %v13418_v51  ;;  %13419 = vst [vmem:[#allocation214_spill] sm:$0xff] %v9436_v44  ;;  %v13420_v3 = vand.u32 4294901760, %v9396_v63  ;;  %v9445_v51 = vsub.f32 %v162_v27, %v9424_v50  ;;  %v12828_v27 = vand.u32 4294901760, %v9434_v53 }
  0xec   :  { %1307 = vmatmul.mubr.f32.gmra.mxu0 %v1306_v48  ;;  %2551 = vmatprep.subr.mxu1 %v13113_v1  ;;  %v9459_v31 = vsub.f32 %v161_v56, %v9436_v44  ;;  %v13424_v56 = vld [vmem:[#allocation56_spill] sm:$0xff] }
  0xed   :  { %1873 = vmatmul.mubr.f32.gmra.mxu1 %v9255_v7  ;;  %1316 = vmatprep.mubr.f32.mxu0 %v1315_v24  ;;  %v1344_v48 = vsub.f32 %v9396_v63, %v13420_v3  ;;  %v1336_v24 = vand.u32 4294901760, %v1335_v8  ;;  %v1350_v3 = vsub.f32 %v9408_v32, %v13422_v41 }
  0xee   :  { %1878 = vmatprep.mubr.f32.mxu1 %v9268_v40  ;;  %2051 = vmatprep.subr.mxu0 %v13113_v1  ;;  %v236_v40 = vld [vmem:[%s12405_s1 + $0xd8] sm:$0xff] }
  0xef   :  { %2553 = vmatpush2.msra.mxu1 %v13421_v52  ;;  %2054 = vmatpush2.msra.mxu0 %v8383_v46  ;;  %v1345_v7 = vand.u32 4294901760, %v1344_v48  ;;  %v1365_v48 = vsub.f32 %v9434_v53, %v12828_v27 }
  0xf0   :  { %1322 = vmatmul.mubr.f32.gmra.mxu0 %v1321_v62  ;;  %386 = vperm.xlu0 %7820, %v235_v45   ;;  %v13423_v62 = vand.u32 4294901760, %v9422_v39  ;;  %v237_v45 = vld [vmem:[%s12405_s1 + $0xe0] sm:$0xff] }
  0xf1   :  { %1880 = vmatmul.mubr.f32.gmra.mxu1 %v9283_v17  ;;  %1331 = vmatprep.mubr.f32.mxu0 %v1330_v33  ;;  %v1351_v33 = vand.u32 4294901760, %v1350_v3  ;;  %v239_v3 = vld [vmem:[%s12405_s1 + $0xf0] sm:$0xff]  ;;  %v1366_v27 = vand.u32 4294901760, %v1365_v48  ;;  %v242_v48 = vld [vmem:[%s12405_s1 + $0x108] sm:$0xff] }
  0xf2   :  { %v1359_v8 = vsub.f32 %v9422_v39, %v13423_v62  ;;  %1885 = vmatprep.mubr.f32.mxu1 %v9294_v37  ;;  %2554 = vmatprep.subr.mxu1 %v13113_v1  ;;  %v12829_v62 = vand.u32 4294901760, %v9459_v31  ;;  %v13425_v37 = vand.u32 4294901760, %v9445_v51 }
  0xf3   :  { %391 = vperm.xlu1 %7821, %v236_v40   ;;  %2556 = vmatpush2.msra.mxu1 %v13424_v56  ;;  %v238_v40 = vld [vmem:[%s12405_s1 + $0xe8] sm:$0xff] }
  0xf4   :  { %1337 = vmatmul.mubr.f32.gmra.mxu0 %v1336_v24  ;;  %3053 = vmatprep.subr.mxu0 %v13113_v1  ;;  %v1360_v41 = vand.u32 4294901760, %v1359_v8  ;;  %v1374_v24 = vsub.f32 %v9445_v51, %v13425_v37  ;;  %v240_v37 = vld [vmem:[%s12405_s1 + $0xf8] sm:$0xff] }
  0xf5   :  { %1887 = vmatmul.mubr.f32.gmra.mxu1 %v9299_v22  ;;  %1346 = vmatprep.mubr.f32.mxu0 %v1345_v7  ;;  %v1380_v7 = vsub.f32 %v9459_v31, %v12829_v62 }
  0xf6   :  { %1892 = vmatprep.mubr.f32.mxu1 %v9309_v19  ;;  %396 = vperm.xlu0 %7820, %v237_v45   ;;  %v1375_v8 = vand.u32 4294901760, %v1374_v24  ;;  %v241_v45 = vld [vmem:[%s12405_s1 + $0x100] sm:$0xff]  ;;  %v13427_v24 = vld [vmem:[#allocation51_spill] sm:$0xff] }
  0xf7   :  { %3529 = vmatprep.subr.mxu1 %v13113_v1  ;;  %401 = vperm.xlu1 %7821, %v238_v40   ;;  %v13426_v40 = vld [vmem:[#allocation50_spill] sm:$0xff] }
  0xf8   :  { %1352 = vmatmul.mubr.f32.gmra.mxu0 %v1351_v33  ;;  %v1381_v33 = vand.u32 4294901760, %v1380_v7  ;;  %v13428_v7 = vld [vmem:[#allocation53_spill] sm:$0xff] }
  0xf9   :  { %1894 = vmatmul.mubr.f32.gmra.mxu1 %v9328_v49  ;;  %1361 = vmatprep.mubr.f32.mxu0 %v1360_v41  ;;  %v243_v41 = vld [vmem:[%s12405_s1 + $0x110] sm:$0xff] }
  0xfa   :  { %1899 = vmatprep.mubr.f32.mxu1 %v9346_v2  ;;  %406 = vperm.xlu0 %7820, %v239_v3   ;;  %v245_v3 = vld [vmem:[%s12405_s1 + $0x120] sm:$0xff] }
  0xfb   :  { %411 = vperm.xlu1 %7821, %v240_v37   ;;  %v246_v37 = vld [vmem:[%s12405_s1 + $0x128] sm:$0xff] }
  0xfc   :  { %1367 = vmatmul.mubr.f32.gmra.mxu0 %v1366_v27  ;;  %v244_v27 = vld [vmem:[%s12405_s1 + $0x118] sm:$0xff] }
  0xfd   :  { %1901 = vmatmul.mubr.f32.gmra.mxu1 %v9359_v55  ;;  %1376 = vmatprep.mubr.f32.mxu0 %v1375_v8  ;;  %v13429_v8 = vand.u32 4294901760, %v7938_v15  ;;  %v13432_v15 = vand.u32 4294901760, %v13426_v40 }
  0xfe   :  { %1906 = vmatprep.mubr.f32.mxu1 %v9372_v58  ;;  %416 = vperm.xlu0 %7820, %v241_v45   ;;  %v13430_v45 = vld [vmem:[#allocation59_spill] sm:$0xff] }
  0xff   :  { %421 = vperm.xlu1 %7821, %v242_v48   ;;  %v13431_v48 = vld [vmem:[#allocation61_spill] sm:$0xff] }
 0x100   :  { %1382 = vmatmul.mubr.f32.gmra.mxu0 %v1381_v33  ;;  %v247_v33 = vld [vmem:[%s12405_s1 + $0x130] sm:$0xff] }
 0x101   :  { %1908 = vmatmul.mubr.f32.gmra.mxu1 %v9387_v0  ;;  %2057 = vmatprep.mubr.f32.mxu0 %v13426_v40 }
 0x102   :  { %1913 = vmatprep.mubr.f32.mxu1 %v9398_v26  ;;  %426 = vperm.xlu0 %7820, %v243_v41   ;;  %v248_v41 = vld [vmem:[%s12405_s1 + $0x138] sm:$0xff] }
 0x103   :  { %431 = vperm.xlu1 %7821, %v244_v27   ;;  %v13433_v27 = vand.u32 4294901760, %v7941_v16  ;;  %v13437_v16 = vand.u32 4294901760, %v7946_v18 }
 0x104   :  { %2060 = vmatmul.mubr.f32.vlgmr.msra.gmra.mxu0 %v13427_v24 }
 0x105   :  { %1915 = vmatmul.mubr.f32.gmra.mxu1 %v9410_v6  ;;  %2066 = vmatprep.mubr.f32.mxu0 %v13428_v7 }
 0x106   :  { %1920 = vmatprep.mubr.f32.mxu1 %v9424_v50  ;;  %3057 = vmatpush1.msra.mxu0 %v13429_v8  ;;  %v13436_v8 = vand.u32 4294901760, %v13428_v7  ;;  %v13441_v7 = vand.u32 4294901760, %v13431_v48 }
 0x107   :  { %3058 = vmatprep.subr.mxu0 %v13113_v1  ;;  %436 = vperm.xlu0 %7820, %v245_v3   ;;  %v13434_v3 = vld [vmem:[#allocation63_spill] sm:$0xff] }
 0x108   :  { %2069 = vmatmul.mubr.f32.gmra.mxu0 %v13430_v45  ;;  %441 = vperm.xlu1 %7821, %v246_v37   ;;  %v13435_v37 = vand.u32 4294901760, %v13427_v24  ;;  %v13439_v24 = vand.u32 4294901760, %v13430_v45  ;;  %v13445_v45 = vld [vmem:[#allocation71_spill] sm:$0xff] }
 0x109   :  { %1922 = vmatmul.mubr.f32.gmra.mxu1 %v9436_v44  ;;  %2075 = vmatprep.mubr.f32.mxu0 %v13431_v48  ;;  %v13446_v48 = vand.u32 4294901760, %v8411_v13 }
 0x10a   :  { %2560 = vmatprep.mubr.f32.mxu1 %v13432_v15  ;;  %3062 = vmatpush1.msra.mxu0 %v13433_v27  ;;  %v257_v15 = vpop.permute.xlu0 %256  ;;  %v13442_v27 = vld [vmem:[#allocation8_spill] sm:$0xff] }
 0x10b   :  { %3063 = vmatprep.subr.mxu0 %v13113_v1  ;;  %446 = vperm.xlu0 %7820, %v247_v33   ;;  %v13438_v33 = vld [vmem:[#allocation68_spill] sm:$0xff] }
 0x10c   :  { %2078 = vmatmul.mubr.f32.gmra.mxu0 %v13434_v3  ;;  %451 = vperm.xlu1 %7821, %v248_v41   ;;  %v13440_v41 = vld [vmem:[#allocation69_spill] sm:$0xff] }
 0x10d   :  { %2564 = vmatmul.mubr.f32.vlgmr.msra.gmra.mxu1 %v13435_v37  ;;  %2084 = vmatprep.mubr.f32.mxu0 %v8411_v13  ;;  %v13443_v37 = vld [vmem:[#allocation70_spill] sm:$0xff] }
 0x10e   :  { %3531 = vmatpush1.msra.mxu1 %v7909_v4  ;;  %2571 = vmatprep.mubr.f32.mxu1 %v13436_v8  ;;  %v267_v13 = vpop.permute.xlu1 %266 }
 0x10f   :  { %3532 = vmatprep.subr.mxu1 %v13113_v1  ;;  %3067 = vmatpush1.msra.mxu0 %v13437_v16 }
 0x110   :  { %v723_v40 = vpop.f32.mrf.mxu0  ;;  %2087 = vmatmul.mubr.f32.gmra.mxu0 %v13438_v33  ;;  %3534 = vmatpush1.msra.mxu1 %v7911_v5  ;;  %v13444_v5 = vand.u32 4294901760, %v13434_v3 }
 0x111   :  { %2575 = vmatmul.mubr.f32.gmra.mxu1 %v13439_v24  ;;  %2093 = vmatprep.mubr.f32.mxu0 %v13440_v41  ;;  %v724_v16 = vadd.f32 %v723_v40, %v257_v15  ;;  %v13447_v24 = vand.u32 4294901760, %v7953_v20  ;;  %v13450_v40 = vld [vmem:[#allocation76_spill] sm:$0xff] }
 0x112   :  { %v725_v4 = vpop.f32.mrf.mxu0  ;;  %2582 = vmatprep.mubr.f32.mxu1 %v13441_v7  ;;  %3535 = vmatprep.subr.mxu1 %v13113_v1 }
 0x113   :  { %3537 = vmatpush1.msra.mxu1 %v13442_v27  ;;  %3068 = vmatprep.subr.mxu0 %v13113_v1  ;;  %v262_v4 = vpop.permute.xlu0 %261  ;;  %v13448_v27 = vld [vmem:[#allocation74_spill] sm:$0xff] }
 0x114   :  { %v738_v18 = vpop.f32.mrf.mxu0  ;;  %2096 = vmatmul.mubr.f32.gmra.mxu0 %v13443_v37  ;;  %3538 = vmatprep.subr.mxu1 %v13113_v1 }
 0x115   :  { %2586 = vmatmul.mubr.f32.gmra.mxu1 %v13444_v5  ;;  %2102 = vmatprep.mubr.f32.mxu0 %v13445_v45  ;;  %v13449_v5 = vand.u32 4294901760, %v13438_v33 }
 0x116   :  { %v740_v8 = vpop.f32.mrf.mxu0  ;;  %2593 = vmatprep.mubr.f32.mxu1 %v13446_v48  ;;  %3072 = vmatpush1.msra.mxu0 %v13447_v24  ;;  %v13452_v48 = vand.u32 4294901760, %v7956_v21 }
 0x117   :  { %3540 = vmatpush1.msra.mxu1 %v7924_v10  ;;  %3073 = vmatprep.subr.mxu0 %v13113_v1  ;;  %v739_v8 = vadd.f32 %v738_v18, %v262_v4  ;;  %v13451_v10 = vand.u32 4294901760, %v13440_v41  ;;  %v13454_v4 = vand.u32 4294901760, %v13445_v45  ;;  %v13458_v45 = vld [vmem:[#allocation82_spill] sm:$0xff] }
 0x118   :  { %v753_v7 = vpop.f32.mrf.mxu0  ;;  %2105 = vmatmul.mubr.f32.gmra.mxu0 %v13448_v27  ;;  %3541 = vmatprep.subr.mxu1 %v13113_v1 }
 0x119   :  { %v1615_v3 = vpop.f32.mrf.mxu1  ;;  %2597 = vmatmul.mubr.f32.gmra.mxu1 %v13449_v5  ;;  %2111 = vmatprep.mubr.f32.mxu0 %v13450_v40  ;;  %v754_v18 = vadd.f32 %v753_v7, %v267_v13  ;;  %v13457_v7 = vand.u32 4294901760, %v13448_v27 }
 0x11a   :  { %v9580_v15 = vadd.f32 %v1615_v3, %v724_v16  ;;  %v755_v20 = vpop.f32.mrf.mxu0  ;;  %2604 = vmatprep.mubr.f32.mxu1 %v13451_v10  ;;  %3077 = vmatpush1.msra.mxu0 %v13452_v48  ;;  %v13453_v3 = vand.u32 4294901760, %v13443_v37  ;;  %v13456_v10 = vld [vmem:[#allocation80_spill] sm:$0xff] }
 0x11b   :  { %v1617_v24 = vpop.f32.mrf.mxu1  ;;  %3543 = vmatpush1.msra.mxu1 %v7926_v11  ;;  %3078 = vmatprep.subr.mxu0 %v13113_v1  ;;  %v13455_v11 = vand.u32 4294901760, %v7973_v30  ;;  %v272_v20 = vpop.permute.xlu1 %271 }
 0x11c   :  { %v768_v33 = vpop.f32.mrf.mxu0  ;;  %2114 = vmatmul.mubr.f32.gmra.mxu0 %v8500_v59  ;;  %3544 = vmatprep.subr.mxu1 %v13113_v1  ;;  %v13459_v24 = vand.u32 4294901760, %v13450_v40  ;;  %v13464_v40 = vld [vmem:[#allocation87_spill] sm:$0xff] }
 0x11d   :  { %v1622_v16 = vpop.f32.mrf.mxu1  ;;  %2608 = vmatmul.mubr.f32.gmra.mxu1 %v13453_v3  ;;  %2120 = vmatprep.mubr.f32.mxu0 %v8508_v29  ;;  %v769_v48 = vadd.f32 %v768_v33, %v272_v20  ;;  %v277_v3 = vpop.permute.xlu0 %276  ;;  %v13463_v33 = vand.u32 4294901760, %v8500_v59  ;;  %v13465_v20 = vand.u32 4294901760, %v8508_v29 }
 0x11e   :  { %v9593_v41 = vadd.f32 %v1622_v16, %v739_v8  ;;  %v770_v21 = vpop.f32.mrf.mxu0  ;;  %2615 = vmatprep.mubr.f32.mxu1 %v13454_v4  ;;  %3082 = vmatpush1.msra.mxu0 %v13455_v11  ;;  %v13462_v4 = vld [vmem:[#allocation86_spill] sm:$0xff] }
 0x11f   :  { %v1624_v5 = vpop.f32.mrf.mxu1  ;;  %3546 = vmatpush1.msra.mxu1 %v7928_v12  ;;  %3083 = vmatprep.subr.mxu0 %v13113_v1  ;;  %v13460_v12 = vand.u32 4294901760, %v7986_v34  ;;  %v13461_v21 = vld [vmem:[#allocation9_spill] sm:$0xff] }
 0x120   :  { %v783_v37 = vpop.f32.mrf.mxu0  ;;  %2123 = vmatmul.mubr.f32.gmra.mxu0 %v13456_v10  ;;  %3547 = vmatprep.subr.mxu1 %v13113_v1 }
 0x121   :  { %v1629_v8 = vpop.f32.mrf.mxu1  ;;  %2619 = vmatmul.mubr.f32.gmra.mxu1 %v13457_v7  ;;  %2129 = vmatprep.mubr.f32.mxu0 %v13458_v45  ;;  %v784_v5 = vadd.f32 %v783_v37, %v277_v3  ;;  %v249_v37 = vld [vmem:[%s12405_s1 + $0x140] sm:$0xff]  ;;  %v13470_v3 = vand.u32 4294901760, %v13458_v45  ;;  %v13473_v45 = vand.u32 4294901760, %v13462_v4 }
 0x122   :  { %v9606_v13 = vadd.f32 %v1629_v8, %v754_v18  ;;  %v785_v30 = vpop.f32.mrf.mxu0  ;;  %2626 = vmatprep.mubr.f32.mxu1 %v13459_v24  ;;  %3087 = vmatpush1.msra.mxu0 %v13460_v12  ;;  %v13466_v8 = vand.u32 4294901760, %v8007_v43  ;;  %v13467_v24 = vld [vmem:[#allocation88_spill] sm:$0xff]  ;;  %v13469_v43 = vld [vmem:[#allocation89_spill] sm:$0xff] }
 0x123   :  { %v1631_v16 = vpop.f32.mrf.mxu1  ;;  %3549 = vmatpush1.msra.mxu1 %v13461_v21  ;;  %3088 = vmatprep.subr.mxu0 %v13113_v1  ;;  %v282_v30 = vpop.permute.xlu1 %281  ;;  %v13471_v21 = vand.u32 4294901760, %v8014_v47  ;;  %v13474_v47 = vld [vmem:[#allocation94_spill] sm:$0xff] }
 0x124   :  { %v798_v27 = vpop.f32.mrf.mxu0  ;;  %2132 = vmatmul.mubr.f32.gmra.mxu0 %v13462_v4  ;;  %3550 = vmatprep.subr.mxu1 %v13113_v1  ;;  %v251_v4 = vld [vmem:[%s12405_s1 + $0x150] sm:$0xff] }
 0x125   :  { %v1636_v18 = vpop.f32.mrf.mxu1  ;;  %2630 = vmatmul.mubr.f32.gmra.mxu1 %v13463_v33  ;;  %2138 = vmatprep.mubr.f32.mxu0 %v13464_v40  ;;  %v799_v16 = vadd.f32 %v798_v27, %v282_v30  ;;  %v287_v33 = vpop.permute.xlu0 %286  ;;  %v250_v27 = vld [vmem:[%s12405_s1 + $0x148] sm:$0xff]  ;;  %v13476_v30 = vand.u32 4294901760, %v8032_v54 }
 0x126   :  { %v9619_v11 = vadd.f32 %v1636_v18, %v769_v48  ;;  %v800_v34 = vpop.f32.mrf.mxu0  ;;  %2637 = vmatprep.mubr.f32.mxu1 %v13465_v20  ;;  %3092 = vmatpush1.msra.mxu0 %v13466_v8  ;;  %v13468_v48 = vand.u32 4294901760, %v13456_v10  ;;  %v13472_v10 = vld [vmem:[#allocation92_spill] sm:$0xff]  ;;  %v13478_v54 = vld [vmem:[#allocation97_spill] sm:$0xff] }
 0x127   :  { %v1638_v7 = vpop.f32.mrf.mxu1  ;;  %3552 = vmatpush1.msra.mxu1 %v7962_v25  ;;  %3093 = vmatprep.subr.mxu0 %v13113_v1 }
 0x128   :  { %v813_v59 = vpop.f32.mrf.mxu0  ;;  %2141 = vmatmul.mubr.f32.gmra.mxu0 %v13467_v24  ;;  %3553 = vmatprep.subr.mxu1 %v13113_v1  ;;  %v13475_v7 = vand.u32 4294901760, %v13464_v40  ;;  %v13477_v40 = vand.u32 4294901760, %v13467_v24  ;;  %v13481_v24 = vld [vmem:[#allocation99_spill] sm:$0xff] }
 0x129   :  { %v1643_v29 = vpop.f32.mrf.mxu1  ;;  %2641 = vmatmul.mubr.f32.gmra.mxu1 %v13468_v48  ;;  %2147 = vmatprep.mubr.f32.mxu0 %v13469_v43 }
 0x12a   :  { %v9635_v12 = vadd.f32 %v1643_v29, %v784_v5  ;;  %v815_v25 = vpop.f32.mrf.mxu0  ;;  %2648 = vmatprep.mubr.f32.mxu1 %v13470_v3  ;;  %3097 = vmatpush1.msra.mxu0 %v13471_v21  ;;  %v292_v29 = vpop.permute.xlu1 %291  ;;  %v13479_v21 = vand.u32 4294901760, %v13469_v43  ;;  %v13482_v43 = vand.u32 4294901760, %v13472_v10 }
 0x12b   :  { %v1645_v18 = vpop.f32.mrf.mxu1  ;;  %3555 = vmatpush1.msra.mxu1 %v7969_v28  ;;  %456 = vperm.xlu0 %7820, %v249_v37   ;;  %v814_v28 = vadd.f32 %v813_v59, %v287_v33  ;;  %v13480_v33 = vand.u32 4294901760, %v8047_v60 }
 0x12c   :  { %v828_v34 = vpop.f32.mrf.mxu0  ;;  %2150 = vmatmul.mubr.f32.gmra.mxu0 %v13472_v10  ;;  %3098 = vmatprep.subr.mxu0 %v13113_v1  ;;  %v297_v18 = vpop.permute.xlu0 %296  ;;  %v253_v10 = vld [vmem:[%s12405_s1 + $0x160] sm:$0xff] }
 0x12d   :  { %v1650_v5 = vpop.f32.mrf.mxu1  ;;  %2652 = vmatmul.mubr.f32.gmra.mxu1 %v13473_v45  ;;  %2156 = vmatprep.mubr.f32.mxu0 %v13474_v47  ;;  %v829_v3 = vadd.f32 %v828_v34, %v292_v29  ;;  %v252_v34 = vld [vmem:[%s12405_s1 + $0x158] sm:$0xff]  ;;  %v13483_v45 = vld [vmem:[#allocation101_spill] sm:$0xff] }
 0x12e   :  { %v9650_v20 = vadd.f32 %v1650_v5, %v799_v16  ;;  %v830_v8 = vpop.f32.mrf.mxu0  ;;  %2659 = vmatprep.mubr.f32.mxu1 %v13475_v7  ;;  %3102 = vmatpush1.msra.mxu0 %v13476_v30  ;;  %v13484_v7 = vand.u32 4294901760, %v13474_v47  ;;  %v13485_v30 = vld [vmem:[#allocation10_spill] sm:$0xff]  ;;  %v302_v29 = vpop.permute.xlu1 %301  ;;  %v13487_v47 = vand.u32 4294901760, %v8620_v38 }
 0x12f   :  { %v1652_v37 = vpop.f32.mrf.mxu1  ;;  %3556 = vmatprep.subr.mxu1 %v13113_v1  ;;  %461 = vperm.xlu1 %7821, %v250_v27  }
 0x130   :  { %v843_v48 = vpop.f32.mrf.mxu0  ;;  %2159 = vmatmul.mubr.f32.gmra.mxu0 %v8620_v38  ;;  %3558 = vmatpush1.msra.mxu1 %v7989_v35  ;;  %v13493_v38 = vld [vmem:[#allocation107_spill] sm:$0xff] }
 0x131   :  { %v1657_v59 = vpop.f32.mrf.mxu1  ;;  %2663 = vmatmul.mubr.f32.gmra.mxu1 %v13477_v40  ;;  %2165 = vmatprep.mubr.f32.mxu0 %v13478_v54  ;;  %v844_v60 = vadd.f32 %v843_v48, %v297_v18  ;;  %v13488_v40 = vld [vmem:[#allocation106_spill] sm:$0xff] }
 0x132   :  { %v9665_v25 = vadd.f32 %v1657_v59, %v814_v28  ;;  %v845_v16 = vpop.f32.mrf.mxu0  ;;  %2670 = vmatprep.mubr.f32.mxu1 %v13479_v21  ;;  %3103 = vmatprep.subr.mxu0 %v13113_v1  ;;  %v13486_v59 = vld [vmem:[#allocation105_spill] sm:$0xff]  ;;  %v13490_v18 = vld [vmem:[#allocation14_spill] sm:$0xff] }
 0x133   :  { %v1659_v35 = vpop.f32.mrf.mxu1  ;;  %466 = vperm.xlu0 %7820, %v251_v4   ;;  %3107 = vmatpush1.msra.mxu0 %v13480_v33  ;;  %v13491_v33 = vand.u32 4294901760, %v13490_v18 }
 0x134   :  { %v858_v27 = vpop.f32.mrf.mxu0  ;;  %2168 = vmatmul.mubr.f32.gmra.mxu0 %v13481_v24  ;;  %3559 = vmatprep.subr.mxu1 %v13113_v1  ;;  %v13489_v35 = vand.u32 4294901760, %v13478_v54 }
 0x135   :  { %v1664_v5 = vpop.f32.mrf.mxu1  ;;  %2674 = vmatmul.mubr.f32.gmra.mxu1 %v13482_v43  ;;  %2174 = vmatprep.mubr.f32.mxu0 %v13483_v45  ;;  %v859_v21 = vadd.f32 %v858_v27, %v302_v29  ;;  %v13492_v43 = vld [vmem:[#allocation11_spill] sm:$0xff]  ;;  %v13495_v27 = vld [vmem:[#allocation108_spill] sm:$0xff]  ;;  %v13496_v29 = vand.u32 4294901760, %v13483_v45  ;;  %v13501_v45 = vld [vmem:[#allocation113_spill] sm:$0xff] }
 0x136   :  { %v9680_v8 = vadd.f32 %v1664_v5, %v829_v3  ;;  %v860_v28 = vpop.f32.mrf.mxu0  ;;  %2681 = vmatprep.mubr.f32.mxu1 %v13484_v7  ;;  %3561 = vmatpush1.msra.mxu1 %v13485_v30  ;;  %v307_v5 = vpop.permute.xlu0 %306  ;;  %v13494_v7 = vand.u32 4294901760, %v13481_v24 }
 0x137   :  { %v1666_v37 = vpop.f32.mrf.mxu1  ;;  %471 = vperm.xlu1 %7821, %v252_v34   ;;  %3108 = vmatprep.subr.mxu0 %v13113_v1 }
 0x138   :  { %v873_v4 = vpop.f32.mrf.mxu0  ;;  %2177 = vmatmul.mubr.f32.gmra.mxu0 %v13486_v59  ;;  %3562 = vmatprep.subr.mxu1 %v13113_v1 }
 0x139   :  { %v1671_v48 = vpop.f32.mrf.mxu1  ;;  %2685 = vmatmul.mubr.f32.gmra.mxu1 %v13487_v47  ;;  %2183 = vmatprep.mubr.f32.mxu0 %v13488_v40  ;;  %v874_v37 = vadd.f32 %v873_v4, %v307_v5  ;;  %v13500_v4 = vand.u32 4294901760, %v13486_v59  ;;  %v13502_v5 = vand.u32 4294901760, %v13488_v40  ;;  %v13505_v59 = vld [vmem:[#allocation115_spill] sm:$0xff]  ;;  %v13508_v40 = vld [vmem:[#allocation117_spill] sm:$0xff] }
 0x13a   :  { %v9694_v16 = vadd.f32 %v1671_v48, %v844_v60  ;;  %v875_v3 = vpop.f32.mrf.mxu0  ;;  %2692 = vmatprep.mubr.f32.mxu1 %v13489_v35  ;;  %3112 = vmatpush1.msra.mxu0 %v13491_v33  ;;  %v13497_v48 = vld [vmem:[#allocation16_spill] sm:$0xff]  ;;  %v13499_v35 = vld [vmem:[#allocation111_spill] sm:$0xff] }
 0x13b   :  { %v1673_v34 = vpop.f32.mrf.mxu1  ;;  %3564 = vmatpush1.msra.mxu1 %v13492_v43  ;;  %476 = vperm.xlu0 %7820, %v253_v10   ;;  %v13498_v10 = vand.u32 4294901760, %v13497_v48  ;;  %v312_v3 = vpop.permute.xlu1 %311  ;;  %v13503_v43 = vld [vmem:[#allocation18_spill] sm:$0xff] }
 0x13c   :  { %v888_v28 = vpop.f32.mrf.mxu0  ;;  %2186 = vmatmul.mubr.f32.gmra.mxu0 %v13493_v38  ;;  %3113 = vmatprep.subr.mxu0 %v13113_v1 }
 0x13d   :  { %v1678_v60 = vpop.f32.mrf.mxu1  ;;  %2696 = vmatmul.mubr.f32.gmra.mxu1 %v13494_v7  ;;  %2192 = vmatprep.mubr.f32.mxu0 %v13495_v27  ;;  %v889_v34 = vadd.f32 %v888_v28, %v312_v3  ;;  %v13507_v28 = vand.u32 4294901760, %v13493_v38  ;;  %v13509_v3 = vand.u32 4294901760, %v13495_v27  ;;  %v13515_v27 = vld [vmem:[#allocation121_spill] sm:$0xff] }
 0x13e   :  { %v9706_v54 = vadd.f32 %v1678_v60, %v859_v21  ;;  %v890_v30 = vpop.f32.mrf.mxu0  ;;  %2703 = vmatprep.mubr.f32.mxu1 %v13496_v29  ;;  %3117 = vmatpush1.msra.mxu0 %v13498_v10  ;;  %v13504_v60 = vand.u32 4294901760, %v13503_v43  ;;  %v13506_v29 = vld [vmem:[#allocation13_spill] sm:$0xff]  ;;  %v13512_v43 = vld [vmem:[#allocation119_spill] sm:$0xff] }
 0x13f   :  { %v1680_v47 = vpop.f32.mrf.mxu1  ;;  %3565 = vmatprep.subr.mxu1 %v13113_v1  ;;  %3118 = vmatprep.subr.mxu0 %v13113_v1  ;;  %v317_v30 = vpop.permute.xlu0 %316 }
 0x140   :  { %v903_v24 = vpop.f32.mrf.mxu0  ;;  %2195 = vmatmul.mubr.f32.gmra.mxu0 %v13499_v35  ;;  %3567 = vmatpush1.msra.mxu1 %v13248_v9 }
 0x141   :  { %v1685_v21 = vpop.f32.mrf.mxu1  ;;  %2707 = vmatmul.mubr.f32.gmra.mxu1 %v13500_v4  ;;  %2201 = vmatprep.mubr.f32.mxu0 %v13501_v45  ;;  %v904_v47 = vadd.f32 %v903_v24, %v317_v30  ;;  %v13514_v24 = vand.u32 4294901760, %v13499_v35 }
 0x142   :  { %v9719_v18 = vadd.f32 %v1685_v21, %v874_v37  ;;  %v905_v33 = vpop.f32.mrf.mxu0  ;;  %2714 = vmatprep.mubr.f32.mxu1 %v13502_v5  ;;  %3122 = vmatpush1.msra.mxu0 %v13504_v60  ;;  %v13510_v21 = vld [vmem:[#allocation20_spill] sm:$0xff]  ;;  %v322_v5 = vpop.permute.xlu1 %321  ;;  %v13513_v60 = vld [vmem:[#allocation15_spill] sm:$0xff] }
 0x143   :  { %v1687_v7 = vpop.f32.mrf.mxu1  ;;  %3568 = vmatprep.subr.mxu1 %v13113_v1  ;;  %3123 = vmatprep.subr.mxu0 %v13113_v1  ;;  %v13511_v4 = vand.u32 4294901760, %v13510_v21  ;;  %v327_v21 = vpop.permute.xlu0 %326 }
 0x144   :  { %v918_v9 = vpop.f32.mrf.mxu0  ;;  %2204 = vmatmul.mubr.f32.gmra.mxu0 %v13505_v59  ;;  %3570 = vmatpush1.msra.mxu1 %v13506_v29 }
 0x145   :  { %v1692_v37 = vpop.f32.mrf.mxu1  ;;  %2718 = vmatmul.mubr.f32.gmra.mxu1 %v13507_v28  ;;  %2210 = vmatprep.mubr.f32.mxu0 %v13508_v40  ;;  %v919_v29 = vadd.f32 %v918_v9, %v322_v5  ;;  %v13517_v28 = vld [vmem:[#allocation22_spill] sm:$0xff]  ;;  %v13521_v9 = vand.u32 4294901760, %v13505_v59 }
 0x146   :  { %v9732_v48 = vadd.f32 %v1692_v37, %v889_v34  ;;  %v920_v10 = vpop.f32.mrf.mxu0  ;;  %2725 = vmatprep.mubr.f32.mxu1 %v13509_v3  ;;  %3127 = vmatpush1.msra.mxu0 %v13511_v4  ;;  %v13516_v37 = vand.u32 4294901760, %v13501_v45  ;;  %v13519_v4 = vld [vmem:[#allocation124_spill] sm:$0xff]  ;;  %v13522_v45 = vld [vmem:[#allocation126_spill] sm:$0xff] }
 0x147   :  { %v1694_v33 = vpop.f32.mrf.mxu1  ;;  %3571 = vmatprep.subr.mxu1 %v13113_v1  ;;  %3128 = vmatprep.subr.mxu0 %v13113_v1  ;;  %v13518_v10 = vand.u32 4294901760, %v13517_v28 }
 0x148   :  { %v933_v38 = vpop.f32.mrf.mxu0  ;;  %2213 = vmatmul.mubr.f32.gmra.mxu0 %v13512_v43  ;;  %3573 = vmatpush1.msra.mxu1 %v13513_v60  ;;  %v13520_v33 = vld [vmem:[#allocation17_spill] sm:$0xff] }
 0x149   :  { %v1699_v34 = vpop.f32.mrf.mxu1  ;;  %2729 = vmatmul.mubr.f32.gmra.mxu1 %v13514_v24  ;;  %2219 = vmatprep.mubr.f32.mxu0 %v13515_v27  ;;  %v13523_v24 = vand.u32 4294901760, %v13508_v40  ;;  %v13529_v40 = vld [vmem:[#allocation12_spill] sm:$0xff] }
 0x14a   :  { %v9745_v7 = vadd.f32 %v1699_v34, %v904_v47  ;;  %v935_v30 = vpop.f32.mrf.mxu0  ;;  %2736 = vmatprep.mubr.f32.mxu1 %v13516_v37  ;;  %3132 = vmatpush1.msra.mxu0 %v13518_v10  ;;  %v934_v34 = vadd.f32 %v933_v38, %v327_v21  ;;  %v332_v10 = vpop.permute.xlu1 %331  ;;  %v13528_v38 = vand.u32 4294901760, %v13512_v43 }
 0x14b   :  { %v1701_v3 = vpop.f32.mrf.mxu1  ;;  %3574 = vmatprep.subr.mxu1 %v13113_v1  ;;  %3133 = vmatprep.subr.mxu0 %v13113_v1  ;;  %v13524_v30 = vld [vmem:[#allocation24_spill] sm:$0xff] }
 0x14c   :  { %v948_v35 = vpop.f32.mrf.mxu0  ;;  %2222 = vmatmul.mubr.f32.gmra.mxu0 %v13519_v4  ;;  %3576 = vmatpush1.msra.mxu1 %v13520_v33  ;;  %v13525_v37 = vand.u32 4294901760, %v13524_v30  ;;  %v13526_v3 = vld [vmem:[#allocation127_spill] sm:$0xff] }
 0x14d   :  { %v1706_v47 = vpop.f32.mrf.mxu1  ;;  %2740 = vmatmul.mubr.f32.gmra.mxu1 %v13521_v9  ;;  %2228 = vmatprep.mubr.f32.mxu0 %v13522_v45  ;;  %v13527_v33 = vld [vmem:[#allocation19_spill] sm:$0xff]  ;;  %v949_v9 = vadd.f32 %v948_v35, %v332_v10  ;;  %v13535_v35 = vand.u32 4294901760, %v13519_v4 }
 0x14e   :  { %v9758_v5 = vadd.f32 %v1706_v47, %v919_v29  ;;  %v950_v60 = vpop.f32.mrf.mxu0  ;;  %2747 = vmatprep.mubr.f32.mxu1 %v13523_v24  ;;  %3137 = vmatpush2.msra.mxu0 %v13525_v37  ;;  %v13531_v24 = vld [vmem:[#allocation26_spill] sm:$0xff]  ;;  %v342_v62 = vpop.permute.xlu1 %341 }
 0x14f   :  { %v1708_v28 = vpop.f32.mrf.mxu1  ;;  %3577 = vmatprep.subr.mxu1 %v13113_v1  ;;  %3138 = vmatprep.subr.mxu0 %v13113_v1  ;;  %v13530_v60 = vand.u32 4294901760, %v13515_v27  ;;  %v13532_v30 = vand.u32 4294901760, %v13531_v24  ;;  %v13536_v27 = vld [vmem:[#allocation132_spill] sm:$0xff] }
 0x150   :  { %v963_v59 = vpop.f32.mrf.mxu0  ;;  %2231 = vmatmul.mubr.f32.gmra.mxu0 %v13526_v3  ;;  %3579 = vmatpush2.msra.mxu1 %v13527_v33  ;;  %v337_v28 = vpop.permute.xlu0 %336  ;;  %v13533_v33 = vld [vmem:[#allocation130_spill] sm:$0xff]  ;;  %v13538_v24 = vld [vmem:[#allocation28_spill] sm:$0xff] }
 0x151   :  { %v1713_v29 = vpop.f32.mrf.mxu1  ;;  %2751 = vmatmul.mubr.f32.gmra.mxu1 %v13528_v38  ;;  %2237 = vmatprep.mubr.f32.mxu0 %v13529_v40  ;;  %v13534_v38 = vld [vmem:[#allocation21_spill] sm:$0xff] }
 0x152   :  { %v9771_v21 = vadd.f32 %v1713_v29, %v934_v34  ;;  %v965_v47 = vpop.f32.mrf.mxu0  ;;  %2758 = vmatprep.mubr.f32.mxu1 %v13530_v60  ;;  %3142 = vmatpush2.msra.mxu0 %v13532_v30  ;;  %v13537_v60 = vand.u32 4294901760, %v13522_v45  ;;  %v13539_v30 = vand.u32 4294901760, %v13538_v24  ;;  %v13543_v45 = vld [vmem:[#allocation136_spill] sm:$0xff]  ;;  %v13545_v24 = vld [vmem:[#allocation29_spill] sm:$0xff]  ;;  %v352_v50 = vpop.permute.xlu1 %351 }
 0x153   :  { %v1715_v37 = vpop.f32.mrf.mxu1  ;;  %3580 = vmatprep.subr.mxu1 %v13113_v1  ;;  %3143 = vmatprep.subr.mxu0 %v13113_v1  ;;  %v964_v47 = vadd.f32 %v963_v59, %v337_v28  ;;  %v13542_v59 = vand.u32 4294901760, %v13526_v3 }
 0x154   :  { %v978_v43 = vpop.f32.mrf.mxu0  ;;  %2240 = vmatmul.mubr.f32.gmra.mxu0 %v13533_v33  ;;  %3582 = vmatpush2.msra.mxu1 %v13534_v38  ;;  %v13540_v38 = vld [vmem:[#allocation134_spill] sm:$0xff]  ;;  %v347_v44 = vpop.permute.xlu0 %346 }
 0x155   :  { %v1720_v34 = vpop.f32.mrf.mxu1  ;;  %2762 = vmatmul.mubr.f32.gmra.mxu1 %v13535_v35  ;;  %2246 = vmatprep.mubr.f32.mxu0 %v13536_v27  ;;  %v13541_v35 = vld [vmem:[#allocation23_spill] sm:$0xff] }
 0x156   :  { %v9784_v10 = vadd.f32 %v1720_v34, %v949_v9  ;;  %v980_v29 = vpop.f32.mrf.mxu0  ;;  %2769 = vmatprep.mubr.f32.mxu1 %v13537_v60  ;;  %3147 = vmatpush2.msra.mxu0 %v13539_v30  ;;  %v13544_v60 = vand.u32 4294901760, %v13529_v40  ;;  %v13546_v30 = vand.u32 4294901760, %v13545_v24  ;;  %v13550_v40 = vld [vmem:[#allocation141_spill] sm:$0xff]  ;;  %v13552_v24 = vld [vmem:[#allocation32_spill] sm:$0xff] }
 0x157   :  { %v1722_v37 = vpop.f32.mrf.mxu1  ;;  %3583 = vmatprep.subr.mxu1 %v13113_v1  ;;  %3148 = vmatprep.subr.mxu0 %v13113_v1  ;;  %v979_v29 = vadd.f32 %v978_v43, %v342_v62  ;;  %v13549_v62 = vand.u32 4294901760, %v13533_v33 }
 0x158   :  { %v993_v4 = vpop.f32.mrf.mxu0  ;;  %2249 = vmatmul.mubr.f32.gmra.mxu0 %v13540_v38  ;;  %3585 = vmatpush2.msra.mxu1 %v13541_v35  ;;  %v13547_v35 = vld [vmem:[#allocation138_spill] sm:$0xff]  ;;  %v357_v6 = vpop.permute.xlu0 %356 }
 0x159   :  { %v1727_v9 = vpop.f32.mrf.mxu1  ;;  %2773 = vmatmul.mubr.f32.gmra.mxu1 %v13542_v59  ;;  %2255 = vmatprep.mubr.f32.mxu0 %v13543_v45  ;;  %v13548_v59 = vld [vmem:[#allocation25_spill] sm:$0xff] }
 0x15a   :  { %v9797_v28 = vadd.f32 %v1727_v9, %v964_v47  ;;  %v995_v34 = vpop.f32.mrf.mxu0  ;;  %2780 = vmatprep.mubr.f32.mxu1 %v13544_v60  ;;  %3152 = vmatpush2.msra.mxu0 %v13546_v30  ;;  %v13551_v60 = vand.u32 4294901760, %v13536_v27  ;;  %v13553_v30 = vand.u32 4294901760, %v13552_v24  ;;  %v13557_v27 = vld [vmem:[#allocation144_spill] sm:$0xff]  ;;  %v13559_v24 = vld [vmem:[#allocation34_spill] sm:$0xff] }
 0x15b   :  { %v1729_v37 = vpop.f32.mrf.mxu1  ;;  %3586 = vmatprep.subr.mxu1 %v13113_v1  ;;  %3153 = vmatprep.subr.mxu0 %v13113_v1  ;;  %v994_v34 = vadd.f32 %v993_v4, %v347_v44  ;;  %v13556_v44 = vand.u32 4294901760, %v13540_v38 }
 0x15c   :  { %v1008_v3 = vpop.f32.mrf.mxu0  ;;  %2258 = vmatmul.mubr.f32.gmra.mxu0 %v13547_v35  ;;  %3588 = vmatpush2.msra.mxu1 %v13548_v59  ;;  %v13554_v59 = vld [vmem:[#allocation143_spill] sm:$0xff]  ;;  %v367_v26 = vpop.permute.xlu0 %366 }
 0x15d   :  { %v1734_v47 = vpop.f32.mrf.mxu1  ;;  %2784 = vmatmul.mubr.f32.gmra.mxu1 %v13549_v62  ;;  %2264 = vmatprep.mubr.f32.mxu0 %v13550_v40  ;;  %v13555_v62 = vld [vmem:[#allocation27_spill] sm:$0xff] }
 0x15e   :  { %v9810_v43 = vadd.f32 %v1734_v47, %v979_v29  ;;  %v1010_v9 = vpop.f32.mrf.mxu0  ;;  %2791 = vmatprep.mubr.f32.mxu1 %v13551_v60  ;;  %3157 = vmatpush2.msra.mxu0 %v13553_v30  ;;  %v13558_v60 = vand.u32 4294901760, %v13543_v45  ;;  %v13560_v30 = vand.u32 4294901760, %v13559_v24  ;;  %v13564_v45 = vld [vmem:[#allocation148_spill] sm:$0xff]  ;;  %v13566_v24 = vand.u32 4294901760, %v13347_v42 }
 0x15f   :  { %v1736_v37 = vpop.f32.mrf.mxu1  ;;  %3589 = vmatprep.subr.mxu1 %v13113_v1  ;;  %3158 = vmatprep.subr.mxu0 %v13113_v1  ;;  %v1009_v9 = vadd.f32 %v1008_v3, %v352_v50  ;;  %v13563_v50 = vand.u32 4294901760, %v13547_v35 }
 0x160   :  { %v1023_v33 = vpop.f32.mrf.mxu0  ;;  %2267 = vmatmul.mubr.f32.gmra.mxu0 %v13554_v59  ;;  %3591 = vmatpush2.msra.mxu1 %v13555_v62  ;;  %v13561_v62 = vld [vmem:[#allocation146_spill] sm:$0xff] }
 0x161   :  { %v1741_v29 = vpop.f32.mrf.mxu1  ;;  %2795 = vmatmul.mubr.f32.gmra.mxu1 %v13556_v44  ;;  %2273 = vmatprep.mubr.f32.mxu0 %v13557_v27  ;;  %v13562_v44 = vld [vmem:[#allocation30_spill] sm:$0xff] }
 0x162   :  { %v9823_v4 = vadd.f32 %v1741_v29, %v994_v34  ;;  %v1025_v47 = vpop.f32.mrf.mxu0  ;;  %2802 = vmatprep.mubr.f32.mxu1 %v13558_v60  ;;  %3162 = vmatpush2.msra.mxu0 %v13560_v30  ;;  %v13565_v60 = vand.u32 4294901760, %v13550_v40  ;;  %v13570_v40 = vld [vmem:[#allocation152_spill] sm:$0xff]  ;;  %v377_v58 = vpop.permute.xlu0 %376 }
 0x163   :  { %v1743_v37 = vpop.f32.mrf.mxu1  ;;  %3592 = vmatprep.subr.mxu1 %v13113_v1  ;;  %3163 = vmatprep.subr.mxu0 %v13113_v1  ;;  %v1024_v47 = vadd.f32 %v1023_v33, %v357_v6  ;;  %v13569_v6 = vand.u32 4294901760, %v13554_v59 }
 0x164   :  { %v1038_v38 = vpop.f32.mrf.mxu0  ;;  %2276 = vmatmul.mubr.f32.gmra.mxu0 %v13561_v62  ;;  %3594 = vmatpush2.msra.mxu1 %v13562_v44  ;;  %v362_v37 = vpop.permute.xlu1 %361  ;;  %v13567_v44 = vld [vmem:[#allocation150_spill] sm:$0xff] }
 0x165   :  { %v1748_v34 = vpop.f32.mrf.mxu1  ;;  %2806 = vmatmul.mubr.f32.gmra.mxu1 %v13563_v50  ;;  %2282 = vmatprep.mubr.f32.mxu0 %v13564_v45  ;;  %v13568_v50 = vld [vmem:[#allocation31_spill] sm:$0xff] }
 0x166   :  { %v9836_v3 = vadd.f32 %v1748_v34, %v1009_v9  ;;  %v1040_v29 = vpop.f32.mrf.mxu0  ;;  %2813 = vmatprep.mubr.f32.mxu1 %v13565_v60  ;;  %3167 = vmatpush2.msra.mxu0 %v13566_v24  ;;  %v1039_v34 = vadd.f32 %v1038_v38, %v362_v37  ;;  %v13572_v60 = vld [vmem:[#allocation39_spill] sm:$0xff]  ;;  %v13576_v38 = vand.u32 4294901760, %v13561_v62 }
 0x167   :  { %v1750_v30 = vpop.f32.mrf.mxu1  ;;  %3595 = vmatprep.subr.mxu1 %v13113_v1  ;;  %3168 = vmatprep.subr.mxu0 %v13113_v1  ;;  %v13571_v29 = vand.u32 4294901760, %v13557_v27  ;;  %v13573_v24 = vand.u32 4294901760, %v13572_v60  ;;  %v13577_v27 = vld [vmem:[#allocation157_spill] sm:$0xff] }
 0x168   :  { %v1053_v35 = vpop.f32.mrf.mxu0  ;;  %2285 = vmatmul.mubr.f32.gmra.mxu0 %v13567_v44  ;;  %3597 = vmatpush2.msra.mxu1 %v13568_v50  ;;  %v13574_v50 = vld [vmem:[#allocation154_spill] sm:$0xff]  ;;  %v13579_v60 = vld [vmem:[#allocation41_spill] sm:$0xff]  ;;  %v372_v0 = vpop.permute.xlu1 %371 }
 0x169   :  { %v1755_v9 = vpop.f32.mrf.mxu1  ;;  %2817 = vmatmul.mubr.f32.gmra.mxu1 %v13569_v6  ;;  %2291 = vmatprep.mubr.f32.mxu0 %v13570_v40  ;;  %v13575_v6 = vld [vmem:[#allocation33_spill] sm:$0xff] }
 0x16a   :  { %v9849_v33 = vadd.f32 %v1755_v9, %v1024_v47  ;;  %v1055_v42 = vpop.f32.mrf.mxu0  ;;  %2824 = vmatprep.mubr.f32.mxu1 %v13571_v29  ;;  %3172 = vmatpush2.msra.mxu0 %v13573_v24  ;;  %v13578_v29 = vand.u32 4294901760, %v13564_v45  ;;  %v13580_v24 = vand.u32 4294901760, %v13579_v60  ;;  %v13584_v45 = vld [vmem:[#allocation159_spill] sm:$0xff] }
 0x16b   :  { %v1757_v30 = vpop.f32.mrf.mxu1  ;;  %3598 = vmatprep.subr.mxu1 %v13113_v1  ;;  %3173 = vmatprep.subr.mxu0 %v13113_v1  ;;  %v1054_v42 = vadd.f32 %v1053_v35, %v367_v26  ;;  %v13583_v26 = vand.u32 4294901760, %v13567_v44  ;;  %v13586_v60 = vld [vmem:[#allocation43_spill] sm:$0xff]  ;;  %v387_v2 = vpop.permute.xlu0 %386 }
 0x16c   :  { %v1068_v59 = vpop.f32.mrf.mxu0  ;;  %2294 = vmatmul.mubr.f32.gmra.mxu0 %v13574_v50  ;;  %3600 = vmatpush2.msra.mxu1 %v13575_v6  ;;  %v13581_v6 = vld [vmem:[#allocation158_spill] sm:$0xff]  ;;  %v382_v55 = vpop.permute.xlu1 %381 }
 0x16d   :  { %v1762_v47 = vpop.f32.mrf.mxu1  ;;  %2828 = vmatmul.mubr.f32.gmra.mxu1 %v13576_v38  ;;  %2300 = vmatprep.mubr.f32.mxu0 %v13577_v27  ;;  %v13582_v38 = vld [vmem:[#allocation36_spill] sm:$0xff] }
 0x16e   :  { %v9862_v37 = vadd.f32 %v1762_v47, %v1039_v34  ;;  %v1070_v9 = vpop.f32.mrf.mxu0  ;;  %2835 = vmatprep.mubr.f32.mxu1 %v13578_v29  ;;  %3177 = vmatpush2.msra.mxu0 %v13580_v24  ;;  %v13585_v29 = vand.u32 4294901760, %v13570_v40  ;;  %v13587_v24 = vand.u32 4294901760, %v13586_v60  ;;  %v13591_v40 = vld [vmem:[#allocation164_spill] sm:$0xff] }
 0x16f   :  { %v1764_v30 = vpop.f32.mrf.mxu1  ;;  %3601 = vmatprep.subr.mxu1 %v13113_v1  ;;  %3178 = vmatprep.subr.mxu0 %v13113_v1  ;;  %v1069_v9 = vadd.f32 %v1068_v59, %v372_v0  ;;  %v13590_v0 = vand.u32 4294901760, %v13574_v50  ;;  %v13593_v60 = vld [vmem:[#allocation44_spill] sm:$0xff] }
 0x170   :  { %v1083_v62 = vpop.f32.mrf.mxu0  ;;  %2303 = vmatmul.mubr.f32.gmra.mxu0 %v13581_v6  ;;  %3603 = vmatpush2.msra.mxu1 %v13582_v38  ;;  %v13588_v38 = vld [vmem:[#allocation163_spill] sm:$0xff]  ;;  %v392_v49 = vpop.permute.xlu1 %391 }
 0x171   :  { %v1769_v34 = vpop.f32.mrf.mxu1  ;;  %2839 = vmatmul.mubr.f32.gmra.mxu1 %v13583_v26  ;;  %2309 = vmatprep.mubr.f32.mxu0 %v13584_v45  ;;  %v13589_v26 = vld [vmem:[#allocation37_spill] sm:$0xff] }
 0x172   :  { %v9875_v35 = vadd.f32 %v1769_v34, %v1054_v42  ;;  %v1085_v47 = vpop.f32.mrf.mxu0  ;;  %2846 = vmatprep.mubr.f32.mxu1 %v13585_v29  ;;  %3182 = vmatpush2.msra.mxu0 %v13587_v24  ;;  %v13592_v29 = vand.u32 4294901760, %v13577_v27  ;;  %v13594_v24 = vand.u32 4294901760, %v13593_v60  ;;  %v13598_v27 = vld [vmem:[#allocation168_spill] sm:$0xff]  ;;  %v13600_v60 = vld [vmem:[#allocation46_spill] sm:$0xff] }
 0x173   :  { %v1771_v30 = vpop.f32.mrf.mxu1  ;;  %3604 = vmatprep.subr.mxu1 %v13113_v1  ;;  %3183 = vmatprep.subr.mxu0 %v13113_v1  ;;  %v1084_v47 = vadd.f32 %v1083_v62, %v377_v58  ;;  %v13597_v58 = vand.u32 4294901760, %v13581_v6 }
 0x174   :  { %v1098_v44 = vpop.f32.mrf.mxu0  ;;  %2312 = vmatmul.mubr.f32.gmra.mxu0 %v13588_v38  ;;  %3606 = vmatpush2.msra.mxu1 %v13589_v26  ;;  %v13595_v26 = vld [vmem:[#allocation166_spill] sm:$0xff] }
 0x175   :  { %v1776_v42 = vpop.f32.mrf.mxu1  ;;  %2850 = vmatmul.mubr.f32.gmra.mxu1 %v13590_v0  ;;  %2318 = vmatprep.mubr.f32.mxu0 %v13591_v40  ;;  %v13596_v0 = vld [vmem:[#allocation38_spill] sm:$0xff] }
 0x176   :  { %v9888_v59 = vadd.f32 %v1776_v42, %v1069_v9  ;;  %v1100_v34 = vpop.f32.mrf.mxu0  ;;  %2857 = vmatprep.mubr.f32.mxu1 %v13592_v29  ;;  %3187 = vmatpush2.msra.mxu0 %v13594_v24  ;;  %v13599_v29 = vand.u32 4294901760, %v13584_v45  ;;  %v13601_v24 = vand.u32 4294901760, %v13600_v60  ;;  %v13605_v45 = vld [vmem:[#allocation173_spill] sm:$0xff] }
 0x177   :  { %v1778_v30 = vpop.f32.mrf.mxu1  ;;  %3607 = vmatprep.subr.mxu1 %v13113_v1  ;;  %3188 = vmatprep.subr.mxu0 %v13113_v1  ;;  %v1099_v34 = vadd.f32 %v1098_v44, %v382_v55  ;;  %v13604_v55 = vand.u32 4294901760, %v13588_v38  ;;  %v13607_v60 = vld [vmem:[#allocation57_spill] sm:$0xff] }
 0x178   :  { %v1113_v50 = vpop.f32.mrf.mxu0  ;;  %2321 = vmatmul.mubr.f32.gmra.mxu0 %v13595_v26  ;;  %3609 = vmatpush2.msra.mxu1 %v13596_v0  ;;  %v13602_v0 = vld [vmem:[#allocation170_spill] sm:$0xff] }
 0x179   :  { %v1783_v9 = vpop.f32.mrf.mxu1  ;;  %2861 = vmatmul.mubr.f32.gmra.mxu1 %v13597_v58  ;;  %2327 = vmatprep.mubr.f32.mxu0 %v13598_v27  ;;  %v13603_v58 = vld [vmem:[#allocation40_spill] sm:$0xff] }
 0x17a   :  { %v9901_v62 = vadd.f32 %v1783_v9, %v1084_v47  ;;  %v1115_v42 = vpop.f32.mrf.mxu0  ;;  %2868 = vmatprep.mubr.f32.mxu1 %v13599_v29  ;;  %3192 = vmatpush2.msra.mxu0 %v13601_v24  ;;  %v13606_v29 = vand.u32 4294901760, %v13591_v40  ;;  %v13608_v24 = vand.u32 4294901760, %v13607_v60  ;;  %v13612_v40 = vld [vmem:[#allocation175_spill] sm:$0xff]  ;;  %v13614_v60 = vand.u32 4294901760, %v13412_v36 }
 0x17b   :  { %v1785_v30 = vpop.f32.mrf.mxu1  ;;  %3610 = vmatprep.subr.mxu1 %v13113_v1  ;;  %3193 = vmatprep.subr.mxu0 %v13113_v1  ;;  %v1114_v42 = vadd.f32 %v1113_v50, %v387_v2  ;;  %v13611_v2 = vand.u32 4294901760, %v13595_v26 }
 0x17c   :  { %v1128_v6 = vpop.f32.mrf.mxu0  ;;  %2330 = vmatmul.mubr.f32.gmra.mxu0 %v13602_v0  ;;  %3612 = vmatpush2.msra.mxu1 %v13603_v58  ;;  %v13609_v58 = vld [vmem:[#allocation174_spill] sm:$0xff] }
 0x17d   :  { %v1790_v47 = vpop.f32.mrf.mxu1  ;;  %2872 = vmatmul.mubr.f32.gmra.mxu1 %v13604_v55  ;;  %2336 = vmatprep.mubr.f32.mxu0 %v13605_v45  ;;  %v13610_v55 = vld [vmem:[#allocation48_spill] sm:$0xff] }
 0x17e   :  { %v9914_v44 = vadd.f32 %v1790_v47, %v1099_v34  ;;  %v1130_v9 = vpop.f32.mrf.mxu0  ;;  %2879 = vmatprep.mubr.f32.mxu1 %v13606_v29  ;;  %3197 = vmatpush2.msra.mxu0 %v13608_v24  ;;  %v13613_v29 = vand.u32 4294901760, %v13598_v27  ;;  %v13617_v27 = vld [vmem:[#allocation180_spill] sm:$0xff] }
 0x17f   :  { %v1792_v30 = vpop.f32.mrf.mxu1  ;;  %3613 = vmatprep.subr.mxu1 %v13113_v1  ;;  %3198 = vmatprep.subr.mxu0 %v13113_v1  ;;  %v1129_v9 = vadd.f32 %v1128_v6, %v392_v49  ;;  %v13616_v49 = vand.u32 4294901760, %v13602_v0  ;;  %v13620_v0 = vld [vmem:[#allocation182_spill] sm:$0xff] }
 0x180   :  { %v1143_v38 = vpop.f32.mrf.mxu0  ;;  %2339 = vmatmul.mubr.f32.gmra.mxu0 %v13609_v58  ;;  %3615 = vmatpush2.msra.mxu1 %v13610_v55  ;;  %v397_v30 = vpop.permute.xlu0 %396  ;;  %v13615_v55 = vld [vmem:[#allocation178_spill] sm:$0xff] }
 0x181   :  { %v1797_v34 = vpop.f32.mrf.mxu1  ;;  %2883 = vmatmul.mubr.f32.gmra.mxu1 %v13611_v2  ;;  %2345 = vmatprep.mubr.f32.mxu0 %v13612_v40  ;;  %v13618_v2 = vand.u32 4294901760, %v13605_v45  ;;  %v13622_v45 = vld [vmem:[#allocation183_spill] sm:$0xff] }
 0x182   :  { %v9927_v50 = vadd.f32 %v1797_v34, %v1114_v42  ;;  %v1145_v47 = vpop.f32.mrf.mxu0  ;;  %2890 = vmatprep.mubr.f32.mxu1 %v13613_v29  ;;  %3202 = vmatpush2.msra.mxu0 %v13614_v60  ;;  %v1144_v34 = vadd.f32 %v1143_v38, %v397_v30  ;;  %v402_v60 = vpop.permute.xlu1 %401  ;;  %v13621_v38 = vand.u32 4294901760, %v13609_v58  ;;  %v13625_v58 = vld [vmem:[#allocation185_spill] sm:$0xff] }
 0x183   :  { %v1799_v24 = vpop.f32.mrf.mxu1  ;;  %3616 = vmatprep.subr.mxu1 %v13113_v1  ;;  %3203 = vmatprep.subr.mxu0 %v13113_v1  ;;  %v13619_v47 = vand.u32 4294901760, %v8376_v23 }
 0x184   :  { %v1158_v26 = vpop.f32.mrf.mxu0  ;;  %2348 = vmatmul.mubr.f32.gmra.mxu0 %v13615_v55  ;;  %3618 = vmatpush2.msra.mxu1 %v13415_v57 }
 0x185   :  { %v1804_v42 = vpop.f32.mrf.mxu1  ;;  %2894 = vmatmul.mubr.f32.gmra.mxu1 %v13616_v49  ;;  %2354 = vmatprep.mubr.f32.mxu0 %v13617_v27  ;;  %v1159_v30 = vadd.f32 %v1158_v26, %v402_v60  ;;  %v13624_v49 = vand.u32 4294901760, %v8383_v46  ;;  %v13626_v26 = vand.u32 4294901760, %v13615_v55  ;;  %v13628_v60 = vand.u32 4294901760, %v13617_v27 }
 0x186   :  { %v9940_v6 = vadd.f32 %v1804_v42, %v1129_v9  ;;  %v1160_v36 = vpop.f32.mrf.mxu0  ;;  %2901 = vmatprep.mubr.f32.mxu1 %v13618_v2  ;;  %3207 = vmatpush2.msra.mxu0 %v13619_v47  ;;  %v13623_v42 = vand.u32 4294901760, %v13612_v40  ;;  %v407_v2 = vpop.permute.xlu0 %406  ;;  %v13627_v40 = vld [vmem:[#allocation188_spill] sm:$0xff]  ;;  %v13630_v55 = vand.u32 4294901760, %v13620_v0  ;;  %v13632_v27 = vand.u32 4294901760, %v13622_v45 }
 0x187   :  { %v1806_v29 = vpop.f32.mrf.mxu1  ;;  %3619 = vmatprep.subr.mxu1 %v13113_v1  ;;  %3208 = vmatprep.subr.mxu0 %v13113_v1 }
 0x188   :  { %v1173_v57 = vpop.f32.mrf.mxu0  ;;  %2357 = vmatmul.mubr.f32.gmra.mxu0 %v13620_v0  ;;  %3621 = vmatpush2.msra.mxu1 %v13421_v52  ;;  %v13635_v0 = vld [vmem:[#allocation195_spill] sm:$0xff] }
 0x189   :  { %v1811_v9 = vpop.f32.mrf.mxu1  ;;  %2905 = vmatmul.mubr.f32.gmra.mxu1 %v13621_v38  ;;  %2363 = vmatprep.mubr.f32.mxu0 %v13622_v45  ;;  %v1174_v29 = vadd.f32 %v1173_v57, %v407_v2  ;;  %v412_v38 = vpop.permute.xlu1 %411 }
 0x18a   :  { %v9953_v24 = vadd.f32 %v1811_v9, %v1144_v34  ;;  %v1175_v23 = vpop.f32.mrf.mxu0  ;;  %2912 = vmatprep.mubr.f32.mxu1 %v13623_v42  ;;  %3212 = vmatpush2.msra.mxu0 %v13624_v49  ;;  %v13629_v42 = vld [vmem:[#allocation189_spill] sm:$0xff]  ;;  %v13631_v49 = vld [vmem:[#allocation190_spill] sm:$0xff] }
 0x18b   :  { %v1813_v36 = vpop.f32.mrf.mxu1  ;;  %3622 = vmatprep.subr.mxu1 %v13113_v1  ;;  %6845 = vmatprep.subr.mxu0 %v13113_v1  ;;  %v13638_v19 = vand.u32 4294901760, %v13629_v42 }
 0x18c   :  { %v1188_v52 = vpop.f32.mrf.mxu0  ;;  %2366 = vmatmul.mubr.f32.gmra.mxu0 %v13625_v58  ;;  %3624 = vmatpush2.msra.mxu1 %v13424_v56 }
 0x18d   :  { %v1818_v34 = vpop.f32.mrf.mxu1  ;;  %2916 = vmatmul.mubr.f32.gmra.mxu1 %v13626_v26  ;;  %2372 = vmatprep.mubr.f32.mxu0 %v13627_v40  ;;  %v1189_v57 = vadd.f32 %v1188_v52, %v412_v38  ;;  %v13636_v52 = vand.u32 4294901760, %v13627_v40  ;;  %v422_v38 = vpop.permute.xlu1 %421 }
 0x18e   :  { %v9966_v47 = vadd.f32 %v1818_v34, %v1159_v30  ;;  %v1190_v46 = vpop.f32.mrf.mxu0  ;;  %2923 = vmatprep.mubr.f32.mxu1 %v13628_v60  ;;  %7006 = vmatprep.subr.mxu1 %v13113_v1  ;;  %v417_v34 = vpop.permute.xlu0 %416 }
 0x18f   :  { %v1820_v9 = vpop.f32.mrf.mxu1  ;;  %v13633_v46 = vld [vmem:[#allocation193_spill] sm:$0xff] }
 0x190   :  { %v1203_v23 = vpop.f32.mrf.mxu0  ;;  %2375 = vmatmul.mubr.f32.gmra.mxu0 %v13629_v42  ;;  %v13634_v9 = vand.u32 4294901760, %v13625_v58  ;;  %v13639_v58 = vld [vmem:[#allocation199_spill] sm:$0xff]  ;;  %v13642_v22 = vand.u32 4294901760, %v13633_v46  ;;  %v13643_v42 = vld [vmem:[#allocation204_spill] sm:$0xff] }
 0x191   :  { %v1825_v56 = vpop.f32.mrf.mxu1  ;;  %2927 = vmatmul.mubr.f32.gmra.mxu1 %v13630_v55  ;;  %2381 = vmatprep.mubr.f32.mxu0 %v13631_v49 }
 0x192   :  { %v9975_v30 = vadd.f32 %v1825_v56, %v1174_v29  ;;  %v1205_v36 = vpop.f32.mrf.mxu0  ;;  %2934 = vmatprep.mubr.f32.mxu1 %v13632_v27  ;;  %v1204_v56 = vadd.f32 %v1203_v23, %v417_v34  ;;  %v13637_v27 = vld [vmem:[#allocation197_spill] sm:$0xff]  ;;  %v13640_v23 = vand.u32 4294901760, %v13631_v49  ;;  %v427_v34 = vpop.permute.xlu0 %426 }
 0x193   :  { %v1827_v2 = vpop.f32.mrf.mxu1  ;;  %v13647_v17 = vand.u32 4294901760, %v13637_v27 }
 0x194   :  { %v1218_v26 = vpop.f32.mrf.mxu0  ;;  %2384 = vmatmul.mubr.f32.gmra.mxu0 %v13633_v46  ;;  %v13648_v46 = vld [vmem:[#allocation207_spill] sm:$0xff] }
 0x195   :  { %v1832_v60 = vpop.f32.mrf.mxu1  ;;  %2938 = vmatmul.mubr.f32.gmra.mxu1 %v13634_v9  ;;  %2390 = vmatprep.mubr.f32.mxu0 %v13635_v0 }
 0x196   :  { %v9983_v55 = vadd.f32 %v1832_v60, %v1189_v57  ;;  %v1220_v29 = vpop.f32.mrf.mxu0  ;;  %2945 = vmatprep.mubr.f32.mxu1 %v13636_v52  ;;  %v1219_v60 = vadd.f32 %v1218_v26, %v422_v38  ;;  %v13641_v52 = vld [vmem:[#allocation202_spill] sm:$0xff]  ;;  %v13645_v26 = vand.u32 4294901760, %v13635_v0  ;;  %v432_v38 = vpop.permute.xlu1 %431 }
 0x197   :  { %v1834_v45 = vpop.f32.mrf.mxu1 }
 0x198   :  { %v1233_v36 = vpop.f32.mrf.mxu0  ;;  %2393 = vmatmul.mubr.f32.gmra.mxu0 %v13637_v27 }
 0x199   :  { %v1839_v2 = vpop.f32.mrf.mxu1  ;;  %2949 = vmatmul.mubr.f32.gmra.mxu1 %v13638_v19  ;;  %2399 = vmatprep.mubr.f32.mxu0 %v13639_v58 }
 0x19a   :  { %v9991_v9 = vadd.f32 %v1839_v2, %v1204_v56  ;;  %v1235_v57 = vpop.f32.mrf.mxu0  ;;  %2956 = vmatprep.mubr.f32.mxu1 %v13640_v23  ;;  %v1234_v2 = vadd.f32 %v1233_v36, %v427_v34  ;;  %v13646_v23 = vld [vmem:[#allocation205_spill] sm:$0xff]  ;;  %v13650_v36 = vand.u32 4294901760, %v13639_v58  ;;  %v437_v34 = vpop.permute.xlu0 %436 }
 0x19b   :  { %v1841_v40 = vpop.f32.mrf.mxu1 }
 0x19c   :  { %v1248_v29 = vpop.f32.mrf.mxu0  ;;  %2402 = vmatmul.mubr.f32.gmra.mxu0 %v13641_v52 }
 0x19d   :  { %v1846_v45 = vpop.f32.mrf.mxu1  ;;  %2960 = vmatmul.mubr.f32.gmra.mxu1 %v13642_v22  ;;  %2408 = vmatprep.mubr.f32.mxu0 %v13643_v42 }
 0x19e   :  { %v9999_v19 = vadd.f32 %v1846_v45, %v1219_v60  ;;  %v1250_v56 = vpop.f32.mrf.mxu0  ;;  %2967 = vmatprep.mubr.f32.mxu1 %v13645_v26  ;;  %v1249_v45 = vadd.f32 %v1248_v29, %v432_v38  ;;  %v13651_v26 = vld [vmem:[#allocation209_spill] sm:$0xff]  ;;  %v13654_v29 = vand.u32 4294901760, %v13643_v42  ;;  %v442_v38 = vpop.permute.xlu1 %441 }
 0x19f   :  { %v1848_v49 = vpop.f32.mrf.mxu1 }
 0x1a0   :  { %13644 = vst [vmem:[#allocation55_spill] sm:$0xff] %v9999_v19  ;;  %v1263_v57 = vpop.f32.mrf.mxu0  ;;  %2411 = vmatmul.mubr.f32.gmra.mxu0 %v13646_v23  ;;  %v13652_v19 = vand.u32 4294901760, %v13641_v52 }
 0x1a1   :  { %v1853_v40 = vpop.f32.mrf.mxu1  ;;  %2971 = vmatmul.mubr.f32.gmra.mxu1 %v13647_v17  ;;  %2417 = vmatprep.mubr.f32.mxu0 %v13648_v46 }
 0x1a2   :  { %v10007_v22 = vadd.f32 %v1853_v40, %v1234_v2  ;;  %v1265_v60 = vpop.f32.mrf.mxu0  ;;  %2978 = vmatprep.mubr.f32.mxu1 %v13650_v36  ;;  %v1264_v2 = vadd.f32 %v1263_v57, %v437_v34  ;;  %v13655_v36 = vand.u32 4294901760, %v13646_v23  ;;  %v13657_v57 = vand.u32 4294901760, %v13648_v46  ;;  %v208_v34 = vld [vmem:[%s12406_s2 + $0x160] sm:$0xff]  ;;  %v207_v46 = vld [vmem:[%s12406_s2 + $0x158] sm:$0xff] }
 0x1a3   :  { %v1855_v0 = vpop.f32.mrf.mxu1 }
 0x1a4   :  { %13649 = vst [vmem:[#allocation56_spill] sm:$0xff] %v10007_v22  ;;  %v1278_v56 = vpop.f32.mrf.mxu0  ;;  %2420 = vmatmul.mubr.f32.gmra.mxu0 %v13651_v26  ;;  %v447_v0 = vpop.permute.xlu0 %446 }
 0x1a5   :  { %v1860_v49 = vpop.f32.mrf.mxu1  ;;  %2982 = vmatmul.mubr.f32.gmra.mxu1 %v13652_v19  ;;  %2426 = vmatprep.mubr.f32.mxu0 %v9370_v14 }
 0x1a6   :  { %v10015_v17 = vadd.f32 %v1860_v49, %v1249_v45  ;;  %v1280_v27 = vpop.f32.mrf.mxu0  ;;  %2989 = vmatprep.mubr.f32.mxu1 %v13654_v29  ;;  %v1279_v45 = vadd.f32 %v1278_v56, %v442_v38  ;;  %v10041_v38 = vand.u32 4294901760, %v208_v34 }
 0x1a7   :  { %v1862_v58 = vpop.f32.mrf.mxu1  ;;  %v13658_v27 = vand.u32 4294901760, %v13651_v26  ;;  %v10044_v26 = vand.u32 4294901760, %v207_v46 }
 0x1a8   :  { %13653 = vst [vmem:[#allocation50_spill] sm:$0xff] %v10015_v17  ;;  %v1293_v40 = vpop.f32.mrf.mxu0  ;;  %2429 = vmatmul.mubr.f32.gmra.mxu0 %v9385_v61  ;;  %v13660_v58 = vand.u32 4294901760, %v9370_v14  ;;  %13661 = vst [vmem:[#allocation59_spill] sm:$0xff] %v10041_v38 }
 0x1a9   :  { %v1867_v60 = vpop.f32.mrf.mxu1  ;;  %2993 = vmatmul.mubr.f32.gmra.mxu1 %v13655_v36  ;;  %2435 = vmatprep.mubr.f32.mxu0 %v9396_v63  ;;  %v1294_v29 = vadd.f32 %v1293_v40, %v447_v0  ;;  %v452_v36 = vpop.permute.xlu1 %451  ;;  %13662 = vst [vmem:[#allocation61_spill] sm:$0xff] %v10044_v26 }
 0x1aa   :  { %v10023_v52 = vadd.f32 %v1867_v60, %v1264_v2  ;;  %v1295_v19 = vpop.f32.mrf.mxu0  ;;  %3000 = vmatprep.mubr.f32.mxu1 %v13657_v57  ;;  %v206_v57 = vld [vmem:[%s12406_s2 + $0x150] sm:$0xff] }
 0x1ab   :  { %v1869_v42 = vpop.f32.mrf.mxu1 }
 0x1ac   :  { %13656 = vst [vmem:[#allocation51_spill] sm:$0xff] %v10023_v52  ;;  %v1308_v49 = vpop.f32.mrf.mxu0  ;;  %2438 = vmatmul.mubr.f32.gmra.mxu0 %v9408_v32  ;;  %v13663_v42 = vand.u32 4294901760, %v9385_v61  ;;  %v10063_v61 = vsub.f32 %v207_v46, %v10044_v26 }
 0x1ad   :  { %v1874_v23 = vpop.f32.mrf.mxu1  ;;  %3004 = vmatmul.mubr.f32.gmra.mxu1 %v13658_v27  ;;  %2444 = vmatprep.mubr.f32.mxu0 %v9422_v39  ;;  %v1309_v0 = vadd.f32 %v1308_v49, %v452_v36  ;;  %v10057_v27 = vsub.f32 %v208_v34, %v10041_v38  ;;  %v205_v49 = vld [vmem:[%s12406_s2 + $0x148] sm:$0xff]  ;;  %v13670_v34 = vld [vmem:[#allocation42_spill] sm:$0xff] }
 0x1ae   :  { %v10037_v56 = vadd.f32 %v1874_v23, %v1279_v45  ;;  %v1310_v2 = vpop.f32.mrf.mxu0  ;;  %3011 = vmatprep.mubr.f32.mxu1 %v13660_v58  ;;  %v13665_v23 = vand.u32 4294901760, %v9396_v63  ;;  %v457_v58 = vpop.permute.xlu0 %456  ;;  %13668 = vst [vmem:[#allocation8_spill] sm:$0xff] %v10063_v61  ;;  %v13669_v63 = vand.u32 4294901760, %v9408_v32  ;;  %v10079_v52 = vand.u32 4294901760, %v205_v49 }
 0x1af   :  { %v1876_v60 = vpop.f32.mrf.mxu1  ;;  %13666 = vst [vmem:[#allocation68_spill] sm:$0xff] %v10057_v27  ;;  %v12854_v46 = vand.u32 4294901760, %v10057_v27 }
 0x1b0   :  { %13659 = vst [vmem:[#allocation53_spill] sm:$0xff] %v10037_v56  ;;  %v1323_v19 = vpop.f32.mrf.mxu0  ;;  %2447 = vmatmul.mubr.f32.gmra.mxu0 %v9434_v53  ;;  %v10059_v60 = vand.u32 4294901760, %v206_v57  ;;  %13674 = vst [vmem:[#allocation74_spill] sm:$0xff] %v10079_v52 }
 0x1b1   :  { %v1881_v45 = vpop.f32.mrf.mxu1  ;;  %3015 = vmatmul.mubr.f32.gmra.mxu1 %v13663_v42  ;;  %2453 = vmatprep.mubr.f32.mxu0 %v9445_v51  ;;  %v1324_v42 = vadd.f32 %v1323_v19, %v457_v58  ;;  %v204_v19 = vld [vmem:[%s12406_s2 + $0x140] sm:$0xff]  ;;  %v13676_v58 = vand.u32 4294901760, %v9434_v53 }
 0x1b2   :  { %v10052_v14 = vadd.f32 %v1881_v45, %v1294_v29  ;;  %v1325_v40 = vpop.f32.mrf.mxu0  ;;  %3022 = vmatprep.mubr.f32.mxu1 %v13665_v23  ;;  %13667 = vst [vmem:[#allocation69_spill] sm:$0xff] %v10059_v60  ;;  %v467_v17 = vpop.permute.xlu0 %466 }
 0x1b3   :  { %v1883_v2 = vpop.f32.mrf.mxu1  ;;  %v13672_v40 = vand.u32 4294901760, %v9422_v39 }
 0x1b4   :  { %13664 = vst [vmem:[#allocation63_spill] sm:$0xff] %v10052_v14  ;;  %v1338_v56 = vpop.f32.mrf.mxu0  ;;  %2456 = vmatmul.mubr.f32.gmra.mxu0 %v9459_v31  ;;  %v462_v2 = vpop.permute.xlu1 %461  ;;  %v10077_v14 = vsub.f32 %v206_v57, %v10059_v60 }
 0x1b5   :  { %v1888_v29 = vpop.f32.mrf.mxu1  ;;  %3026 = vmatmul.mubr.f32.gmra.mxu1 %v13669_v63  ;;  %3214 = vmatprep.mubr.f32.mxu0 %v13670_v34  ;;  %v13675_v63 = vld [vmem:[#allocation45_spill] sm:$0xff] }
 0x1b6   :  { %v10071_v36 = vadd.f32 %v1888_v29, %v1309_v0  ;;  %v1340_v45 = vpop.f32.mrf.mxu0  ;;  %3033 = vmatprep.mubr.f32.mxu1 %v13672_v40  ;;  %13673 = vst [vmem:[#allocation71_spill] sm:$0xff] %v10077_v14  ;;  %v13677_v29 = vld [vmem:[#allocation47_spill] sm:$0xff]  ;;  %v1339_v40 = vadd.f32 %v1338_v56, %v462_v2  ;;  %v4479_v0 = vsub.f32 %v10057_v27, %v12854_v46  ;;  %v13682_v2 = vand.u32 4294901760, %v10063_v61  ;;  %v13684_v46 = vld [vmem:[#allocation54_spill] sm:$0xff] }
 0x1b7   :  { %v1890_v23 = vpop.f32.mrf.mxu1 }
 0x1b8   :  { %13671 = vst [vmem:[#allocation70_spill] sm:$0xff] %v10071_v36  ;;  %v1353_v32 = vpop.f32.mrf.mxu0  ;;  %3216 = vmatmul.mubr.f32.vlgmr.msra.gmra.mxu0 %v13675_v63  ;;  %v13679_v23 = vand.u32 4294901760, %v9445_v51  ;;  %v13681_v51 = vld [vmem:[#allocation52_spill] sm:$0xff]  ;;  %v4480_v27 = vand.u32 4294901760, %v4479_v0 }
 0x1b9   :  { %v1895_v39 = vpop.f32.mrf.mxu1  ;;  %3037 = vmatmul.mubr.f32.gmra.mxu1 %v13676_v58  ;;  %3221 = vmatprep.mubr.f32.mxu0 %v13677_v29  ;;  %v4486_v58 = vsub.f32 %v10063_v61, %v13682_v2  ;;  %v472_v61 = vpop.permute.xlu1 %471 }
 0x1ba   :  { %v10089_v45 = vadd.f32 %v1895_v39, %v1324_v42  ;;  %v1355_v57 = vpop.f32.mrf.mxu0  ;;  %3044 = vmatprep.mubr.f32.mxu1 %v13679_v23  ;;  %6846 = vmatpush3.msra.mxu0 %v10041_v38  ;;  %v10100_v42 = vsub.f32 %v205_v49, %v10079_v52  ;;  %v10102_v39 = vand.u32 4294901760, %v204_v19  ;;  %v13683_v23 = vand.u32 4294901760, %v9459_v31 }
 0x1bb   :  { %v1897_v36 = vpop.f32.mrf.mxu1  ;;  %6847 = vmatprep.subr.mxu0 %v13113_v1  ;;  %v1354_v38 = vadd.f32 %v1353_v32, %v467_v17  ;;  %v202_v17 = vld [vmem:[%s12406_s2 + $0x130] sm:$0xff]  ;;  %v13689_v32 = vld [vmem:[#allocation60_spill] sm:$0xff]  ;;  %v4487_v0 = vand.u32 4294901760, %v4486_v58 }
 0x1bc   :  { %13678 = vst [vmem:[#allocation76_spill] sm:$0xff] %v10089_v45  ;;  %13680 = vst [vmem:[#allocation80_spill] sm:$0xff] %v10102_v39  ;;  %v1368_v56 = vpop.f32.mrf.mxu0  ;;  %3223 = vmatmul.mubr.f32.gmra.mxu0 %v13681_v51  ;;  %v203_v36 = vld [vmem:[%s12406_s2 + $0x138] sm:$0xff]  ;;  %v13686_v45 = vand.u32 4294901760, %v10077_v14 }
 0x1bd   :  { %v1902_v57 = vpop.f32.mrf.mxu1  ;;  %3048 = vmatmul.mubr.f32.gmra.mxu1 %v13683_v23  ;;  %3228 = vmatprep.mubr.f32.mxu0 %v13684_v46  ;;  %v1369_v23 = vadd.f32 %v1368_v56, %v472_v61 }
 0x1be   :  { %v10114_v49 = vadd.f32 %v1902_v57, %v1339_v40  ;;  %v1370_v53 = vpop.f32.mrf.mxu0  ;;  %3626 = vmatprep.mubr.f32.mxu1 %v13670_v34  ;;  %6848 = vmatpush3.msra.mxu0 %v10044_v26  ;;  %v4493_v31 = vsub.f32 %v10077_v14, %v13686_v45  ;;  %v10124_v40 = vsub.f32 %v204_v19, %v10102_v39  ;;  %v10137_v26 = vand.u32 4294901760, %v202_v17 }
 0x1bf   :  { %v1904_v2 = vpop.f32.mrf.mxu1  ;;  %6849 = vmatprep.subr.mxu0 %v13113_v1  ;;  %v10126_v53 = vand.u32 4294901760, %v203_v36 }
 0x1c0   :  { %13685 = vst [vmem:[#allocation82_spill] sm:$0xff] %v10114_v49  ;;  %13687 = vst [vmem:[#allocation9_spill] sm:$0xff] %v10124_v40  ;;  %v1383_v34 = vpop.f32.mrf.mxu0  ;;  %3230 = vmatmul.mubr.f32.gmra.mxu0 %v13689_v32  ;;  %v13690_v2 = vld [vmem:[#allocation62_spill] sm:$0xff]  ;;  %v477_v49 = vpop.permute.xlu0 %476  ;;  %v4494_v58 = vand.u32 4294901760, %v4493_v31 }
 0x1c1   :  { %13688 = vst [vmem:[#allocation86_spill] sm:$0xff] %v10126_v53  ;;  %v1909_v57 = vpop.f32.mrf.mxu1  ;;  %3628 = vmatmul.mubr.f32.vlgmr.msra.gmra.mxu1 %v13675_v63  ;;  %3235 = vmatprep.mubr.f32.mxu0 %v13690_v2  ;;  %13691 = vst [vmem:[#allocation87_spill] sm:$0xff] %v10137_v26  ;;  %v13692_v63 = vand.u32 4294901760, %v10100_v42 }
 0x1c2   :  { %v10134_v45 = vadd.f32 %v1909_v57, %v1354_v38  ;;  %7007 = vmatpush3.msra.mxu1 %v4480_v27  ;;  %v1385_v19 = vpop.f32.mrf.mxu0  ;;  %3633 = vmatprep.mubr.f32.mxu1 %v13677_v29  ;;  %v10146_v27 = vsub.f32 %v203_v36, %v10126_v53  ;;  %v13694_v29 = vld [vmem:[#allocation64_spill] sm:$0xff]  ;;  %v13695_v57 = vld [vmem:[#allocation65_spill] sm:$0xff]  ;;  %v1384_v36 = vadd.f32 %v1383_v34, %v477_v49 }
 0x1c3   :  { %v1911_v14 = vpop.f32.mrf.mxu1  ;;  %7008 = vmatprep.subr.mxu1 %v13113_v1  ;;  %6850 = vmatpush3.msra.mxu0 %v10059_v60  ;;  %v4500_v22 = vsub.f32 %v10100_v42, %v13692_v63 }
 0x1c4   :  { %13693 = vst [vmem:[#allocation88_spill] sm:$0xff] %v10146_v27  ;;  %v2061_v61 = vpop.f32.mrf.mxu0  ;;  %3237 = vmatmul.mubr.f32.gmra.mxu0 %v13694_v29  ;;  %7009 = vmatpush3.msra.mxu1 %v4487_v0  ;;  %v201_v14 = vld [vmem:[%s12406_s2 + $0x128] sm:$0xff]  ;;  %v10160_v0 = vsub.f32 %v202_v17, %v10137_v26  ;;  %v200_v17 = vld [vmem:[%s12406_s2 + $0x120] sm:$0xff] }
 0x1c5   :  { %v1916_v56 = vpop.f32.mrf.mxu1  ;;  %v2062_v31 = vadd.f32 %v2061_v61, %v9580_v15  ;;  %3635 = vmatmul.mubr.f32.gmra.mxu1 %v13681_v51  ;;  %3242 = vmatprep.mubr.f32.mxu0 %v13695_v57  ;;  %v4501_v15 = vand.u32 4294901760, %v4500_v22  ;;  %v13697_v51 = vand.u32 4294901760, %v10124_v40 }
 0x1c6   :  { %v10155_v19 = vadd.f32 %v1916_v56, %v1369_v23  ;;  %v2063_v63 = vpop.f32.mrf.mxu0  ;;  %3640 = vmatprep.mubr.f32.mxu1 %v13684_v46  ;;  %7010 = vmatprep.subr.mxu1 %v13113_v1  ;;  %13696 = vst [vmem:[#allocation89_spill] sm:$0xff] %v10160_v0  ;;  %v10167_v56 = vand.u32 4294901760, %v201_v14  ;;  %v13699_v46 = vld [vmem:[#allocation66_spill] sm:$0xff] }
 0x1c7   :  { %v1918_v38 = vpop.f32.mrf.mxu1  ;;  %7011 = vmatpush3.msra.mxu1 %v4494_v58  ;;  %6851 = vmatprep.subr.mxu0 %v13113_v1  ;;  %v4507_v61 = vsub.f32 %v10124_v40, %v13697_v51  ;;  %v13700_v58 = vld [vmem:[#allocation67_spill] sm:$0xff]  ;;  %v12871_v51 = vand.u32 4294901760, %v10160_v0 }
 0x1c8   :  { %13698 = vst [vmem:[#allocation92_spill] sm:$0xff] %v10167_v56  ;;  %v2070_v49 = vpop.f32.mrf.mxu0  ;;  %3244 = vmatmul.mubr.f32.gmra.mxu0 %v13699_v46  ;;  %7012 = vmatprep.subr.mxu1 %v13113_v1 }
 0x1c9   :  { %v1923_v34 = vpop.f32.mrf.mxu1  ;;  %v2071_v22 = vadd.f32 %v2070_v49, %v9593_v41  ;;  %3642 = vmatmul.mubr.f32.gmra.mxu1 %v13689_v32  ;;  %3249 = vmatprep.mubr.f32.mxu0 %v13700_v58  ;;  %v4508_v40 = vand.u32 4294901760, %v4507_v61  ;;  %v13701_v41 = vand.u32 4294901760, %v10146_v27  ;;  %v10187_v49 = vsub.f32 %v201_v14, %v10167_v56 }
 0x1ca   :  { %v10177_v38 = vadd.f32 %v1923_v34, %v1384_v36  ;;  %v2072_v63 = vpop.f32.mrf.mxu0  ;;  %3647 = vmatprep.mubr.f32.mxu1 %v13690_v2  ;;  %6852 = vmatpush3.msra.mxu0 %v10079_v52  ;;  %v10189_v36 = vand.u32 4294901760, %v200_v17  ;;  %v13703_v2 = vld [vmem:[#allocation72_spill] sm:$0xff] }
 0x1cb   :  { %v1925_v23 = vpop.f32.mrf.mxu1  ;;  %7013 = vmatpush3.msra.mxu1 %v4501_v15  ;;  %6853 = vmatprep.subr.mxu0 %v13113_v1  ;;  %v4514_v32 = vsub.f32 %v10146_v27, %v13701_v41  ;;  %13702 = vst [vmem:[#allocation94_spill] sm:$0xff] %v10187_v49  ;;  %v199_v15 = vld [vmem:[%s12406_s2 + $0x118] sm:$0xff]  ;;  %v13704_v63 = vld [vmem:[#allocation73_spill] sm:$0xff]  ;;  %v4521_v27 = vsub.f32 %v10160_v0, %v12871_v51 }
 0x1cc   :  { %v2079_v34 = vpop.f32.mrf.mxu0  ;;  %3251 = vmatmul.mubr.f32.gmra.mxu0 %v13703_v2  ;;  %7014 = vmatprep.subr.mxu1 %v13113_v1 }
 0x1cd   :  { %v2080_v61 = vadd.f32 %v2079_v34, %v9606_v13  ;;  %v2565_v23 = vpop.f32.mrf.mxu1  ;;  %3649 = vmatmul.mubr.f32.gmra.mxu1 %v13694_v29  ;;  %3256 = vmatprep.mubr.f32.mxu0 %v13704_v63  ;;  %v4515_v13 = vand.u32 4294901760, %v4514_v32  ;;  %v10209_v34 = vsub.f32 %v200_v17, %v10189_v36  ;;  %v13708_v32 = vld [vmem:[#allocation77_spill] sm:$0xff]  ;;  %v4522_v29 = vand.u32 4294901760, %v4521_v27 }
 0x1ce   :  { %v10199_v14 = vadd.f32 %v2565_v23, %v2062_v31  ;;  %v2081_v41 = vpop.f32.mrf.mxu0  ;;  %3654 = vmatprep.mubr.f32.mxu1 %v13695_v57  ;;  %6854 = vmatpush3.msra.mxu0 %v10102_v39  ;;  %v10211_v31 = vand.u32 4294901760, %v199_v15  ;;  %v13707_v57 = vld [vmem:[#allocation75_spill] sm:$0xff]  ;;  %v13709_v39 = vand.u32 4294901760, %v10187_v49 }
 0x1cf   :  { %v2567_v52 = vpop.f32.mrf.mxu1  ;;  %7015 = vmatpush3.msra.mxu1 %v4508_v40  ;;  %6855 = vmatprep.subr.mxu0 %v13113_v1  ;;  %13705 = vst [vmem:[#allocation97_spill] sm:$0xff] %v10209_v34 }
 0x1d0   :  { %13706 = vst [vmem:[#allocation99_spill] sm:$0xff] %v10211_v31  ;;  %v2088_v23 = vpop.f32.mrf.mxu0  ;;  %3258 = vmatmul.mubr.f32.gmra.mxu0 %v13707_v57  ;;  %7016 = vmatprep.subr.mxu1 %v13113_v1  ;;  %v198_v52 = vld [vmem:[%s12406_s2 + $0x110] sm:$0xff] }
 0x1d1   :  { %v2089_v40 = vadd.f32 %v2088_v23, %v9619_v11  ;;  %v2576_v41 = vpop.f32.mrf.mxu1  ;;  %3656 = vmatmul.mubr.f32.gmra.mxu1 %v13699_v46  ;;  %3263 = vmatprep.mubr.f32.mxu0 %v13708_v32  ;;  %v4528_v11 = vsub.f32 %v10187_v49, %v13709_v39  ;;  %v10231_v23 = vsub.f32 %v199_v15, %v10211_v31  ;;  %v13713_v49 = vand.u32 4294901760, %v10209_v34 }
 0x1d2   :  { %v10221_v17 = vadd.f32 %v2576_v41, %v2071_v22  ;;  %v2090_v51 = vpop.f32.mrf.mxu0  ;;  %3661 = vmatprep.mubr.f32.mxu1 %v13700_v58  ;;  %6856 = vmatpush3.msra.mxu0 %v10126_v53  ;;  %v10233_v22 = vand.u32 4294901760, %v198_v52  ;;  %v13711_v58 = vld [vmem:[#allocation78_spill] sm:$0xff] }
 0x1d3   :  { %v2578_v0 = vpop.f32.mrf.mxu1  ;;  %7017 = vmatpush3.msra.mxu1 %v4515_v13  ;;  %6857 = vmatprep.subr.mxu0 %v13113_v1  ;;  %13710 = vst [vmem:[#allocation101_spill] sm:$0xff] %v10231_v23  ;;  %v13712_v13 = vld [vmem:[#allocation79_spill] sm:$0xff]  ;;  %v4529_v46 = vand.u32 4294901760, %v4528_v11 }
 0x1d4   :  { %v2097_v51 = vpop.f32.mrf.mxu0  ;;  %3265 = vmatmul.mubr.f32.gmra.mxu0 %v13711_v58  ;;  %7018 = vmatprep.subr.mxu1 %v13113_v1  ;;  %v13715_v11 = vld [vmem:[#allocation83_spill] sm:$0xff] }
 0x1d5   :  { %v2098_v27 = vadd.f32 %v2097_v51, %v9635_v12  ;;  %v2587_v0 = vpop.f32.mrf.mxu1  ;;  %3663 = vmatmul.mubr.f32.gmra.mxu1 %v13703_v2  ;;  %3270 = vmatprep.mubr.f32.mxu0 %v13712_v13  ;;  %v4535_v12 = vsub.f32 %v10209_v34, %v13713_v49  ;;  %v12878_v2 = vand.u32 4294901760, %v10231_v23  ;;  %v10250_v51 = vsub.f32 %v198_v52, %v10233_v22  ;;  %v197_v52 = vld [vmem:[%s12406_s2 + $0x108] sm:$0xff] }
 0x1d6   :  { %v10240_v39 = vadd.f32 %v2587_v0, %v2080_v61  ;;  %v2099_v41 = vpop.f32.mrf.mxu0  ;;  %3668 = vmatprep.mubr.f32.mxu1 %v13704_v63  ;;  %6858 = vmatpush3.msra.mxu0 %v10137_v26  ;;  %v13714_v0 = vld [vmem:[#allocation81_spill] sm:$0xff] }
 0x1d7   :  { %v2589_v15 = vpop.f32.mrf.mxu1  ;;  %7019 = vmatpush3.msra.mxu1 %v4522_v29  ;;  %6859 = vmatprep.subr.mxu0 %v13113_v1 }
 0x1d8   :  { %v2106_v61 = vpop.f32.mrf.mxu0  ;;  %3272 = vmatmul.mubr.f32.gmra.mxu0 %v13714_v0  ;;  %7020 = vmatprep.subr.mxu1 %v13113_v1 }
 0x1d9   :  { %v2107_v63 = vadd.f32 %v2106_v61, %v9650_v20  ;;  %v2598_v29 = vpop.f32.mrf.mxu1  ;;  %3670 = vmatmul.mubr.f32.gmra.mxu1 %v13707_v57  ;;  %3277 = vmatprep.mubr.f32.mxu0 %v13715_v11  ;;  %v4536_v20 = vand.u32 4294901760, %v4535_v12  ;;  %v4542_v57 = vsub.f32 %v10231_v23, %v12878_v2  ;;  %v10269_v61 = vand.u32 4294901760, %v197_v52 }
 0x1da   :  { %v10257_v41 = vadd.f32 %v2598_v29, %v2089_v40  ;;  %v2108_v49 = vpop.f32.mrf.mxu0  ;;  %3675 = vmatprep.mubr.f32.mxu1 %v13708_v32  ;;  %6860 = vmatpush3.msra.mxu0 %v10167_v56  ;;  %v13717_v29 = vld [vmem:[#allocation84_spill] sm:$0xff]  ;;  %v13720_v56 = vld [vmem:[#allocation90_spill] sm:$0xff] }
 0x1db   :  { %v2600_v15 = vpop.f32.mrf.mxu1  ;;  %7021 = vmatpush3.msra.mxu1 %v4529_v46  ;;  %6861 = vmatprep.subr.mxu0 %v13113_v1  ;;  %13716 = vst [vmem:[#allocation10_spill] sm:$0xff] %v10269_v61  ;;  %v13718_v46 = vld [vmem:[#allocation85_spill] sm:$0xff]  ;;  %v10277_v12 = vsub.f32 %v197_v52, %v10269_v61 }
 0x1dc   :  { %v2115_v32 = vpop.f32.mrf.mxu0  ;;  %3279 = vmatmul.mubr.f32.gmra.mxu0 %v13717_v29  ;;  %7022 = vmatprep.subr.mxu1 %v13113_v1 }
 0x1dd   :  { %v2116_v49 = vadd.f32 %v2115_v32, %v9665_v25  ;;  %v2609_v15 = vpop.f32.mrf.mxu1  ;;  %3677 = vmatmul.mubr.f32.gmra.mxu1 %v13711_v58  ;;  %3284 = vmatprep.mubr.f32.mxu0 %v13718_v46  ;;  %v4543_v25 = vand.u32 4294901760, %v4542_v57  ;;  %v13719_v32 = vand.u32 4294901760, %v10250_v51  ;;  %v12885_v34 = vand.u32 4294901760, %v10277_v12 }
 0x1de   :  { %v10279_v2 = vadd.f32 %v2609_v15, %v2098_v27  ;;  %v2117_v40 = vpop.f32.mrf.mxu0  ;;  %3682 = vmatprep.mubr.f32.mxu1 %v13712_v13  ;;  %6862 = vmatpush3.msra.mxu0 %v10189_v36 }
 0x1df   :  { %v2611_v23 = vpop.f32.mrf.mxu1  ;;  %7023 = vmatpush3.msra.mxu1 %v4536_v20  ;;  %6863 = vmatprep.subr.mxu0 %v13113_v1  ;;  %v4549_v58 = vsub.f32 %v10250_v51, %v13719_v32 }
 0x1e0   :  { %v2124_v52 = vpop.f32.mrf.mxu0  ;;  %3286 = vmatmul.mubr.f32.gmra.mxu0 %v13720_v56  ;;  %7024 = vmatprep.subr.mxu1 %v13113_v1  ;;  %v13721_v23 = vld [vmem:[#allocation91_spill] sm:$0xff] }
 0x1e1   :  { %v2125_v27 = vadd.f32 %v2124_v52, %v9680_v8  ;;  %v2620_v13 = vpop.f32.mrf.mxu1  ;;  %3684 = vmatmul.mubr.f32.gmra.mxu1 %v13714_v0  ;;  %3291 = vmatprep.mubr.f32.mxu0 %v13721_v23  ;;  %v4550_v15 = vand.u32 4294901760, %v4549_v58  ;;  %v4556_v8 = vsub.f32 %v10277_v12, %v12885_v34  ;;  %v13722_v0 = vld [vmem:[#allocation93_spill] sm:$0xff] }
 0x1e2   :  { %v10293_v20 = vadd.f32 %v2620_v13, %v2107_v63  ;;  %v2126_v57 = vpop.f32.mrf.mxu0  ;;  %3689 = vmatprep.mubr.f32.mxu1 %v13715_v11  ;;  %6864 = vmatpush3.msra.mxu0 %v10211_v31  ;;  %v13723_v11 = vld [vmem:[#allocation95_spill] sm:$0xff] }
 0x1e3   :  { %v2622_v40 = vpop.f32.mrf.mxu1  ;;  %7025 = vmatpush3.msra.mxu1 %v4543_v25  ;;  %6865 = vmatprep.subr.mxu0 %v13113_v1  ;;  %v4557_v57 = vand.u32 4294901760, %v4556_v8 }
 0x1e4   :  { %v2133_v32 = vpop.f32.mrf.mxu0  ;;  %3293 = vmatmul.mubr.f32.gmra.mxu0 %v13722_v0  ;;  %7026 = vmatprep.subr.mxu1 %v13113_v1 }
 0x1e5   :  { %v2134_v63 = vadd.f32 %v2133_v32, %v9694_v16  ;;  %v2631_v52 = vpop.f32.mrf.mxu1  ;;  %3691 = vmatmul.mubr.f32.gmra.mxu1 %v13717_v29  ;;  %3298 = vmatprep.mubr.f32.mxu0 %v13723_v11  ;;  %v196_v16 = vld [vmem:[%s12406_s2 + $0x100] sm:$0xff]  ;;  %s7872_s2 = smov [#allocation5]  }
 0x1e6   :  { %v10306_v25 = vadd.f32 %v2631_v52, %v2116_v49  ;;  %v2135_v13 = vpop.f32.mrf.mxu0  ;;  %3696 = vmatprep.mubr.f32.mxu1 %v13718_v46  ;;  %6866 = vmatpush3.msra.mxu0 %v10233_v22  ;;  %v13724_v29 = vld [vmem:[#allocation96_spill] sm:$0xff]  ;;  %v10316_v49 = vand.u32 4294901760, %v196_v16  ;;  %s6485_s29 = sshll.u32 %s7872_s2, 4  ;;  %s6486_s29 = int_to_ptr.vmem [resolvable:$true] %s6485_s29 }
 0x1e7   :  { %v2633_v58 = vpop.f32.mrf.mxu1  ;;  %7027 = vmatpush3.msra.mxu1 %v4550_v15  ;;  %6867 = vmatprep.subr.mxu0 %v13113_v1  ;;  %v13726_v15 = vld [vmem:[#allocation98_spill] sm:$0xff]  ;;  %s7842_s30 = scalar_lea.vmem %s6486_s29, 5760  ;;  %p7847_p6 = scmp.lt.s32.totalorder %s6486_s29, %s6486_s29 }
 0x1e8   :  { %v2142_v40 = vpop.f32.mrf.mxu0  ;;  %3300 = vmatmul.mubr.f32.gmra.mxu0 %v13724_v29  ;;  %7028 = vmatprep.subr.mxu1 %v13113_v1  ;;  %13725 = vst [vmem:[#allocation105_spill] sm:$0xff] %v10316_v49  ;;  %v10326_v13 = vsub.f32 %v196_v16, %v10316_v49  ;;  %p7843_p5 = scmp.ne.s32.totalorder %s6486_s29, %s7842_s30  ;;  %p7848_p7 = scmp.lt.s32.totalorder %s7842_s30, %s7842_s30 }
 0x1e9   :  { %v2143_v46 = vadd.f32 %v2142_v40, %v9706_v54  ;;  %v2642_v32 = vpop.f32.mrf.mxu1  ;;  %3698 = vmatmul.mubr.f32.gmra.mxu1 %v13720_v56  ;;  %3305 = vmatprep.mubr.f32.mxu0 %v13726_v15  ;;  %v13728_v40 = vld [vmem:[#allocation100_spill] sm:$0xff] }
 0x1ea   :  { %v10321_v52 = vadd.f32 %v2642_v32, %v2125_v27  ;;  %v2144_v8 = vpop.f32.mrf.mxu0  ;;  %3703 = vmatprep.mubr.f32.mxu1 %v13721_v23  ;;  %6868 = vmatpush3.msra.mxu0 %v10269_v61  ;;  %13727 = vst [vmem:[#allocation106_spill] sm:$0xff] %v10326_v13  ;;  %v12886_v56 = vand.u32 4294901760, %v10326_v13  ;;  %v13729_v23 = vld [vmem:[#allocation102_spill] sm:$0xff]  ;;  %p7849_p8 = por %p7848_p7, %p7847_p6 }
 0x1eb   :  { %v2644_v58 = vpop.f32.mrf.mxu1  ;;  %7029 = vmatpush3.msra.mxu1 %v4557_v57  ;;  %6869 = vmatprep.subr.mxu0 %v13113_v1 }
 0x1ec   :  { %v2151_v54 = vpop.f32.mrf.mxu0  ;;  %3307 = vmatmul.mubr.f32.gmra.mxu0 %v13728_v40  ;;  %7030 = vmatprep.subr.mxu1 %v13113_v1  ;;  %v4563_v57 = vsub.f32 %v10326_v13, %v12886_v56  ;;  %p7850_p9 = pnand %p7849_p8, %p7843_p5 }
 0x1ed   :  { %v2152_v27 = vadd.f32 %v2151_v54, %v9719_v18  ;;  %v2653_v32 = vpop.f32.mrf.mxu1  ;;  %3705 = vmatmul.mubr.f32.gmra.mxu1 %v13722_v0  ;;  %3312 = vmatprep.mubr.f32.mxu0 %v13729_v23  ;;  %v13730_v54 = vld [vmem:[#allocation103_spill] sm:$0xff] }
 0x1ee   :  { %v10335_v16 = vadd.f32 %v2653_v32, %v2134_v63  ;;  %v2153_v8 = vpop.f32.mrf.mxu0  ;;  %3710 = vmatprep.mubr.f32.mxu1 %v13723_v11  ;;  %6870 = vmatpush3.msra.mxu0 %v10316_v49  ;;  %v4564_v0 = vand.u32 4294901760, %v4563_v57  ;;  %v13731_v32 = vld [vmem:[#allocation104_spill] sm:$0xff]  ;;  %v13732_v49 = vld [vmem:[#allocation109_spill] sm:$0xff] }
 0x1ef   :  { %v2655_v58 = vpop.f32.mrf.mxu1  ;;  %7167 = vmatprep.subr.mxu0 %v13113_v1 }
 0x1f0   :  { %v2160_v18 = vpop.f32.mrf.mxu0  ;;  %3314 = vmatmul.mubr.f32.gmra.mxu0 %v13730_v54  ;;  %7031 = vmatpush3.msra.mxu1 %v4564_v0 }
 0x1f1   :  { %v2161_v34 = vadd.f32 %v2160_v18, %v9732_v48  ;;  %v2664_v63 = vpop.f32.mrf.mxu1  ;;  %3712 = vmatmul.mubr.f32.gmra.mxu1 %v13724_v29  ;;  %3319 = vmatprep.mubr.f32.mxu0 %v13731_v32  ;;  %v13733_v29 = vld [vmem:[#allocation110_spill] sm:$0xff] }
 0x1f2   :  { %v10347_v11 = vadd.f32 %v2664_v63, %v2143_v46  ;;  %v2162_v8 = vpop.f32.mrf.mxu0  ;;  %3717 = vmatprep.mubr.f32.mxu1 %v13726_v15  ;;  %7328 = vmatprep.subr.mxu1 %v13113_v1  ;;  %v13734_v63 = vld [vmem:[#allocation112_spill] sm:$0xff] }
 0x1f3   :  { %v2666_v58 = vpop.f32.mrf.mxu1 }
 0x1f4   :  { %v2169_v56 = vpop.f32.mrf.mxu0  ;;  %3321 = vmatmul.mubr.f32.gmra.mxu0 %v13732_v49 }
 0x1f5   :  { %v2170_v57 = vadd.f32 %v2169_v56, %v9745_v7  ;;  %v2675_v48 = vpop.f32.mrf.mxu1  ;;  %3719 = vmatmul.mubr.f32.gmra.mxu1 %v13728_v40  ;;  %3326 = vmatprep.mubr.f32.mxu0 %v13733_v29  ;;  %v13735_v7 = vld [vmem:[#allocation114_spill] sm:$0xff] }
 0x1f6   :  { %v10355_v18 = vadd.f32 %v2675_v48, %v2152_v27  ;;  %v2171_v46 = vpop.f32.mrf.mxu0  ;;  %3724 = vmatprep.mubr.f32.mxu1 %v13729_v23 }
 0x1f7   :  { %v2677_v15 = vpop.f32.mrf.mxu1  ;;  %v13736_v46 = vld [vmem:[#allocation116_spill] sm:$0xff] }
 0x1f8   :  { %v2178_v0 = vpop.f32.mrf.mxu0  ;;  %3328 = vmatmul.mubr.f32.gmra.mxu0 %v13734_v63 }
 0x1f9   :  { %v2179_v8 = vadd.f32 %v2178_v0, %v9758_v5  ;;  %v2686_v58 = vpop.f32.mrf.mxu1  ;;  %3726 = vmatmul.mubr.f32.gmra.mxu1 %v13730_v54  ;;  %3333 = vmatprep.mubr.f32.mxu0 %v13735_v7  ;;  %v13737_v5 = vld [vmem:[#allocation118_spill] sm:$0xff] }
 0x1fa   :  { %v10362_v56 = vadd.f32 %v2686_v58, %v2161_v34  ;;  %v2180_v40 = vpop.f32.mrf.mxu0  ;;  %3731 = vmatprep.mubr.f32.mxu1 %v13731_v32 }
 0x1fb   :  { %v2688_v27 = vpop.f32.mrf.mxu1  ;;  %v13738_v40 = vld [vmem:[#allocation120_spill] sm:$0xff] }
 0x1fc   :  { %v2187_v48 = vpop.f32.mrf.mxu0  ;;  %3335 = vmatmul.mubr.f32.gmra.mxu0 %v13736_v46 }
 0x1fd   :  { %v2188_v23 = vadd.f32 %v2187_v48, %v9771_v21  ;;  %v2697_v15 = vpop.f32.mrf.mxu1  ;;  %3733 = vmatmul.mubr.f32.gmra.mxu1 %v13732_v49  ;;  %3340 = vmatprep.mubr.f32.mxu0 %v13737_v5  ;;  %v13739_v21 = vld [vmem:[#allocation122_spill] sm:$0xff] }
 0x1fe   :  { %v10369_v0 = vadd.f32 %v2697_v15, %v2170_v57  ;;  %v2189_v54 = vpop.f32.mrf.mxu0  ;;  %3738 = vmatprep.mubr.f32.mxu1 %v13733_v29 }
 0x1ff   :  { %v2699_v34 = vpop.f32.mrf.mxu1  ;;  %v13740_v54 = vld [vmem:[#allocation123_spill] sm:$0xff] }
 0x200   :  { %v2196_v58 = vpop.f32.mrf.mxu0  ;;  %3342 = vmatmul.mubr.f32.gmra.mxu0 %v13738_v40 }
 0x201   :  { %v2197_v32 = vadd.f32 %v2196_v58, %v9784_v10  ;;  %v2708_v27 = vpop.f32.mrf.mxu1  ;;  %3740 = vmatmul.mubr.f32.gmra.mxu1 %v13734_v63  ;;  %3347 = vmatprep.mubr.f32.mxu0 %v13739_v21  ;;  %v13741_v10 = vld [vmem:[#allocation125_spill] sm:$0xff] }
 0x202   :  { %v10376_v48 = vadd.f32 %v2708_v27, %v2179_v8  ;;  %v2198_v49 = vpop.f32.mrf.mxu0  ;;  %3745 = vmatprep.mubr.f32.mxu1 %v13735_v7 }
 0x203   :  { %v2710_v57 = vpop.f32.mrf.mxu1  ;;  %v13742_v49 = vld [vmem:[#allocation128_spill] sm:$0xff] }
 0x204   :  { %v2205_v15 = vpop.f32.mrf.mxu0  ;;  %3349 = vmatmul.mubr.f32.gmra.mxu0 %v13740_v54 }
 0x205   :  { %v2206_v29 = vadd.f32 %v2205_v15, %v9797_v28  ;;  %v2719_v34 = vpop.f32.mrf.mxu1  ;;  %3747 = vmatmul.mubr.f32.gmra.mxu1 %v13736_v46  ;;  %3354 = vmatprep.mubr.f32.mxu0 %v13741_v10  ;;  %v13743_v28 = vld [vmem:[#allocation129_spill] sm:$0xff] }
 0x206   :  { %v10383_v58 = vadd.f32 %v2719_v34, %v2188_v23  ;;  %v2207_v63 = vpop.f32.mrf.mxu0  ;;  %3752 = vmatprep.mubr.f32.mxu1 %v13737_v5 }
 0x207   :  { %v2721_v8 = vpop.f32.mrf.mxu1  ;;  %v13744_v63 = vld [vmem:[#allocation131_spill] sm:$0xff] }
 0x208   :  { %v2214_v27 = vpop.f32.mrf.mxu0  ;;  %3356 = vmatmul.mubr.f32.gmra.mxu0 %v13742_v49 }
 0x209   :  { %v2215_v7 = vadd.f32 %v2214_v27, %v9810_v43  ;;  %v2730_v57 = vpop.f32.mrf.mxu1  ;;  %3754 = vmatmul.mubr.f32.gmra.mxu1 %v13738_v40  ;;  %3361 = vmatprep.mubr.f32.mxu0 %v13743_v28  ;;  %v13745_v43 = vld [vmem:[#allocation133_spill] sm:$0xff] }
 0x20a   :  { %v10390_v15 = vadd.f32 %v2730_v57, %v2197_v32  ;;  %v2216_v46 = vpop.f32.mrf.mxu0  ;;  %3759 = vmatprep.mubr.f32.mxu1 %v13739_v21 }
 0x20b   :  { %v2732_v23 = vpop.f32.mrf.mxu1  ;;  %v13746_v46 = vld [vmem:[#allocation135_spill] sm:$0xff] }
 0x20c   :  { %v2223_v34 = vpop.f32.mrf.mxu0  ;;  %3363 = vmatmul.mubr.f32.gmra.mxu0 %v13744_v63 }
 0x20d   :  { %v2224_v5 = vadd.f32 %v2223_v34, %v9823_v4  ;;  %v2741_v8 = vpop.f32.mrf.mxu1  ;;  %3761 = vmatmul.mubr.f32.gmra.mxu1 %v13740_v54  ;;  %3368 = vmatprep.mubr.f32.mxu0 %v13745_v43  ;;  %v13747_v4 = vld [vmem:[#allocation137_spill] sm:$0xff] }
 0x20e   :  { %v10397_v27 = vadd.f32 %v2741_v8, %v2206_v29  ;;  %v2225_v40 = vpop.f32.mrf.mxu0  ;;  %3766 = vmatprep.mubr.f32.mxu1 %v13741_v10 }
 0x20f   :  { %v2743_v32 = vpop.f32.mrf.mxu1  ;;  %v13748_v40 = vld [vmem:[#allocation139_spill] sm:$0xff] }
 0x210   :  { %v2232_v57 = vpop.f32.mrf.mxu0  ;;  %3370 = vmatmul.mubr.f32.gmra.mxu0 %v13746_v46 }
 0x211   :  { %v2233_v21 = vadd.f32 %v2232_v57, %v9836_v3  ;;  %v2752_v23 = vpop.f32.mrf.mxu1  ;;  %3768 = vmatmul.mubr.f32.gmra.mxu1 %v13742_v49  ;;  %3375 = vmatprep.mubr.f32.mxu0 %v13747_v4  ;;  %v13749_v3 = vld [vmem:[#allocation140_spill] sm:$0xff] }
 0x212   :  { %v10404_v34 = vadd.f32 %v2752_v23, %v2215_v7  ;;  %v2234_v54 = vpop.f32.mrf.mxu0  ;;  %3773 = vmatprep.mubr.f32.mxu1 %v13743_v28 }
 0x213   :  { %v2754_v29 = vpop.f32.mrf.mxu1  ;;  %v13750_v54 = vld [vmem:[#allocation142_spill] sm:$0xff] }
 0x214   :  { %v2241_v8 = vpop.f32.mrf.mxu0  ;;  %3377 = vmatmul.mubr.f32.gmra.mxu0 %v13748_v40 }
 0x215   :  { %v2242_v10 = vadd.f32 %v2241_v8, %v9849_v33  ;;  %v2763_v32 = vpop.f32.mrf.mxu1  ;;  %3775 = vmatmul.mubr.f32.gmra.mxu1 %v13744_v63  ;;  %3382 = vmatprep.mubr.f32.mxu0 %v13749_v3  ;;  %v13751_v33 = vld [vmem:[#allocation145_spill] sm:$0xff] }
 0x216   :  { %v10411_v57 = vadd.f32 %v2763_v32, %v2224_v5  ;;  %v2243_v49 = vpop.f32.mrf.mxu0  ;;  %3780 = vmatprep.mubr.f32.mxu1 %v13745_v43 }
 0x217   :  { %v2765_v7 = vpop.f32.mrf.mxu1  ;;  %v13753_v49 = vld [vmem:[#allocation147_spill] sm:$0xff] }
 0x218   :  { %v2250_v23 = vpop.f32.mrf.mxu0  ;;  %3384 = vmatmul.mubr.f32.gmra.mxu0 %v13750_v54 }
 0x219   :  { %v2251_v28 = vadd.f32 %v2250_v23, %v9862_v37  ;;  %v2774_v29 = vpop.f32.mrf.mxu1  ;;  %3782 = vmatmul.mubr.f32.gmra.mxu1 %v13746_v46  ;;  %3389 = vmatprep.mubr.f32.mxu0 %v13751_v33  ;;  %v13754_v37 = vld [vmem:[#allocation149_spill] sm:$0xff] }
 0x21a   :  { %v10418_v8 = vadd.f32 %v2774_v29, %v2233_v21  ;;  %v2252_v63 = vpop.f32.mrf.mxu0  ;;  %3787 = vmatprep.mubr.f32.mxu1 %v13747_v4 }
 0x21b   :  { %v2776_v5 = vpop.f32.mrf.mxu1  ;;  %v13756_v63 = vld [vmem:[#allocation151_spill] sm:$0xff] }
 0x21c   :  { %13752 = vst [vmem:[#allocation14_spill] sm:$0xff] %v10418_v8  ;;  %v2259_v32 = vpop.f32.mrf.mxu0  ;;  %3391 = vmatmul.mubr.f32.gmra.mxu0 %v13753_v49 }
 0x21d   :  { %v2260_v43 = vadd.f32 %v2259_v32, %v9875_v35  ;;  %v2785_v7 = vpop.f32.mrf.mxu1  ;;  %3789 = vmatmul.mubr.f32.gmra.mxu1 %v13748_v40  ;;  %3396 = vmatprep.mubr.f32.mxu0 %v13754_v37  ;;  %v13757_v35 = vld [vmem:[#allocation153_spill] sm:$0xff] }
 0x21e   :  { %v10425_v23 = vadd.f32 %v2785_v7, %v2242_v10  ;;  %v2261_v46 = vpop.f32.mrf.mxu0  ;;  %3794 = vmatprep.mubr.f32.mxu1 %v13749_v3 }
 0x21f   :  { %v2787_v21 = vpop.f32.mrf.mxu1  ;;  %v13759_v46 = vld [vmem:[#allocation155_spill] sm:$0xff] }
 0x220   :  { %13755 = vst [vmem:[#allocation11_spill] sm:$0xff] %v10425_v23  ;;  %v2268_v29 = vpop.f32.mrf.mxu0  ;;  %3398 = vmatmul.mubr.f32.gmra.mxu0 %v13756_v63 }
 0x221   :  { %v2269_v4 = vadd.f32 %v2268_v29, %v9888_v59  ;;  %v2796_v5 = vpop.f32.mrf.mxu1  ;;  %3796 = vmatmul.mubr.f32.gmra.mxu1 %v13750_v54  ;;  %3403 = vmatprep.mubr.f32.mxu0 %v13757_v35  ;;  %v13760_v59 = vld [vmem:[#allocation156_spill] sm:$0xff] }
 0x222   :  { %v10432_v32 = vadd.f32 %v2796_v5, %v2251_v28  ;;  %v2270_v40 = vpop.f32.mrf.mxu0  ;;  %3801 = vmatprep.mubr.f32.mxu1 %v13751_v33 }
 0x223   :  { %v2798_v10 = vpop.f32.mrf.mxu1  ;;  %v13762_v40 = vld [vmem:[#allocation160_spill] sm:$0xff] }
 0x224   :  { %13758 = vst [vmem:[#allocation107_spill] sm:$0xff] %v10432_v32  ;;  %v2277_v7 = vpop.f32.mrf.mxu0  ;;  %3405 = vmatmul.mubr.f32.gmra.mxu0 %v13759_v46 }
 0x225   :  { %v2278_v3 = vadd.f32 %v2277_v7, %v9901_v62  ;;  %v2807_v21 = vpop.f32.mrf.mxu1  ;;  %3803 = vmatmul.mubr.f32.gmra.mxu1 %v13753_v49  ;;  %3410 = vmatprep.mubr.f32.mxu0 %v13760_v59  ;;  %v13763_v62 = vld [vmem:[#allocation161_spill] sm:$0xff] }
 0x226   :  { %v10439_v29 = vadd.f32 %v2807_v21, %v2260_v43  ;;  %v2279_v54 = vpop.f32.mrf.mxu0  ;;  %3808 = vmatprep.mubr.f32.mxu1 %v13754_v37 }
 0x227   :  { %v2809_v28 = vpop.f32.mrf.mxu1  ;;  %v13765_v54 = vld [vmem:[#allocation162_spill] sm:$0xff] }
 0x228   :  { %13761 = vst [vmem:[#allocation108_spill] sm:$0xff] %v10439_v29  ;;  %v2286_v5 = vpop.f32.mrf.mxu0  ;;  %3412 = vmatmul.mubr.f32.gmra.mxu0 %v13762_v40  ;;  %v13819_v29 = vld [vmem:[#allocation58_spill] sm:$0xff] }
 0x229   :  { %v2287_v33 = vadd.f32 %v2286_v5, %v9914_v44  ;;  %v2818_v10 = vpop.f32.mrf.mxu1  ;;  %3810 = vmatmul.mubr.f32.gmra.mxu1 %v13756_v63  ;;  %3417 = vmatprep.mubr.f32.mxu0 %v13763_v62  ;;  %v13766_v44 = vld [vmem:[#allocation165_spill] sm:$0xff] }
 0x22a   :  { %v10446_v7 = vadd.f32 %v2818_v10, %v2269_v4  ;;  %v2288_v49 = vpop.f32.mrf.mxu0  ;;  %3815 = vmatprep.mubr.f32.mxu1 %v13757_v35 }
 0x22b   :  { %v2820_v43 = vpop.f32.mrf.mxu1  ;;  %v13768_v49 = vld [vmem:[#allocation167_spill] sm:$0xff] }
 0x22c   :  { %13764 = vst [vmem:[#allocation16_spill] sm:$0xff] %v10446_v7  ;;  %v2295_v21 = vpop.f32.mrf.mxu0  ;;  %3419 = vmatmul.mubr.f32.gmra.mxu0 %v13765_v54 }
 0x22d   :  { %v2296_v37 = vadd.f32 %v2295_v21, %v9927_v50  ;;  %v2829_v28 = vpop.f32.mrf.mxu1  ;;  %3817 = vmatmul.mubr.f32.gmra.mxu1 %v13759_v46  ;;  %3424 = vmatprep.mubr.f32.mxu0 %v13766_v44  ;;  %v13769_v50 = vld [vmem:[#allocation169_spill] sm:$0xff] }
 0x22e   :  { %v10453_v5 = vadd.f32 %v2829_v28, %v2278_v3  ;;  %v2297_v63 = vpop.f32.mrf.mxu0  ;;  %3822 = vmatprep.mubr.f32.mxu1 %v13760_v59 }
 0x22f   :  { %v2831_v4 = vpop.f32.mrf.mxu1  ;;  %v13771_v63 = vld [vmem:[#allocation171_spill] sm:$0xff] }
 0x230   :  { %13767 = vst [vmem:[#allocation111_spill] sm:$0xff] %v10453_v5  ;;  %v2304_v10 = vpop.f32.mrf.mxu0  ;;  %3426 = vmatmul.mubr.f32.gmra.mxu0 %v13768_v49  ;;  %v13816_v5 = vld [vmem:[#allocation70_spill] sm:$0xff] }
 0x231   :  { %v2305_v35 = vadd.f32 %v2304_v10, %v9940_v6  ;;  %v2840_v43 = vpop.f32.mrf.mxu1  ;;  %3824 = vmatmul.mubr.f32.gmra.mxu1 %v13762_v40  ;;  %3431 = vmatprep.mubr.f32.mxu0 %v13769_v50  ;;  %v13772_v6 = vld [vmem:[#allocation172_spill] sm:$0xff] }
 0x232   :  { %v10460_v21 = vadd.f32 %v2840_v43, %v2287_v33  ;;  %v2306_v46 = vpop.f32.mrf.mxu0  ;;  %3829 = vmatprep.mubr.f32.mxu1 %v13763_v62 }
 0x233   :  { %v2842_v3 = vpop.f32.mrf.mxu1  ;;  %v13774_v46 = vld [vmem:[#allocation176_spill] sm:$0xff] }
 0x234   :  { %13770 = vst [vmem:[#allocation113_spill] sm:$0xff] %v10460_v21  ;;  %v2313_v28 = vpop.f32.mrf.mxu0  ;;  %3433 = vmatmul.mubr.f32.gmra.mxu0 %v13771_v63 }
 0x235   :  { %v2314_v59 = vadd.f32 %v2313_v28, %v9953_v24  ;;  %v2851_v4 = vpop.f32.mrf.mxu1  ;;  %3831 = vmatmul.mubr.f32.gmra.mxu1 %v13765_v54  ;;  %3438 = vmatprep.mubr.f32.mxu0 %v13772_v6  ;;  %v13775_v24 = vld [vmem:[#allocation177_spill] sm:$0xff] }
 0x236   :  { %v10467_v10 = vadd.f32 %v2851_v4, %v2296_v37  ;;  %v2315_v40 = vpop.f32.mrf.mxu0  ;;  %3836 = vmatprep.mubr.f32.mxu1 %v13766_v44 }
 0x237   :  { %v2853_v33 = vpop.f32.mrf.mxu1  ;;  %v13777_v40 = vld [vmem:[#allocation179_spill] sm:$0xff] }
 0x238   :  { %13773 = vst [vmem:[#allocation18_spill] sm:$0xff] %v10467_v10  ;;  %v2322_v43 = vpop.f32.mrf.mxu0  ;;  %3440 = vmatmul.mubr.f32.gmra.mxu0 %v13774_v46  ;;  %v13809_v10 = vld [vmem:[#allocation210_spill] sm:$0xff] }
 0x239   :  { %v2323_v62 = vadd.f32 %v2322_v43, %v9966_v47  ;;  %v2862_v3 = vpop.f32.mrf.mxu1  ;;  %3838 = vmatmul.mubr.f32.gmra.mxu1 %v13768_v49  ;;  %3445 = vmatprep.mubr.f32.mxu0 %v13775_v24  ;;  %v13778_v47 = vld [vmem:[#allocation181_spill] sm:$0xff] }
 0x23a   :  { %v10474_v28 = vadd.f32 %v2862_v3, %v2305_v35  ;;  %v2324_v54 = vpop.f32.mrf.mxu0  ;;  %3843 = vmatprep.mubr.f32.mxu1 %v13769_v50 }
 0x23b   :  { %v2864_v37 = vpop.f32.mrf.mxu1  ;;  %v13780_v54 = vld [vmem:[#allocation35_spill] sm:$0xff] }
 0x23c   :  { %13776 = vst [vmem:[#allocation115_spill] sm:$0xff] %v10474_v28  ;;  %v2331_v4 = vpop.f32.mrf.mxu0  ;;  %3447 = vmatmul.mubr.f32.gmra.mxu0 %v13777_v40 }
 0x23d   :  { %v2332_v44 = vadd.f32 %v2331_v4, %v9975_v30  ;;  %v2873_v33 = vpop.f32.mrf.mxu1  ;;  %3845 = vmatmul.mubr.f32.gmra.mxu1 %v13771_v63  ;;  %3452 = vmatprep.mubr.f32.mxu0 %v13778_v47  ;;  %v13781_v30 = vld [vmem:[#allocation184_spill] sm:$0xff] }
 0x23e   :  { %v10481_v43 = vadd.f32 %v2873_v33, %v2314_v59  ;;  %v2333_v49 = vpop.f32.mrf.mxu0  ;;  %3850 = vmatprep.mubr.f32.mxu1 %v13772_v6 }
 0x23f   :  { %v2875_v35 = vpop.f32.mrf.mxu1  ;;  %v13783_v49 = vld [vmem:[#allocation186_spill] sm:$0xff] }
 0x240   :  { %13779 = vst [vmem:[#allocation13_spill] sm:$0xff] %v10481_v43  ;;  %v2340_v3 = vpop.f32.mrf.mxu0  ;;  %3454 = vmatmul.mubr.f32.gmra.mxu0 %v13780_v54  ;;  %v34_v43 = vld [vmem:[#allocation2 + $0x28] sm:$0xff] }
 0x241   :  { %v2341_v50 = vadd.f32 %v2340_v3, %v9983_v55  ;;  %v2884_v37 = vpop.f32.mrf.mxu1  ;;  %3852 = vmatmul.mubr.f32.gmra.mxu1 %v13774_v46  ;;  %3459 = vmatprep.mubr.f32.mxu0 %v13781_v30  ;;  %v13784_v55 = vld [vmem:[#allocation187_spill] sm:$0xff] }
 0x242   :  { %v10488_v4 = vadd.f32 %v2884_v37, %v2323_v62  ;;  %v2342_v63 = vpop.f32.mrf.mxu0  ;;  %3857 = vmatprep.mubr.f32.mxu1 %v13775_v24  ;;  %v13787_v24 = vld [vmem:[#allocation55_spill] sm:$0xff] }
 0x243   :  { %v2886_v59 = vpop.f32.mrf.mxu1  ;;  %v13786_v63 = vld [vmem:[#allocation191_spill] sm:$0xff] }
 0x244   :  { %13782 = vst [vmem:[#allocation117_spill] sm:$0xff] %v10488_v4  ;;  %v2349_v33 = vpop.f32.mrf.mxu0  ;;  %3461 = vmatmul.mubr.f32.gmra.mxu0 %v13783_v49 }
 0x245   :  { %v2350_v6 = vadd.f32 %v2349_v33, %v9991_v9  ;;  %v2895_v35 = vpop.f32.mrf.mxu1  ;;  %3859 = vmatmul.mubr.f32.gmra.mxu1 %v13777_v40  ;;  %3466 = vmatprep.mubr.f32.mxu0 %v13784_v55  ;;  %v13788_v9 = vld [vmem:[#allocation192_spill] sm:$0xff] }
 0x246   :  { %v10495_v3 = vadd.f32 %v2895_v35, %v2332_v44  ;;  %v2351_v46 = vpop.f32.mrf.mxu0  ;;  %3864 = vmatprep.mubr.f32.mxu1 %v13778_v47  ;;  %v13791_v47 = vld [vmem:[#allocation56_spill] sm:$0xff] }
 0x247   :  { %v2897_v62 = vpop.f32.mrf.mxu1  ;;  %v13790_v46 = vld [vmem:[#allocation194_spill] sm:$0xff] }
 0x248   :  { %13785 = vst [vmem:[#allocation20_spill] sm:$0xff] %v10495_v3  ;;  %v2358_v37 = vpop.f32.mrf.mxu0  ;;  %3468 = vmatmul.mubr.f32.gmra.mxu0 %v13786_v63 }
 0x249   :  { %v2359_v59 = vadd.f32 %v2358_v37, %v13787_v24  ;;  %v2906_v4 = vpop.f32.mrf.mxu1  ;;  %3866 = vmatmul.mubr.f32.gmra.mxu1 %v13780_v54  ;;  %3473 = vmatprep.mubr.f32.mxu0 %v13788_v9  ;;  %v13792_v37 = vld [vmem:[#allocation196_spill] sm:$0xff] }
 0x24a   :  { %v10502_v33 = vadd.f32 %v2906_v4, %v2341_v50  ;;  %v2360_v40 = vpop.f32.mrf.mxu0  ;;  %3871 = vmatprep.mubr.f32.mxu1 %v13781_v30  ;;  %v13795_v30 = vld [vmem:[#allocation50_spill] sm:$0xff] }
 0x24b   :  { %v2908_v44 = vpop.f32.mrf.mxu1  ;;  %v13794_v40 = vld [vmem:[#allocation198_spill] sm:$0xff] }
 0x24c   :  { %13789 = vst [vmem:[#allocation119_spill] sm:$0xff] %v10502_v33  ;;  %v2367_v35 = vpop.f32.mrf.mxu0  ;;  %3475 = vmatmul.mubr.f32.gmra.mxu0 %v13790_v46 }
 0x24d   :  { %v2368_v62 = vadd.f32 %v2367_v35, %v13791_v47  ;;  %v2917_v3 = vpop.f32.mrf.mxu1  ;;  %3873 = vmatmul.mubr.f32.gmra.mxu1 %v13783_v49  ;;  %3480 = vmatprep.mubr.f32.mxu0 %v13792_v37  ;;  %v13796_v35 = vld [vmem:[#allocation200_spill] sm:$0xff]  ;;  %v31_v47 = vld [vmem:[#allocation2 + $0x10] sm:$0xff] }
 0x24e   :  { %v10509_v24 = vadd.f32 %v2917_v3, %v2350_v6  ;;  %v2369_v54 = vpop.f32.mrf.mxu0  ;;  %3878 = vmatprep.mubr.f32.mxu1 %v13784_v55 }
 0x24f   :  { %v2919_v50 = vpop.f32.mrf.mxu1  ;;  %v13798_v54 = vld [vmem:[#allocation201_spill] sm:$0xff] }
 0x250   :  { %13793 = vst [vmem:[#allocation15_spill] sm:$0xff] %v10509_v24  ;;  %v2376_v4 = vpop.f32.mrf.mxu0  ;;  %3482 = vmatmul.mubr.f32.gmra.mxu0 %v13794_v40  ;;  %v481_v50 = vsel %vm479_vm0, %v31_v47, 0  ;;  %v13799_v24 = vld [vmem:[#allocation51_spill] sm:$0xff]  ;;  %v484_v47 = vsel %vm479_vm0, %v34_v43, 0 }
 0x251   :  { %v2377_v44 = vadd.f32 %v2376_v4, %v13795_v30  ;;  %v2928_v33 = vpop.f32.mrf.mxu1  ;;  %3880 = vmatmul.mubr.f32.gmra.mxu1 %v13786_v63  ;;  %3487 = vmatprep.mubr.f32.mxu0 %v13796_v35  ;;  %v13800_v63 = vld [vmem:[#allocation203_spill] sm:$0xff] }
 0x252   :  { %v10516_v49 = vadd.f32 %v2928_v33, %v2359_v59  ;;  %v2378_v6 = vpop.f32.mrf.mxu0  ;;  %3885 = vmatprep.mubr.f32.mxu1 %v13788_v9  ;;  %v10527_v33 = vand.u32 4294901760, %v481_v50 }
 0x253   :  { %v2930_v3 = vpop.f32.mrf.mxu1 }
 0x254   :  { %13797 = vst [vmem:[#allocation121_spill] sm:$0xff] %v10516_v49  ;;  %v2385_v55 = vpop.f32.mrf.mxu0  ;;  %3489 = vmatmul.mubr.f32.gmra.mxu0 %v13798_v54  ;;  %13802 = vst [vmem:[#allocation124_spill] sm:$0xff] %v10527_v33  ;;  %v13803_v3 = vld [vmem:[#allocation206_spill] sm:$0xff] }
 0x255   :  { %v2386_v4 = vadd.f32 %v2385_v55, %v13799_v24  ;;  %v2939_v30 = vpop.f32.mrf.mxu1  ;;  %3887 = vmatmul.mubr.f32.gmra.mxu1 %v13790_v46  ;;  %3494 = vmatprep.mubr.f32.mxu0 %v13800_v63  ;;  %v13804_v24 = vld [vmem:[#allocation53_spill] sm:$0xff]  ;;  %v13805_v46 = vld [vmem:[#allocation208_spill] sm:$0xff] }
 0x256   :  { %v10524_v28 = vadd.f32 %v2939_v30, %v2368_v62  ;;  %v2387_v59 = vpop.f32.mrf.mxu0  ;;  %3892 = vmatprep.mubr.f32.mxu1 %v13792_v37  ;;  %v37_v37 = vld [vmem:[#allocation2 + $0x40] sm:$0xff] }
 0x257   :  { %v2941_v9 = vpop.f32.mrf.mxu1 }
 0x258   :  { %13801 = vst [vmem:[#allocation22_spill] sm:$0xff] %v10524_v28  ;;  %v2394_v6 = vpop.f32.mrf.mxu0  ;;  %3496 = vmatmul.mubr.f32.gmra.mxu0 %v13803_v3  ;;  %v10538_v9 = vsub.f32 %v481_v50, %v10527_v33  ;;  %v10540_v28 = vand.u32 4294901760, %v484_v47  ;;  %v40_v50 = vld [vmem:[#allocation2 + $0x58] sm:$0xff] }
 0x259   :  { %v2395_v55 = vadd.f32 %v2394_v6, %v13804_v24  ;;  %v2950_v49 = vpop.f32.mrf.mxu1  ;;  %3894 = vmatmul.mubr.f32.gmra.mxu1 %v13794_v40  ;;  %3501 = vmatprep.mubr.f32.mxu0 %v13805_v46  ;;  %v13810_v6 = vld [vmem:[#allocation63_spill] sm:$0xff] }
 0x25a   :  { %v10534_v62 = vadd.f32 %v2950_v49, %v2377_v44  ;;  %v2396_v30 = vpop.f32.mrf.mxu0  ;;  %3899 = vmatprep.mubr.f32.mxu1 %v13796_v35  ;;  %13807 = vst [vmem:[#allocation126_spill] sm:$0xff] %v10538_v9  ;;  %13808 = vst [vmem:[#allocation24_spill] sm:$0xff] %v10540_v28  ;;  %v13811_v44 = vld [vmem:[#allocation211_spill] sm:$0xff]  ;;  %v487_v49 = vsel %vm479_vm0, %v37_v37, 0  ;;  %v10552_v21 = vsub.f32 %v484_v47, %v10540_v28  ;;  %v43_v47 = vld [vmem:[#allocation2 + $0x70] sm:$0xff] }
 0x25b   :  { %v2952_v59 = vpop.f32.mrf.mxu1 }
 0x25c   :  { %13806 = vst [vmem:[#allocation17_spill] sm:$0xff] %v10534_v62  ;;  %v2403_v43 = vpop.f32.mrf.mxu0  ;;  %3503 = vmatmul.mubr.f32.gmra.mxu0 %v13809_v10  ;;  %v12889_v62 = vand.u32 4294901760, %v10538_v9  ;;  %13813 = vst [vmem:[#allocation19_spill] sm:$0xff] %v10552_v21  ;;  %v13825_v32 = vand.u32 4294901760, %v10552_v21 }
 0x25d   :  { %v2404_v24 = vadd.f32 %v2403_v43, %v13810_v6  ;;  %v2961_v40 = vpop.f32.mrf.mxu1  ;;  %3901 = vmatmul.mubr.f32.gmra.mxu1 %v13798_v54  ;;  %3508 = vmatprep.mubr.f32.mxu0 %v13811_v44  ;;  %v13814_v6 = vld [vmem:[#allocation212_spill] sm:$0xff]  ;;  %v10555_v54 = vand.u32 4294901760, %v487_v49 }
 0x25e   :  { %v10547_v35 = vadd.f32 %v2961_v40, %v2386_v4  ;;  %v2405_v30 = vpop.f32.mrf.mxu0  ;;  %3906 = vmatprep.mubr.f32.mxu1 %v13800_v63  ;;  %v13817_v4 = vld [vmem:[#allocation213_spill] sm:$0xff]  ;;  %v490_v63 = vsel %vm479_vm0, %v40_v50, 0  ;;  %v4032_v23 = vsub.f32 %v10552_v21, %v13825_v32  ;;  %v49_v32 = vld [vmem:[#allocation2 + $0xa0] sm:$0xff] }
 0x25f   :  { %v2963_v59 = vpop.f32.mrf.mxu1  ;;  %13815 = vst [vmem:[#allocation12_spill] sm:$0xff] %v10555_v54  ;;  %v10572_v50 = vand.u32 4294901760, %v490_v63 }
 0x260   :  { %13812 = vst [vmem:[#allocation127_spill] sm:$0xff] %v10547_v35  ;;  %v2412_v43 = vpop.f32.mrf.mxu0  ;;  %3510 = vmatmul.mubr.f32.gmra.mxu0 %v13814_v6  ;;  %v4022_v35 = vsub.f32 %v10538_v9, %v12889_v62  ;;  %v46_v62 = vld [vmem:[#allocation2 + $0x88] sm:$0xff] }
 0x261   :  { %v2413_v7 = vadd.f32 %v2412_v43, %v13816_v5  ;;  %v2972_v37 = vpop.f32.mrf.mxu1  ;;  %3908 = vmatmul.mubr.f32.gmra.mxu1 %v13803_v3  ;;  %3515 = vmatprep.mubr.f32.mxu0 %v13817_v4  ;;  %v10570_v3 = vsub.f32 %v487_v49, %v10555_v54  ;;  %13821 = vst [vmem:[#allocation21_spill] sm:$0xff] %v10572_v50 }
 0x262   :  { %v10561_v40 = vadd.f32 %v2972_v37, %v2395_v55  ;;  %v2414_v30 = vpop.f32.mrf.mxu0  ;;  %3913 = vmatprep.mubr.f32.mxu1 %v13805_v46  ;;  %v13822_v55 = vld [vmem:[#allocation76_spill] sm:$0xff]  ;;  %v13823_v46 = vld [vmem:[#allocation49_spill] sm:$0xff]  ;;  %v4023_v49 = vand.u32 4294901760, %v4022_v35  ;;  %v10587_v8 = vsub.f32 %v490_v63, %v10572_v50 }
 0x263   :  { %v2974_v59 = vpop.f32.mrf.mxu1  ;;  %13820 = vst [vmem:[#allocation130_spill] sm:$0xff] %v10570_v3 }
 0x264   :  { %13818 = vst [vmem:[#allocation26_spill] sm:$0xff] %v10561_v40  ;;  %v2421_v43 = vpop.f32.mrf.mxu0  ;;  %3517 = vmatmul.mubr.f32.gmra.mxu0 %v13819_v29  ;;  %v493_v59 = vsel %vm479_vm0, %v43_v47, 0  ;;  %13827 = vst [vmem:[#allocation28_spill] sm:$0xff] %v10587_v8 }
 0x265   :  { %v2422_v37 = vadd.f32 %v2421_v43, %v13822_v55  ;;  %v2983_v30 = vpop.f32.mrf.mxu1  ;;  %3915 = vmatmul.mubr.f32.gmra.mxu1 %v13809_v10  ;;  %3522 = vmatprep.mubr.f32.mxu0 %v13823_v46  ;;  %v13826_v55 = vld [vmem:[#allocation214_spill] sm:$0xff]  ;;  %v10589_v47 = vand.u32 4294901760, %v493_v59  ;;  %v4033_v10 = vand.u32 4294901760, %v4032_v23 }
 0x266   :  { %v10578_v9 = vadd.f32 %v2983_v30, %v2404_v24  ;;  %v2423_v5 = vpop.f32.mrf.mxu0  ;;  %3920 = vmatprep.mubr.f32.mxu1 %v13811_v44  ;;  %v496_v24 = vsel %vm479_vm0, %v46_v62, 0 }
 0x267   :  { %v2985_v40 = vpop.f32.mrf.mxu1  ;;  %13828 = vst [vmem:[#allocation134_spill] sm:$0xff] %v10589_v47  ;;  %v13829_v5 = vld [vmem:[#allocation82_spill] sm:$0xff]  ;;  %v10599_v21 = vand.u32 4294901760, %v496_v24 }
 0x268   :  { %13824 = vst [vmem:[#allocation132_spill] sm:$0xff] %v10578_v9  ;;  %v2430_v43 = vpop.f32.mrf.mxu0  ;;  %3524 = vmatmul.mubr.f32.gmra.mxu0 %v13826_v55  ;;  %v10606_v9 = vsub.f32 %v493_v59, %v10589_v47 }
 0x269   :  { %v2431_v44 = vadd.f32 %v2430_v43, %v13829_v5  ;;  %v2994_v40 = vpop.f32.mrf.mxu1  ;;  %3922 = vmatmul.mubr.f32.gmra.mxu1 %v13814_v6  ;;  %6871 = vmatprep.mubr.msk.f32.mxu0 %vm7871_vm1, %v13113_v1  ;;  %13830 = vst [vmem:[#allocation23_spill] sm:$0xff] %v10599_v21  ;;  %v13831_v43 = vand.u32 4294901760, %v10570_v3  ;;  %v12894_v5 = vand.u32 4294901760, %v10587_v8 }
 0x26a   :  { %v10596_v35 = vadd.f32 %v2994_v40, %v2413_v7  ;;  %v2432_v30 = vpop.f32.mrf.mxu0  ;;  %3927 = vmatprep.mubr.f32.mxu1 %v13817_v4  ;;  %13832 = vst [vmem:[#allocation136_spill] sm:$0xff] %v10606_v9  ;;  %v499_v7 = vsel %vm479_vm0, %v49_v32, 0 }
 0x26b   :  { %v2996_v63 = vpop.f32.mrf.mxu1  ;;  %v4042_v6 = vsub.f32 %v10570_v3, %v13831_v43  ;;  %v13833_v30 = vld [vmem:[#allocation68_spill] sm:$0xff]  ;;  %v10618_v43 = vsub.f32 %v496_v24, %v10599_v21 }
 0x26c   :  { %v2439_v62 = vpop.f32.mrf.mxu0  ;;  %6872 = vmatmul.mubr.f32.vlgmr.msra.gmra.mxu0 %v4023_v49  ;;  %v52_v63 = vld [vmem:[#allocation2 + $0xb8] sm:$0xff] }
 0x26d   :  { %v2440_v40 = vadd.f32 %v2439_v62, %v10134_v45  ;;  %v3005_v4 = vpop.f32.mrf.mxu1  ;;  %3929 = vmatmul.mubr.f32.gmra.mxu1 %v13819_v29  ;;  %6874 = vmatprep.mubr.msk.f32.mxu0 %vm7871_vm1, %v13113_v1  ;;  %13834 = vst [vmem:[#allocation29_spill] sm:$0xff] %v10618_v43  ;;  %v10621_v45 = vand.u32 4294901760, %v499_v7  ;;  %v4043_v32 = vand.u32 4294901760, %v4042_v6  ;;  %v502_v24 = vsel %vm479_vm0, %v52_v63, 0  ;;  %v13836_v6 = vld [vmem:[#allocation8_spill] sm:$0xff] }
 0x26e   :  { %v10613_v23 = vadd.f32 %v3005_v4, %v2422_v37  ;;  %v2441_v49 = vpop.f32.mrf.mxu0  ;;  %3934 = vmatprep.mubr.f32.mxu1 %v13823_v46  ;;  %7168 = vmatpush3.msra.mxu0 %v13833_v30  ;;  %v4052_v37 = vsub.f32 %v10587_v8, %v12894_v5  ;;  %v12897_v46 = vand.u32 4294901760, %v10606_v9 }
 0x26f   :  { %v3007_v59 = vpop.f32.mrf.mxu1  ;;  %7169 = vmatprep.subr.mxu0 %v13113_v1  ;;  %13835 = vst [vmem:[#allocation138_spill] sm:$0xff] %v10621_v45 }
 0x270   :  { %v2448_v29 = vpop.f32.mrf.mxu0  ;;  %6875 = vmatmul.mubr.f32.gmra.mxu0 %v4033_v10  ;;  %v55_v59 = vld [vmem:[#allocation2 + $0xd0] sm:$0xff]  ;;  %v4053_v63 = vand.u32 4294901760, %v4052_v37 }
 0x271   :  { %v2449_v62 = vadd.f32 %v2448_v29, %v10155_v19  ;;  %v3016_v4 = vpop.f32.mrf.mxu1  ;;  %3936 = vmatmul.mubr.f32.gmra.mxu1 %v13826_v55  ;;  %6877 = vmatprep.mubr.msk.f32.mxu0 %vm7871_vm1, %v13113_v1  ;;  %v10639_v29 = vsub.f32 %v499_v7, %v10621_v45 }
 0x272   :  { %v10632_v49 = vadd.f32 %v3016_v4, %v2431_v44  ;;  %v2450_v10 = vpop.f32.mrf.mxu0  ;;  %7032 = vmatprep.mubr.msk.f32.mxu1 %vm7871_vm1, %v13113_v1  ;;  %7170 = vmatpush3.msra.mxu0 %v13836_v6  ;;  %v4062_v44 = vsub.f32 %v10606_v9, %v12897_v46  ;;  %v10645_v4 = vand.u32 4294901760, %v502_v24  ;;  %v58_v46 = vld [vmem:[#allocation2 + $0xe8] sm:$0xff]  ;;  %v13841_v9 = vld [vmem:[#allocation71_spill] sm:$0xff] }
 0x273   :  { %v3018_v5 = vpop.f32.mrf.mxu1  ;;  %13837 = vst [vmem:[#allocation25_spill] sm:$0xff] %v10639_v29  ;;  %7171 = vmatprep.subr.mxu0 %v13113_v1 }
 0x274   :  { %v2457_v55 = vpop.f32.mrf.mxu0  ;;  %6878 = vmatmul.mubr.f32.gmra.mxu0 %v4043_v32  ;;  %13838 = vst [vmem:[#allocation141_spill] sm:$0xff] %v10645_v4  ;;  %v505_v5 = vsel %vm479_vm0, %v55_v59, 0  ;;  %v13839_v32 = vld [vmem:[#allocation59_spill] sm:$0xff]  ;;  %v13842_v59 = vld [vmem:[#allocation61_spill] sm:$0xff] }
 0x275   :  { %v2458_v10 = vadd.f32 %v2457_v55, %v10177_v38  ;;  %v3027_v8 = vpop.f32.mrf.mxu1  ;;  %7033 = vmatmul.mubr.f32.vlgmr.msra.gmra.mxu1 %v10527_v33  ;;  %6880 = vmatprep.mubr.msk.f32.mxu0 %vm7871_vm1, %v13113_v1  ;;  %v13840_v38 = vand.u32 4294901760, %v10618_v43  ;;  %v61_v33 = vld [vmem:[#allocation2 + $0x100] sm:$0xff] }
 0x276   :  { %v10652_v7 = vadd.f32 %v3027_v8, %v2440_v40  ;;  %7329 = vmatpush3.msra.mxu1 %v13839_v32  ;;  %v2459_v37 = vpop.f32.mrf.mxu0  ;;  %7035 = vmatprep.mubr.msk.f32.mxu1 %vm7871_vm1, %v13113_v1  ;;  %v4063_v40 = vand.u32 4294901760, %v4062_v44  ;;  %v10667_v32 = vand.u32 4294901760, %v505_v5 }
 0x277   :  { %v3029_v19 = vpop.f32.mrf.mxu1  ;;  %v4072_v55 = vsub.f32 %v10618_v43, %v13840_v38  ;;  %7330 = vmatprep.subr.mxu1 %v13113_v1  ;;  %7172 = vmatpush3.msra.mxu0 %v13841_v9  ;;  %v10665_v37 = vsub.f32 %v502_v24, %v10645_v4  ;;  %v508_v38 = vsel %vm479_vm0, %v58_v46, 0 }
 0x278   :  { %v3217_v8 = vpop.f32.mrf.mxu0  ;;  %6881 = vmatmul.mubr.f32.gmra.mxu0 %v4053_v63  ;;  %7331 = vmatpush3.msra.mxu1 %v13842_v59  ;;  %13844 = vst [vmem:[#allocation143_spill] sm:$0xff] %v10667_v32 }
 0x279   :  { %13843 = vst [vmem:[#allocation32_spill] sm:$0xff] %v10665_v37  ;;  %v3038_v19 = vpop.f32.mrf.mxu1  ;;  %v3218_v3 = vadd.f32 %v3217_v8, %v10199_v14  ;;  %7036 = vmatmul.mubr.f32.gmra.mxu1 %v10540_v28  ;;  %6883 = vmatprep.mubr.msk.f32.mxu0 %vm7871_vm1, %v13113_v1  ;;  %v4073_v43 = vand.u32 4294901760, %v4072_v55  ;;  %v13845_v14 = vand.u32 4294901760, %v10639_v29 }
 0x27a   :  { %v10674_v63 = vadd.f32 %v3038_v19, %v2449_v62  ;;  %v3219_v44 = vpop.f32.mrf.mxu0  ;;  %7038 = vmatprep.mubr.msk.f32.mxu1 %vm7871_vm1, %v13113_v1  ;;  %7332 = vmatprep.subr.mxu1 %v13113_v1  ;;  %v10686_v19 = vsub.f32 %v505_v5, %v10667_v32 }
 0x27b   :  { %v3040_v24 = vpop.f32.mrf.mxu1  ;;  %v4082_v8 = vsub.f32 %v10639_v29, %v13845_v14  ;;  %7333 = vmatpush3.msra.mxu1 %v10059_v60  ;;  %7173 = vmatprep.subr.mxu0 %v13113_v1  ;;  %v10688_v44 = vand.u32 4294901760, %v508_v38  ;;  %v13849_v60 = vld [vmem:[#allocation74_spill] sm:$0xff] }
 0x27c   :  { %v3224_v46 = vpop.f32.mrf.mxu0  ;;  %6884 = vmatmul.mubr.f32.gmra.mxu0 %v4063_v40  ;;  %13846 = vst [vmem:[#allocation27_spill] sm:$0xff] %v10686_v19  ;;  %v511_v24 = vsel %vm479_vm0, %v61_v33, 0  ;;  %7334 = vmatprep.subr.mxu1 %v13113_v1  ;;  %v64_v40 = vld [vmem:[#allocation2 + $0x118] sm:$0xff] }
 0x27d   :  { %13847 = vst [vmem:[#allocation144_spill] sm:$0xff] %v10688_v44  ;;  %v3049_v55 = vpop.f32.mrf.mxu1  ;;  %v3225_v14 = vadd.f32 %v3224_v46, %v10221_v17  ;;  %7039 = vmatmul.mubr.f32.gmra.mxu1 %v10555_v54  ;;  %6886 = vmatprep.mubr.msk.f32.mxu0 %vm7871_vm1, %v13113_v1  ;;  %v4083_v5 = vand.u32 4294901760, %v4082_v8  ;;  %v10701_v29 = vand.u32 4294901760, %v511_v24  ;;  %v13850_v46 = vand.u32 4294901760, %v10665_v37 }
 0x27e   :  { %v10696_v28 = vadd.f32 %v3049_v55, %v2458_v10  ;;  %v3226_v62 = vpop.f32.mrf.mxu0  ;;  %7041 = vmatprep.mubr.msk.f32.mxu1 %vm7871_vm1, %v13113_v1  ;;  %7174 = vmatpush3.msra.mxu0 %v10100_v42  ;;  %v10710_v55 = vsub.f32 %v508_v38, %v10688_v44  ;;  %v67_v38 = vld [vmem:[#allocation2 + $0x130] sm:$0xff] }
 0x27f   :  { %v3051_v33 = vpop.f32.mrf.mxu1  ;;  %13848 = vst [vmem:[#allocation34_spill] sm:$0xff] %v10701_v29  ;;  %7335 = vmatpush3.msra.mxu1 %v13849_v60  ;;  %7175 = vmatprep.subr.mxu0 %v13113_v1  ;;  %v4092_v10 = vsub.f32 %v10665_v37, %v13850_v46  ;;  %v13852_v62 = vld [vmem:[#allocation9_spill] sm:$0xff]  ;;  %v10724_v37 = vsub.f32 %v511_v24, %v10701_v29  ;;  %v13857_v60 = vld [vmem:[#allocation88_spill] sm:$0xff] }
 0x280   :  { %v3231_v17 = vpop.f32.mrf.mxu0  ;;  %6887 = vmatmul.mubr.f32.gmra.mxu0 %v4073_v43  ;;  %13851 = vst [vmem:[#allocation146_spill] sm:$0xff] %v10710_v55  ;;  %v514_v33 = vsel %vm479_vm0, %v64_v40, 0  ;;  %7336 = vmatprep.subr.mxu1 %v13113_v1 }
 0x281   :  { %v3232_v8 = vadd.f32 %v3231_v17, %v10240_v39  ;;  %v3629_v54 = vpop.f32.mrf.mxu1  ;;  %7042 = vmatmul.mubr.f32.gmra.mxu1 %v10572_v50  ;;  %6889 = vmatprep.mubr.msk.f32.mxu0 %vm7871_vm1, %v13113_v1  ;;  %13853 = vst [vmem:[#allocation30_spill] sm:$0xff] %v10724_v37  ;;  %v10726_v39 = vand.u32 4294901760, %v514_v33  ;;  %v13855_v17 = vld [vmem:[#allocation80_spill] sm:$0xff] }
 0x282   :  { %v10718_v43 = vadd.f32 %v3629_v54, %v3218_v3  ;;  %v3233_v46 = vpop.f32.mrf.mxu0  ;;  %7044 = vmatprep.mubr.msk.f32.mxu1 %vm7871_vm1, %v13113_v1  ;;  %7176 = vmatpush3.msra.mxu0 %v13852_v62  ;;  %v4093_v54 = vand.u32 4294901760, %v4092_v10  ;;  %v13856_v3 = vand.u32 4294901760, %v10686_v19 }
 0x283   :  { %v3631_v40 = vpop.f32.mrf.mxu1  ;;  %13854 = vst [vmem:[#allocation148_spill] sm:$0xff] %v10726_v39  ;;  %7337 = vmatpush3.msra.mxu1 %v13855_v17  ;;  %7177 = vmatprep.subr.mxu0 %v13113_v1  ;;  %v517_v17 = vsel %vm479_vm0, %v67_v38, 0 }
 0x284   :  { %v3238_v50 = vpop.f32.mrf.mxu0  ;;  %6890 = vmatmul.mubr.f32.gmra.mxu0 %v4083_v5  ;;  %v4102_v46 = vsub.f32 %v10686_v19, %v13856_v3  ;;  %7338 = vmatprep.subr.mxu1 %v13113_v1  ;;  %v70_v3 = vld [vmem:[#allocation2 + $0x148] sm:$0xff] }
 0x285   :  { %v3239_v24 = vadd.f32 %v3238_v50, %v10257_v41  ;;  %v3636_v40 = vpop.f32.mrf.mxu1  ;;  %7045 = vmatmul.mubr.f32.gmra.mxu1 %v10589_v47  ;;  %6892 = vmatprep.mubr.msk.f32.mxu0 %vm7871_vm1, %v13113_v1  ;;  %v10747_v50 = vsub.f32 %v514_v33, %v10726_v39  ;;  %v10754_v47 = vand.u32 4294901760, %v517_v17  ;;  %v520_v33 = vsel %vm479_vm0, %v70_v3, 0 }
 0x286   :  { %v10740_v5 = vadd.f32 %v3636_v40, %v3225_v14  ;;  %v3240_v10 = vpop.f32.mrf.mxu0  ;;  %7047 = vmatprep.mubr.msk.f32.mxu1 %vm7871_vm1, %v13113_v1  ;;  %7178 = vmatpush3.msra.mxu0 %v13857_v60  ;;  %v4103_v14 = vand.u32 4294901760, %v4102_v46  ;;  %v13859_v40 = vand.u32 4294901760, %v10710_v55 }
 0x287   :  { %v3638_v19 = vpop.f32.mrf.mxu1  ;;  %13858 = vst [vmem:[#allocation150_spill] sm:$0xff] %v10747_v50  ;;  %7339 = vmatpush3.msra.mxu1 %v10126_v53  ;;  %7179 = vmatprep.subr.mxu0 %v13113_v1  ;;  %13860 = vst [vmem:[#allocation31_spill] sm:$0xff] %v10754_v47 }
 0x288   :  { %v3245_v38 = vpop.f32.mrf.mxu0  ;;  %6893 = vmatmul.mubr.f32.gmra.mxu0 %v4093_v54  ;;  %v4112_v10 = vsub.f32 %v10710_v55, %v13859_v40  ;;  %7340 = vmatprep.subr.mxu1 %v13113_v1  ;;  %v73_v40 = vld [vmem:[#allocation2 + $0x160] sm:$0xff]  ;;  %v13861_v55 = vld [vmem:[#allocation89_spill] sm:$0xff] }
 0x289   :  { %v3246_v19 = vadd.f32 %v3245_v38, %v10279_v2  ;;  %v3643_v41 = vpop.f32.mrf.mxu1  ;;  %7048 = vmatmul.mubr.f32.gmra.mxu1 %v10599_v21  ;;  %6895 = vmatprep.mubr.msk.f32.mxu0 %vm7871_vm1, %v13113_v1  ;;  %v13862_v2 = vand.u32 4294901760, %v10724_v37  ;;  %v76_v21 = vld [vmem:[#allocation2 + $0x178] sm:$0xff] }
 0x28a   :  { %v10762_v54 = vadd.f32 %v3643_v41, %v3232_v8  ;;  %v3247_v46 = vpop.f32.mrf.mxu0  ;;  %7050 = vmatprep.mubr.msk.f32.mxu1 %vm7871_vm1, %v13113_v1  ;;  %7180 = vmatpush3.msra.mxu0 %v13861_v55  ;;  %v4113_v3 = vand.u32 4294901760, %v4112_v10  ;;  %v10774_v41 = vsub.f32 %v517_v17, %v10754_v47  ;;  %v13865_v17 = vld [vmem:[#allocation94_spill] sm:$0xff] }
 0x28b   :  { %v3645_v53 = vpop.f32.mrf.mxu1  ;;  %v4122_v38 = vsub.f32 %v10724_v37, %v13862_v2  ;;  %7341 = vmatpush3.msra.mxu1 %v10137_v26  ;;  %7181 = vmatprep.subr.mxu0 %v13113_v1  ;;  %v10776_v46 = vand.u32 4294901760, %v520_v33  ;;  %v523_v2 = vsel %vm479_vm0, %v73_v40, 0 }
 0x28c   :  { %v3252_v8 = vpop.f32.mrf.mxu0  ;;  %6896 = vmatmul.mubr.f32.gmra.mxu0 %v4103_v14  ;;  %13863 = vst [vmem:[#allocation152_spill] sm:$0xff] %v10774_v41  ;;  %7342 = vmatprep.subr.mxu1 %v13113_v1 }
 0x28d   :  { %13864 = vst [vmem:[#allocation39_spill] sm:$0xff] %v10776_v46  ;;  %v3253_v53 = vadd.f32 %v3252_v8, %v10293_v20  ;;  %v3650_v55 = vpop.f32.mrf.mxu1  ;;  %7051 = vmatmul.mubr.f32.gmra.mxu1 %v10621_v45  ;;  %6898 = vmatprep.mubr.msk.f32.mxu0 %vm7871_vm1, %v13113_v1  ;;  %v4123_v26 = vand.u32 4294901760, %v4122_v38  ;;  %v13866_v20 = vand.u32 4294901760, %v10747_v50  ;;  %v13867_v45 = vld [vmem:[#allocation92_spill] sm:$0xff] }
 0x28e   :  { %v10784_v14 = vadd.f32 %v3650_v55, %v3239_v24  ;;  %v3254_v10 = vpop.f32.mrf.mxu0  ;;  %7053 = vmatprep.mubr.msk.f32.mxu1 %vm7871_vm1, %v13113_v1  ;;  %7182 = vmatpush3.msra.mxu0 %v13865_v17  ;;  %v10796_v24 = vsub.f32 %v520_v33, %v10776_v46  ;;  %v13870_v33 = vld [vmem:[#allocation97_spill] sm:$0xff] }
 0x28f   :  { %v3652_v37 = vpop.f32.mrf.mxu1  ;;  %v4132_v8 = vsub.f32 %v10747_v50, %v13866_v20  ;;  %7343 = vmatpush3.msra.mxu1 %v13867_v45  ;;  %7183 = vmatprep.subr.mxu0 %v13113_v1  ;;  %v10798_v10 = vand.u32 4294901760, %v523_v2 }
 0x290   :  { %v3259_v40 = vpop.f32.mrf.mxu0  ;;  %6899 = vmatmul.mubr.f32.gmra.mxu0 %v4113_v3  ;;  %13868 = vst [vmem:[#allocation154_spill] sm:$0xff] %v10796_v24  ;;  %v526_v37 = vsel %vm479_vm0, %v76_v21, 0  ;;  %7344 = vmatprep.subr.mxu1 %v13113_v1  ;;  %v79_v3 = vld [vmem:[#allocation2 + $0x190] sm:$0xff] }
 0x291   :  { %13869 = vst [vmem:[#allocation33_spill] sm:$0xff] %v10798_v10  ;;  %v3260_v38 = vadd.f32 %v3259_v40, %v10306_v25  ;;  %v3657_v20 = vpop.f32.mrf.mxu1  ;;  %7054 = vmatmul.mubr.f32.gmra.mxu1 %v10645_v4  ;;  %6901 = vmatprep.mubr.msk.f32.mxu0 %vm7871_vm1, %v13113_v1  ;;  %v4133_v45 = vand.u32 4294901760, %v4132_v8  ;;  %v10811_v17 = vand.u32 4294901760, %v526_v37  ;;  %v13872_v40 = vand.u32 4294901760, %v10774_v41 }
 0x292   :  { %v10806_v50 = vadd.f32 %v3657_v20, %v3246_v19  ;;  %v3261_v55 = vpop.f32.mrf.mxu0  ;;  %7056 = vmatprep.mubr.msk.f32.mxu1 %vm7871_vm1, %v13113_v1  ;;  %7184 = vmatpush3.msra.mxu0 %v13870_v33  ;;  %v10820_v20 = vsub.f32 %v523_v2, %v10798_v10  ;;  %v82_v2 = vld [vmem:[#allocation2 + $0x1a8] sm:$0xff] }
 0x293   :  { %v3659_v21 = vpop.f32.mrf.mxu1  ;;  %13871 = vst [vmem:[#allocation157_spill] sm:$0xff] %v10811_v17  ;;  %7345 = vmatpush3.msra.mxu1 %v10189_v36  ;;  %7185 = vmatprep.subr.mxu0 %v13113_v1  ;;  %v4142_v19 = vsub.f32 %v10774_v41, %v13872_v40  ;;  %v13874_v55 = vld [vmem:[#allocation101_spill] sm:$0xff]  ;;  %v10834_v41 = vsub.f32 %v526_v37, %v10811_v17 }
 0x294   :  { %v3266_v25 = vpop.f32.mrf.mxu0  ;;  %6902 = vmatmul.mubr.f32.gmra.mxu0 %v4123_v26  ;;  %13873 = vst [vmem:[#allocation41_spill] sm:$0xff] %v10820_v20  ;;  %v529_v21 = vsel %vm479_vm0, %v79_v3, 0  ;;  %7346 = vmatprep.subr.mxu1 %v13113_v1 }
 0x295   :  { %v3267_v8 = vadd.f32 %v3266_v25, %v10321_v52  ;;  %v3664_v4 = vpop.f32.mrf.mxu1  ;;  %7057 = vmatmul.mubr.f32.gmra.mxu1 %v10667_v32  ;;  %6904 = vmatprep.mubr.msk.f32.mxu0 %vm7871_vm1, %v13113_v1  ;;  %13875 = vst [vmem:[#allocation158_spill] sm:$0xff] %v10834_v41  ;;  %v10836_v52 = vand.u32 4294901760, %v529_v21 }
 0x296   :  { %v10828_v26 = vadd.f32 %v3664_v4, %v3253_v53  ;;  %v3268_v40 = vpop.f32.mrf.mxu0  ;;  %7059 = vmatprep.mubr.msk.f32.mxu1 %vm7871_vm1, %v13113_v1  ;;  %7186 = vmatpush3.msra.mxu0 %v13874_v55  ;;  %v4143_v4 = vand.u32 4294901760, %v4142_v19  ;;  %v13877_v53 = vand.u32 4294901760, %v10796_v24 }
 0x297   :  { %v3666_v3 = vpop.f32.mrf.mxu1  ;;  %13876 = vst [vmem:[#allocation36_spill] sm:$0xff] %v10836_v52  ;;  %7347 = vmatpush3.msra.mxu1 %v10211_v31  ;;  %7187 = vmatprep.subr.mxu0 %v13113_v1  ;;  %v532_v31 = vsel %vm479_vm0, %v82_v2, 0 }
 0x298   :  { %v3273_v25 = vpop.f32.mrf.mxu0  ;;  %6905 = vmatmul.mubr.f32.gmra.mxu0 %v4133_v45  ;;  %v4152_v40 = vsub.f32 %v10796_v24, %v13877_v53  ;;  %7348 = vmatprep.subr.mxu1 %v13113_v1  ;;  %v85_v53 = vld [vmem:[#allocation2 + $0x1c0] sm:$0xff] }
 0x299   :  { %v3274_v37 = vadd.f32 %v3273_v25, %v10335_v16  ;;  %v3671_v3 = vpop.f32.mrf.mxu1  ;;  %7060 = vmatmul.mubr.f32.gmra.mxu1 %v10688_v44  ;;  %6907 = vmatprep.mubr.msk.f32.mxu0 %vm7871_vm1, %v13113_v1  ;;  %v10857_v25 = vsub.f32 %v529_v21, %v10836_v52  ;;  %v10864_v44 = vand.u32 4294901760, %v532_v31  ;;  %v535_v21 = vsel %vm479_vm0, %v85_v53, 0 }
 0x29a   :  { %v10850_v45 = vadd.f32 %v3671_v3, %v3260_v38  ;;  %v3275_v19 = vpop.f32.mrf.mxu0  ;;  %7062 = vmatprep.mubr.msk.f32.mxu1 %vm7871_vm1, %v13113_v1  ;;  %7188 = vmatpush3.msra.mxu0 %v10250_v51  ;;  %v4153_v38 = vand.u32 4294901760, %v4152_v40  ;;  %v13879_v3 = vand.u32 4294901760, %v10820_v20 }
 0x29b   :  { %v3673_v32 = vpop.f32.mrf.mxu1  ;;  %13878 = vst [vmem:[#allocation159_spill] sm:$0xff] %v10857_v25  ;;  %7349 = vmatpush3.msra.mxu1 %v10233_v22  ;;  %7189 = vmatprep.subr.mxu0 %v13113_v1  ;;  %13880 = vst [vmem:[#allocation43_spill] sm:$0xff] %v10864_v44 }
 0x29c   :  { %v3280_v2 = vpop.f32.mrf.mxu0  ;;  %6908 = vmatmul.mubr.f32.gmra.mxu0 %v4143_v4  ;;  %v4162_v19 = vsub.f32 %v10820_v20, %v13879_v3  ;;  %7350 = vmatprep.subr.mxu1 %v13113_v1  ;;  %v88_v3 = vld [vmem:[#allocation2 + $0x1d8] sm:$0xff] }
 0x29d   :  { %v3281_v32 = vadd.f32 %v3280_v2, %v10347_v11  ;;  %v3678_v16 = vpop.f32.mrf.mxu1  ;;  %7063 = vmatmul.mubr.f32.gmra.mxu1 %v10701_v29  ;;  %6910 = vmatprep.mubr.msk.f32.mxu0 %vm7871_vm1, %v13113_v1  ;;  %v13881_v11 = vand.u32 4294901760, %v10834_v41  ;;  %v91_v29 = vld [vmem:[#allocation2 + $0x1f0] sm:$0xff] }
 0x29e   :  { %v10872_v4 = vadd.f32 %v3678_v16, %v3267_v8  ;;  %v3282_v40 = vpop.f32.mrf.mxu0  ;;  %7065 = vmatprep.mubr.msk.f32.mxu1 %vm7871_vm1, %v13113_v1  ;;  %7190 = vmatpush3.msra.mxu0 %v10277_v12  ;;  %v4163_v53 = vand.u32 4294901760, %v4162_v19  ;;  %v10884_v16 = vsub.f32 %v532_v31, %v10864_v44 }
 0x29f   :  { %v3680_v20 = vpop.f32.mrf.mxu1  ;;  %v4172_v2 = vsub.f32 %v10834_v41, %v13881_v11  ;;  %7351 = vmatpush3.msra.mxu1 %v10269_v61  ;;  %7191 = vmatprep.subr.mxu0 %v13113_v1  ;;  %v10886_v40 = vand.u32 4294901760, %v535_v21  ;;  %v538_v11 = vsel %vm479_vm0, %v88_v3, 0 }
 0x2a0   :  { %v3287_v8 = vpop.f32.mrf.mxu0  ;;  %6911 = vmatmul.mubr.f32.gmra.mxu0 %v4153_v38  ;;  %13882 = vst [vmem:[#allocation163_spill] sm:$0xff] %v10884_v16  ;;  %7352 = vmatprep.subr.mxu1 %v13113_v1 }
 0x2a1   :  { %13883 = vst [vmem:[#allocation37_spill] sm:$0xff] %v10886_v40  ;;  %v3288_v20 = vadd.f32 %v3287_v8, %v10355_v18  ;;  %v3685_v24 = vpop.f32.mrf.mxu1  ;;  %7066 = vmatmul.mubr.f32.gmra.mxu1 %v10726_v39  ;;  %6913 = vmatprep.mubr.msk.f32.mxu0 %vm7871_vm1, %v13113_v1  ;;  %v4173_v41 = vand.u32 4294901760, %v4172_v2  ;;  %v13884_v18 = vand.u32 4294901760, %v10857_v25  ;;  %v13885_v39 = vld [vmem:[#allocation105_spill] sm:$0xff] }
 0x2a2   :  { %v10894_v38 = vadd.f32 %v3685_v24, %v3274_v37  ;;  %v3289_v19 = vpop.f32.mrf.mxu0  ;;  %7068 = vmatprep.mubr.msk.f32.mxu1 %vm7871_vm1, %v13113_v1  ;;  %7192 = vmatpush3.msra.mxu0 %v10326_v13  ;;  %v10906_v37 = vsub.f32 %v535_v21, %v10886_v40 }
 0x2a3   :  { %v3687_v31 = vpop.f32.mrf.mxu1  ;;  %v4182_v8 = vsub.f32 %v10857_v25, %v13884_v18  ;;  %7353 = vmatpush3.msra.mxu1 %v13885_v39  ;;  %7489 = vmatprep.subr.mxu0 %v13113_v1  ;;  %v10908_v19 = vand.u32 4294901760, %v538_v11 }
 0x2a4   :  { %v3294_v3 = vpop.f32.mrf.mxu0  ;;  %6914 = vmatmul.mubr.f32.gmra.mxu0 %v4163_v53  ;;  %13886 = vst [vmem:[#allocation164_spill] sm:$0xff] %v10906_v37  ;;  %v541_v31 = vsel %vm479_vm0, %v91_v29, 0  ;;  %7650 = vmatprep.subr.mxu1 %v13113_v1  ;;  %v94_v53 = vld [vmem:[#allocation2 + $0x208] sm:$0xff] }
 0x2a5   :  { %13887 = vst [vmem:[#allocation44_spill] sm:$0xff] %v10908_v19  ;;  %v3295_v2 = vadd.f32 %v3294_v3, %v10362_v56  ;;  %v3692_v18 = vpop.f32.mrf.mxu1  ;;  %7069 = vmatmul.mubr.f32.gmra.mxu1 %v10754_v47  ;;  %6916 = vmatprep.mubr.msk.f32.mxu0 %vm7871_vm1, %v13113_v1  ;;  %v4183_v39 = vand.u32 4294901760, %v4182_v8  ;;  %v10920_v29 = vand.u32 4294901760, %v541_v31  ;;  %v13889_v56 = vand.u32 4294901760, %v10884_v16 }
 0x2a6   :  { %v10916_v25 = vadd.f32 %v3692_v18, %v3281_v32  ;;  %v3296_v24 = vpop.f32.mrf.mxu0  ;;  %7071 = vmatprep.mubr.msk.f32.mxu1 %vm7871_vm1, %v13113_v1  ;;  %v12960_v47 = vand.u32 4294901760, %v10906_v37  ;;  %v10927_v61 = vsub.f32 %v538_v11, %v10908_v19  ;;  %v544_v32 = vsel %vm479_vm0, %v94_v53, 0 }
 0x2a7   :  { %v3694_v21 = vpop.f32.mrf.mxu1  ;;  %13888 = vst [vmem:[#allocation166_spill] sm:$0xff] %v10920_v29  ;;  %v4192_v3 = vsub.f32 %v10884_v16, %v13889_v56  ;;  %v10939_v11 = vsub.f32 %v541_v31, %v10920_v29  ;;  %v10941_v53 = vand.u32 4294901760, %v544_v32 }
 0x2a8   :  { %v3301_v13 = vpop.f32.mrf.mxu0  ;;  %6917 = vmatmul.mubr.f32.gmra.mxu0 %v4173_v41  ;;  %13890 = vst [vmem:[#allocation38_spill] sm:$0xff] %v10927_v61  ;;  %v97_v21 = vld [vmem:[#allocation2 + $0x220] sm:$0xff] }
 0x2a9   :  { %v3302_v24 = vadd.f32 %v3301_v13, %v10369_v0  ;;  %v3699_v18 = vpop.f32.mrf.mxu1  ;;  %7072 = vmatmul.mubr.f32.gmra.mxu1 %v10776_v46  ;;  %6919 = vmatprep.mubr.msk.f32.mxu0 %vm7871_vm1, %v13113_v1  ;;  %13891 = vst [vmem:[#allocation168_spill] sm:$0xff] %v10939_v11  ;;  %13892 = vst [vmem:[#allocation46_spill] sm:$0xff] %v10941_v53  ;;  %v4193_v0 = vand.u32 4294901760, %v4192_v3  ;;  %v4202_v46 = vsub.f32 %v10906_v37, %v12960_v47  ;;  %v100_v3 = vld [vmem:[#allocation2 + $0x238] sm:$0xff] }
 0x2aa   :  { %v10934_v41 = vadd.f32 %v3699_v18, %v3288_v20  ;;  %v3303_v8 = vpop.f32.mrf.mxu0  ;;  %7074 = vmatprep.mubr.msk.f32.mxu1 %vm7871_vm1, %v13113_v1  ;;  %v547_v31 = vsel %vm479_vm0, %v97_v21, 0  ;;  %v12971_v20 = vand.u32 4294901760, %v10939_v11  ;;  %v13894_v37 = vand.u32 4294901760, %v10927_v61 }
 0x2ab   :  { %v3701_v56 = vpop.f32.mrf.mxu1 }
 0x2ac   :  { %v3308_v13 = vpop.f32.mrf.mxu0  ;;  %6920 = vmatmul.mubr.f32.gmra.mxu0 %v4183_v39  ;;  %v4212_v21 = vsub.f32 %v10927_v61, %v13894_v37 }
 0x2ad   :  { %v3309_v18 = vadd.f32 %v3308_v13, %v10376_v48  ;;  %v3706_v8 = vpop.f32.mrf.mxu1  ;;  %7075 = vmatmul.mubr.f32.gmra.mxu1 %v10798_v10  ;;  %6922 = vmatprep.mubr.msk.f32.mxu0 %vm7871_vm1, %v13113_v1  ;;  %v10958_v48 = vsub.f32 %v544_v32, %v10941_v53  ;;  %v4203_v10 = vand.u32 4294901760, %v4202_v46  ;;  %v103_v46 = vld [vmem:[#allocation2 + $0x250] sm:$0xff] }
 0x2ae   :  { %v10952_v56 = vadd.f32 %v3706_v8, %v3295_v2  ;;  %v3310_v39 = vpop.f32.mrf.mxu0  ;;  %7077 = vmatprep.mubr.msk.f32.mxu1 %vm7871_vm1, %v13113_v1  ;;  %v10963_v2 = vand.u32 4294901760, %v547_v31  ;;  %v4213_v61 = vand.u32 4294901760, %v4212_v21 }
 0x2af   :  { %v3708_v47 = vpop.f32.mrf.mxu1  ;;  %13893 = vst [vmem:[#allocation170_spill] sm:$0xff] %v10958_v48 }
 0x2b0   :  { %v3315_v13 = vpop.f32.mrf.mxu0  ;;  %6923 = vmatmul.mubr.f32.gmra.mxu0 %v4193_v0  ;;  %13895 = vst [vmem:[#allocation40_spill] sm:$0xff] %v10963_v2  ;;  %v550_v47 = vsel %vm479_vm0, %v100_v3, 0  ;;  %v10979_v16 = vsub.f32 %v547_v31, %v10963_v2 }
 0x2b1   :  { %v3316_v8 = vadd.f32 %v3315_v13, %v10383_v58  ;;  %v3713_v39 = vpop.f32.mrf.mxu1  ;;  %7078 = vmatmul.mubr.f32.gmra.mxu1 %v10811_v17  ;;  %6925 = vmatprep.mubr.msk.f32.mxu0 %vm7871_vm1, %v13113_v1  ;;  %v4222_v58 = vsub.f32 %v10939_v11, %v12971_v20  ;;  %v12976_v13 = vand.u32 4294901760, %v10958_v48 }
 0x2b2   :  { %v10970_v32 = vadd.f32 %v3713_v39, %v3302_v24  ;;  %v3317_v0 = vpop.f32.mrf.mxu0  ;;  %7080 = vmatprep.mubr.msk.f32.mxu1 %vm7871_vm1, %v13113_v1  ;;  %13896 = vst [vmem:[#allocation173_spill] sm:$0xff] %v10979_v16  ;;  %v10981_v24 = vand.u32 4294901760, %v550_v47 }
 0x2b3   :  { %v3715_v37 = vpop.f32.mrf.mxu1  ;;  %v553_v0 = vsel %vm479_vm0, %v103_v46, 0  ;;  %v4223_v21 = vand.u32 4294901760, %v4222_v58  ;;  %v109_v58 = vld [vmem:[#allocation2 + $0x280] sm:$0xff] }
 0x2b4   :  { %v3322_v17 = vpop.f32.mrf.mxu0  ;;  %6926 = vmatmul.mubr.f32.gmra.mxu0 %v4203_v10  ;;  %13897 = vst [vmem:[#allocation57_spill] sm:$0xff] %v10981_v24  ;;  %v106_v37 = vld [vmem:[#allocation2 + $0x268] sm:$0xff]  ;;  %v10997_v11 = vsub.f32 %v550_v47, %v10981_v24  ;;  %v10999_v46 = vand.u32 4294901760, %v553_v0 }
 0x2b5   :  { %v3323_v3 = vadd.f32 %v3322_v17, %v10390_v15  ;;  %v3720_v39 = vpop.f32.mrf.mxu1  ;;  %7081 = vmatmul.mubr.f32.gmra.mxu1 %v10836_v52  ;;  %6928 = vmatprep.mubr.msk.f32.mxu0 %vm7871_vm1, %v13113_v1  ;;  %v4232_v15 = vsub.f32 %v10958_v48, %v12976_v13 }
 0x2b6   :  { %v10988_v20 = vadd.f32 %v3720_v39, %v3309_v18  ;;  %v3324_v10 = vpop.f32.mrf.mxu0  ;;  %7083 = vmatprep.mubr.msk.f32.mxu1 %vm7871_vm1, %v13113_v1  ;;  %13898 = vst [vmem:[#allocation174_spill] sm:$0xff] %v10997_v11  ;;  %13899 = vst [vmem:[#allocation48_spill] sm:$0xff] %v10999_v46  ;;  %v556_v18 = vsel %vm479_vm0, %v106_v37, 0  ;;  %v11017_v48 = vsub.f32 %v553_v0, %v10999_v46 }
 0x2b7   :  { %v3722_v31 = vpop.f32.mrf.mxu1  ;;  %v4233_v13 = vand.u32 4294901760, %v4232_v15  ;;  %v11010_v52 = vand.u32 4294901760, %v556_v18 }
 0x2b8   :  { %v3329_v17 = vpop.f32.mrf.mxu0  ;;  %6929 = vmatmul.mubr.f32.gmra.mxu0 %v4213_v61  ;;  %13902 = vst [vmem:[#allocation178_spill] sm:$0xff] %v11017_v48 }
 0x2b9   :  { %v3330_v39 = vadd.f32 %v3329_v17, %v10397_v27  ;;  %v3727_v10 = vpop.f32.mrf.mxu1  ;;  %7084 = vmatmul.mubr.f32.gmra.mxu1 %v10864_v44  ;;  %6931 = vmatprep.mubr.msk.f32.mxu0 %vm7871_vm1, %v13113_v1  ;;  %13900 = vst [vmem:[#allocation175_spill] sm:$0xff] %v11010_v52  ;;  %v13901_v27 = vand.u32 4294901760, %v10979_v16  ;;  %v12983_v44 = vand.u32 4294901760, %v10997_v11  ;;  %v11029_v0 = vsub.f32 %v556_v18, %v11010_v52 }
 0x2ba   :  { %v11006_v31 = vadd.f32 %v3727_v10, %v3316_v8  ;;  %v3331_v61 = vpop.f32.mrf.mxu0  ;;  %7086 = vmatprep.mubr.msk.f32.mxu1 %vm7871_vm1, %v13113_v1  ;;  %v559_v8 = vsel %vm479_vm0, %v109_v58, 0 }
 0x2bb   :  { %v3729_v47 = vpop.f32.mrf.mxu1  ;;  %v4242_v17 = vsub.f32 %v10979_v16, %v13901_v27  ;;  %13903 = vst [vmem:[#allocation180_spill] sm:$0xff] %v11029_v0  ;;  %v11031_v58 = vand.u32 4294901760, %v559_v8 }
 0x2bc   :  { %v3336_v37 = vpop.f32.mrf.mxu0  ;;  %6932 = vmatmul.mubr.f32.gmra.mxu0 %v4223_v21  ;;  %v112_v47 = vld [vmem:[#allocation2 + $0x298] sm:$0xff] }
 0x2bd   :  { %v3337_v10 = vadd.f32 %v3336_v37, %v10404_v34  ;;  %v3734_v61 = vpop.f32.mrf.mxu1  ;;  %7087 = vmatmul.mubr.f32.gmra.mxu1 %v10886_v40  ;;  %6934 = vmatprep.mubr.msk.f32.mxu0 %vm7871_vm1, %v13113_v1  ;;  %13904 = vst [vmem:[#allocation182_spill] sm:$0xff] %v11031_v58  ;;  %v4243_v37 = vand.u32 4294901760, %v4242_v17  ;;  %v4252_v40 = vsub.f32 %v10997_v11, %v12983_v44  ;;  %v562_v18 = vsel %vm479_vm0, %v112_v47, 0  ;;  %v115_v17 = vld [vmem:[#allocation2 + $0x2b0] sm:$0xff] }
 0x2be   :  { %v11024_v21 = vadd.f32 %v3734_v61, %v3323_v3  ;;  %v3338_v15 = vpop.f32.mrf.mxu0  ;;  %7089 = vmatprep.mubr.msk.f32.mxu1 %vm7871_vm1, %v13113_v1  ;;  %v12994_v3 = vand.u32 4294901760, %v11029_v0  ;;  %v13907_v11 = vand.u32 4294901760, %v11017_v48 }
 0x2bf   :  { %v3736_v27 = vpop.f32.mrf.mxu1 }
 0x2c0   :  { %v3343_v34 = vpop.f32.mrf.mxu0  ;;  %6935 = vmatmul.mubr.f32.gmra.mxu0 %v4233_v13  ;;  %v4262_v47 = vsub.f32 %v11017_v48, %v13907_v11 }
 0x2c1   :  { %v3344_v61 = vadd.f32 %v3343_v34, %v10411_v57  ;;  %v3741_v15 = vpop.f32.mrf.mxu1  ;;  %7090 = vmatmul.mubr.f32.gmra.mxu1 %v10908_v19  ;;  %6937 = vmatprep.mubr.msk.f32.mxu0 %vm7871_vm1, %v13113_v1  ;;  %v11048_v57 = vsub.f32 %v559_v8, %v11031_v58  ;;  %v4253_v19 = vand.u32 4294901760, %v4252_v40  ;;  %v118_v40 = vld [vmem:[#allocation2 + $0x2c8] sm:$0xff] }
 0x2c2   :  { %v11042_v27 = vadd.f32 %v3741_v15, %v3330_v39  ;;  %v3345_v13 = vpop.f32.mrf.mxu0  ;;  %7092 = vmatprep.mubr.msk.f32.mxu1 %vm7871_vm1, %v13113_v1  ;;  %v11053_v39 = vand.u32 4294901760, %v562_v18  ;;  %v13909_v15 = vld [vmem:[#allocation14_spill] sm:$0xff]  ;;  %v4263_v48 = vand.u32 4294901760, %v4262_v47 }
 0x2c3   :  { %v3743_v44 = vpop.f32.mrf.mxu1  ;;  %13906 = vst [vmem:[#allocation185_spill] sm:$0xff] %v11048_v57 }
 0x2c4   :  { %13905 = vst [vmem:[#allocation183_spill] sm:$0xff] %v11042_v27  ;;  %v3350_v34 = vpop.f32.mrf.mxu0  ;;  %6938 = vmatmul.mubr.f32.gmra.mxu0 %v4243_v37  ;;  %13908 = vst [vmem:[#allocation188_spill] sm:$0xff] %v11053_v39  ;;  %v565_v44 = vsel %vm479_vm0, %v115_v17, 0  ;;  %v11069_v27 = vsub.f32 %v562_v18, %v11053_v39 }
 0x2c5   :  { %v3351_v13 = vadd.f32 %v3350_v34, %v13909_v15  ;;  %v3748_v16 = vpop.f32.mrf.mxu1  ;;  %7093 = vmatmul.mubr.f32.gmra.mxu1 %v10920_v29  ;;  %6940 = vmatprep.mubr.msk.f32.mxu0 %vm7871_vm1, %v13113_v1  ;;  %v4272_v34 = vsub.f32 %v11029_v0, %v12994_v3  ;;  %v121_v3 = vld [vmem:[#allocation2 + $0x2e0] sm:$0xff]  ;;  %v13915_v0 = vand.u32 4294901760, %v11048_v57 }
 0x2c6   :  { %v11060_v8 = vadd.f32 %v3748_v16, %v3337_v10  ;;  %v3352_v37 = vpop.f32.mrf.mxu0  ;;  %7095 = vmatprep.mubr.msk.f32.mxu1 %vm7871_vm1, %v13113_v1  ;;  %13911 = vst [vmem:[#allocation190_spill] sm:$0xff] %v11069_v27  ;;  %v11071_v16 = vand.u32 4294901760, %v565_v44  ;;  %v13913_v10 = vld [vmem:[#allocation11_spill] sm:$0xff] }
 0x2c7   :  { %v3750_v11 = vpop.f32.mrf.mxu1  ;;  %v4273_v47 = vand.u32 4294901760, %v4272_v34 }
 0x2c8   :  { %13910 = vst [vmem:[#allocation189_spill] sm:$0xff] %v11060_v8  ;;  %v3357_v29 = vpop.f32.mrf.mxu0  ;;  %6941 = vmatmul.mubr.f32.gmra.mxu0 %v4253_v19  ;;  %13912 = vst [vmem:[#allocation193_spill] sm:$0xff] %v11071_v16  ;;  %v568_v11 = vsel %vm479_vm0, %v118_v40, 0  ;;  %v11087_v8 = vsub.f32 %v565_v44, %v11071_v16 }
 0x2c9   :  { %v3358_v17 = vadd.f32 %v3357_v29, %v13913_v10  ;;  %v3755_v37 = vpop.f32.mrf.mxu1  ;;  %7096 = vmatmul.mubr.f32.gmra.mxu1 %v10941_v53  ;;  %6943 = vmatprep.mubr.msk.f32.mxu0 %vm7871_vm1, %v13113_v1  ;;  %v4282_v29 = vsub.f32 %v11048_v57, %v13915_v0  ;;  %v11089_v40 = vand.u32 4294901760, %v568_v11  ;;  %v124_v0 = vld [vmem:[#allocation2 + $0x2f8] sm:$0xff] }
 0x2ca   :  { %v11078_v15 = vadd.f32 %v3755_v37, %v3344_v61  ;;  %v3359_v19 = vpop.f32.mrf.mxu0  ;;  %7098 = vmatprep.mubr.msk.f32.mxu1 %vm7871_vm1, %v13113_v1  ;;  %13916 = vst [vmem:[#allocation197_spill] sm:$0xff] %v11087_v8  ;;  %v571_v61 = vsel %vm479_vm0, %v121_v3, 0  ;;  %v13918_v37 = vld [vmem:[#allocation107_spill] sm:$0xff] }
 0x2cb   :  { %v3757_v18 = vpop.f32.mrf.mxu1  ;;  %13917 = vst [vmem:[#allocation199_spill] sm:$0xff] %v11089_v40  ;;  %v11100_v53 = vand.u32 4294901760, %v571_v61  ;;  %v11107_v57 = vsub.f32 %v568_v11, %v11089_v40 }
 0x2cc   :  { %13914 = vst [vmem:[#allocation195_spill] sm:$0xff] %v11078_v15  ;;  %v3364_v10 = vpop.f32.mrf.mxu0  ;;  %6944 = vmatmul.mubr.f32.gmra.mxu0 %v4263_v48  ;;  %v4283_v18 = vand.u32 4294901760, %v4282_v29 }
 0x2cd   :  { %v3365_v19 = vadd.f32 %v3364_v10, %v13918_v37  ;;  %v3762_v15 = vpop.f32.mrf.mxu1  ;;  %7099 = vmatmul.mubr.f32.gmra.mxu1 %v10963_v2  ;;  %6946 = vmatprep.mubr.msk.f32.mxu0 %vm7871_vm1, %v13113_v1  ;;  %13920 = vst [vmem:[#allocation204_spill] sm:$0xff] %v11100_v53  ;;  %v13921_v10 = vand.u32 4294901760, %v11069_v27  ;;  %v13007_v2 = vand.u32 4294901760, %v11087_v8  ;;  %13922 = vst [vmem:[#allocation205_spill] sm:$0xff] %v11107_v57 }
 0x2ce   :  { %v11096_v34 = vadd.f32 %v3762_v15, %v3351_v13  ;;  %v3366_v48 = vpop.f32.mrf.mxu0  ;;  %7101 = vmatprep.mubr.msk.f32.mxu1 %vm7871_vm1, %v13113_v1  ;;  %v574_v13 = vsel %vm479_vm0, %v124_v0, 0  ;;  %v13923_v15 = vld [vmem:[#allocation108_spill] sm:$0xff]  ;;  %v11119_v11 = vsub.f32 %v571_v61, %v11100_v53 }
 0x2cf   :  { %v3764_v44 = vpop.f32.mrf.mxu1  ;;  %v4292_v37 = vsub.f32 %v11069_v27, %v13921_v10  ;;  %v11121_v0 = vand.u32 4294901760, %v574_v13 }
 0x2d0   :  { %13919 = vst [vmem:[#allocation202_spill] sm:$0xff] %v11096_v34  ;;  %v3371_v3 = vpop.f32.mrf.mxu0  ;;  %6947 = vmatmul.mubr.f32.gmra.mxu0 %v4273_v47  ;;  %v127_v44 = vld [vmem:[#allocation2 + $0x310] sm:$0xff]  ;;  %13925 = vst [vmem:[#allocation209_spill] sm:$0xff] %v11119_v11 }
 0x2d1   :  { %v3372_v48 = vadd.f32 %v3371_v3, %v13923_v15  ;;  %v3769_v34 = vpop.f32.mrf.mxu1  ;;  %7102 = vmatmul.mubr.f32.gmra.mxu1 %v10981_v24  ;;  %6949 = vmatprep.mubr.msk.f32.mxu0 %vm7871_vm1, %v13113_v1  ;;  %13926 = vst [vmem:[#allocation42_spill] sm:$0xff] %v11121_v0  ;;  %v4293_v15 = vand.u32 4294901760, %v4292_v37  ;;  %v4302_v24 = vsub.f32 %v11087_v8, %v13007_v2  ;;  %v577_v61 = vsel %vm479_vm0, %v127_v44, 0  ;;  %v130_v37 = vld [vmem:[#allocation2 + $0x328] sm:$0xff] }
 0x2d2   :  { %v11114_v47 = vadd.f32 %v3769_v34, %v3358_v17  ;;  %v3373_v29 = vpop.f32.mrf.mxu0  ;;  %7104 = vmatprep.mubr.msk.f32.mxu1 %vm7871_vm1, %v13113_v1  ;;  %v13927_v34 = vld [vmem:[#allocation16_spill] sm:$0xff]  ;;  %v13016_v17 = vand.u32 4294901760, %v11119_v11  ;;  %v13930_v8 = vand.u32 4294901760, %v11107_v57 }
 0x2d3   :  { %v3771_v10 = vpop.f32.mrf.mxu1 }
 0x2d4   :  { %13924 = vst [vmem:[#allocation207_spill] sm:$0xff] %v11114_v47  ;;  %v3378_v3 = vpop.f32.mrf.mxu0  ;;  %6950 = vmatmul.mubr.f32.gmra.mxu0 %v4283_v18  ;;  %v4312_v44 = vsub.f32 %v11107_v57, %v13930_v8 }
 0x2d5   :  { %v3379_v29 = vadd.f32 %v3378_v3, %v13927_v34  ;;  %v3776_v27 = vpop.f32.mrf.mxu1  ;;  %7105 = vmatmul.mubr.f32.gmra.mxu1 %v10999_v46  ;;  %6952 = vmatprep.mubr.msk.f32.mxu0 %vm7871_vm1, %v13113_v1  ;;  %v11138_v3 = vsub.f32 %v574_v13, %v11121_v0  ;;  %v4303_v46 = vand.u32 4294901760, %v4302_v24  ;;  %v133_v24 = vld [vmem:[#allocation2 + $0x340] sm:$0xff] }
 0x2d6   :  { %v11132_v10 = vadd.f32 %v3776_v27, %v3365_v19  ;;  %v3380_v18 = vpop.f32.mrf.mxu0  ;;  %7107 = vmatprep.mubr.msk.f32.mxu1 %vm7871_vm1, %v13113_v1  ;;  %v11143_v27 = vand.u32 4294901760, %v577_v61  ;;  %v13932_v19 = vld [vmem:[#allocation111_spill] sm:$0xff]  ;;  %v4313_v57 = vand.u32 4294901760, %v4312_v44 }
 0x2d7   :  { %v3778_v2 = vpop.f32.mrf.mxu1  ;;  %13929 = vst [vmem:[#allocation47_spill] sm:$0xff] %v11138_v3 }
 0x2d8   :  { %13928 = vst [vmem:[#allocation45_spill] sm:$0xff] %v11132_v10  ;;  %v3385_v34 = vpop.f32.mrf.mxu0  ;;  %6953 = vmatmul.mubr.f32.gmra.mxu0 %v4293_v15  ;;  %13931 = vst [vmem:[#allocation52_spill] sm:$0xff] %v11143_v27  ;;  %v580_v2 = vsel %vm479_vm0, %v130_v37, 0  ;;  %v11159_v47 = vsub.f32 %v577_v61, %v11143_v27 }
 0x2d9   :  { %v3386_v18 = vadd.f32 %v3385_v34, %v13932_v19  ;;  %v3783_v10 = vpop.f32.mrf.mxu1  ;;  %7108 = vmatmul.mubr.f32.gmra.mxu1 %v11010_v52  ;;  %6955 = vmatprep.mubr.msk.f32.mxu0 %vm7871_vm1, %v13113_v1  ;;  %v4322_v34 = vsub.f32 %v11119_v11, %v13016_v17  ;;  %v136_v17 = vld [vmem:[#allocation2 + $0x358] sm:$0xff]  ;;  %v13938_v11 = vand.u32 4294901760, %v11138_v3 }
 0x2da   :  { %v11150_v13 = vadd.f32 %v3783_v10, %v3372_v48  ;;  %v3387_v15 = vpop.f32.mrf.mxu0  ;;  %7110 = vmatprep.mubr.msk.f32.mxu1 %vm7871_vm1, %v13113_v1  ;;  %13934 = vst [vmem:[#allocation60_spill] sm:$0xff] %v11159_v47  ;;  %v11161_v48 = vand.u32 4294901760, %v580_v2  ;;  %v13936_v10 = vld [vmem:[#allocation113_spill] sm:$0xff] }
 0x2db   :  { %v3785_v8 = vpop.f32.mrf.mxu1  ;;  %v4323_v44 = vand.u32 4294901760, %v4322_v34 }
 0x2dc   :  { %13933 = vst [vmem:[#allocation54_spill] sm:$0xff] %v11150_v13  ;;  %v3392_v52 = vpop.f32.mrf.mxu0  ;;  %6956 = vmatmul.mubr.f32.gmra.mxu0 %v4303_v46  ;;  %13935 = vst [vmem:[#allocation62_spill] sm:$0xff] %v11161_v48  ;;  %v583_v8 = vsel %vm479_vm0, %v133_v24, 0  ;;  %v11177_v13 = vsub.f32 %v580_v2, %v11161_v48 }
 0x2dd   :  { %v3393_v37 = vadd.f32 %v3392_v52, %v13936_v10  ;;  %v3790_v15 = vpop.f32.mrf.mxu1  ;;  %7111 = vmatmul.mubr.f32.gmra.mxu1 %v11031_v58  ;;  %6958 = vmatprep.mubr.msk.f32.mxu0 %vm7871_vm1, %v13113_v1  ;;  %v4332_v52 = vsub.f32 %v11138_v3, %v13938_v11  ;;  %v11179_v24 = vand.u32 4294901760, %v583_v8  ;;  %v139_v11 = vld [vmem:[#allocation2 + $0x370] sm:$0xff] }
 0x2de   :  { %v11168_v19 = vadd.f32 %v3790_v15, %v3379_v29  ;;  %v3394_v46 = vpop.f32.mrf.mxu0  ;;  %7113 = vmatprep.mubr.msk.f32.mxu1 %vm7871_vm1, %v13113_v1  ;;  %13939 = vst [vmem:[#allocation65_spill] sm:$0xff] %v11177_v13  ;;  %v586_v29 = vsel %vm479_vm0, %v136_v17, 0  ;;  %v13941_v15 = vld [vmem:[#allocation18_spill] sm:$0xff] }
 0x2df   :  { %v3792_v61 = vpop.f32.mrf.mxu1  ;;  %13940 = vst [vmem:[#allocation66_spill] sm:$0xff] %v11179_v24  ;;  %v11190_v58 = vand.u32 4294901760, %v586_v29  ;;  %v11197_v3 = vsub.f32 %v583_v8, %v11179_v24 }
 0x2e0   :  { %13937 = vst [vmem:[#allocation64_spill] sm:$0xff] %v11168_v19  ;;  %v3399_v10 = vpop.f32.mrf.mxu0  ;;  %6959 = vmatmul.mubr.f32.gmra.mxu0 %v4313_v57  ;;  %v4333_v61 = vand.u32 4294901760, %v4332_v52 }
 0x2e1   :  { %v3400_v46 = vadd.f32 %v3399_v10, %v13941_v15  ;;  %v3797_v19 = vpop.f32.mrf.mxu1  ;;  %7114 = vmatmul.mubr.f32.gmra.mxu1 %v11053_v39  ;;  %6961 = vmatprep.mubr.msk.f32.mxu0 %vm7871_vm1, %v13113_v1  ;;  %13943 = vst [vmem:[#allocation72_spill] sm:$0xff] %v11190_v58  ;;  %v13944_v10 = vand.u32 4294901760, %v11159_v47  ;;  %v13029_v39 = vand.u32 4294901760, %v11177_v13  ;;  %13945 = vst [vmem:[#allocation73_spill] sm:$0xff] %v11197_v3 }
 0x2e2   :  { %v11186_v34 = vadd.f32 %v3797_v19, %v3386_v18  ;;  %v3401_v57 = vpop.f32.mrf.mxu0  ;;  %7116 = vmatprep.mubr.msk.f32.mxu1 %vm7871_vm1, %v13113_v1  ;;  %v589_v18 = vsel %vm479_vm0, %v139_v11, 0  ;;  %v13946_v19 = vld [vmem:[#allocation115_spill] sm:$0xff]  ;;  %v11209_v8 = vsub.f32 %v586_v29, %v11190_v58 }
 0x2e3   :  { %v3799_v2 = vpop.f32.mrf.mxu1  ;;  %v4342_v15 = vsub.f32 %v11159_v47, %v13944_v10  ;;  %v11211_v11 = vand.u32 4294901760, %v589_v18 }
 0x2e4   :  { %13942 = vst [vmem:[#allocation67_spill] sm:$0xff] %v11186_v34  ;;  %v3406_v17 = vpop.f32.mrf.mxu0  ;;  %6962 = vmatmul.mubr.f32.gmra.mxu0 %v4323_v44  ;;  %v142_v2 = vld [vmem:[#allocation2 + $0x388] sm:$0xff]  ;;  %13948 = vst [vmem:[#allocation77_spill] sm:$0xff] %v11209_v8 }
 0x2e5   :  { %v3407_v57 = vadd.f32 %v3406_v17, %v13946_v19  ;;  %v3804_v34 = vpop.f32.mrf.mxu1  ;;  %7117 = vmatmul.mubr.f32.gmra.mxu1 %v11071_v16  ;;  %6964 = vmatprep.mubr.msk.f32.mxu0 %vm7871_vm1, %v13113_v1  ;;  %13949 = vst [vmem:[#allocation78_spill] sm:$0xff] %v11211_v11  ;;  %v4343_v19 = vand.u32 4294901760, %v4342_v15  ;;  %v4352_v16 = vsub.f32 %v11177_v13, %v13029_v39  ;;  %v592_v29 = vsel %vm479_vm0, %v142_v2, 0  ;;  %v145_v15 = vld [vmem:[#allocation2 + $0x3a0] sm:$0xff] }
 0x2e6   :  { %v11204_v44 = vadd.f32 %v3804_v34, %v3393_v37  ;;  %v3408_v52 = vpop.f32.mrf.mxu0  ;;  %7119 = vmatprep.mubr.msk.f32.mxu1 %vm7871_vm1, %v13113_v1  ;;  %v13950_v34 = vld [vmem:[#allocation13_spill] sm:$0xff]  ;;  %v13038_v37 = vand.u32 4294901760, %v11209_v8  ;;  %v13953_v13 = vand.u32 4294901760, %v11197_v3 }
 0x2e7   :  { %v3806_v10 = vpop.f32.mrf.mxu1 }
 0x2e8   :  { %13947 = vst [vmem:[#allocation75_spill] sm:$0xff] %v11204_v44  ;;  %v3413_v17 = vpop.f32.mrf.mxu0  ;;  %6965 = vmatmul.mubr.f32.gmra.mxu0 %v4333_v61  ;;  %v4362_v2 = vsub.f32 %v11197_v3, %v13953_v13 }
 0x2e9   :  { %v3414_v52 = vadd.f32 %v3413_v17, %v13950_v34  ;;  %v3811_v47 = vpop.f32.mrf.mxu1  ;;  %7120 = vmatmul.mubr.f32.gmra.mxu1 %v11089_v40  ;;  %6967 = vmatprep.mubr.msk.f32.mxu0 %vm7871_vm1, %v13113_v1  ;;  %v11228_v17 = vsub.f32 %v589_v18, %v11211_v11  ;;  %v4353_v40 = vand.u32 4294901760, %v4352_v16  ;;  %v148_v16 = vld [vmem:[#allocation2 + $0x3b8] sm:$0xff] }
 0x2ea   :  { %v11222_v10 = vadd.f32 %v3811_v47, %v3400_v46  ;;  %v3415_v61 = vpop.f32.mrf.mxu0  ;;  %7122 = vmatprep.mubr.msk.f32.mxu1 %vm7871_vm1, %v13113_v1  ;;  %v11233_v47 = vand.u32 4294901760, %v592_v29  ;;  %v13955_v46 = vld [vmem:[#allocation117_spill] sm:$0xff]  ;;  %v4363_v3 = vand.u32 4294901760, %v4362_v2 }
 0x2eb   :  { %v3813_v39 = vpop.f32.mrf.mxu1  ;;  %13952 = vst [vmem:[#allocation81_spill] sm:$0xff] %v11228_v17 }
 0x2ec   :  { %13951 = vst [vmem:[#allocation79_spill] sm:$0xff] %v11222_v10  ;;  %v3420_v34 = vpop.f32.mrf.mxu0  ;;  %6968 = vmatmul.mubr.f32.gmra.mxu0 %v4343_v19  ;;  %13954 = vst [vmem:[#allocation83_spill] sm:$0xff] %v11233_v47  ;;  %v595_v39 = vsel %vm479_vm0, %v145_v15, 0  ;;  %v11249_v44 = vsub.f32 %v592_v29, %v11233_v47 }
 0x2ed   :  { %v3421_v61 = vadd.f32 %v3420_v34, %v13955_v46  ;;  %v3818_v10 = vpop.f32.mrf.mxu1  ;;  %7123 = vmatmul.mubr.f32.gmra.mxu1 %v11100_v53  ;;  %6970 = vmatprep.mubr.msk.f32.mxu0 %vm7871_vm1, %v13113_v1  ;;  %v4372_v34 = vsub.f32 %v11209_v8, %v13038_v37  ;;  %v151_v37 = vld [vmem:[#allocation2 + $0x3d0] sm:$0xff]  ;;  %v13961_v8 = vand.u32 4294901760, %v11228_v17 }
 0x2ee   :  { %v11240_v18 = vadd.f32 %v3818_v10, %v3407_v57  ;;  %v3422_v19 = vpop.f32.mrf.mxu0  ;;  %7125 = vmatprep.mubr.msk.f32.mxu1 %vm7871_vm1, %v13113_v1  ;;  %13957 = vst [vmem:[#allocation85_spill] sm:$0xff] %v11249_v44  ;;  %v11251_v57 = vand.u32 4294901760, %v595_v39  ;;  %v13959_v10 = vld [vmem:[#allocation20_spill] sm:$0xff] }
 0x2ef   :  { %v3820_v13 = vpop.f32.mrf.mxu1  ;;  %v4373_v2 = vand.u32 4294901760, %v4372_v34 }
 0x2f0   :  { %13956 = vst [vmem:[#allocation84_spill] sm:$0xff] %v11240_v18  ;;  %v3427_v53 = vpop.f32.mrf.mxu0  ;;  %6971 = vmatmul.mubr.f32.gmra.mxu0 %v4353_v40  ;;  %13958 = vst [vmem:[#allocation90_spill] sm:$0xff] %v11251_v57  ;;  %v598_v13 = vsel %vm479_vm0, %v148_v16, 0  ;;  %v11267_v18 = vsub.f32 %v595_v39, %v11251_v57  ;;  %v154_v39 = vld [vmem:[#allocation2 + $0x3e8] sm:$0xff] }
 0x2f1   :  { %v3428_v15 = vadd.f32 %v3427_v53, %v13959_v10  ;;  %v3825_v19 = vpop.f32.mrf.mxu1  ;;  %7126 = vmatmul.mubr.f32.gmra.mxu1 %v11121_v0  ;;  %6973 = vmatprep.mubr.msk.f32.mxu0 %vm7871_vm1, %v13113_v1  ;;  %v4382_v53 = vsub.f32 %v11228_v17, %v13961_v8  ;;  %v11269_v16 = vand.u32 4294901760, %v598_v13 }
 0x2f2   :  { %v11258_v46 = vadd.f32 %v3825_v19, %v3414_v52  ;;  %v3429_v40 = vpop.f32.mrf.mxu0  ;;  %7128 = vmatprep.mubr.msk.f32.mxu1 %vm7871_vm1, %v13113_v1  ;;  %13962 = vst [vmem:[#allocation93_spill] sm:$0xff] %v11267_v18  ;;  %v601_v52 = vsel %vm479_vm0, %v151_v37, 0  ;;  %v13963_v19 = vld [vmem:[#allocation119_spill] sm:$0xff] }
 0x2f3   :  { %v3827_v29 = vpop.f32.mrf.mxu1  ;;  %v4383_v37 = vand.u32 4294901760, %v4382_v53 }
 0x2f4   :  { %13960 = vst [vmem:[#allocation91_spill] sm:$0xff] %v11258_v46  ;;  %v3434_v10 = vpop.f32.mrf.mxu0  ;;  %6974 = vmatmul.mubr.f32.gmra.mxu0 %v4363_v3  ;;  %v11280_v29 = vand.u32 4294901760, %v601_v52 }
 0x2f5   :  { %v3435_v40 = vadd.f32 %v3434_v10, %v13963_v19  ;;  %v3832_v46 = vpop.f32.mrf.mxu1  ;;  %7129 = vmatmul.mubr.f32.gmra.mxu1 %v11143_v27  ;;  %6976 = vmatprep.mubr.msk.f32.mxu0 %vm7871_vm1, %v13113_v1  ;;  %v13965_v10 = vand.u32 4294901760, %v11249_v44 }
 0x2f6   :  { %v11276_v8 = vadd.f32 %v3832_v46, %v3421_v61  ;;  %v3436_v3 = vpop.f32.mrf.mxu0  ;;  %7131 = vmatprep.mubr.msk.f32.mxu1 %vm7871_vm1, %v13113_v1  ;;  %v11287_v61 = vsub.f32 %v598_v13, %v11269_v16  ;;  %v13967_v46 = vld [vmem:[#allocation15_spill] sm:$0xff]  ;;  %v11299_v13 = vsub.f32 %v601_v52, %v11280_v29 }
 0x2f7   :  { %v3834_v34 = vpop.f32.mrf.mxu1  ;;  %v4392_v19 = vsub.f32 %v11249_v44, %v13965_v10  ;;  %v157_v10 = vld [vmem:[#allocation2 + $0x400] sm:$0xff] }
 0x2f8   :  { %13964 = vst [vmem:[#allocation95_spill] sm:$0xff] %v11276_v8  ;;  %v3441_v0 = vpop.f32.mrf.mxu0  ;;  %6977 = vmatmul.mubr.f32.gmra.mxu0 %v4373_v2  ;;  %13966 = vst [vmem:[#allocation96_spill] sm:$0xff] %v11287_v61  ;;  %v604_v2 = vsel %vm479_vm0, %v154_v39, 0  ;;  %v13059_v39 = vand.u32 4294901760, %v11299_v13 }
 0x2f9   :  { %v3442_v3 = vadd.f32 %v3441_v0, %v13967_v46  ;;  %v3839_v17 = vpop.f32.mrf.mxu1  ;;  %7132 = vmatmul.mubr.f32.gmra.mxu1 %v11161_v48  ;;  %6979 = vmatprep.mubr.msk.f32.mxu0 %vm7871_vm1, %v13113_v1  ;;  %13969 = vst [vmem:[#allocation100_spill] sm:$0xff] %v11299_v13  ;;  %v4393_v46 = vand.u32 4294901760, %v4392_v19  ;;  %v13970_v48 = vand.u32 4294901760, %v11267_v18 }
 0x2fa   :  { %v11294_v53 = vadd.f32 %v3839_v17, %v3428_v15  ;;  %v3443_v34 = vpop.f32.mrf.mxu0  ;;  %7134 = vmatprep.mubr.msk.f32.mxu1 %vm7871_vm1, %v13113_v1  ;;  %v11305_v17 = vand.u32 4294901760, %v604_v2  ;;  %v13971_v15 = vld [vmem:[#allocation121_spill] sm:$0xff] }
 0x2fb   :  { %v3841_v27 = vpop.f32.mrf.mxu1  ;;  %v4402_v44 = vsub.f32 %v11267_v18, %v13970_v48  ;;  %v160_v48 = vld [vmem:[#allocation2 + $0x418] sm:$0xff] }
 0x2fc   :  { %13968 = vst [vmem:[#allocation98_spill] sm:$0xff] %v11294_v53  ;;  %v3448_v0 = vpop.f32.mrf.mxu0  ;;  %6980 = vmatmul.mubr.f32.gmra.mxu0 %v4383_v37  ;;  %v607_v27 = vsel %vm479_vm0, %v157_v10, 0  ;;  %v11321_v8 = vsub.f32 %v604_v2, %v11305_v17  ;;  %v163_v2 = vld [vmem:[#allocation2 + $0x430] sm:$0xff] }
 0x2fd   :  { %v3449_v34 = vadd.f32 %v3448_v0, %v13971_v15  ;;  %v3846_v53 = vpop.f32.mrf.mxu1  ;;  %7135 = vmatmul.mubr.f32.gmra.mxu1 %v11179_v24  ;;  %6982 = vmatprep.mubr.msk.f32.mxu0 %vm7871_vm1, %v13113_v1  ;;  %v4403_v0 = vand.u32 4294901760, %v4402_v44  ;;  %v13973_v15 = vand.u32 4294901760, %v11287_v61 }
 0x2fe   :  { %v11312_v52 = vadd.f32 %v3846_v53, %v3435_v40  ;;  %v3450_v37 = vpop.f32.mrf.mxu0  ;;  %7137 = vmatprep.mubr.msk.f32.mxu1 %vm7871_vm1, %v13113_v1  ;;  %13974 = vst [vmem:[#allocation103_spill] sm:$0xff] %v11321_v8  ;;  %v11323_v40 = vand.u32 4294901760, %v607_v27  ;;  %v13976_v53 = vld [vmem:[#allocation22_spill] sm:$0xff] }
 0x2ff   :  { %v3848_v19 = vpop.f32.mrf.mxu1  ;;  %v4412_v24 = vsub.f32 %v11287_v61, %v13973_v15 }
 0x300   :  { %13972 = vst [vmem:[#allocation102_spill] sm:$0xff] %v11312_v52  ;;  %v3455_v18 = vpop.f32.mrf.mxu0  ;;  %6983 = vmatmul.mubr.f32.gmra.mxu0 %v4393_v46  ;;  %13975 = vst [vmem:[#allocation104_spill] sm:$0xff] %v11323_v40  ;;  %v610_v46 = vsel %vm479_vm0, %v160_v48, 0  ;;  %v11339_v52 = vsub.f32 %v607_v27, %v11323_v40  ;;  %v13979_v48 = vld [vmem:[#allocation17_spill] sm:$0xff] }
 0x301   :  { %v3456_v10 = vadd.f32 %v3455_v18, %v13976_v53  ;;  %v3853_v37 = vpop.f32.mrf.mxu1  ;;  %7138 = vmatmul.mubr.f32.gmra.mxu1 %v11190_v58  ;;  %6985 = vmatprep.mubr.msk.f32.mxu0 %vm7871_vm1, %v13113_v1  ;;  %v4422_v18 = vsub.f32 %v11299_v13, %v13059_v39  ;;  %v4413_v58 = vand.u32 4294901760, %v4412_v24 }
 0x302   :  { %v11330_v44 = vadd.f32 %v3853_v37, %v3442_v3  ;;  %v3457_v19 = vpop.f32.mrf.mxu0  ;;  %7140 = vmatprep.mubr.msk.f32.mxu1 %vm7871_vm1, %v13113_v1  ;;  %13977 = vst [vmem:[#allocation109_spill] sm:$0xff] %v11339_v52  ;;  %v11341_v3 = vand.u32 4294901760, %v610_v46 }
 0x303   :  { %v3855_v15 = vpop.f32.mrf.mxu1 }
 0x304   :  { %v3462_v53 = vpop.f32.mrf.mxu0  ;;  %6986 = vmatmul.mubr.f32.gmra.mxu0 %v4403_v0  ;;  %13978 = vst [vmem:[#allocation110_spill] sm:$0xff] %v11341_v3  ;;  %v613_v15 = vsel %vm479_vm0, %v163_v2, 0  ;;  %v4423_v0 = vand.u32 4294901760, %v4422_v18  ;;  %v11357_v13 = vsub.f32 %v610_v46, %v11341_v3 }
 0x305   :  { %v3463_v37 = vadd.f32 %v3462_v53, %v13979_v48  ;;  %v3860_v19 = vpop.f32.mrf.mxu1  ;;  %7141 = vmatmul.mubr.f32.gmra.mxu1 %v11211_v11  ;;  %6988 = vmatprep.mubr.msk.f32.mxu0 %vm7871_vm1, %v13113_v1  ;;  %v13980_v53 = vand.u32 4294901760, %v11321_v8  ;;  %v13068_v11 = vand.u32 4294901760, %v11339_v52  ;;  %v11359_v2 = vand.u32 4294901760, %v613_v15 }
 0x306   :  { %v11348_v39 = vadd.f32 %v3860_v19, %v3449_v34  ;;  %v3464_v24 = vpop.f32.mrf.mxu0  ;;  %7143 = vmatprep.mubr.msk.f32.mxu1 %vm7871_vm1, %v13113_v1  ;;  %v13982_v34 = vld [vmem:[#allocation127_spill] sm:$0xff] }
 0x307   :  { %v3862_v27 = vpop.f32.mrf.mxu1  ;;  %v4432_v48 = vsub.f32 %v11321_v8, %v13980_v53  ;;  %13981 = vst [vmem:[#allocation112_spill] sm:$0xff] %v11359_v2  ;;  %v13983_v8 = vld [vmem:[#allocation26_spill] sm:$0xff] }
 0x308   :  { %v3469_v61 = vpop.f32.mrf.mxu0  ;;  %6989 = vmatmul.mubr.f32.gmra.mxu0 %v4413_v58 }
 0x309   :  { %v3470_v19 = vadd.f32 %v3469_v61, %v13982_v34  ;;  %v3867_v24 = vpop.f32.mrf.mxu1  ;;  %7144 = vmatmul.mubr.f32.gmra.mxu1 %v11233_v47  ;;  %6991 = vmatprep.mubr.msk.f32.mxu0 %vm7871_vm1, %v13113_v1  ;;  %v4433_v46 = vand.u32 4294901760, %v4432_v48  ;;  %v4442_v61 = vsub.f32 %v11339_v52, %v13068_v11  ;;  %v13074_v34 = vand.u32 4294901760, %v11357_v13 }
 0x30a   :  { %v11365_v58 = vadd.f32 %v3867_v24, %v3456_v10  ;;  %v3471_v18 = vpop.f32.mrf.mxu0  ;;  %7146 = vmatprep.mubr.msk.f32.mxu1 %vm7871_vm1, %v13113_v1  ;;  %v11374_v47 = vsub.f32 %v613_v15, %v11359_v2 }
 0x30b   :  { %v3869_v27 = vpop.f32.mrf.mxu1  ;;  %v4443_v11 = vand.u32 4294901760, %v4442_v61 }
 0x30c   :  { %v3476_v53 = vpop.f32.mrf.mxu0  ;;  %6992 = vmatmul.mubr.f32.gmra.mxu0 %v4423_v0  ;;  %v13073_v15 = vand.u32 4294901760, %v11374_v47 }
 0x30d   :  { %v3477_v10 = vadd.f32 %v3476_v53, %v13983_v8  ;;  %v3874_v24 = vpop.f32.mrf.mxu1  ;;  %7147 = vmatmul.mubr.f32.gmra.mxu1 %v11251_v57  ;;  %6994 = vmatprep.mubr.msk.f32.mxu0 %vm7871_vm1, %v13113_v1  ;;  %v4452_v8 = vsub.f32 %v11357_v13, %v13074_v34  ;;  %v13984_v53 = vld [vmem:[#allocation132_spill] sm:$0xff] }
 0x30e   :  { %v11380_v18 = vadd.f32 %v3874_v24, %v3463_v37  ;;  %v3478_v0 = vpop.f32.mrf.mxu0  ;;  %7149 = vmatprep.mubr.msk.f32.mxu1 %vm7871_vm1, %v13113_v1 }
 0x30f   :  { %v3876_v48 = vpop.f32.mrf.mxu1  ;;  %v4453_v0 = vand.u32 4294901760, %v4452_v8 }
 0x310   :  { %v3483_v27 = vpop.f32.mrf.mxu0  ;;  %6995 = vmatmul.mubr.f32.gmra.mxu0 %v4433_v46  ;;  %v4462_v48 = vsub.f32 %v11374_v47, %v13073_v15 }
 0x311   :  { %v3484_v57 = vadd.f32 %v3483_v27, %v13984_v53  ;;  %v3881_v52 = vpop.f32.mrf.mxu1  ;;  %7150 = vmatmul.mubr.f32.gmra.mxu1 %v11269_v16  ;;  %6997 = vmatprep.mubr.msk.f32.mxu0 %vm7871_vm1, %v13113_v1 }
 0x312   :  { %v11392_v37 = vadd.f32 %v3881_v52, %v3470_v19  ;;  %v3485_v24 = vpop.f32.mrf.mxu0  ;;  %7152 = vmatprep.mubr.msk.f32.mxu1 %vm7871_vm1, %v13113_v1 }
 0x313   :  { %v3883_v46 = vpop.f32.mrf.mxu1  ;;  %v4463_v24 = vand.u32 4294901760, %v4462_v48 }
 0x314   :  { %v3490_v61 = vpop.f32.mrf.mxu0  ;;  %6998 = vmatmul.mubr.f32.gmra.mxu0 %v4443_v11 }
 0x315   :  { %v3491_v27 = vadd.f32 %v3490_v61, %v10596_v35  ;;  %v3888_v53 = vpop.f32.mrf.mxu1  ;;  %7153 = vmatmul.mubr.f32.gmra.mxu1 %v11280_v29  ;;  %7000 = vmatprep.mubr.msk.f32.mxu0 %vm7871_vm1, %v13113_v1 }
 0x316   :  { %v11403_v52 = vadd.f32 %v3888_v53, %v3477_v10  ;;  %v3492_v19 = vpop.f32.mrf.mxu0  ;;  %7155 = vmatprep.mubr.msk.f32.mxu1 %vm7871_vm1, %v13113_v1 }
 0x317   :  { %v3890_v11 = vpop.f32.mrf.mxu1 }
 0x318   :  { %v3497_v8 = vpop.f32.mrf.mxu0  ;;  %7001 = vmatmul.mubr.f32.gmra.mxu0 %v4453_v0  ;;  %v13985_v11 = vld [vmem:[#allocation126_spill] sm:$0xff] }
 0x319   :  { %v3498_v46 = vadd.f32 %v3497_v8, %v10613_v23  ;;  %v3895_v15 = vpop.f32.mrf.mxu1  ;;  %7156 = vmatmul.mubr.f32.gmra.mxu1 %v11305_v17  ;;  %7003 = vmatprep.mubr.msk.f32.mxu0 %vm7871_vm1, %v13113_v1 }
 0x31a   :  { %v11411_v35 = vadd.f32 %v3895_v15, %v3484_v57  ;;  %v3499_v10 = vpop.f32.mrf.mxu0  ;;  %7158 = vmatprep.mubr.msk.f32.mxu1 %vm7871_vm1, %v13113_v1 }
 0x31b   :  { %v3897_v61 = vpop.f32.mrf.mxu1  ;;  %v13986_v10 = vand.u32 4294901760, %v13833_v30  ;;  %v13988_v30 = vand.u32 4294901760, %v13836_v6 }
 0x31c   :  { %v3504_v53 = vpop.f32.mrf.mxu0  ;;  %7004 = vmatmul.mubr.f32.gmra.mxu0 %v4463_v24 }
 0x31d   :  { %v3505_v0 = vadd.f32 %v3504_v53, %v10632_v49  ;;  %v3902_v48 = vpop.f32.mrf.mxu1  ;;  %7159 = vmatmul.mubr.f32.gmra.mxu1 %v11323_v40  ;;  %7193 = vmatprep.mubr.msk.f32.mxu0 %vm7871_vm1, %v13113_v1 }
 0x31e   :  { %v11419_v23 = vadd.f32 %v3902_v48, %v3491_v27  ;;  %v3506_v19 = vpop.f32.mrf.mxu0  ;;  %7161 = vmatprep.mubr.msk.f32.mxu1 %vm7871_vm1, %v13113_v1 }
 0x31f   :  { %v3904_v57 = vpop.f32.mrf.mxu1 }
 0x320   :  { %v3511_v15 = vpop.f32.mrf.mxu0  ;;  %7194 = vmatmul.mubr.f32.vlgmr.msra.gmra.mxu0 %v13985_v11 }
 0x321   :  { %v3512_v8 = vadd.f32 %v3511_v15, %v10652_v7  ;;  %v3909_v24 = vpop.f32.mrf.mxu1  ;;  %7162 = vmatmul.mubr.f32.gmra.mxu1 %v11341_v3  ;;  %7196 = vmatprep.mubr.msk.f32.mxu0 %vm7871_vm1, %v13113_v1  ;;  %v13987_v7 = vld [vmem:[#allocation19_spill] sm:$0xff] }
 0x322   :  { %v11428_v49 = vadd.f32 %v3909_v24, %v3498_v46  ;;  %v3513_v27 = vpop.f32.mrf.mxu0  ;;  %7164 = vmatprep.mubr.msk.f32.mxu1 %vm7871_vm1, %v13113_v1  ;;  %7490 = vmatpush3.msra.mxu0 %v13986_v10 }
 0x323   :  { %v3911_v61 = vpop.f32.mrf.mxu1  ;;  %7491 = vmatprep.subr.mxu0 %v13113_v1 }
 0x324   :  { %v3518_v53 = vpop.f32.mrf.mxu0  ;;  %7197 = vmatmul.mubr.f32.gmra.mxu0 %v13987_v7  ;;  %v13990_v61 = vand.u32 4294901760, %v13985_v11  ;;  %v13993_v11 = vld [vmem:[#allocation28_spill] sm:$0xff] }
 0x325   :  { %v3519_v48 = vadd.f32 %v3518_v53, %v10674_v63  ;;  %v3916_v19 = vpop.f32.mrf.mxu1  ;;  %7165 = vmatmul.mubr.f32.gmra.mxu1 %v11359_v2  ;;  %7199 = vmatprep.mubr.msk.f32.mxu0 %vm7871_vm1, %v13113_v1  ;;  %v13989_v63 = vld [vmem:[#allocation130_spill] sm:$0xff]  ;;  %v13991_v53 = vld [vmem:[#allocation59_spill] sm:$0xff] }
 0x326   :  { %v11440_v46 = vadd.f32 %v3916_v19, %v3505_v0  ;;  %v3520_v57 = vpop.f32.mrf.mxu0  ;;  %7354 = vmatprep.mubr.msk.f32.mxu1 %vm7871_vm1, %v13113_v1  ;;  %7492 = vmatpush3.msra.mxu0 %v13988_v30 }
 0x327   :  { %v3918_v15 = vpop.f32.mrf.mxu1  ;;  %7493 = vmatprep.subr.mxu0 %v13113_v1 }
 0x328   :  { %v3525_v24 = vpop.f32.mrf.mxu0  ;;  %7200 = vmatmul.mubr.f32.gmra.mxu0 %v13989_v63  ;;  %v13994_v15 = vand.u32 4294901760, %v13987_v7 }
 0x329   :  { %v3526_v27 = vadd.f32 %v3525_v24, %v10696_v28  ;;  %v3923_v10 = vpop.f32.mrf.mxu1  ;;  %7355 = vmatmul.mubr.f32.vlgmr.msra.gmra.mxu1 %v13990_v61  ;;  %7202 = vmatprep.mubr.msk.f32.mxu0 %vm7871_vm1, %v13113_v1  ;;  %v13992_v28 = vand.u32 4294901760, %v13841_v9  ;;  %v13995_v61 = vld [vmem:[#allocation69_spill] sm:$0xff] }
 0x32a   :  { %v11453_v0 = vadd.f32 %v3923_v10, %v3512_v8  ;;  %7651 = vmatpush3.msra.mxu1 %v13991_v53  ;;  %v3527_v6 = vpop.f32.mrf.mxu0  ;;  %7357 = vmatprep.mubr.msk.f32.mxu1 %vm7871_vm1, %v13113_v1  ;;  %v13997_v53 = vand.u32 4294901760, %v13989_v63  ;;  %v14000_v63 = vld [vmem:[#allocation29_spill] sm:$0xff] }
 0x32b   :  { %v3925_v19 = vpop.f32.mrf.mxu1  ;;  %7652 = vmatprep.subr.mxu1 %v13113_v1  ;;  %7494 = vmatpush3.msra.mxu0 %v13992_v28  ;;  %v13998_v28 = vand.u32 4294901760, %v10100_v42 }
 0x32c   :  { %v4025_v57 = vpop.f32.mrf.mxu0  ;;  %7203 = vmatmul.mubr.f32.gmra.mxu0 %v13993_v11  ;;  %7653 = vmatpush3.msra.mxu1 %v13842_v59 }
 0x32d   :  { %v3930_v30 = vpop.f32.mrf.mxu1  ;;  %v4026_v8 = vadd.f32 %v4025_v57, %v10718_v43  ;;  %7358 = vmatmul.mubr.f32.gmra.mxu1 %v13994_v15  ;;  %7205 = vmatprep.mubr.msk.f32.mxu0 %vm7871_vm1, %v13113_v1  ;;  %v13996_v43 = vld [vmem:[#allocation136_spill] sm:$0xff] }
 0x32e   :  { %v11468_v24 = vadd.f32 %v3930_v30, %v3519_v48  ;;  %v6873_v10 = vpop.f32.mrf.mxu0  ;;  %7360 = vmatprep.mubr.msk.f32.mxu1 %vm7871_vm1, %v13113_v1  ;;  %7654 = vmatprep.subr.mxu1 %v13113_v1  ;;  %v13999_v30 = vld [vmem:[#allocation74_spill] sm:$0xff] }
 0x32f   :  { %v3932_v9 = vpop.f32.mrf.mxu1  ;;  %7655 = vmatpush3.msra.mxu1 %v13995_v61  ;;  %7495 = vmatprep.subr.mxu0 %v13113_v1  ;;  %v14001_v10 = vand.u32 4294901760, %v13993_v11  ;;  %v14002_v61 = vand.u32 4294901760, %v13852_v62  ;;  %v14004_v11 = vld [vmem:[#allocation25_spill] sm:$0xff] }
 0x330   :  { %v4035_v59 = vpop.f32.mrf.mxu0  ;;  %7206 = vmatmul.mubr.f32.gmra.mxu0 %v13996_v43  ;;  %7656 = vmatprep.subr.mxu1 %v13113_v1 }
 0x331   :  { %v3937_v7 = vpop.f32.mrf.mxu1  ;;  %v4036_v48 = vadd.f32 %v4035_v59, %v10740_v5  ;;  %7361 = vmatmul.mubr.f32.gmra.mxu1 %v13997_v53  ;;  %7208 = vmatprep.mubr.msk.f32.mxu0 %vm7871_vm1, %v13113_v1 }
 0x332   :  { %v11482_v6 = vadd.f32 %v3937_v7, %v3526_v27  ;;  %v6876_v19 = vpop.f32.mrf.mxu0  ;;  %7363 = vmatprep.mubr.msk.f32.mxu1 %vm7871_vm1, %v13113_v1  ;;  %7496 = vmatpush3.msra.mxu0 %v13998_v28  ;;  %v14003_v7 = vld [vmem:[#allocation80_spill] sm:$0xff] }
 0x333   :  { %v3939_v57 = vpop.f32.mrf.mxu1  ;;  %7657 = vmatpush3.msra.mxu1 %v13999_v30  ;;  %7497 = vmatprep.subr.mxu0 %v13113_v1  ;;  %v14005_v19 = vand.u32 4294901760, %v13996_v43  ;;  %v14008_v43 = vld [vmem:[#allocation32_spill] sm:$0xff] }
 0x334   :  { %v4045_v5 = vpop.f32.mrf.mxu0  ;;  %7209 = vmatmul.mubr.f32.gmra.mxu0 %v14000_v63  ;;  %7658 = vmatprep.subr.mxu1 %v13113_v1  ;;  %v14006_v57 = vand.u32 4294901760, %v13857_v60 }
 0x335   :  { %v4046_v27 = vadd.f32 %v4045_v5, %v10762_v54  ;;  %v4601_v15 = vpop.f32.mrf.mxu1  ;;  %7364 = vmatmul.mubr.f32.gmra.mxu1 %v14001_v10  ;;  %7211 = vmatprep.mubr.msk.f32.mxu0 %vm7871_vm1, %v13113_v1  ;;  %v14007_v5 = vld [vmem:[#allocation86_spill] sm:$0xff]  ;;  %v14009_v10 = vand.u32 4294901760, %v14000_v63  ;;  %v14013_v63 = vld [vmem:[#allocation27_spill] sm:$0xff] }
 0x336   :  { %v11497_v42 = vadd.f32 %v4601_v15, %v4026_v8  ;;  %v6879_v9 = vpop.f32.mrf.mxu0  ;;  %7366 = vmatprep.mubr.msk.f32.mxu1 %vm7871_vm1, %v13113_v1  ;;  %7498 = vmatpush3.msra.mxu0 %v14002_v61  ;;  %v14010_v61 = vld [vmem:[#allocation89_spill] sm:$0xff] }
 0x337   :  { %v7034_v59 = vpop.f32.mrf.mxu1  ;;  %7659 = vmatpush3.msra.mxu1 %v14003_v7  ;;  %7499 = vmatprep.subr.mxu0 %v13113_v1 }
 0x338   :  { %v4055_v54 = vpop.f32.mrf.mxu0  ;;  %7212 = vmatmul.mubr.f32.gmra.mxu0 %v14004_v11  ;;  %7660 = vmatprep.subr.mxu1 %v13113_v1  ;;  %v14011_v59 = vand.u32 4294901760, %v14010_v61 }
 0x339   :  { %v4056_v8 = vadd.f32 %v4055_v54, %v10784_v14  ;;  %v4607_v53 = vpop.f32.mrf.mxu1  ;;  %7367 = vmatmul.mubr.f32.gmra.mxu1 %v14005_v19  ;;  %7214 = vmatprep.mubr.msk.f32.mxu0 %vm7871_vm1, %v13113_v1  ;;  %v14012_v54 = vld [vmem:[#allocation87_spill] sm:$0xff]  ;;  %v14014_v19 = vand.u32 4294901760, %v14004_v11  ;;  %v14018_v11 = vld [vmem:[#allocation146_spill] sm:$0xff] }
 0x33a   :  { %v11512_v62 = vadd.f32 %v4607_v53, %v4036_v48  ;;  %v6882_v28 = vpop.f32.mrf.mxu0  ;;  %7369 = vmatprep.mubr.msk.f32.mxu1 %vm7871_vm1, %v13113_v1  ;;  %7500 = vmatpush3.msra.mxu0 %v14006_v57 }
 0x33b   :  { %v7037_v30 = vpop.f32.mrf.mxu1  ;;  %7661 = vmatpush3.msra.mxu1 %v14007_v5  ;;  %7501 = vmatprep.subr.mxu0 %v13113_v1 }
 0x33c   :  { %v4065_v14 = vpop.f32.mrf.mxu0  ;;  %7215 = vmatmul.mubr.f32.gmra.mxu0 %v14008_v43  ;;  %7662 = vmatprep.subr.mxu1 %v13113_v1  ;;  %v14015_v30 = vld [vmem:[#allocation94_spill] sm:$0xff] }
 0x33d   :  { %v4066_v48 = vadd.f32 %v4065_v14, %v10806_v50  ;;  %v4613_v15 = vpop.f32.mrf.mxu1  ;;  %7370 = vmatmul.mubr.f32.gmra.mxu1 %v14009_v10  ;;  %7217 = vmatprep.mubr.msk.f32.mxu0 %vm7871_vm1, %v13113_v1  ;;  %v14016_v5 = vand.u32 4294901760, %v14015_v30  ;;  %v14024_v30 = vld [vmem:[#allocation99_spill] sm:$0xff] }
 0x33e   :  { %v11527_v60 = vadd.f32 %v4613_v15, %v4046_v27  ;;  %v6885_v9 = vpop.f32.mrf.mxu0  ;;  %7372 = vmatprep.mubr.msk.f32.mxu1 %vm7871_vm1, %v13113_v1  ;;  %7502 = vmatpush3.msra.mxu0 %v14011_v59  ;;  %v14017_v15 = vld [vmem:[#allocation92_spill] sm:$0xff] }
 0x33f   :  { %v7040_v7 = vpop.f32.mrf.mxu1  ;;  %7663 = vmatpush3.msra.mxu1 %v14012_v54  ;;  %7503 = vmatprep.subr.mxu0 %v13113_v1  ;;  %v14019_v9 = vand.u32 4294901760, %v14008_v43  ;;  %v14021_v43 = vld [vmem:[#allocation30_spill] sm:$0xff] }
 0x340   :  { %v4075_v50 = vpop.f32.mrf.mxu0  ;;  %7218 = vmatmul.mubr.f32.gmra.mxu0 %v14013_v63  ;;  %7664 = vmatprep.subr.mxu1 %v13113_v1  ;;  %v14020_v7 = vand.u32 4294901760, %v13870_v33 }
 0x341   :  { %v4076_v27 = vadd.f32 %v4075_v50, %v10828_v26  ;;  %v4619_v53 = vpop.f32.mrf.mxu1  ;;  %7373 = vmatmul.mubr.f32.gmra.mxu1 %v14014_v19  ;;  %7220 = vmatprep.mubr.msk.f32.mxu0 %vm7871_vm1, %v13113_v1 }
 0x342   :  { %v11542_v28 = vadd.f32 %v4619_v53, %v4056_v8  ;;  %v6888_v57 = vpop.f32.mrf.mxu0  ;;  %7375 = vmatprep.mubr.msk.f32.mxu1 %vm7871_vm1, %v13113_v1  ;;  %7504 = vmatpush3.msra.mxu0 %v14016_v5  ;;  %v14022_v53 = vand.u32 4294901760, %v14013_v63  ;;  %v14025_v63 = vld [vmem:[#allocation150_spill] sm:$0xff] }
 0x343   :  { %v7043_v14 = vpop.f32.mrf.mxu1  ;;  %7665 = vmatpush3.msra.mxu1 %v14017_v15  ;;  %7505 = vmatprep.subr.mxu0 %v13113_v1 }
 0x344   :  { %v4085_v26 = vpop.f32.mrf.mxu0  ;;  %7221 = vmatmul.mubr.f32.gmra.mxu0 %v14018_v11  ;;  %7666 = vmatprep.subr.mxu1 %v13113_v1  ;;  %v14026_v14 = vand.u32 4294901760, %v14018_v11  ;;  %v14028_v11 = vld [vmem:[#allocation152_spill] sm:$0xff] }
 0x345   :  { %v4086_v8 = vadd.f32 %v4085_v26, %v10850_v45  ;;  %v4625_v10 = vpop.f32.mrf.mxu1  ;;  %7376 = vmatmul.mubr.f32.gmra.mxu1 %v14019_v9  ;;  %7223 = vmatprep.mubr.msk.f32.mxu0 %vm7871_vm1, %v13113_v1  ;;  %v14027_v26 = vand.u32 4294901760, %v10250_v51 }
 0x346   :  { %v11557_v61 = vadd.f32 %v4625_v10, %v4066_v48  ;;  %v6891_v59 = vpop.f32.mrf.mxu0  ;;  %7378 = vmatprep.mubr.msk.f32.mxu1 %vm7871_vm1, %v13113_v1  ;;  %7506 = vmatpush3.msra.mxu0 %v14020_v7 }
 0x347   :  { %v7046_v54 = vpop.f32.mrf.mxu1  ;;  %7667 = vmatpush3.msra.mxu1 %v10189_v36  ;;  %7507 = vmatprep.subr.mxu0 %v13113_v1  ;;  %v14023_v36 = vand.u32 4294901760, %v13874_v55  ;;  %v14029_v59 = vand.u32 4294901760, %v14021_v43 }
 0x348   :  { %v4095_v45 = vpop.f32.mrf.mxu0  ;;  %7224 = vmatmul.mubr.f32.gmra.mxu0 %v14021_v43  ;;  %7668 = vmatprep.subr.mxu1 %v13113_v1  ;;  %v14032_v43 = vld [vmem:[#allocation154_spill] sm:$0xff] }
 0x349   :  { %v4096_v48 = vadd.f32 %v4095_v45, %v10872_v4  ;;  %v4631_v50 = vpop.f32.mrf.mxu1  ;;  %7379 = vmatmul.mubr.f32.gmra.mxu1 %v14022_v53  ;;  %7226 = vmatprep.mubr.msk.f32.mxu0 %vm7871_vm1, %v13113_v1  ;;  %v14031_v45 = vld [vmem:[#allocation10_spill] sm:$0xff]  ;;  %v14033_v53 = vand.u32 4294901760, %v14025_v63 }
 0x34a   :  { %v11572_v33 = vadd.f32 %v4631_v50, %v4076_v27  ;;  %v6894_v19 = vpop.f32.mrf.mxu0  ;;  %7381 = vmatprep.mubr.msk.f32.mxu1 %vm7871_vm1, %v13113_v1  ;;  %7508 = vmatpush3.msra.mxu0 %v14023_v36  ;;  %v14034_v36 = vld [vmem:[#allocation106_spill] sm:$0xff] }
 0x34b   :  { %v7049_v57 = vpop.f32.mrf.mxu1  ;;  %7669 = vmatpush3.msra.mxu1 %v14024_v30  ;;  %7509 = vmatprep.subr.mxu0 %v13113_v1 }
 0x34c   :  { %v4105_v4 = vpop.f32.mrf.mxu0  ;;  %7227 = vmatmul.mubr.f32.gmra.mxu0 %v14025_v63  ;;  %7670 = vmatprep.subr.mxu1 %v13113_v1  ;;  %v14035_v57 = vand.u32 4294901760, %v14034_v36  ;;  %v14043_v36 = vld [vmem:[#allocation163_spill] sm:$0xff] }
 0x34d   :  { %v4106_v27 = vadd.f32 %v4105_v4, %v10894_v38  ;;  %v4637_v5 = vpop.f32.mrf.mxu1  ;;  %7382 = vmatmul.mubr.f32.gmra.mxu1 %v14026_v14  ;;  %7229 = vmatprep.mubr.msk.f32.mxu0 %vm7871_vm1, %v13113_v1  ;;  %v14036_v4 = vld [vmem:[#allocation105_spill] sm:$0xff] }
 0x34e   :  { %v11587_v55 = vadd.f32 %v4637_v5, %v4086_v8  ;;  %v6897_v15 = vpop.f32.mrf.mxu0  ;;  %7384 = vmatprep.mubr.msk.f32.mxu1 %vm7871_vm1, %v13113_v1  ;;  %7510 = vmatpush3.msra.mxu0 %v14027_v26  ;;  %v14037_v5 = vld [vmem:[#allocation41_spill] sm:$0xff] }
 0x34f   :  { %v7052_v10 = vpop.f32.mrf.mxu1  ;;  %7671 = vmatpush3.msra.mxu1 %v10233_v22  ;;  %7511 = vmatprep.subr.mxu0 %v13113_v1  ;;  %v14030_v22 = vand.u32 4294901760, %v10277_v12  ;;  %v14038_v15 = vand.u32 4294901760, %v14028_v11 }
 0x350   :  { %v4115_v38 = vpop.f32.mrf.mxu0  ;;  %7230 = vmatmul.mubr.f32.gmra.mxu0 %v14028_v11  ;;  %7672 = vmatprep.subr.mxu1 %v13113_v1 }
 0x351   :  { %v4116_v8 = vadd.f32 %v4115_v38, %v10916_v25  ;;  %v4643_v9 = vpop.f32.mrf.mxu1  ;;  %7385 = vmatmul.mubr.f32.gmra.mxu1 %v14029_v59  ;;  %7232 = vmatprep.mubr.msk.f32.mxu0 %vm7871_vm1, %v13113_v1 }
 0x352   :  { %v11602_v51 = vadd.f32 %v4643_v9, %v4096_v48  ;;  %v6900_v7 = vpop.f32.mrf.mxu0  ;;  %7387 = vmatprep.mubr.msk.f32.mxu1 %vm7871_vm1, %v13113_v1  ;;  %7512 = vmatpush3.msra.mxu0 %v14030_v22  ;;  %v14039_v9 = vld [vmem:[#allocation158_spill] sm:$0xff] }
 0x353   :  { %v7055_v54 = vpop.f32.mrf.mxu1  ;;  %7673 = vmatpush3.msra.mxu1 %v14031_v45  ;;  %7513 = vmatprep.subr.mxu0 %v13113_v1  ;;  %v14040_v7 = vand.u32 4294901760, %v14032_v43  ;;  %v14041_v45 = vld [vmem:[#allocation159_spill] sm:$0xff] }
 0x354   :  { %v4125_v25 = vpop.f32.mrf.mxu0  ;;  %7233 = vmatmul.mubr.f32.gmra.mxu0 %v14032_v43  ;;  %7674 = vmatprep.subr.mxu1 %v13113_v1 }
 0x355   :  { %v4126_v48 = vadd.f32 %v4125_v25, %v10934_v41  ;;  %v4649_v50 = vpop.f32.mrf.mxu1  ;;  %7388 = vmatmul.mubr.f32.gmra.mxu1 %v14033_v53  ;;  %7235 = vmatprep.mubr.msk.f32.mxu0 %vm7871_vm1, %v13113_v1 }
 0x356   :  { %v11617_v12 = vadd.f32 %v4649_v50, %v4106_v27  ;;  %v6903_v19 = vpop.f32.mrf.mxu0  ;;  %7390 = vmatprep.mubr.msk.f32.mxu1 %vm7871_vm1, %v13113_v1  ;;  %7514 = vmatpush3.msra.mxu0 %v14035_v57  ;;  %v14042_v50 = vand.u32 4294901760, %v14037_v5 }
 0x357   :  { %v7058_v30 = vpop.f32.mrf.mxu1  ;;  %7675 = vmatpush3.msra.mxu1 %v14036_v4 }
 0x358   :  { %v4135_v41 = vpop.f32.mrf.mxu0  ;;  %7236 = vmatmul.mubr.f32.gmra.mxu0 %v14037_v5  ;;  %v14044_v30 = vand.u32 4294901760, %v14039_v9 }
 0x359   :  { %v4136_v63 = vadd.f32 %v4135_v41, %v10952_v56  ;;  %v4655_v14 = vpop.f32.mrf.mxu1  ;;  %7391 = vmatmul.mubr.f32.gmra.mxu1 %v14038_v15  ;;  %7238 = vmatprep.mubr.msk.f32.mxu0 %vm7871_vm1, %v13113_v1 }
 0x35a   :  { %v11630_v27 = vadd.f32 %v4655_v14, %v4116_v8  ;;  %v6906_v26 = vpop.f32.mrf.mxu0  ;;  %7393 = vmatprep.mubr.msk.f32.mxu1 %vm7871_vm1, %v13113_v1  ;;  %v14045_v14 = vld [vmem:[#allocation164_spill] sm:$0xff] }
 0x35b   :  { %v7061_v10 = vpop.f32.mrf.mxu1  ;;  %v14046_v26 = vand.u32 4294901760, %v14041_v45 }
 0x35c   :  { %v4145_v38 = vpop.f32.mrf.mxu0  ;;  %7239 = vmatmul.mubr.f32.gmra.mxu0 %v14039_v9 }
 0x35d   :  { %v4146_v59 = vadd.f32 %v4145_v38, %v10970_v32  ;;  %v4661_v56 = vpop.f32.mrf.mxu1  ;;  %7394 = vmatmul.mubr.f32.gmra.mxu1 %v14040_v7  ;;  %7241 = vmatprep.mubr.msk.f32.mxu0 %vm7871_vm1, %v13113_v1  ;;  %v14048_v7 = vld [vmem:[#allocation183_spill] sm:$0xff] }
 0x35e   :  { %v11640_v11 = vadd.f32 %v4661_v56, %v4126_v48  ;;  %v6909_v8 = vpop.f32.mrf.mxu0  ;;  %7396 = vmatprep.mubr.msk.f32.mxu1 %vm7871_vm1, %v13113_v1  ;;  %v14047_v56 = vld [vmem:[#allocation38_spill] sm:$0xff] }
 0x35f   :  { %v7064_v22 = vpop.f32.mrf.mxu1 }
 0x360   :  { %v4155_v54 = vpop.f32.mrf.mxu0  ;;  %7242 = vmatmul.mubr.f32.gmra.mxu0 %v14041_v45  ;;  %v14049_v22 = vand.u32 4294901760, %v14043_v36 }
 0x361   :  { %v4156_v25 = vadd.f32 %v4155_v54, %v10988_v20  ;;  %v4667_v32 = vpop.f32.mrf.mxu1  ;;  %7397 = vmatmul.mubr.f32.gmra.mxu1 %v14042_v50  ;;  %7244 = vmatprep.mubr.msk.f32.mxu0 %vm7871_vm1, %v13113_v1  ;;  %v14050_v50 = vld [vmem:[#allocation168_spill] sm:$0xff] }
 0x362   :  { %v11650_v43 = vadd.f32 %v4667_v32, %v4136_v63  ;;  %v6912_v48 = vpop.f32.mrf.mxu0  ;;  %7399 = vmatprep.mubr.msk.f32.mxu1 %vm7871_vm1, %v13113_v1 }
 0x363   :  { %v7067_v53 = vpop.f32.mrf.mxu1  ;;  %v14051_v48 = vld [vmem:[#allocation189_spill] sm:$0xff] }
 0x364   :  { %v4165_v19 = vpop.f32.mrf.mxu0  ;;  %7245 = vmatmul.mubr.f32.gmra.mxu0 %v14043_v36 }
 0x365   :  { %v4166_v57 = vadd.f32 %v4165_v19, %v11006_v31  ;;  %v4673_v20 = vpop.f32.mrf.mxu1  ;;  %7400 = vmatmul.mubr.f32.gmra.mxu1 %v14044_v30  ;;  %7247 = vmatprep.mubr.msk.f32.mxu0 %vm7871_vm1, %v13113_v1 }
 0x366   :  { %v11660_v4 = vadd.f32 %v4673_v20, %v4146_v59  ;;  %v6915_v41 = vpop.f32.mrf.mxu0  ;;  %7402 = vmatprep.mubr.msk.f32.mxu1 %vm7871_vm1, %v13113_v1  ;;  %v14052_v20 = vand.u32 4294901760, %v14045_v14 }
 0x367   :  { %v7070_v5 = vpop.f32.mrf.mxu1 }
 0x368   :  { %v4175_v63 = vpop.f32.mrf.mxu0  ;;  %7248 = vmatmul.mubr.f32.gmra.mxu0 %v14045_v14  ;;  %v14053_v5 = vld [vmem:[#allocation170_spill] sm:$0xff] }
 0x369   :  { %v4176_v15 = vadd.f32 %v4175_v63, %v11024_v21  ;;  %v4679_v31 = vpop.f32.mrf.mxu1  ;;  %7403 = vmatmul.mubr.f32.gmra.mxu1 %v14046_v26  ;;  %7250 = vmatprep.mubr.msk.f32.mxu0 %vm7871_vm1, %v13113_v1  ;;  %v14054_v63 = vld [vmem:[#allocation195_spill] sm:$0xff] }
 0x36a   :  { %v11670_v10 = vadd.f32 %v4679_v31, %v4156_v25  ;;  %v6918_v38 = vpop.f32.mrf.mxu0  ;;  %7405 = vmatprep.mubr.msk.f32.mxu1 %vm7871_vm1, %v13113_v1 }
 0x36b   :  { %v7073_v9 = vpop.f32.mrf.mxu1  ;;  %v14055_v38 = vand.u32 4294901760, %v14047_v56 }
 0x36c   :  { %v4185_v59 = vpop.f32.mrf.mxu0  ;;  %7251 = vmatmul.mubr.f32.gmra.mxu0 %v14047_v56 }
 0x36d   :  { %v4186_v8 = vadd.f32 %v4185_v59, %v14048_v7  ;;  %v4685_v21 = vpop.f32.mrf.mxu1  ;;  %7406 = vmatmul.mubr.f32.gmra.mxu1 %v14049_v22  ;;  %7253 = vmatprep.mubr.msk.f32.mxu0 %vm7871_vm1, %v13113_v1  ;;  %v14056_v7 = vld [vmem:[#allocation173_spill] sm:$0xff] }
 0x36e   :  { %v11680_v54 = vadd.f32 %v4685_v21, %v4166_v57  ;;  %v6921_v45 = vpop.f32.mrf.mxu0  ;;  %7408 = vmatprep.mubr.msk.f32.mxu1 %vm7871_vm1, %v13113_v1  ;;  %v14057_v21 = vld [vmem:[#allocation202_spill] sm:$0xff] }
 0x36f   :  { %v7076_v25 = vpop.f32.mrf.mxu1 }
 0x370   :  { %v4195_v32 = vpop.f32.mrf.mxu0  ;;  %7254 = vmatmul.mubr.f32.gmra.mxu0 %v14050_v50  ;;  %v14058_v25 = vand.u32 4294901760, %v14050_v50 }
 0x371   :  { %v4196_v53 = vadd.f32 %v4195_v32, %v14051_v48  ;;  %v4691_v19 = vpop.f32.mrf.mxu1  ;;  %7409 = vmatmul.mubr.f32.gmra.mxu1 %v14052_v20  ;;  %7256 = vmatprep.mubr.msk.f32.mxu0 %vm7871_vm1, %v13113_v1  ;;  %v14060_v20 = vld [vmem:[#allocation207_spill] sm:$0xff] }
 0x372   :  { %v11690_v36 = vadd.f32 %v4691_v19, %v4176_v15  ;;  %v6924_v57 = vpop.f32.mrf.mxu0  ;;  %7411 = vmatprep.mubr.msk.f32.mxu1 %vm7871_vm1, %v13113_v1  ;;  %v14059_v19 = vld [vmem:[#allocation174_spill] sm:$0xff] }
 0x373   :  { %v7079_v30 = vpop.f32.mrf.mxu1 }
 0x374   :  { %v4205_v41 = vpop.f32.mrf.mxu0  ;;  %7257 = vmatmul.mubr.f32.gmra.mxu0 %v14053_v5 }
 0x375   :  { %v4206_v31 = vadd.f32 %v4205_v41, %v14054_v63  ;;  %v4697_v26 = vpop.f32.mrf.mxu1  ;;  %7412 = vmatmul.mubr.f32.gmra.mxu1 %v14055_v38  ;;  %7259 = vmatprep.mubr.msk.f32.mxu0 %vm7871_vm1, %v13113_v1  ;;  %v14061_v41 = vand.u32 4294901760, %v14053_v5  ;;  %v14062_v38 = vld [vmem:[#allocation178_spill] sm:$0xff] }
 0x376   :  { %v11700_v14 = vadd.f32 %v4697_v26, %v4186_v8  ;;  %v6927_v15 = vpop.f32.mrf.mxu0  ;;  %7414 = vmatprep.mubr.msk.f32.mxu1 %vm7871_vm1, %v13113_v1 }
 0x377   :  { %v7082_v9 = vpop.f32.mrf.mxu1  ;;  %v14063_v15 = vld [vmem:[#allocation45_spill] sm:$0xff] }
 0x378   :  { %v4215_v59 = vpop.f32.mrf.mxu0  ;;  %7260 = vmatmul.mubr.f32.gmra.mxu0 %v14056_v7 }
 0x379   :  { %v4216_v22 = vadd.f32 %v4215_v59, %v14057_v21  ;;  %v4703_v45 = vpop.f32.mrf.mxu1  ;;  %7415 = vmatmul.mubr.f32.gmra.mxu1 %v14058_v25  ;;  %7262 = vmatprep.mubr.msk.f32.mxu0 %vm7871_vm1, %v13113_v1  ;;  %v14064_v21 = vand.u32 4294901760, %v14056_v7 }
 0x37a   :  { %v11710_v56 = vadd.f32 %v4703_v45, %v4196_v53  ;;  %v6930_v8 = vpop.f32.mrf.mxu0  ;;  %7417 = vmatprep.mubr.msk.f32.mxu1 %vm7871_vm1, %v13113_v1 }
 0x37b   :  { %v7085_v32 = vpop.f32.mrf.mxu1  ;;  %v14065_v8 = vld [vmem:[#allocation180_spill] sm:$0xff] }
 0x37c   :  { %v4225_v48 = vpop.f32.mrf.mxu0  ;;  %7263 = vmatmul.mubr.f32.gmra.mxu0 %v14059_v19  ;;  %v14066_v32 = vld [vmem:[#allocation54_spill] sm:$0xff] }
 0x37d   :  { %v4226_v57 = vadd.f32 %v4225_v48, %v14060_v20  ;;  %v4709_v30 = vpop.f32.mrf.mxu1  ;;  %7418 = vmatmul.mubr.f32.gmra.mxu1 %v14061_v41  ;;  %7265 = vmatprep.mubr.msk.f32.mxu0 %vm7871_vm1, %v13113_v1 }
 0x37e   :  { %v11720_v50 = vadd.f32 %v4709_v30, %v4206_v31  ;;  %v6933_v53 = vpop.f32.mrf.mxu0  ;;  %7420 = vmatprep.mubr.msk.f32.mxu1 %vm7871_vm1, %v13113_v1  ;;  %v14067_v30 = vand.u32 4294901760, %v14059_v19 }
 0x37f   :  { %v7088_v63 = vpop.f32.mrf.mxu1 }
 0x380   :  { %v4235_v26 = vpop.f32.mrf.mxu0  ;;  %7266 = vmatmul.mubr.f32.gmra.mxu0 %v14062_v38  ;;  %v14068_v63 = vld [vmem:[#allocation185_spill] sm:$0xff] }
 0x381   :  { %v4236_v9 = vadd.f32 %v4235_v26, %v14063_v15  ;;  %v4715_v59 = vpop.f32.mrf.mxu1  ;;  %7421 = vmatmul.mubr.f32.gmra.mxu1 %v14064_v21  ;;  %7268 = vmatprep.mubr.msk.f32.mxu0 %vm7871_vm1, %v13113_v1  ;;  %v14069_v26 = vld [vmem:[#allocation64_spill] sm:$0xff]  ;;  %v14070_v21 = vand.u32 4294901760, %v14062_v38 }
 0x382   :  { %v11730_v5 = vadd.f32 %v4715_v59, %v4216_v22  ;;  %v6936_v31 = vpop.f32.mrf.mxu0  ;;  %7423 = vmatprep.mubr.msk.f32.mxu1 %vm7871_vm1, %v13113_v1 }
 0x383   :  { %v7091_v45 = vpop.f32.mrf.mxu1 }
 0x384   :  { %v4245_v25 = vpop.f32.mrf.mxu0  ;;  %7269 = vmatmul.mubr.f32.gmra.mxu0 %v14065_v8 }
 0x385   :  { %v4246_v48 = vadd.f32 %v4245_v25, %v14066_v32  ;;  %v4721_v20 = vpop.f32.mrf.mxu1  ;;  %7424 = vmatmul.mubr.f32.gmra.mxu1 %v14067_v30  ;;  %7271 = vmatprep.mubr.msk.f32.mxu0 %vm7871_vm1, %v13113_v1  ;;  %v14071_v25 = vld [vmem:[#allocation190_spill] sm:$0xff]  ;;  %v14072_v32 = vld [vmem:[#allocation67_spill] sm:$0xff] }
 0x386   :  { %v11740_v7 = vadd.f32 %v4721_v20, %v4226_v57  ;;  %v6939_v22 = vpop.f32.mrf.mxu0  ;;  %7426 = vmatprep.mubr.msk.f32.mxu1 %vm7871_vm1, %v13113_v1 }
 0x387   :  { %v7094_v41 = vpop.f32.mrf.mxu1  ;;  %v14073_v22 = vand.u32 4294901760, %v14065_v8 }
 0x388   :  { %v4255_v53 = vpop.f32.mrf.mxu0  ;;  %7272 = vmatmul.mubr.f32.gmra.mxu0 %v14068_v63 }
 0x389   :  { %v4256_v15 = vadd.f32 %v4255_v53, %v14069_v26  ;;  %v4727_v59 = vpop.f32.mrf.mxu1  ;;  %7427 = vmatmul.mubr.f32.gmra.mxu1 %v14070_v21  ;;  %7274 = vmatprep.mubr.msk.f32.mxu0 %vm7871_vm1, %v13113_v1  ;;  %v14074_v26 = vld [vmem:[#allocation197_spill] sm:$0xff] }
 0x38a   :  { %v11750_v19 = vadd.f32 %v4727_v59, %v4236_v9  ;;  %v6942_v57 = vpop.f32.mrf.mxu0  ;;  %7429 = vmatprep.mubr.msk.f32.mxu1 %vm7871_vm1, %v13113_v1  ;;  %v14075_v59 = vld [vmem:[#allocation75_spill] sm:$0xff] }
 0x38b   :  { %v7097_v31 = vpop.f32.mrf.mxu1 }
 0x38c   :  { %v4265_v45 = vpop.f32.mrf.mxu0  ;;  %7275 = vmatmul.mubr.f32.gmra.mxu0 %v14071_v25  ;;  %v14076_v31 = vand.u32 4294901760, %v14068_v63 }
 0x38d   :  { %v4266_v20 = vadd.f32 %v4265_v45, %v14072_v32  ;;  %v4733_v30 = vpop.f32.mrf.mxu1  ;;  %7430 = vmatmul.mubr.f32.gmra.mxu1 %v14073_v22  ;;  %7277 = vmatprep.mubr.msk.f32.mxu0 %vm7871_vm1, %v13113_v1  ;;  %v14078_v22 = vld [vmem:[#allocation79_spill] sm:$0xff] }
 0x38e   :  { %v11760_v38 = vadd.f32 %v4733_v30, %v4246_v48  ;;  %v6945_v9 = vpop.f32.mrf.mxu0  ;;  %7432 = vmatprep.mubr.msk.f32.mxu1 %vm7871_vm1, %v13113_v1  ;;  %v14077_v30 = vld [vmem:[#allocation205_spill] sm:$0xff] }
 0x38f   :  { %v7100_v41 = vpop.f32.mrf.mxu1 }
 0x390   :  { %v4275_v53 = vpop.f32.mrf.mxu0  ;;  %7278 = vmatmul.mubr.f32.gmra.mxu0 %v14074_v26 }
 0x391   :  { %v4276_v21 = vadd.f32 %v4275_v53, %v14075_v59  ;;  %v4739_v57 = vpop.f32.mrf.mxu1  ;;  %7433 = vmatmul.mubr.f32.gmra.mxu1 %v14076_v31  ;;  %7280 = vmatprep.mubr.msk.f32.mxu0 %vm7871_vm1, %v13113_v1  ;;  %v14079_v53 = vand.u32 4294901760, %v14071_v25  ;;  %v14080_v31 = vld [vmem:[#allocation209_spill] sm:$0xff] }
 0x392   :  { %v11770_v8 = vadd.f32 %v4739_v57, %v4256_v15  ;;  %v6948_v48 = vpop.f32.mrf.mxu0  ;;  %7435 = vmatprep.mubr.msk.f32.mxu1 %vm7871_vm1, %v13113_v1 }
 0x393   :  { %v7103_v45 = vpop.f32.mrf.mxu1  ;;  %v14081_v48 = vld [vmem:[#allocation84_spill] sm:$0xff] }
 0x394   :  { %v4285_v32 = vpop.f32.mrf.mxu0  ;;  %7281 = vmatmul.mubr.f32.gmra.mxu0 %v14077_v30 }
 0x395   :  { %v4286_v9 = vadd.f32 %v4285_v32, %v14078_v22  ;;  %v4745_v41 = vpop.f32.mrf.mxu1  ;;  %7436 = vmatmul.mubr.f32.gmra.mxu1 %v14079_v53  ;;  %7283 = vmatprep.mubr.msk.f32.mxu0 %vm7871_vm1, %v13113_v1  ;;  %v14082_v22 = vand.u32 4294901760, %v14074_v26 }
 0x396   :  { %v11780_v63 = vadd.f32 %v4745_v41, %v4266_v20  ;;  %v6951_v15 = vpop.f32.mrf.mxu0  ;;  %7438 = vmatprep.mubr.msk.f32.mxu1 %vm7871_vm1, %v13113_v1 }
 0x397   :  { %v7106_v59 = vpop.f32.mrf.mxu1  ;;  %v14083_v15 = vld [vmem:[#allocation47_spill] sm:$0xff] }
 0x398   :  { %v4295_v57 = vpop.f32.mrf.mxu0  ;;  %7284 = vmatmul.mubr.f32.gmra.mxu0 %v14080_v31  ;;  %v14084_v59 = vld [vmem:[#allocation91_spill] sm:$0xff] }
 0x399   :  { %v4296_v45 = vadd.f32 %v4295_v57, %v14081_v48  ;;  %v4751_v32 = vpop.f32.mrf.mxu1  ;;  %7439 = vmatmul.mubr.f32.gmra.mxu1 %v14082_v22  ;;  %7286 = vmatprep.mubr.msk.f32.mxu0 %vm7871_vm1, %v13113_v1  ;;  %v14085_v48 = vand.u32 4294901760, %v14077_v30 }
 0x39a   :  { %v11790_v25 = vadd.f32 %v4751_v32, %v4276_v21  ;;  %v6954_v20 = vpop.f32.mrf.mxu0  ;;  %7441 = vmatprep.mubr.msk.f32.mxu1 %vm7871_vm1, %v13113_v1 }
 0x39b   :  { %v7109_v41 = vpop.f32.mrf.mxu1  ;;  %v14086_v20 = vld [vmem:[#allocation60_spill] sm:$0xff] }
 0x39c   :  { %v4305_v53 = vpop.f32.mrf.mxu0  ;;  %7287 = vmatmul.mubr.f32.gmra.mxu0 %v14083_v15  ;;  %v14087_v41 = vld [vmem:[#allocation95_spill] sm:$0xff] }
 0x39d   :  { %v4306_v34 = vadd.f32 %v4305_v53, %v14084_v59  ;;  %v4757_v57 = vpop.f32.mrf.mxu1  ;;  %7442 = vmatmul.mubr.f32.gmra.mxu1 %v14085_v48  ;;  %7289 = vmatprep.mubr.msk.f32.mxu0 %vm7871_vm1, %v13113_v1  ;;  %v14088_v59 = vand.u32 4294901760, %v14080_v31 }
 0x39e   :  { %v11800_v26 = vadd.f32 %v4757_v57, %v4286_v9  ;;  %v6957_v21 = vpop.f32.mrf.mxu0  ;;  %7444 = vmatprep.mubr.msk.f32.mxu1 %vm7871_vm1, %v13113_v1 }
 0x39f   :  { %v7112_v32 = vpop.f32.mrf.mxu1  ;;  %v14089_v21 = vld [vmem:[#allocation65_spill] sm:$0xff] }
 0x3a0   :  { %v4315_v22 = vpop.f32.mrf.mxu0  ;;  %7290 = vmatmul.mubr.f32.gmra.mxu0 %v14086_v20  ;;  %v14090_v32 = vld [vmem:[#allocation98_spill] sm:$0xff] }
 0x3a1   :  { %v4316_v2 = vadd.f32 %v4315_v22, %v14087_v41  ;;  %v4763_v53 = vpop.f32.mrf.mxu1  ;;  %7445 = vmatmul.mubr.f32.gmra.mxu1 %v14088_v59  ;;  %7292 = vmatprep.mubr.msk.f32.mxu0 %vm7871_vm1, %v13113_v1  ;;  %v14091_v41 = vand.u32 4294901760, %v14083_v15 }
 0x3a2   :  { %v11810_v30 = vadd.f32 %v4763_v53, %v4296_v45  ;;  %v6960_v9 = vpop.f32.mrf.mxu0  ;;  %7447 = vmatprep.mubr.msk.f32.mxu1 %vm7871_vm1, %v13113_v1 }
 0x3a3   :  { %v7115_v57 = vpop.f32.mrf.mxu1  ;;  %v14092_v9 = vld [vmem:[#allocation73_spill] sm:$0xff] }
 0x3a4   :  { %v4325_v48 = vpop.f32.mrf.mxu0  ;;  %7293 = vmatmul.mubr.f32.gmra.mxu0 %v14089_v21  ;;  %v14093_v57 = vld [vmem:[#allocation102_spill] sm:$0xff] }
 0x3a5   :  { %v4326_v3 = vadd.f32 %v4325_v48, %v14090_v32  ;;  %v4769_v22 = vpop.f32.mrf.mxu1  ;;  %7448 = vmatmul.mubr.f32.gmra.mxu1 %v14091_v41  ;;  %7295 = vmatprep.mubr.msk.f32.mxu0 %vm7871_vm1, %v13113_v1  ;;  %v14094_v32 = vand.u32 4294901760, %v14086_v20 }
 0x3a6   :  { %v11820_v31 = vadd.f32 %v4769_v22, %v4306_v34  ;;  %v6963_v45 = vpop.f32.mrf.mxu0  ;;  %7450 = vmatprep.mubr.msk.f32.mxu1 %vm7871_vm1, %v13113_v1 }
 0x3a7   :  { %v7118_v53 = vpop.f32.mrf.mxu1  ;;  %v14095_v45 = vld [vmem:[#allocation77_spill] sm:$0xff] }
 0x3a8   :  { %v4335_v59 = vpop.f32.mrf.mxu0  ;;  %7296 = vmatmul.mubr.f32.gmra.mxu0 %v14092_v9 }
 0x3a9   :  { %v4336_v40 = vadd.f32 %v4335_v59, %v14093_v57  ;;  %v4775_v48 = vpop.f32.mrf.mxu1  ;;  %7451 = vmatmul.mubr.f32.gmra.mxu1 %v14094_v32  ;;  %7298 = vmatprep.mubr.msk.f32.mxu0 %vm7871_vm1, %v13113_v1  ;;  %v14096_v57 = vand.u32 4294901760, %v14089_v21 }
 0x3aa   :  { %v11830_v15 = vadd.f32 %v4775_v48, %v4316_v2  ;;  %v6966_v34 = vpop.f32.mrf.mxu0  ;;  %7453 = vmatprep.mubr.msk.f32.mxu1 %vm7871_vm1, %v13113_v1 }
 0x3ab   :  { %v7121_v22 = vpop.f32.mrf.mxu1  ;;  %v14097_v34 = vld [vmem:[#allocation81_spill] sm:$0xff] }
 0x3ac   :  { %v4345_v41 = vpop.f32.mrf.mxu0  ;;  %7299 = vmatmul.mubr.f32.gmra.mxu0 %v14095_v45 }
 0x3ad   :  { %v4346_v53 = vadd.f32 %v4345_v41, %v11330_v44  ;;  %v4781_v59 = vpop.f32.mrf.mxu1  ;;  %7454 = vmatmul.mubr.f32.gmra.mxu1 %v14096_v57  ;;  %7301 = vmatprep.mubr.msk.f32.mxu0 %vm7871_vm1, %v13113_v1  ;;  %v14098_v41 = vand.u32 4294901760, %v14092_v9 }
 0x3ae   :  { %v11840_v20 = vadd.f32 %v4781_v59, %v4326_v3  ;;  %v6969_v2 = vpop.f32.mrf.mxu0  ;;  %7456 = vmatprep.mubr.msk.f32.mxu1 %vm7871_vm1, %v13113_v1 }
 0x3af   :  { %v7124_v48 = vpop.f32.mrf.mxu1  ;;  %v14099_v2 = vld [vmem:[#allocation85_spill] sm:$0xff] }
 0x3b0   :  { %v4355_v32 = vpop.f32.mrf.mxu0  ;;  %7302 = vmatmul.mubr.f32.gmra.mxu0 %v14097_v34 }
 0x3b1   :  { %v4356_v22 = vadd.f32 %v4355_v32, %v11348_v39  ;;  %v4787_v44 = vpop.f32.mrf.mxu1  ;;  %7457 = vmatmul.mubr.f32.gmra.mxu1 %v14098_v41  ;;  %7304 = vmatprep.mubr.msk.f32.mxu0 %vm7871_vm1, %v13113_v1  ;;  %v14100_v32 = vand.u32 4294901760, %v14095_v45 }
 0x3b2   :  { %v11850_v21 = vadd.f32 %v4787_v44, %v4336_v40  ;;  %v6972_v3 = vpop.f32.mrf.mxu0  ;;  %7459 = vmatprep.mubr.msk.f32.mxu1 %vm7871_vm1, %v13113_v1 }
 0x3b3   :  { %v7127_v59 = vpop.f32.mrf.mxu1  ;;  %v14101_v3 = vld [vmem:[#allocation93_spill] sm:$0xff] }
 0x3b4   :  { %v4365_v57 = vpop.f32.mrf.mxu0  ;;  %7305 = vmatmul.mubr.f32.gmra.mxu0 %v14099_v2 }
 0x3b5   :  { %v4366_v48 = vadd.f32 %v4365_v57, %v11365_v58  ;;  %v4793_v39 = vpop.f32.mrf.mxu1  ;;  %7460 = vmatmul.mubr.f32.gmra.mxu1 %v14100_v32  ;;  %7307 = vmatprep.mubr.msk.f32.mxu0 %vm7871_vm1, %v13113_v1  ;;  %v14102_v57 = vand.u32 4294901760, %v14097_v34 }
 0x3b6   :  { %v11860_v9 = vadd.f32 %v4793_v39, %v4346_v53  ;;  %v6975_v40 = vpop.f32.mrf.mxu0  ;;  %7462 = vmatprep.mubr.msk.f32.mxu1 %vm7871_vm1, %v13113_v1 }
 0x3b7   :  { %v7130_v44 = vpop.f32.mrf.mxu1  ;;  %v14103_v40 = vld [vmem:[#allocation96_spill] sm:$0xff] }
 0x3b8   :  { %v4375_v41 = vpop.f32.mrf.mxu0  ;;  %7308 = vmatmul.mubr.f32.gmra.mxu0 %v14101_v3 }
 0x3b9   :  { %v4376_v59 = vadd.f32 %v4375_v41, %v11380_v18  ;;  %v4799_v58 = vpop.f32.mrf.mxu1  ;;  %7463 = vmatmul.mubr.f32.gmra.mxu1 %v14102_v57  ;;  %7310 = vmatprep.mubr.msk.f32.mxu0 %vm7871_vm1, %v13113_v1  ;;  %v14104_v41 = vand.u32 4294901760, %v14099_v2 }
 0x3ba   :  { %v11870_v45 = vadd.f32 %v4799_v58, %v4356_v22  ;;  %v6978_v53 = vpop.f32.mrf.mxu0  ;;  %7465 = vmatprep.mubr.msk.f32.mxu1 %vm7871_vm1, %v13113_v1 }
 0x3bb   :  { %v7133_v39 = vpop.f32.mrf.mxu1  ;;  %v14105_v53 = vld [vmem:[#allocation100_spill] sm:$0xff] }
 0x3bc   :  { %v4385_v32 = vpop.f32.mrf.mxu0  ;;  %7311 = vmatmul.mubr.f32.gmra.mxu0 %v14103_v40 }
 0x3bd   :  { %v4386_v44 = vadd.f32 %v4385_v32, %v11392_v37  ;;  %v4805_v18 = vpop.f32.mrf.mxu1  ;;  %7466 = vmatmul.mubr.f32.gmra.mxu1 %v14104_v41  ;;  %7313 = vmatprep.mubr.msk.f32.mxu0 %vm7871_vm1, %v13113_v1  ;;  %v14106_v32 = vand.u32 4294901760, %v14101_v3 }
 0x3be   :  { %v11880_v34 = vadd.f32 %v4805_v18, %v4366_v48  ;;  %v6981_v22 = vpop.f32.mrf.mxu0  ;;  %7468 = vmatprep.mubr.msk.f32.mxu1 %vm7871_vm1, %v13113_v1 }
 0x3bf   :  { %v7136_v58 = vpop.f32.mrf.mxu1  ;;  %v14107_v22 = vld [vmem:[#allocation103_spill] sm:$0xff] }
 0x3c0   :  { %v4395_v57 = vpop.f32.mrf.mxu0  ;;  %7314 = vmatmul.mubr.f32.gmra.mxu0 %v14105_v53 }
 0x3c1   :  { %v4396_v39 = vadd.f32 %v4395_v57, %v11403_v52  ;;  %v4811_v37 = vpop.f32.mrf.mxu1  ;;  %7469 = vmatmul.mubr.f32.gmra.mxu1 %v14106_v32  ;;  %7316 = vmatprep.mubr.msk.f32.mxu0 %vm7871_vm1, %v13113_v1  ;;  %v14108_v57 = vand.u32 4294901760, %v14103_v40 }
 0x3c2   :  { %v11890_v2 = vadd.f32 %v4811_v37, %v4376_v59  ;;  %v6984_v48 = vpop.f32.mrf.mxu0  ;;  %7471 = vmatprep.mubr.msk.f32.mxu1 %vm7871_vm1, %v13113_v1 }
 0x3c3   :  { %v7139_v18 = vpop.f32.mrf.mxu1  ;;  %v14109_v48 = vld [vmem:[#allocation109_spill] sm:$0xff] }
 0x3c4   :  { %v4405_v41 = vpop.f32.mrf.mxu0  ;;  %7317 = vmatmul.mubr.f32.gmra.mxu0 %v14107_v22 }
 0x3c5   :  { %v4406_v58 = vadd.f32 %v4405_v41, %v11411_v35  ;;  %v4817_v52 = vpop.f32.mrf.mxu1  ;;  %7472 = vmatmul.mubr.f32.gmra.mxu1 %v14108_v57  ;;  %7319 = vmatprep.mubr.msk.f32.mxu0 %vm7871_vm1, %v13113_v1  ;;  %v14110_v41 = vand.u32 4294901760, %v14105_v53 }
 0x3c6   :  { %v11900_v3 = vadd.f32 %v4817_v52, %v4386_v44  ;;  %v6987_v59 = vpop.f32.mrf.mxu0  ;;  %7474 = vmatprep.mubr.msk.f32.mxu1 %vm7871_vm1, %v13113_v1 }
 0x3c7   :  { %v7142_v37 = vpop.f32.mrf.mxu1 }
 0x3c8   :  { %v4415_v32 = vpop.f32.mrf.mxu0  ;;  %7320 = vmatmul.mubr.f32.gmra.mxu0 %v14109_v48  ;;  %v14111_v37 = vand.u32 4294901760, %v14107_v22 }
 0x3c9   :  { %v4416_v18 = vadd.f32 %v4415_v32, %v11419_v23  ;;  %v4823_v35 = vpop.f32.mrf.mxu1  ;;  %7475 = vmatmul.mubr.f32.gmra.mxu1 %v14110_v41  ;;  %7322 = vmatprep.mubr.msk.f32.mxu0 %vm7871_vm1, %v13113_v1 }
 0x3ca   :  { %v11910_v40 = vadd.f32 %v4823_v35, %v4396_v39  ;;  %v6990_v44 = vpop.f32.mrf.mxu0  ;;  %7477 = vmatprep.mubr.msk.f32.mxu1 %vm7871_vm1, %v13113_v1 }
 0x3cb   :  { %v7145_v52 = vpop.f32.mrf.mxu1  ;;  %v14112_v44 = vand.u32 4294901760, %v14109_v48 }
 0x3cc   :  { %v4425_v57 = vpop.f32.mrf.mxu0  ;;  %7323 = vmatmul.mubr.f32.gmra.mxu0 %v11357_v13 }
 0x3cd   :  { %v4426_v59 = vadd.f32 %v4425_v57, %v11428_v49  ;;  %v4829_v23 = vpop.f32.mrf.mxu1  ;;  %7478 = vmatmul.mubr.f32.gmra.mxu1 %v14111_v37  ;;  %7325 = vmatprep.mubr.msk.f32.mxu0 %vm7871_vm1, %v13113_v1 }
 0x3ce   :  { %v11920_v53 = vadd.f32 %v4829_v23, %v4406_v58  ;;  %v6993_v39 = vpop.f32.mrf.mxu0  ;;  %7480 = vmatprep.mubr.msk.f32.mxu1 %vm7871_vm1, %v13113_v1  ;;  %v14113_v23 = vld [vmem:[#allocation124_spill] sm:$0xff] }
 0x3cf   :  { %v7148_v32 = vpop.f32.mrf.mxu1  ;;  %v14114_v39 = vand.u32 4294901760, %v11357_v13 }
 0x3d0   :  { %v4435_v35 = vpop.f32.mrf.mxu0  ;;  %7326 = vmatmul.mubr.f32.gmra.mxu0 %v11374_v47 }
 0x3d1   :  { %v4436_v41 = vadd.f32 %v4435_v35, %v11440_v46  ;;  %v4835_v49 = vpop.f32.mrf.mxu1  ;;  %7481 = vmatmul.mubr.f32.gmra.mxu1 %v14112_v44  ;;  %7515 = vmatprep.mubr.msk.f32.mxu0 %vm7871_vm1, %v13113_v1 }
 0x3d2   :  { %v11930_v22 = vadd.f32 %v4835_v49, %v4416_v18  ;;  %v6996_v58 = vpop.f32.mrf.mxu0  ;;  %7483 = vmatprep.mubr.msk.f32.mxu1 %vm7871_vm1, %v13113_v1  ;;  %v14115_v49 = vld [vmem:[#allocation24_spill] sm:$0xff] }
 0x3d3   :  { %v7151_v52 = vpop.f32.mrf.mxu1  ;;  %v14116_v58 = vand.u32 4294901760, %v11374_v47 }
 0x3d4   :  { %v4445_v57 = vpop.f32.mrf.mxu0  ;;  %7516 = vmatmul.mubr.f32.vlgmr.msra.gmra.mxu0 %v14113_v23 }
 0x3d5   :  { %v4446_v37 = vadd.f32 %v4445_v57, %v11453_v0  ;;  %v4841_v46 = vpop.f32.mrf.mxu1  ;;  %7484 = vmatmul.mubr.f32.gmra.mxu1 %v14114_v39  ;;  %7518 = vmatprep.mubr.msk.f32.mxu0 %vm7871_vm1, %v13113_v1 }
 0x3d6   :  { %v11940_v48 = vadd.f32 %v4841_v46, %v4426_v59  ;;  %v6999_v18 = vpop.f32.mrf.mxu0  ;;  %7486 = vmatprep.mubr.msk.f32.mxu1 %vm7871_vm1, %v13113_v1  ;;  %v14117_v46 = vld [vmem:[#allocation12_spill] sm:$0xff] }
 0x3d7   :  { %v7154_v32 = vpop.f32.mrf.mxu1 }
 0x3d8   :  { %v4455_v35 = vpop.f32.mrf.mxu0  ;;  %7519 = vmatmul.mubr.f32.gmra.mxu0 %v14115_v49 }
 0x3d9   :  { %v4456_v44 = vadd.f32 %v4455_v35, %v11468_v24  ;;  %v4847_v0 = vpop.f32.mrf.mxu1  ;;  %7487 = vmatmul.mubr.f32.gmra.mxu1 %v14116_v58  ;;  %7521 = vmatprep.mubr.msk.f32.mxu0 %vm7871_vm1, %v13113_v1  ;;  %v14118_v35 = vld [vmem:[#allocation21_spill] sm:$0xff] }
 0x3da   :  { %v11950_v13 = vadd.f32 %v4847_v0, %v4436_v41  ;;  %v7002_v59 = vpop.f32.mrf.mxu0  ;;  %7676 = vmatprep.mubr.msk.f32.mxu1 %vm7871_vm1, %v13113_v1 }
 0x3db   :  { %v7157_v52 = vpop.f32.mrf.mxu1 }
 0x3dc   :  { %v4465_v57 = vpop.f32.mrf.mxu0  ;;  %7522 = vmatmul.mubr.f32.gmra.mxu0 %v14117_v46  ;;  %v14119_v52 = vld [vmem:[#allocation134_spill] sm:$0xff] }
 0x3dd   :  { %v4466_v39 = vadd.f32 %v4465_v57, %v11482_v6  ;;  %v4853_v24 = vpop.f32.mrf.mxu1  ;;  %7677 = vmatmul.mubr.f32.vlgmr.msra.gmra.mxu1 %v14113_v23  ;;  %7524 = vmatprep.mubr.msk.f32.mxu0 %vm7871_vm1, %v13113_v1 }
 0x3de   :  { %v11959_v47 = vadd.f32 %v4853_v24, %v4446_v37  ;;  %v7005_v41 = vpop.f32.mrf.mxu0  ;;  %7679 = vmatprep.mubr.msk.f32.mxu1 %vm7871_vm1, %v13113_v1 }
 0x3df   :  { %v7160_v18 = vpop.f32.mrf.mxu1 }
 0x3e0   :  { %v4963_v32 = vpop.f32.mrf.mxu0  ;;  %7525 = vmatmul.mubr.f32.gmra.mxu0 %v14118_v35  ;;  %v14120_v18 = vld [vmem:[#allocation23_spill] sm:$0xff] }
 0x3e1   :  { %v4859_v0 = vpop.f32.mrf.mxu1  ;;  %v4964_v58 = vadd.f32 %v4963_v32, %v11497_v42  ;;  %7680 = vmatmul.mubr.f32.gmra.mxu1 %v14115_v49  ;;  %7527 = vmatprep.mubr.msk.f32.mxu0 %vm7871_vm1, %v13113_v1 }
 0x3e2   :  { %v11968_v6 = vadd.f32 %v4859_v0, %v4456_v44  ;;  %v7195_v23 = vpop.f32.mrf.mxu0  ;;  %7682 = vmatprep.mubr.msk.f32.mxu1 %vm7871_vm1, %v13113_v1 }
 0x3e3   :  { %v7163_v37 = vpop.f32.mrf.mxu1 }
 0x3e4   :  { %v4970_v59 = vpop.f32.mrf.mxu0  ;;  %7528 = vmatmul.mubr.f32.gmra.mxu0 %v14119_v52  ;;  %v14121_v37 = vld [vmem:[#allocation138_spill] sm:$0xff] }
 0x3e5   :  { %v4865_v57 = vpop.f32.mrf.mxu1  ;;  %v4971_v24 = vadd.f32 %v4970_v59, %v11512_v62  ;;  %7683 = vmatmul.mubr.f32.gmra.mxu1 %v14117_v46  ;;  %7530 = vmatprep.mubr.msk.f32.mxu0 %vm7871_vm1, %v13113_v1 }
 0x3e6   :  { %v11977_v42 = vadd.f32 %v4865_v57, %v4466_v39  ;;  %v7198_v49 = vpop.f32.mrf.mxu0  ;;  %7685 = vmatprep.mubr.msk.f32.mxu1 %vm7871_vm1, %v13113_v1 }
 0x3e7   :  { %v7166_v44 = vpop.f32.mrf.mxu1 }
 0x3e8   :  { %v4977_v41 = vpop.f32.mrf.mxu0  ;;  %7531 = vmatmul.mubr.f32.gmra.mxu0 %v14120_v18  ;;  %v14122_v44 = vld [vmem:[#allocation141_spill] sm:$0xff] }
 0x3e9   :  { %v4978_v32 = vadd.f32 %v4977_v41, %v11527_v60  ;;  %v5357_v0 = vpop.f32.mrf.mxu1  ;;  %7686 = vmatmul.mubr.f32.gmra.mxu1 %v14118_v35  ;;  %7533 = vmatprep.mubr.msk.f32.mxu0 %vm7871_vm1, %v13113_v1 }
 0x3ea   :  { %v11986_v62 = vadd.f32 %v5357_v0, %v4964_v58  ;;  %v7201_v46 = vpop.f32.mrf.mxu0  ;;  %7688 = vmatprep.mubr.msk.f32.mxu1 %vm7871_vm1, %v13113_v1 }
 0x3eb   :  { %v7356_v39 = vpop.f32.mrf.mxu1 }
 0x3ec   :  { %v4984_v23 = vpop.f32.mrf.mxu0  ;;  %7534 = vmatmul.mubr.f32.gmra.mxu0 %v14121_v37  ;;  %v14123_v39 = vld [vmem:[#allocation143_spill] sm:$0xff] }
 0x3ed   :  { %v4985_v59 = vadd.f32 %v4984_v23, %v11542_v28  ;;  %v5365_v57 = vpop.f32.mrf.mxu1  ;;  %7689 = vmatmul.mubr.f32.gmra.mxu1 %v14119_v52  ;;  %7536 = vmatprep.mubr.msk.f32.mxu0 %vm7871_vm1, %v13113_v1 }
 0x3ee   :  { %v11995_v60 = vadd.f32 %v5365_v57, %v4971_v24  ;;  %v7204_v35 = vpop.f32.mrf.mxu0  ;;  %7691 = vmatprep.mubr.msk.f32.mxu1 %vm7871_vm1, %v13113_v1 }
 0x3ef   :  { %v7359_v58 = vpop.f32.mrf.mxu1 }
 0x3f0   :  { %v4991_v49 = vpop.f32.mrf.mxu0  ;;  %7537 = vmatmul.mubr.f32.gmra.mxu0 %v14122_v44  ;;  %v14124_v58 = vld [vmem:[#allocation144_spill] sm:$0xff] }
 0x3f1   :  { %v4992_v41 = vadd.f32 %v4991_v49, %v11557_v61  ;;  %v5373_v0 = vpop.f32.mrf.mxu1  ;;  %7692 = vmatmul.mubr.f32.gmra.mxu1 %v14120_v18  ;;  %7539 = vmatprep.mubr.msk.f32.mxu0 %vm7871_vm1, %v13113_v1 }
 0x3f2   :  { %v12004_v28 = vadd.f32 %v5373_v0, %v4978_v32  ;;  %v7207_v52 = vpop.f32.mrf.mxu0  ;;  %7694 = vmatprep.mubr.msk.f32.mxu1 %vm7871_vm1, %v13113_v1 }
 0x3f3   :  { %v7362_v24 = vpop.f32.mrf.mxu1 }
 0x3f4   :  { %v4998_v46 = vpop.f32.mrf.mxu0  ;;  %7540 = vmatmul.mubr.f32.gmra.mxu0 %v14123_v39  ;;  %v14125_v24 = vld [vmem:[#allocation34_spill] sm:$0xff] }
 0x3f5   :  { %v4999_v23 = vadd.f32 %v4998_v46, %v11572_v33  ;;  %v5381_v57 = vpop.f32.mrf.mxu1  ;;  %7695 = vmatmul.mubr.f32.gmra.mxu1 %v14121_v37  ;;  %7542 = vmatprep.mubr.msk.f32.mxu0 %vm7871_vm1, %v13113_v1 }
 0x3f6   :  { %v12013_v61 = vadd.f32 %v5381_v57, %v4985_v59  ;;  %v7210_v18 = vpop.f32.mrf.mxu0  ;;  %7697 = vmatprep.mubr.msk.f32.mxu1 %vm7871_vm1, %v13113_v1 }
 0x3f7   :  { %v7365_v32 = vpop.f32.mrf.mxu1 }
 0x3f8   :  { %v5005_v35 = vpop.f32.mrf.mxu0  ;;  %7543 = vmatmul.mubr.f32.gmra.mxu0 %v14124_v58  ;;  %v14126_v32 = vld [vmem:[#allocation148_spill] sm:$0xff] }
 0x3f9   :  { %v5006_v49 = vadd.f32 %v5005_v35, %v11587_v55  ;;  %v5389_v0 = vpop.f32.mrf.mxu1  ;;  %7698 = vmatmul.mubr.f32.gmra.mxu1 %v14122_v44  ;;  %7545 = vmatprep.mubr.msk.f32.mxu0 %vm7871_vm1, %v13113_v1 }
 0x3fa   :  { %v12022_v33 = vadd.f32 %v5389_v0, %v4992_v41  ;;  %v7213_v37 = vpop.f32.mrf.mxu0  ;;  %7700 = vmatprep.mubr.msk.f32.mxu1 %vm7871_vm1, %v13113_v1 }
 0x3fb   :  { %v7368_v59 = vpop.f32.mrf.mxu1 }
 0x3fc   :  { %v5012_v52 = vpop.f32.mrf.mxu0  ;;  %7546 = vmatmul.mubr.f32.gmra.mxu0 %v14125_v24  ;;  %v14127_v59 = vld [vmem:[#allocation31_spill] sm:$0xff] }
 0x3fd   :  { %v5013_v46 = vadd.f32 %v5012_v52, %v11602_v51  ;;  %v5397_v57 = vpop.f32.mrf.mxu1  ;;  %7701 = vmatmul.mubr.f32.gmra.mxu1 %v14123_v39  ;;  %7548 = vmatprep.mubr.msk.f32.mxu0 %vm7871_vm1, %v13113_v1 }
 0x3fe   :  { %v12031_v55 = vadd.f32 %v5397_v57, %v4999_v23  ;;  %v7216_v44 = vpop.f32.mrf.mxu0  ;;  %7703 = vmatprep.mubr.msk.f32.mxu1 %vm7871_vm1, %v13113_v1 }
 0x3ff   :  { %v7371_v41 = vpop.f32.mrf.mxu1 }
 0x400   :  { %v5019_v18 = vpop.f32.mrf.mxu0  ;;  %7549 = vmatmul.mubr.f32.gmra.mxu0 %v14126_v32  ;;  %v14128_v41 = vld [vmem:[#allocation39_spill] sm:$0xff] }
 0x401   :  { %v5020_v35 = vadd.f32 %v5019_v18, %v11617_v12  ;;  %v5405_v0 = vpop.f32.mrf.mxu1  ;;  %7704 = vmatmul.mubr.f32.gmra.mxu1 %v14124_v58  ;;  %7551 = vmatprep.mubr.msk.f32.mxu0 %vm7871_vm1, %v13113_v1 }
 0x402   :  { %v12040_v51 = vadd.f32 %v5405_v0, %v5006_v49  ;;  %v7219_v39 = vpop.f32.mrf.mxu0  ;;  %7706 = vmatprep.mubr.msk.f32.mxu1 %vm7871_vm1, %v13113_v1 }
 0x403   :  { %v7374_v23 = vpop.f32.mrf.mxu1 }
 0x404   :  { %v5026_v37 = vpop.f32.mrf.mxu0  ;;  %7552 = vmatmul.mubr.f32.gmra.mxu0 %v14127_v59  ;;  %v14129_v23 = vld [vmem:[#allocation33_spill] sm:$0xff] }
 0x405   :  { %v5027_v52 = vadd.f32 %v5026_v37, %v11630_v27  ;;  %v5413_v57 = vpop.f32.mrf.mxu1  ;;  %7707 = vmatmul.mubr.f32.gmra.mxu1 %v14125_v24  ;;  %7554 = vmatprep.mubr.msk.f32.mxu0 %vm7871_vm1, %v13113_v1 }
 0x406   :  { %v12049_v12 = vadd.f32 %v5413_v57, %v5013_v46  ;;  %v7222_v58 = vpop.f32.mrf.mxu0  ;;  %7709 = vmatprep.mubr.msk.f32.mxu1 %vm7871_vm1, %v13113_v1 }
 0x407   :  { %v7377_v49 = vpop.f32.mrf.mxu1 }
 0x408   :  { %v5033_v44 = vpop.f32.mrf.mxu0  ;;  %7555 = vmatmul.mubr.f32.gmra.mxu0 %v14128_v41  ;;  %v14130_v49 = vld [vmem:[#allocation157_spill] sm:$0xff] }
 0x409   :  { %v5034_v18 = vadd.f32 %v5033_v44, %v11640_v11  ;;  %v5421_v0 = vpop.f32.mrf.mxu1  ;;  %7710 = vmatmul.mubr.f32.gmra.mxu1 %v14126_v32  ;;  %7557 = vmatprep.mubr.msk.f32.mxu0 %vm7871_vm1, %v13113_v1 }
 0x40a   :  { %v12058_v27 = vadd.f32 %v5421_v0, %v5020_v35  ;;  %v7225_v24 = vpop.f32.mrf.mxu0  ;;  %7712 = vmatprep.mubr.msk.f32.mxu1 %vm7871_vm1, %v13113_v1 }
 0x40b   :  { %v7380_v46 = vpop.f32.mrf.mxu1 }
 0x40c   :  { %v5040_v39 = vpop.f32.mrf.mxu0  ;;  %7558 = vmatmul.mubr.f32.gmra.mxu0 %v14129_v23  ;;  %v14131_v46 = vld [vmem:[#allocation36_spill] sm:$0xff] }
 0x40d   :  { %v5041_v37 = vadd.f32 %v5040_v39, %v11650_v43  ;;  %v5429_v57 = vpop.f32.mrf.mxu1  ;;  %7713 = vmatmul.mubr.f32.gmra.mxu1 %v14127_v59  ;;  %7560 = vmatprep.mubr.msk.f32.mxu0 %vm7871_vm1, %v13113_v1 }
 0x40e   :  { %v12067_v11 = vadd.f32 %v5429_v57, %v5027_v52  ;;  %v7228_v32 = vpop.f32.mrf.mxu0  ;;  %7715 = vmatprep.mubr.msk.f32.mxu1 %vm7871_vm1, %v13113_v1 }
 0x40f   :  { %v7383_v35 = vpop.f32.mrf.mxu1 }
 0x410   :  { %v5047_v58 = vpop.f32.mrf.mxu0  ;;  %7561 = vmatmul.mubr.f32.gmra.mxu0 %v14130_v49  ;;  %v14132_v35 = vld [vmem:[#allocation43_spill] sm:$0xff] }
 0x411   :  { %v5048_v44 = vadd.f32 %v5047_v58, %v11660_v4  ;;  %v5437_v0 = vpop.f32.mrf.mxu1  ;;  %7716 = vmatmul.mubr.f32.gmra.mxu1 %v14128_v41  ;;  %7563 = vmatprep.mubr.msk.f32.mxu0 %vm7871_vm1, %v13113_v1 }
 0x412   :  { %v12076_v43 = vadd.f32 %v5437_v0, %v5034_v18  ;;  %v7231_v59 = vpop.f32.mrf.mxu0  ;;  %7718 = vmatprep.mubr.msk.f32.mxu1 %vm7871_vm1, %v13113_v1 }
 0x413   :  { %v7386_v52 = vpop.f32.mrf.mxu1 }
 0x414   :  { %v5054_v24 = vpop.f32.mrf.mxu0  ;;  %7564 = vmatmul.mubr.f32.gmra.mxu0 %v14131_v46  ;;  %v14133_v52 = vld [vmem:[#allocation37_spill] sm:$0xff] }
 0x415   :  { %v5055_v39 = vadd.f32 %v5054_v24, %v11670_v10  ;;  %v5445_v57 = vpop.f32.mrf.mxu1  ;;  %7719 = vmatmul.mubr.f32.gmra.mxu1 %v14129_v23  ;;  %7566 = vmatprep.mubr.msk.f32.mxu0 %vm7871_vm1, %v13113_v1 }
 0x416   :  { %v12085_v4 = vadd.f32 %v5445_v57, %v5041_v37  ;;  %v7234_v41 = vpop.f32.mrf.mxu0  ;;  %7721 = vmatprep.mubr.msk.f32.mxu1 %vm7871_vm1, %v13113_v1 }
 0x417   :  { %v7389_v18 = vpop.f32.mrf.mxu1 }
 0x418   :  { %v5061_v32 = vpop.f32.mrf.mxu0  ;;  %7567 = vmatmul.mubr.f32.gmra.mxu0 %v14132_v35  ;;  %v14134_v18 = vld [vmem:[#allocation44_spill] sm:$0xff] }
 0x419   :  { %v5062_v58 = vadd.f32 %v5061_v32, %v11680_v54  ;;  %v5453_v0 = vpop.f32.mrf.mxu1  ;;  %7722 = vmatmul.mubr.f32.gmra.mxu1 %v14130_v49  ;;  %7569 = vmatprep.mubr.msk.f32.mxu0 %vm7871_vm1, %v13113_v1 }
 0x41a   :  { %v12094_v10 = vadd.f32 %v5453_v0, %v5048_v44  ;;  %v7237_v23 = vpop.f32.mrf.mxu0  ;;  %7724 = vmatprep.mubr.msk.f32.mxu1 %vm7871_vm1, %v13113_v1 }
 0x41b   :  { %v7392_v37 = vpop.f32.mrf.mxu1 }
 0x41c   :  { %v5068_v59 = vpop.f32.mrf.mxu0  ;;  %7570 = vmatmul.mubr.f32.gmra.mxu0 %v14133_v52  ;;  %v14135_v37 = vld [vmem:[#allocation166_spill] sm:$0xff] }
 0x41d   :  { %v5069_v24 = vadd.f32 %v5068_v59, %v11690_v36  ;;  %v5461_v57 = vpop.f32.mrf.mxu1  ;;  %7725 = vmatmul.mubr.f32.gmra.mxu1 %v14131_v46  ;;  %7572 = vmatprep.mubr.msk.f32.mxu0 %vm7871_vm1, %v13113_v1 }
 0x41e   :  { %v12103_v54 = vadd.f32 %v5461_v57, %v5055_v39  ;;  %v7240_v49 = vpop.f32.mrf.mxu0  ;;  %7727 = vmatprep.mubr.msk.f32.mxu1 %vm7871_vm1, %v13113_v1 }
 0x41f   :  { %v7395_v44 = vpop.f32.mrf.mxu1 }
 0x420   :  { %v5075_v41 = vpop.f32.mrf.mxu0  ;;  %7573 = vmatmul.mubr.f32.gmra.mxu0 %v14134_v18  ;;  %v14136_v44 = vld [vmem:[#allocation46_spill] sm:$0xff] }
 0x421   :  { %v5076_v32 = vadd.f32 %v5075_v41, %v11700_v14  ;;  %v5469_v0 = vpop.f32.mrf.mxu1  ;;  %7728 = vmatmul.mubr.f32.gmra.mxu1 %v14132_v35  ;;  %7575 = vmatprep.mubr.msk.f32.mxu0 %vm7871_vm1, %v13113_v1 }
 0x422   :  { %v12112_v36 = vadd.f32 %v5469_v0, %v5062_v58  ;;  %v7243_v46 = vpop.f32.mrf.mxu0  ;;  %7730 = vmatprep.mubr.msk.f32.mxu1 %vm7871_vm1, %v13113_v1 }
 0x423   :  { %v7398_v39 = vpop.f32.mrf.mxu1 }
 0x424   :  { %v5082_v23 = vpop.f32.mrf.mxu0  ;;  %7576 = vmatmul.mubr.f32.gmra.mxu0 %v14135_v37  ;;  %v14137_v39 = vld [vmem:[#allocation40_spill] sm:$0xff] }
 0x425   :  { %v5083_v59 = vadd.f32 %v5082_v23, %v11710_v56  ;;  %v5477_v57 = vpop.f32.mrf.mxu1  ;;  %7731 = vmatmul.mubr.f32.gmra.mxu1 %v14133_v52  ;;  %7578 = vmatprep.mubr.msk.f32.mxu0 %vm7871_vm1, %v13113_v1 }
 0x426   :  { %v12121_v14 = vadd.f32 %v5477_v57, %v5069_v24  ;;  %v7246_v35 = vpop.f32.mrf.mxu0  ;;  %7733 = vmatprep.mubr.msk.f32.mxu1 %vm7871_vm1, %v13113_v1 }
 0x427   :  { %v7401_v58 = vpop.f32.mrf.mxu1 }
 0x428   :  { %v5089_v49 = vpop.f32.mrf.mxu0  ;;  %7579 = vmatmul.mubr.f32.gmra.mxu0 %v14136_v44  ;;  %v14138_v58 = vld [vmem:[#allocation57_spill] sm:$0xff] }
 0x429   :  { %v5090_v41 = vadd.f32 %v5089_v49, %v11720_v50  ;;  %v5485_v0 = vpop.f32.mrf.mxu1  ;;  %7734 = vmatmul.mubr.f32.gmra.mxu1 %v14134_v18  ;;  %7581 = vmatprep.mubr.msk.f32.mxu0 %vm7871_vm1, %v13113_v1 }
 0x42a   :  { %v12130_v56 = vadd.f32 %v5485_v0, %v5076_v32  ;;  %v7249_v52 = vpop.f32.mrf.mxu0  ;;  %7736 = vmatprep.mubr.msk.f32.mxu1 %vm7871_vm1, %v13113_v1 }
 0x42b   :  { %v7404_v24 = vpop.f32.mrf.mxu1 }
 0x42c   :  { %v5096_v46 = vpop.f32.mrf.mxu0  ;;  %7582 = vmatmul.mubr.f32.gmra.mxu0 %v14137_v39  ;;  %v14139_v24 = vld [vmem:[#allocation48_spill] sm:$0xff] }
 0x42d   :  { %v5097_v23 = vadd.f32 %v5096_v46, %v11730_v5  ;;  %v5493_v57 = vpop.f32.mrf.mxu1  ;;  %7737 = vmatmul.mubr.f32.gmra.mxu1 %v14135_v37  ;;  %7584 = vmatprep.mubr.msk.f32.mxu0 %vm7871_vm1, %v13113_v1 }
 0x42e   :  { %v12139_v50 = vadd.f32 %v5493_v57, %v5083_v59  ;;  %v7252_v18 = vpop.f32.mrf.mxu0  ;;  %7739 = vmatprep.mubr.msk.f32.mxu1 %vm7871_vm1, %v13113_v1 }
 0x42f   :  { %v7407_v32 = vpop.f32.mrf.mxu1 }
 0x430   :  { %v5103_v35 = vpop.f32.mrf.mxu0  ;;  %7585 = vmatmul.mubr.f32.gmra.mxu0 %v14138_v58  ;;  %v14140_v32 = vld [vmem:[#allocation175_spill] sm:$0xff] }
 0x431   :  { %v5104_v49 = vadd.f32 %v5103_v35, %v11740_v7  ;;  %v5501_v0 = vpop.f32.mrf.mxu1  ;;  %7740 = vmatmul.mubr.f32.gmra.mxu1 %v14136_v44  ;;  %7587 = vmatprep.mubr.msk.f32.mxu0 %vm7871_vm1, %v13113_v1 }
 0x432   :  { %v12148_v5 = vadd.f32 %v5501_v0, %v5090_v41  ;;  %v7255_v37 = vpop.f32.mrf.mxu0  ;;  %7742 = vmatprep.mubr.msk.f32.mxu1 %vm7871_vm1, %v13113_v1 }
 0x433   :  { %v7410_v59 = vpop.f32.mrf.mxu1 }
 0x434   :  { %v5110_v52 = vpop.f32.mrf.mxu0  ;;  %7588 = vmatmul.mubr.f32.gmra.mxu0 %v14139_v24  ;;  %v14141_v59 = vld [vmem:[#allocation182_spill] sm:$0xff] }
 0x435   :  { %v5111_v46 = vadd.f32 %v5110_v52, %v11750_v19  ;;  %v5509_v57 = vpop.f32.mrf.mxu1  ;;  %7743 = vmatmul.mubr.f32.gmra.mxu1 %v14137_v39  ;;  %7590 = vmatprep.mubr.msk.f32.mxu0 %vm7871_vm1, %v13113_v1 }
 0x436   :  { %v12157_v7 = vadd.f32 %v5509_v57, %v5097_v23  ;;  %v7258_v44 = vpop.f32.mrf.mxu0  ;;  %7745 = vmatprep.mubr.msk.f32.mxu1 %vm7871_vm1, %v13113_v1 }
 0x437   :  { %v7413_v41 = vpop.f32.mrf.mxu1 }
 0x438   :  { %v5117_v18 = vpop.f32.mrf.mxu0  ;;  %7591 = vmatmul.mubr.f32.gmra.mxu0 %v14140_v32  ;;  %v14142_v41 = vld [vmem:[#allocation188_spill] sm:$0xff] }
 0x439   :  { %v5118_v35 = vadd.f32 %v5117_v18, %v11760_v38  ;;  %v5517_v0 = vpop.f32.mrf.mxu1  ;;  %7746 = vmatmul.mubr.f32.gmra.mxu1 %v14138_v58  ;;  %7593 = vmatprep.mubr.msk.f32.mxu0 %vm7871_vm1, %v13113_v1 }
 0x43a   :  { %v12166_v19 = vadd.f32 %v5517_v0, %v5104_v49  ;;  %v7261_v39 = vpop.f32.mrf.mxu0  ;;  %7748 = vmatprep.mubr.msk.f32.mxu1 %vm7871_vm1, %v13113_v1 }
 0x43b   :  { %v7416_v23 = vpop.f32.mrf.mxu1 }
 0x43c   :  { %v5124_v37 = vpop.f32.mrf.mxu0  ;;  %7594 = vmatmul.mubr.f32.gmra.mxu0 %v14141_v59  ;;  %v14143_v23 = vld [vmem:[#allocation193_spill] sm:$0xff] }
 0x43d   :  { %v5125_v52 = vadd.f32 %v5124_v37, %v11770_v8  ;;  %v5525_v57 = vpop.f32.mrf.mxu1  ;;  %7749 = vmatmul.mubr.f32.gmra.mxu1 %v14139_v24  ;;  %7596 = vmatprep.mubr.msk.f32.mxu0 %vm7871_vm1, %v13113_v1 }
 0x43e   :  { %v12175_v38 = vadd.f32 %v5525_v57, %v5111_v46  ;;  %v7264_v58 = vpop.f32.mrf.mxu0  ;;  %7751 = vmatprep.mubr.msk.f32.mxu1 %vm7871_vm1, %v13113_v1 }
 0x43f   :  { %v7419_v49 = vpop.f32.mrf.mxu1 }
 0x440   :  { %v5131_v44 = vpop.f32.mrf.mxu0  ;;  %7597 = vmatmul.mubr.f32.gmra.mxu0 %v14142_v41  ;;  %v14144_v49 = vld [vmem:[#allocation199_spill] sm:$0xff] }
 0x441   :  { %v5132_v18 = vadd.f32 %v5131_v44, %v11780_v63  ;;  %v5533_v0 = vpop.f32.mrf.mxu1  ;;  %7752 = vmatmul.mubr.f32.gmra.mxu1 %v14140_v32  ;;  %7599 = vmatprep.mubr.msk.f32.mxu0 %vm7871_vm1, %v13113_v1 }
 0x442   :  { %v12184_v8 = vadd.f32 %v5533_v0, %v5118_v35  ;;  %v7267_v24 = vpop.f32.mrf.mxu0  ;;  %7754 = vmatprep.mubr.msk.f32.mxu1 %vm7871_vm1, %v13113_v1 }
 0x443   :  { %v7422_v46 = vpop.f32.mrf.mxu1 }
 0x444   :  { %v5138_v39 = vpop.f32.mrf.mxu0  ;;  %7600 = vmatmul.mubr.f32.gmra.mxu0 %v14143_v23  ;;  %v14145_v46 = vld [vmem:[#allocation204_spill] sm:$0xff] }
 0x445   :  { %v5139_v37 = vadd.f32 %v5138_v39, %v11790_v25  ;;  %v5541_v57 = vpop.f32.mrf.mxu1  ;;  %7755 = vmatmul.mubr.f32.gmra.mxu1 %v14141_v59  ;;  %7602 = vmatprep.mubr.msk.f32.mxu0 %vm7871_vm1, %v13113_v1 }
 0x446   :  { %v12193_v63 = vadd.f32 %v5541_v57, %v5125_v52  ;;  %v7270_v32 = vpop.f32.mrf.mxu0  ;;  %7757 = vmatprep.mubr.msk.f32.mxu1 %vm7871_vm1, %v13113_v1 }
 0x447   :  { %v7425_v35 = vpop.f32.mrf.mxu1 }
 0x448   :  { %v5145_v58 = vpop.f32.mrf.mxu0  ;;  %7603 = vmatmul.mubr.f32.gmra.mxu0 %v14144_v49  ;;  %v14146_v35 = vld [vmem:[#allocation42_spill] sm:$0xff] }
 0x449   :  { %v5146_v44 = vadd.f32 %v5145_v58, %v11800_v26  ;;  %v5549_v0 = vpop.f32.mrf.mxu1  ;;  %7758 = vmatmul.mubr.f32.gmra.mxu1 %v14142_v41  ;;  %7605 = vmatprep.mubr.msk.f32.mxu0 %vm7871_vm1, %v13113_v1 }
 0x44a   :  { %v12202_v25 = vadd.f32 %v5549_v0, %v5132_v18  ;;  %v7273_v59 = vpop.f32.mrf.mxu0  ;;  %7760 = vmatprep.mubr.msk.f32.mxu1 %vm7871_vm1, %v13113_v1 }
 0x44b   :  { %v7428_v52 = vpop.f32.mrf.mxu1 }
 0x44c   :  { %v5152_v24 = vpop.f32.mrf.mxu0  ;;  %7606 = vmatmul.mubr.f32.gmra.mxu0 %v14145_v46  ;;  %v14147_v52 = vld [vmem:[#allocation52_spill] sm:$0xff] }
 0x44d   :  { %v5153_v39 = vadd.f32 %v5152_v24, %v11810_v30  ;;  %v5557_v57 = vpop.f32.mrf.mxu1  ;;  %7761 = vmatmul.mubr.f32.gmra.mxu1 %v14143_v23  ;;  %7608 = vmatprep.mubr.msk.f32.mxu0 %vm7871_vm1, %v13113_v1 }
 0x44e   :  { %v12211_v26 = vadd.f32 %v5557_v57, %v5139_v37  ;;  %v7276_v41 = vpop.f32.mrf.mxu0  ;;  %7763 = vmatprep.mubr.msk.f32.mxu1 %vm7871_vm1, %v13113_v1 }
 0x44f   :  { %v7431_v18 = vpop.f32.mrf.mxu1 }
 0x450   :  { %v5159_v32 = vpop.f32.mrf.mxu0  ;;  %7609 = vmatmul.mubr.f32.gmra.mxu0 %v14146_v35  ;;  %v14148_v18 = vld [vmem:[#allocation62_spill] sm:$0xff] }
 0x451   :  { %v5160_v58 = vadd.f32 %v5159_v32, %v11820_v31  ;;  %v5565_v0 = vpop.f32.mrf.mxu1  ;;  %7764 = vmatmul.mubr.f32.gmra.mxu1 %v14144_v49  ;;  %7611 = vmatprep.mubr.msk.f32.mxu0 %vm7871_vm1, %v13113_v1 }
 0x452   :  { %v12220_v30 = vadd.f32 %v5565_v0, %v5146_v44  ;;  %v7279_v23 = vpop.f32.mrf.mxu0  ;;  %7766 = vmatprep.mubr.msk.f32.mxu1 %vm7871_vm1, %v13113_v1 }
 0x453   :  { %v7434_v37 = vpop.f32.mrf.mxu1 }
 0x454   :  { %v5166_v59 = vpop.f32.mrf.mxu0  ;;  %7612 = vmatmul.mubr.f32.gmra.mxu0 %v14147_v52  ;;  %v14149_v37 = vld [vmem:[#allocation66_spill] sm:$0xff] }
 0x455   :  { %v5167_v24 = vadd.f32 %v5166_v59, %v11830_v15  ;;  %v5573_v57 = vpop.f32.mrf.mxu1  ;;  %7767 = vmatmul.mubr.f32.gmra.mxu1 %v14145_v46  ;;  %7614 = vmatprep.mubr.msk.f32.mxu0 %vm7871_vm1, %v13113_v1 }
 0x456   :  { %v12229_v31 = vadd.f32 %v5573_v57, %v5153_v39  ;;  %v7282_v49 = vpop.f32.mrf.mxu0  ;;  %7769 = vmatprep.mubr.msk.f32.mxu1 %vm7871_vm1, %v13113_v1 }
 0x457   :  { %v7437_v44 = vpop.f32.mrf.mxu1 }
 0x458   :  { %v5173_v41 = vpop.f32.mrf.mxu0  ;;  %7615 = vmatmul.mubr.f32.gmra.mxu0 %v14148_v18  ;;  %v14150_v44 = vld [vmem:[#allocation72_spill] sm:$0xff] }
 0x459   :  { %v5174_v32 = vadd.f32 %v5173_v41, %v11840_v20  ;;  %v5581_v0 = vpop.f32.mrf.mxu1  ;;  %7770 = vmatmul.mubr.f32.gmra.mxu1 %v14146_v35  ;;  %7617 = vmatprep.mubr.msk.f32.mxu0 %vm7871_vm1, %v13113_v1 }
 0x45a   :  { %v12238_v15 = vadd.f32 %v5581_v0, %v5160_v58  ;;  %v7285_v46 = vpop.f32.mrf.mxu0  ;;  %7772 = vmatprep.mubr.msk.f32.mxu1 %vm7871_vm1, %v13113_v1 }
 0x45b   :  { %v7440_v39 = vpop.f32.mrf.mxu1 }
 0x45c   :  { %v5180_v23 = vpop.f32.mrf.mxu0  ;;  %7618 = vmatmul.mubr.f32.gmra.mxu0 %v14149_v37  ;;  %v14151_v39 = vld [vmem:[#allocation78_spill] sm:$0xff] }
 0x45d   :  { %v5181_v59 = vadd.f32 %v5180_v23, %v11850_v21  ;;  %v5589_v57 = vpop.f32.mrf.mxu1  ;;  %7773 = vmatmul.mubr.f32.gmra.mxu1 %v14147_v52  ;;  %7620 = vmatprep.mubr.msk.f32.mxu0 %vm7871_vm1, %v13113_v1 }
 0x45e   :  { %v12247_v20 = vadd.f32 %v5589_v57, %v5167_v24  ;;  %v7288_v35 = vpop.f32.mrf.mxu0  ;;  %7775 = vmatprep.mubr.msk.f32.mxu1 %vm7871_vm1, %v13113_v1 }
 0x45f   :  { %v7443_v58 = vpop.f32.mrf.mxu1 }
 0x460   :  { %v5187_v49 = vpop.f32.mrf.mxu0  ;;  %7621 = vmatmul.mubr.f32.gmra.mxu0 %v14150_v44  ;;  %v14152_v58 = vld [vmem:[#allocation83_spill] sm:$0xff] }
 0x461   :  { %v5188_v41 = vadd.f32 %v5187_v49, %v11860_v9  ;;  %v5597_v0 = vpop.f32.mrf.mxu1  ;;  %7776 = vmatmul.mubr.f32.gmra.mxu1 %v14148_v18  ;;  %7623 = vmatprep.mubr.msk.f32.mxu0 %vm7871_vm1, %v13113_v1 }
 0x462   :  { %v12256_v21 = vadd.f32 %v5597_v0, %v5174_v32  ;;  %v7291_v52 = vpop.f32.mrf.mxu0  ;;  %7778 = vmatprep.mubr.msk.f32.mxu1 %vm7871_vm1, %v13113_v1 }
 0x463   :  { %v7446_v24 = vpop.f32.mrf.mxu1 }
 0x464   :  { %v5194_v46 = vpop.f32.mrf.mxu0  ;;  %7624 = vmatmul.mubr.f32.gmra.mxu0 %v14151_v39  ;;  %v14153_v24 = vld [vmem:[#allocation90_spill] sm:$0xff] }
 0x465   :  { %v5195_v23 = vadd.f32 %v5194_v46, %v11870_v45  ;;  %v5605_v57 = vpop.f32.mrf.mxu1  ;;  %7779 = vmatmul.mubr.f32.gmra.mxu1 %v14149_v37  ;;  %7626 = vmatprep.mubr.msk.f32.mxu0 %vm7871_vm1, %v13113_v1 }
 0x466   :  { %v12265_v9 = vadd.f32 %v5605_v57, %v5181_v59  ;;  %v7294_v18 = vpop.f32.mrf.mxu0  ;;  %7781 = vmatprep.mubr.msk.f32.mxu1 %vm7871_vm1, %v13113_v1 }
 0x467   :  { %v7449_v32 = vpop.f32.mrf.mxu1 }
 0x468   :  { %v5201_v35 = vpop.f32.mrf.mxu0  ;;  %7627 = vmatmul.mubr.f32.gmra.mxu0 %v14152_v58 }
 0x469   :  { %v5202_v49 = vadd.f32 %v5201_v35, %v11880_v34  ;;  %v5613_v0 = vpop.f32.mrf.mxu1  ;;  %7782 = vmatmul.mubr.f32.gmra.mxu1 %v14150_v44  ;;  %7629 = vmatprep.mubr.msk.f32.mxu0 %vm7871_vm1, %v13113_v1 }
 0x46a   :  { %v12274_v45 = vadd.f32 %v5613_v0, %v5188_v41  ;;  %v7297_v37 = vpop.f32.mrf.mxu0  ;;  %7784 = vmatprep.mubr.msk.f32.mxu1 %vm7871_vm1, %v13113_v1 }
 0x46b   :  { %v7452_v59 = vpop.f32.mrf.mxu1 }
 0x46c   :  { %v5208_v52 = vpop.f32.mrf.mxu0  ;;  %7630 = vmatmul.mubr.f32.gmra.mxu0 %v14153_v24 }
 0x46d   :  { %v5209_v46 = vadd.f32 %v5208_v52, %v11890_v2  ;;  %v5621_v57 = vpop.f32.mrf.mxu1  ;;  %7785 = vmatmul.mubr.f32.gmra.mxu1 %v14151_v39  ;;  %7632 = vmatprep.mubr.msk.f32.mxu0 %vm7871_vm1, %v13113_v1 }
 0x46e   :  { %v12283_v34 = vadd.f32 %v5621_v57, %v5195_v23  ;;  %v7300_v44 = vpop.f32.mrf.mxu0  ;;  %7787 = vmatprep.mubr.msk.f32.mxu1 %vm7871_vm1, %v13113_v1 }
 0x46f   :  { %v7455_v41 = vpop.f32.mrf.mxu1 }
 0x470   :  { %v5215_v18 = vpop.f32.mrf.mxu0  ;;  %7633 = vmatmul.mubr.f32.gmra.mxu0 %v11269_v16 }
 0x471   :  { %v5216_v32 = vadd.f32 %v5215_v18, %v11900_v3  ;;  %v5629_v35 = vpop.f32.mrf.mxu1  ;;  %7788 = vmatmul.mubr.f32.gmra.mxu1 %v14152_v58  ;;  %7635 = vmatprep.mubr.msk.f32.mxu0 %vm7871_vm1, %v13113_v1  ;;  %v14154_v18 = vld [vmem:[#allocation104_spill] sm:$0xff] }
 0x472   :  { %v12292_v2 = vadd.f32 %v5629_v35, %v5202_v49  ;;  %v7303_v39 = vpop.f32.mrf.mxu0  ;;  %7790 = vmatprep.mubr.msk.f32.mxu1 %vm7871_vm1, %v13113_v1 }
 0x473   :  { %v7458_v23 = vpop.f32.mrf.mxu1 }
 0x474   :  { %v5222_v0 = vpop.f32.mrf.mxu0  ;;  %7636 = vmatmul.mubr.f32.gmra.mxu0 %v11280_v29 }
 0x475   :  { %v5223_v37 = vadd.f32 %v5222_v0, %v11910_v40  ;;  %v5637_v59 = vpop.f32.mrf.mxu1  ;;  %7791 = vmatmul.mubr.f32.gmra.mxu1 %v14153_v24  ;;  %7638 = vmatprep.mubr.msk.f32.mxu0 %vm7871_vm1, %v13113_v1  ;;  %v14155_v0 = vld [vmem:[#allocation110_spill] sm:$0xff] }
 0x476   :  { %v12301_v3 = vadd.f32 %v5637_v59, %v5209_v46  ;;  %v7306_v58 = vpop.f32.mrf.mxu0  ;;  %7793 = vmatprep.mubr.msk.f32.mxu1 %vm7871_vm1, %v13113_v1 }
 0x477   :  { %v7461_v49 = vpop.f32.mrf.mxu1 }
 0x478   :  { %v5229_v52 = vpop.f32.mrf.mxu0  ;;  %7639 = vmatmul.mubr.f32.gmra.mxu0 %v11305_v17 }
 0x479   :  { %v5230_v57 = vadd.f32 %v5229_v52, %v11920_v53  ;;  %v5645_v44 = vpop.f32.mrf.mxu1  ;;  %7794 = vmatmul.mubr.f32.gmra.mxu1 %v11269_v16  ;;  %7641 = vmatprep.mubr.msk.f32.mxu0 %vm7871_vm1, %v13113_v1  ;;  %v14156_v52 = vld [vmem:[#allocation112_spill] sm:$0xff] }
 0x47a   :  { %v12310_v40 = vadd.f32 %v5645_v44, %v5216_v32  ;;  %v7309_v24 = vpop.f32.mrf.mxu0  ;;  %7796 = vmatprep.mubr.msk.f32.mxu1 %vm7871_vm1, %v13113_v1 }
 0x47b   :  { %v7464_v46 = vpop.f32.mrf.mxu1 }
 0x47c   :  { %v5236_v41 = vpop.f32.mrf.mxu0  ;;  %7642 = vmatmul.mubr.f32.gmra.mxu0 %v14154_v18 }
 0x47d   :  { %v5237_v35 = vadd.f32 %v5236_v41, %v11930_v22  ;;  %v5653_v39 = vpop.f32.mrf.mxu1  ;;  %7797 = vmatmul.mubr.f32.gmra.mxu1 %v11280_v29  ;;  %7644 = vmatprep.mubr.msk.f32.mxu0 %vm7871_vm1, %v13113_v1 }
 0x47e   :  { %v12319_v16 = vadd.f32 %v5653_v39, %v5223_v37  ;;  %v7312_v53 = vpop.f32.mrf.mxu0  ;;  %7799 = vmatprep.mubr.msk.f32.mxu1 %vm7871_vm1, %v13113_v1 }
 0x47f   :  { %v7467_v32 = vpop.f32.mrf.mxu1 }
 0x480   :  { %v5243_v23 = vpop.f32.mrf.mxu0  ;;  %7645 = vmatmul.mubr.f32.gmra.mxu0 %v14155_v0 }
 0x481   :  { %v5244_v59 = vadd.f32 %v5243_v23, %v11940_v48  ;;  %v5661_v58 = vpop.f32.mrf.mxu1  ;;  %7800 = vmatmul.mubr.f32.gmra.mxu1 %v11305_v17  ;;  %7647 = vmatprep.mubr.msk.f32.mxu0 %vm7871_vm1, %v13113_v1 }
 0x482   :  { %v12328_v29 = vadd.f32 %v5661_v58, %v5230_v57  ;;  %v7315_v22 = vpop.f32.mrf.mxu0  ;;  %7802 = vmatprep.mubr.msk.f32.mxu1 %vm7871_vm1, %v13113_v1 }
 0x483   :  { %v7470_v37 = vpop.f32.mrf.mxu1 }
 0x484   :  { %v5250_v49 = vpop.f32.mrf.mxu0  ;;  %7648 = vmatmul.mubr.f32.gmra.mxu0 %v14156_v52 }
 0x485   :  { %v5251_v44 = vadd.f32 %v5250_v49, %v11950_v13  ;;  %v5669_v24 = vpop.f32.mrf.mxu1  ;;  %7803 = vmatmul.mubr.f32.gmra.mxu1 %v14154_v18 }
 0x486   :  { %v12335_v48 = vadd.f32 %v5669_v24, %v5237_v35  ;;  %v7318_v17 = vpop.f32.mrf.mxu0  ;;  %7805 = vmatprep.mubr.msk.f32.mxu1 %vm7871_vm1, %v13113_v1 }
 0x487   :  { %v7473_v57 = vpop.f32.mrf.mxu1 }
 0x488   :  { %v5257_v46 = vpop.f32.mrf.mxu0 }
 0x489   :  { %v5258_v41 = vadd.f32 %v5257_v46, %v11959_v47  ;;  %v5677_v39 = vpop.f32.mrf.mxu1  ;;  %7806 = vmatmul.mubr.f32.gmra.mxu1 %v14155_v0 }
 0x48a   :  { %v12341_v53 = vadd.f32 %v5677_v39, %v5244_v59  ;;  %v7321_v32 = vpop.f32.mrf.mxu0  ;;  %7808 = vmatprep.mubr.msk.f32.mxu1 %vm7871_vm1, %v13113_v1 }
 0x48b   :  { %v7476_v13 = vpop.f32.mrf.mxu1 }
 0x48c   :  { %v5264_v18 = vpop.f32.mrf.mxu0 }
 0x48d   :  { %v5265_v35 = vadd.f32 %v5264_v18, %v11968_v6  ;;  %v5685_v23 = vpop.f32.mrf.mxu1  ;;  %7809 = vmatmul.mubr.f32.gmra.mxu1 %v14156_v52 }
 0x48e   :  { %v12347_v58 = vadd.f32 %v5685_v23, %v5251_v44  ;;  %v7324_v22 = vpop.f32.mrf.mxu0 }
 0x48f   :  { %v7479_v47 = vpop.f32.mrf.mxu1 }
 0x490   :  { %v5271_v37 = vpop.f32.mrf.mxu0 }
 0x491   :  { %v5272_v0 = vadd.f32 %v5271_v37, %v11977_v42  ;;  %v5693_v59 = vpop.f32.mrf.mxu1 }
 0x492   :  { %v12350_v49 = vadd.f32 %v5693_v59, %v5258_v41  ;;  %v7327_v24 = vpop.f32.mrf.mxu0 }
 0x493   :  { %v7482_v17 = vpop.f32.mrf.mxu1 }
 0x494   :  { %v5819_v1 = vpop.f32.mrf.mxu0 }
 0x495   :  { %v5701_v57 = vpop.f32.mrf.mxu1  ;;  %v5820_v23 = vadd.f32 %v5819_v1, %v11986_v62 }
 0x496   :  { %v12352_v46 = vadd.f32 %v5701_v57, %v5265_v35  ;;  %v7517_v6 = vpop.f32.mrf.mxu0 }
 0x497   :  { %v7485_v39 = vpop.f32.mrf.mxu1 }
 0x498   :  { %v5825_v32 = vpop.f32.mrf.mxu0 }
 0x499   :  { %v5709_v52 = vpop.f32.mrf.mxu1  ;;  %v5826_v59 = vadd.f32 %v5825_v32, %v11995_v60 }
 0x49a   :  { %v12354_v44 = vadd.f32 %v5709_v52, %v5272_v0  ;;  %v7520_v13 = vpop.f32.mrf.mxu0 }
 0x49b   :  { %v7488_v18 = vpop.f32.mrf.mxu1 }
 0x49c   :  { %v5831_v42 = vpop.f32.mrf.mxu0 }
 0x49d   :  { %v6167_v22 = vpop.f32.mrf.mxu1  ;;  %v5832_v0 = vadd.f32 %v5831_v42, %v12004_v28 }
 0x49e   :  { %v6168_v41 = vadd.f32 %v6167_v22, %v5820_v23  ;;  %v7523_v47 = vpop.f32.mrf.mxu0 }
 0x49f   :  { %v7678_v37 = vpop.f32.mrf.mxu1 }
 0x4a0   :  { %6435 = vst [vmem:[#allocation5] sm:$0xff] %v6168_v41  ;;  %v5837_v35 = vpop.f32.mrf.mxu0 }
 0x4a1   :  { %v6173_v24 = vpop.f32.mrf.mxu1  ;;  %v5838_v18 = vadd.f32 %v5837_v35, %v12013_v61 }
 0x4a2   :  { %v6174_v17 = vadd.f32 %v6173_v24, %v5826_v59  ;;  %v7526_v57 = vpop.f32.mrf.mxu0 }
 0x4a3   :  { %v7681_v6 = vpop.f32.mrf.mxu1 }
 0x4a4   :  { %6436 = vst [vmem:[#allocation5 + $0x8] sm:$0xff] %v6174_v17  ;;  %v5843_v39 = vpop.f32.mrf.mxu0 }
 0x4a5   :  { %v6179_v52 = vpop.f32.mrf.mxu1  ;;  %v5844_v47 = vadd.f32 %v5843_v39, %v12022_v33 }
 0x4a6   :  { %v6180_v13 = vadd.f32 %v6179_v52, %v5832_v0  ;;  %v7529_v62 = vpop.f32.mrf.mxu0 }
 0x4a7   :  { %v7684_v1 = vpop.f32.mrf.mxu1 }
 0x4a8   :  { %6437 = vst [vmem:[#allocation5 + $0x10] sm:$0xff] %v6180_v13  ;;  %v5849_v23 = vpop.f32.mrf.mxu0 }
 0x4a9   :  { %v6185_v22 = vpop.f32.mrf.mxu1  ;;  %v5850_v17 = vadd.f32 %v5849_v23, %v12031_v55 }
 0x4aa   :  { %v6186_v60 = vadd.f32 %v6185_v22, %v5838_v18  ;;  %v7532_v32 = vpop.f32.mrf.mxu0 }
 0x4ab   :  { %v7687_v41 = vpop.f32.mrf.mxu1 }
 0x4ac   :  { %6438 = vst [vmem:[#allocation5 + $0x18] sm:$0xff] %v6186_v60  ;;  %v5855_v37 = vpop.f32.mrf.mxu0 }
 0x4ad   :  { %v6191_v59 = vpop.f32.mrf.mxu1  ;;  %v5856_v52 = vadd.f32 %v5855_v37, %v12040_v51 }
 0x4ae   :  { %v6192_v28 = vadd.f32 %v6191_v59, %v5844_v47  ;;  %v7535_v42 = vpop.f32.mrf.mxu0 }
 0x4af   :  { %v7690_v24 = vpop.f32.mrf.mxu1 }
 0x4b0   :  { %6439 = vst [vmem:[#allocation5 + $0x20] sm:$0xff] %v6192_v28  ;;  %v5861_v57 = vpop.f32.mrf.mxu0 }
 0x4b1   :  { %v6197_v6 = vpop.f32.mrf.mxu1  ;;  %v5862_v18 = vadd.f32 %v5861_v57, %v12049_v12 }
 0x4b2   :  { %v6198_v61 = vadd.f32 %v6197_v6, %v5850_v17  ;;  %v7538_v35 = vpop.f32.mrf.mxu0 }
 0x4b3   :  { %v7693_v0 = vpop.f32.mrf.mxu1 }
 0x4b4   :  { %6440 = vst [vmem:[#allocation5 + $0x28] sm:$0xff] %v6198_v61  ;;  %v5867_v13 = vpop.f32.mrf.mxu0 }
 0x4b5   :  { %v6203_v62 = vpop.f32.mrf.mxu1  ;;  %v5868_v41 = vadd.f32 %v5867_v13, %v12058_v27 }
 0x4b6   :  { %v6204_v33 = vadd.f32 %v6203_v62, %v5856_v52  ;;  %v7541_v39 = vpop.f32.mrf.mxu0 }
 0x4b7   :  { %v7696_v1 = vpop.f32.mrf.mxu1 }
 0x4b8   :  { %6441 = vst [vmem:[#allocation5 + $0x30] sm:$0xff] %v6204_v33  ;;  %v5873_v22 = vpop.f32.mrf.mxu0 }
 0x4b9   :  { %v6209_v60 = vpop.f32.mrf.mxu1  ;;  %v5874_v42 = vadd.f32 %v5873_v22, %v12067_v11 }
 0x4ba   :  { %v6210_v55 = vadd.f32 %v6209_v60, %v5862_v18  ;;  %v7544_v23 = vpop.f32.mrf.mxu0 }
 0x4bb   :  { %v7699_v32 = vpop.f32.mrf.mxu1 }
 0x4bc   :  { %6442 = vst [vmem:[#allocation5 + $0x38] sm:$0xff] %v6210_v55  ;;  %v5879_v47 = vpop.f32.mrf.mxu0 }
 0x4bd   :  { %v6215_v59 = vpop.f32.mrf.mxu1  ;;  %v5880_v61 = vadd.f32 %v5879_v47, %v12076_v43 }
 0x4be   :  { %v6216_v51 = vadd.f32 %v6215_v59, %v5868_v41  ;;  %v7547_v37 = vpop.f32.mrf.mxu0 }
 0x4bf   :  { %v7702_v28 = vpop.f32.mrf.mxu1 }
 0x4c0   :  { %6443 = vst [vmem:[#allocation5 + $0x40] sm:$0xff] %v6216_v51  ;;  %v5885_v24 = vpop.f32.mrf.mxu0 }
 0x4c1   :  { %v6221_v17 = vpop.f32.mrf.mxu1  ;;  %v5886_v62 = vadd.f32 %v5885_v24, %v12085_v4 }
 0x4c2   :  { %v6222_v12 = vadd.f32 %v6221_v17, %v5874_v42  ;;  %v7550_v57 = vpop.f32.mrf.mxu0 }
 0x4c3   :  { %v7705_v6 = vpop.f32.mrf.mxu1 }
 0x4c4   :  { %6444 = vst [vmem:[#allocation5 + $0x48] sm:$0xff] %v6222_v12  ;;  %v5891_v35 = vpop.f32.mrf.mxu0 }
 0x4c5   :  { %v6227_v0 = vpop.f32.mrf.mxu1  ;;  %v5892_v22 = vadd.f32 %v5891_v35, %v12094_v10 }
 0x4c6   :  { %v6228_v27 = vadd.f32 %v6227_v0, %v5880_v61  ;;  %v7553_v52 = vpop.f32.mrf.mxu0 }
 0x4c7   :  { %v7708_v13 = vpop.f32.mrf.mxu1 }
 0x4c8   :  { %6445 = vst [vmem:[#allocation5 + $0x50] sm:$0xff] %v6228_v27  ;;  %v5897_v33 = vpop.f32.mrf.mxu0 }
 0x4c9   :  { %v6233_v39 = vpop.f32.mrf.mxu1  ;;  %v5898_v41 = vadd.f32 %v5897_v33, %v12103_v54 }
 0x4ca   :  { %v6234_v11 = vadd.f32 %v6233_v39, %v5886_v62  ;;  %v7556_v1 = vpop.f32.mrf.mxu0 }
 0x4cb   :  { %v7711_v18 = vpop.f32.mrf.mxu1 }
 0x4cc   :  { %6446 = vst [vmem:[#allocation5 + $0x58] sm:$0xff] %v6234_v11  ;;  %v5903_v60 = vpop.f32.mrf.mxu0 }
 0x4cd   :  { %v6239_v55 = vpop.f32.mrf.mxu1  ;;  %v5904_v28 = vadd.f32 %v5903_v60, %v12112_v36 }
 0x4ce   :  { %v6240_v43 = vadd.f32 %v6239_v55, %v5892_v22  ;;  %v7559_v23 = vpop.f32.mrf.mxu0 }
 0x4cf   :  { %v7714_v32 = vpop.f32.mrf.mxu1 }
 0x4d0   :  { %6447 = vst [vmem:[#allocation5 + $0x60] sm:$0xff] %v6240_v43  ;;  %v5909_v47 = vpop.f32.mrf.mxu0 }
 0x4d1   :  { %v6245_v59 = vpop.f32.mrf.mxu1  ;;  %v5910_v57 = vadd.f32 %v5909_v47, %v12121_v14 }
 0x4d2   :  { %v6246_v4 = vadd.f32 %v6245_v59, %v5898_v41  ;;  %v7562_v51 = vpop.f32.mrf.mxu0 }
 0x4d3   :  { %v7717_v37 = vpop.f32.mrf.mxu1 }
 0x4d4   :  { %6448 = vst [vmem:[#allocation5 + $0x68] sm:$0xff] %v6246_v4  ;;  %v5915_v42 = vpop.f32.mrf.mxu0 }
 0x4d5   :  { %v6251_v24 = vpop.f32.mrf.mxu1  ;;  %v5916_v27 = vadd.f32 %v5915_v42, %v12130_v56 }
 0x4d6   :  { %v6252_v10 = vadd.f32 %v6251_v24, %v5904_v28  ;;  %v7565_v17 = vpop.f32.mrf.mxu0 }
 0x4d7   :  { %v7720_v12 = vpop.f32.mrf.mxu1 }
 0x4d8   :  { %6449 = vst [vmem:[#allocation5 + $0x70] sm:$0xff] %v6252_v10  ;;  %v5921_v6 = vpop.f32.mrf.mxu0 }
 0x4d9   :  { %v6257_v61 = vpop.f32.mrf.mxu1  ;;  %v5922_v39 = vadd.f32 %v5921_v6, %v12139_v50 }
 0x4da   :  { %v6258_v54 = vadd.f32 %v6257_v61, %v5910_v57  ;;  %v7568_v35 = vpop.f32.mrf.mxu0 }
 0x4db   :  { %v7723_v0 = vpop.f32.mrf.mxu1 }
 0x4dc   :  { %6450 = vst [vmem:[#allocation5 + $0x78] sm:$0xff] %v6258_v54  ;;  %v5927_v52 = vpop.f32.mrf.mxu0 }
 0x4dd   :  { %v6263_v13 = vpop.f32.mrf.mxu1  ;;  %v5928_v60 = vadd.f32 %v5927_v52, %v12148_v5 }
 0x4de   :  { %v6264_v36 = vadd.f32 %v6263_v13, %v5916_v27  ;;  %v7571_v62 = vpop.f32.mrf.mxu0 }
 0x4df   :  { %v7726_v33 = vpop.f32.mrf.mxu1 }
 0x4e0   :  { %6451 = vst [vmem:[#allocation5 + $0x80] sm:$0xff] %v6264_v36  ;;  %v5933_v11 = vpop.f32.mrf.mxu0 }
 0x4e1   :  { %v6269_v1 = vpop.f32.mrf.mxu1  ;;  %v5934_v41 = vadd.f32 %v5933_v11, %v12157_v7 }
 0x4e2   :  { %v6270_v14 = vadd.f32 %v6269_v1, %v5922_v39  ;;  %v7574_v18 = vpop.f32.mrf.mxu0 }
 0x4e3   :  { %v7729_v22 = vpop.f32.mrf.mxu1 }
 0x4e4   :  { %6452 = vst [vmem:[#allocation5 + $0x88] sm:$0xff] %v6270_v14  ;;  %v5939_v55 = vpop.f32.mrf.mxu0 }
 0x4e5   :  { %v6275_v43 = vpop.f32.mrf.mxu1  ;;  %v5940_v37 = vadd.f32 %v5939_v55, %v12166_v19 }
 0x4e6   :  { %v6276_v56 = vadd.f32 %v6275_v43, %v5928_v60  ;;  %v7577_v23 = vpop.f32.mrf.mxu0 }
 0x4e7   :  { %v7732_v32 = vpop.f32.mrf.mxu1 }
 0x4e8   :  { %6453 = vst [vmem:[#allocation5 + $0x90] sm:$0xff] %v6276_v56  ;;  %v5945_v47 = vpop.f32.mrf.mxu0 }
 0x4e9   :  { %v6281_v59 = vpop.f32.mrf.mxu1  ;;  %v5946_v17 = vadd.f32 %v5945_v47, %v12175_v38 }
 0x4ea   :  { %v6282_v50 = vadd.f32 %v6281_v59, %v5934_v41  ;;  %v7580_v4 = vpop.f32.mrf.mxu0 }
 0x4eb   :  { %v7735_v51 = vpop.f32.mrf.mxu1 }
 0x4ec   :  { %6454 = vst [vmem:[#allocation5 + $0x98] sm:$0xff] %v6282_v50  ;;  %v5951_v28 = vpop.f32.mrf.mxu0 }
 0x4ed   :  { %v6287_v42 = vpop.f32.mrf.mxu1  ;;  %v5952_v54 = vadd.f32 %v5951_v28, %v12184_v8 }
 0x4ee   :  { %v6288_v5 = vadd.f32 %v6287_v42, %v5940_v37  ;;  %v7583_v24 = vpop.f32.mrf.mxu0 }
 0x4ef   :  { %v7738_v10 = vpop.f32.mrf.mxu1 }
 0x4f0   :  { %6455 = vst [vmem:[#allocation5 + $0xa0] sm:$0xff] %v6288_v5  ;;  %v5957_v12 = vpop.f32.mrf.mxu0 }
 0x4f1   :  { %v6293_v57 = vpop.f32.mrf.mxu1  ;;  %v5958_v13 = vadd.f32 %v5957_v12, %v12193_v63 }
 0x4f2   :  { %v6294_v7 = vadd.f32 %v6293_v57, %v5946_v17  ;;  %v7586_v6 = vpop.f32.mrf.mxu0 }
 0x4f3   :  { %v7741_v61 = vpop.f32.mrf.mxu1 }
 0x4f4   :  { %6456 = vst [vmem:[#allocation5 + $0xa8] sm:$0xff] %v6294_v7  ;;  %v5963_v35 = vpop.f32.mrf.mxu0 }
 0x4f5   :  { %v6299_v0 = vpop.f32.mrf.mxu1  ;;  %v5964_v11 = vadd.f32 %v5963_v35, %v12202_v25 }
 0x4f6   :  { %v6300_v19 = vadd.f32 %v6299_v0, %v5952_v54  ;;  %v7589_v27 = vpop.f32.mrf.mxu0 }
 0x4f7   :  { %v7744_v52 = vpop.f32.mrf.mxu1 }
 0x4f8   :  { %6457 = vst [vmem:[#allocation5 + $0xb0] sm:$0xff] %v6300_v19  ;;  %v5969_v36 = vpop.f32.mrf.mxu0 }
 0x4f9   :  { %v6305_v62 = vpop.f32.mrf.mxu1  ;;  %v5970_v60 = vadd.f32 %v5969_v36, %v12211_v26 }
 0x4fa   :  { %v6306_v38 = vadd.f32 %v6305_v62, %v5958_v13  ;;  %v7592_v33 = vpop.f32.mrf.mxu0 }
 0x4fb   :  { %v7747_v39 = vpop.f32.mrf.mxu1 }
 0x4fc   :  { %6458 = vst [vmem:[#allocation5 + $0xb8] sm:$0xff] %v6306_v38  ;;  %v5975_v1 = vpop.f32.mrf.mxu0 }
 0x4fd   :  { %v6311_v14 = vpop.f32.mrf.mxu1  ;;  %v5976_v32 = vadd.f32 %v5975_v1, %v12220_v30 }
 0x4fe   :  { %v6312_v8 = vadd.f32 %v6311_v14, %v5964_v11  ;;  %v7595_v18 = vpop.f32.mrf.mxu0 }
 0x4ff   :  { %v7750_v22 = vpop.f32.mrf.mxu1 }
 0x500   :  { %6459 = vst [vmem:[#allocation5 + $0xc0] sm:$0xff] %v6312_v8  ;;  %v5981_v55 = vpop.f32.mrf.mxu0 }
 0x501   :  { %v6317_v43 = vpop.f32.mrf.mxu1  ;;  %v5982_v4 = vadd.f32 %v5981_v55, %v12229_v31 }
 0x502   :  { %v6318_v63 = vadd.f32 %v6317_v43, %v5970_v60  ;;  %v7598_v56 = vpop.f32.mrf.mxu0 }
 0x503   :  { %v7753_v23 = vpop.f32.mrf.mxu1 }
 0x504   :  { %6460 = vst [vmem:[#allocation5 + $0xc8] sm:$0xff] %v6318_v63  ;;  %v5987_v41 = vpop.f32.mrf.mxu0 }
 0x505   :  { %v6323_v47 = vpop.f32.mrf.mxu1  ;;  %v5988_v5 = vadd.f32 %v5987_v41, %v12238_v15 }
 0x506   :  { %v6324_v25 = vadd.f32 %v6323_v47, %v5976_v32  ;;  %v7601_v59 = vpop.f32.mrf.mxu0 }
 0x507   :  { %v7756_v50 = vpop.f32.mrf.mxu1 }
 0x508   :  { %6461 = vst [vmem:[#allocation5 + $0xd0] sm:$0xff] %v6324_v25  ;;  %v5993_v51 = vpop.f32.mrf.mxu0 }
 0x509   :  { %v6329_v37 = vpop.f32.mrf.mxu1  ;;  %v5994_v57 = vadd.f32 %v5993_v51, %v12247_v20 }
 0x50a   :  { %v6330_v26 = vadd.f32 %v6329_v37, %v5982_v4  ;;  %v7604_v28 = vpop.f32.mrf.mxu0 }
 0x50b   :  { %v7759_v42 = vpop.f32.mrf.mxu1 }
 0x50c   :  { %6462 = vst [vmem:[#allocation5 + $0xd8] sm:$0xff] %v6330_v26  ;;  %v5999_v24 = vpop.f32.mrf.mxu0 }
 0x50d   :  { %v6335_v10 = vpop.f32.mrf.mxu1  ;;  %v6000_v35 = vadd.f32 %v5999_v24, %v12256_v21 }
 0x50e   :  { %v6336_v30 = vadd.f32 %v6335_v10, %v5988_v5  ;;  %v7607_v17 = vpop.f32.mrf.mxu0 }
 0x50f   :  { %v7762_v12 = vpop.f32.mrf.mxu1 }
 0x510   :  { %6463 = vst [vmem:[#allocation5 + $0xe0] sm:$0xff] %v6336_v30  ;;  %v6005_v7 = vpop.f32.mrf.mxu0 }
 0x511   :  { %v6341_v6 = vpop.f32.mrf.mxu1  ;;  %v6006_v13 = vadd.f32 %v6005_v7, %v12265_v9 }
 0x512   :  { %v6342_v31 = vadd.f32 %v6341_v6, %v5994_v57  ;;  %v7610_v61 = vpop.f32.mrf.mxu0 }
 0x513   :  { %v7765_v54 = vpop.f32.mrf.mxu1 }
 0x514   :  { %6464 = vst [vmem:[#allocation5 + $0xe8] sm:$0xff] %v6342_v31  ;;  %v6011_v0 = vpop.f32.mrf.mxu0 }
 0x515   :  { %v6347_v19 = vpop.f32.mrf.mxu1  ;;  %v6012_v39 = vadd.f32 %v6011_v0, %v12274_v45 }
 0x516   :  { %v6348_v15 = vadd.f32 %v6347_v19, %v6000_v35  ;;  %v7613_v27 = vpop.f32.mrf.mxu0 }
 0x517   :  { %v7768_v52 = vpop.f32.mrf.mxu1 }
 0x518   :  { %6465 = vst [vmem:[#allocation5 + $0xf0] sm:$0xff] %v6348_v15  ;;  %v6017_v36 = vpop.f32.mrf.mxu0 }
 0x519   :  { %v6353_v62 = vpop.f32.mrf.mxu1  ;;  %v6018_v18 = vadd.f32 %v6017_v36, %v12283_v34 }
 0x51a   :  { %v6354_v20 = vadd.f32 %v6353_v62, %v6006_v13  ;;  %v7616_v38 = vpop.f32.mrf.mxu0 }
 0x51b   :  { %v7771_v33 = vpop.f32.mrf.mxu1 }
 0x51c   :  { %6466 = vst [vmem:[#allocation5 + $0xf8] sm:$0xff] %v6354_v20  ;;  %v6023_v11 = vpop.f32.mrf.mxu0 }
 0x51d   :  { %v6359_v1 = vpop.f32.mrf.mxu1  ;;  %v6024_v63 = vadd.f32 %v6023_v11, %v12292_v2 }
 0x51e   :  { %v6360_v21 = vadd.f32 %v6359_v1, %v6012_v39  ;;  %v7619_v14 = vpop.f32.mrf.mxu0 }
 0x51f   :  { %v7774_v8 = vpop.f32.mrf.mxu1 }
 0x520   :  { %6467 = vst [vmem:[#allocation5 + $0x100] sm:$0xff] %v6360_v21  ;;  %v6029_v22 = vpop.f32.mrf.mxu0 }
 0x521   :  { %v6365_v60 = vpop.f32.mrf.mxu1  ;;  %v6030_v47 = vadd.f32 %v6029_v22, %v12301_v3 }
 0x522   :  { %v6366_v9 = vadd.f32 %v6365_v60, %v6018_v18  ;;  %v7622_v55 = vpop.f32.mrf.mxu0 }
 0x523   :  { %v7777_v43 = vpop.f32.mrf.mxu1 }
 0x524   :  { %6468 = vst [vmem:[#allocation5 + $0x108] sm:$0xff] %v6366_v9  ;;  %v6035_v56 = vpop.f32.mrf.mxu0 }
 0x525   :  { %v6371_v23 = vpop.f32.mrf.mxu1  ;;  %v6036_v51 = vadd.f32 %v6035_v56, %v12310_v40 }
 0x526   :  { %v6372_v45 = vadd.f32 %v6371_v23, %v6024_v63  ;;  %v7625_v32 = vpop.f32.mrf.mxu0 }
 0x527   :  { %v7780_v41 = vpop.f32.mrf.mxu1 }
 0x528   :  { %6469 = vst [vmem:[#allocation5 + $0x110] sm:$0xff] %v6372_v45  ;;  %v6041_v25 = vpop.f32.mrf.mxu0 }
 0x529   :  { %v6377_v59 = vpop.f32.mrf.mxu1  ;;  %v6042_v5 = vadd.f32 %v6041_v25, %v12319_v16 }
 0x52a   :  { %v6378_v34 = vadd.f32 %v6377_v59, %v6030_v47  ;;  %v7628_v50 = vpop.f32.mrf.mxu0 }
 0x52b   :  { %v7783_v4 = vpop.f32.mrf.mxu1 }
 0x52c   :  { %6470 = vst [vmem:[#allocation5 + $0x118] sm:$0xff] %v6378_v34  ;;  %v6047_v37 = vpop.f32.mrf.mxu0 }
 0x52d   :  { %v6383_v26 = vpop.f32.mrf.mxu1  ;;  %v6048_v12 = vadd.f32 %v6047_v37, %v12328_v29 }
 0x52e   :  { %v6384_v2 = vadd.f32 %v6383_v26, %v6036_v51  ;;  %v7631_v28 = vpop.f32.mrf.mxu0 }
 0x52f   :  { %v7786_v42 = vpop.f32.mrf.mxu1 }
 0x530   :  { %6471 = vst [vmem:[#allocation5 + $0x120] sm:$0xff] %v6384_v2  ;;  %v6053_v24 = vpop.f32.mrf.mxu0 }
 0x531   :  { %v6389_v10 = vpop.f32.mrf.mxu1  ;;  %v6054_v61 = vadd.f32 %v6053_v24, %v12335_v48 }
 0x532   :  { %v6390_v3 = vadd.f32 %v6389_v10, %v6042_v5  ;;  %v7634_v30 = vpop.f32.mrf.mxu0 }
 0x533   :  { %v7789_v17 = vpop.f32.mrf.mxu1 }
 0x534   :  { %6472 = vst [vmem:[#allocation5 + $0x128] sm:$0xff] %v6390_v3  ;;  %v6059_v57 = vpop.f32.mrf.mxu0 }
 0x535   :  { %v6395_v7 = vpop.f32.mrf.mxu1  ;;  %v6060_v15 = vadd.f32 %v6059_v57, %v12341_v53 }
 0x536   :  { %v6396_v40 = vadd.f32 %v6395_v7, %v6048_v12  ;;  %v7637_v6 = vpop.f32.mrf.mxu0 }
 0x537   :  { %v7792_v31 = vpop.f32.mrf.mxu1 }
 0x538   :  { %6473 = vst [vmem:[#allocation5 + $0x130] sm:$0xff] %v6396_v40  ;;  %v6065_v54 = vpop.f32.mrf.mxu0 }
 0x539   :  { %v6401_v35 = vpop.f32.mrf.mxu1  ;;  %v6066_v62 = vadd.f32 %v6065_v54, %v12347_v58 }
 0x53a   :  { %v6402_v16 = vadd.f32 %v6401_v35, %v6054_v61  ;;  %v7640_v0 = vpop.f32.mrf.mxu0 }
 0x53b   :  { %v7795_v19 = vpop.f32.mrf.mxu1 }
 0x53c   :  { %6474 = vst [vmem:[#allocation5 + $0x138] sm:$0xff] %v6402_v16  ;;  %v6071_v27 = vpop.f32.mrf.mxu0 }
 0x53d   :  { %v6407_v52 = vpop.f32.mrf.mxu1  ;;  %v6072_v11 = vadd.f32 %v6071_v27, %v12350_v49 }
 0x53e   :  { %v6408_v29 = vadd.f32 %v6407_v52, %v6060_v15  ;;  %v7643_v13 = vpop.f32.mrf.mxu0 }
 0x53f   :  { %v7798_v36 = vpop.f32.mrf.mxu1 }
 0x540   :  { %6475 = vst [vmem:[#allocation5 + $0x140] sm:$0xff] %v6408_v29  ;;  %v6077_v20 = vpop.f32.mrf.mxu0 }
 0x541   :  { %v6413_v38 = vpop.f32.mrf.mxu1  ;;  %v6078_v18 = vadd.f32 %v6077_v20, %v12352_v46 }
 0x542   :  { %v6414_v48 = vadd.f32 %v6413_v38, %v6066_v62  ;;  %v7646_v33 = vpop.f32.mrf.mxu0 }
 0x543   :  { %v7801_v39 = vpop.f32.mrf.mxu1 }
 0x544   :  { %6476 = vst [vmem:[#allocation5 + $0x148] sm:$0xff] %v6414_v48  ;;  %v6083_v1 = vpop.f32.mrf.mxu0 }
 0x545   :  { %v6419_v21 = vpop.f32.mrf.mxu1  ;;  %v6084_v9 = vadd.f32 %v6083_v1, %v12354_v44 }
 0x546   :  { %v6420_v53 = vadd.f32 %v6419_v21, %v6072_v11  ;;  %v7649_v14 = vpop.f32.mrf.mxu0 }
 0x547   :  { %v7804_v8 = vpop.f32.mrf.mxu1 }
 0x548   :  { %6477 = vst [vmem:[#allocation5 + $0x150] sm:$0xff] %v6420_v53 }
 0x549   :  { %v6425_v22 = vpop.f32.mrf.mxu1 }
 0x54a   :  { %v6426_v60 = vadd.f32 %v6425_v22, %v6078_v18 }
 0x54b   :  { %v7807_v58 = vpop.f32.mrf.mxu1 }
 0x54c   :  { %6478 = vst [vmem:[#allocation5 + $0x158] sm:$0xff] %v6426_v60 }
 0x54d   :  { %v6431_v55 = vpop.f32.mrf.mxu1 }
 0x54e   :  { %v6432_v49 = vadd.f32 %v6431_v55, %v6084_v9 }
 0x54f   :  { %v7810_v43 = vpop.f32.mrf.mxu1 }
 0x550   :  { %6479 = vst [vmem:[#allocation5 + $0x160] sm:$0xff] %v6432_v49 }
 0x551   :  { %7853 = shalt.err (!%p7850_p9)
}
 0x552   :  { %s7873_s4 = smov 128   ;;  %s7874_s1 = smov 8  }
 0x553   :  { %6491 = dma.vmem_to_hbm [thread:$0]  %s6486_s29, 5760, %s12407_s3, [#allocation4], %s7873_s4, %s7873_s4, %s7874_s1  }
 0x554   :  { %7864 = dma.done.wait [#allocation4], 5760  }
 0x555   :  { %7865 = vsyncadd [#allocation4], 4294961536 }
 0x556   :  { %6495 = vsyncpa [#allocation3], 1 }
 0x557   :  { %6496 = vsyncpa [#allocation4], 1 }

</bundles_post_ra>
